<compile_context>
chip_gen: v7x
topology: tpu7x:2x2x1
jax: 0.10.0
libtpu: 0.0.40
codegen_flags: <defaults>
</compile_context>

<pallas_src>
import numpy as np

import jax
import jax.numpy as jnp
from jax import lax
from jax.experimental import pallas as pl
from jax.experimental.pallas import tpu as pltpu

H = 8   # spatial size implied by fc1 = Linear(64 * 8 * 8, 128)
W = 8


def _rup(a, m):
    return -(-a // m) * m


# --------------------------------------------------------------------------- #
# Kernel
# --------------------------------------------------------------------------- #
def _snake_kernel(x_ref, m1_ref, b1_ref, m2_ref, b2_ref,
                  wfc1_ref, bfc1_ref, wfc2_ref, bfc2_ref,
                  out_ref, h1_ref):
    """Fused conv1/conv2/fc1/fc2 for one batch tile.

    x_ref   : (TB, H*W*Cin)        bf16  lane index = (h*W + w)*Cin + ci
    m1_ref  : (H*W*Cin, H*W*C1)    bf16  full-image banded conv1 matrix (H+W pad baked in)
    b1_ref  : (1, H*W*C1)          f32   conv1 bias tiled over (h, w)
    m2_ref  : (3*W*C1, W*C2)       bf16  kh-merged banded conv2 matrix (W pad baked in)
    b2_ref  : (1, W*C2)            f32   conv2 bias tiled over w
    wfc1_ref: (H, W*C2, 128)       bf16  fc1 weight chunks, one per image row
    wfc2_ref: (128, Apad)          bf16  fc2 weight, N padded to 128 lanes
    out_ref : (TB, Apad)           f32
    h1_ref  : (TB, (H+2)*W*C1)     bf16  VMEM scratch, rows -1..H zero-padded
    """
    TB = x_ref.shape[0]
    WC1 = m2_ref.shape[0] // 3
    HWC1 = m1_ref.shape[1]
    F1 = wfc1_ref.shape[2]

    def bdot(a, w):  # bf16 MXU matmul, f32 accumulation
        return jnp.dot(a.astype(jnp.bfloat16), w,
                       preferred_element_type=jnp.float32)

    # ---- conv1 + bias + relu : one full-image matmul (K = H*W*Cin) ----
    a1 = bdot(x_ref[...], m1_ref[...]) + b1_ref[...]          # (TB, H*W*C1) f32
    zrow = jnp.zeros((TB, WC1), jnp.bfloat16)
    h1_ref[:, 0:WC1] = zrow                                    # h = -1 pad row
    h1_ref[:, WC1 + HWC1:2 * WC1 + HWC1] = zrow                # h = H  pad row
    h1_ref[:, WC1:WC1 + HWC1] = jnp.maximum(a1, 0.0).astype(jnp.bfloat16)

    # ---- conv2 (kh folded into K) + bias + relu, fused with fc1 accumulation ----
    m2v = m2_ref[...]                                          # hoisted out of loop
    b2v = b2_ref[...]
    zacc = jnp.zeros((TB, F1), jnp.float32)
    for h in range(H):
        win = h1_ref[:, h * WC1:(h + 3) * WC1]                 # (TB, 3*W*C1) bf16
        h2_row = jnp.maximum(bdot(win, m2v) + b2v, 0.0)        # (TB, W*C2) f32
        zacc = zacc + bdot(h2_row, wfc1_ref[h])                # (TB, 128)

    # ---- fc1 bias + relu, fc2 (lane-dense padded output) ----
    z = jnp.maximum(zacc + bfc1_ref[...], 0.0)
    out_ref[...] = bdot(z, wfc2_ref[...]) + bfc2_ref[...]


# --------------------------------------------------------------------------- #
# One-time parameter preparation (hoisted out of the forward pass)
# --------------------------------------------------------------------------- #
def prepare_params(params):
    """Repack PyTorch-layout parameters into the kernel's bf16 layouts (one time)."""
    w1, b1, w2, b2, wfc1, bfc1, wfc2, bfc2 = params
    C1, Cin = int(w1.shape[0]), int(w1.shape[1])
    C2 = int(w2.shape[0])
    F1, A = int(wfc1.shape[0]), int(wfc2.shape[0])

    def full_banded(wt):
        # (Cout, Cin, 3, 3) OIHW -> (H*W*Cin, H*W*Cout); zero padding in H and W
        # baked in:  M[(hi*W+wi)*Cin+ci, (ho*W+wo)*Cout+co] = wt[co, ci, hi-ho+1, wi-wo+1]
        cout, cin = int(wt.shape[0]), int(wt.shape[1])
        wt_np = np.asarray(wt, np.float32)
        m = np.zeros((H * W * cin, H * W * cout), np.float32)
        for ho in range(H):
            for wo in range(W):
                c0 = (ho * W + wo) * cout
                for dh in (-1, 0, 1):
                    hi = ho + dh
                    if not (0 <= hi < H):
                        continue
                    for dw in (-1, 0, 1):
                        wi = wo + dw
                        if not (0 <= wi < W):
                            continue
                        r0 = (hi * W + wi) * cin
                        m[r0:r0 + cin, c0:c0 + cout] = wt_np[:, :, dh + 1, dw + 1].T
        return jnp.asarray(m, jnp.bfloat16)

    def kh_banded(wt):
        # (Cout, Cin, 3, 3) -> (3*W*Cin, W*Cout); kh taps concatenated along K,
        # W zero padding baked in: M[kh*W*Cin + wi*Cin + ci, wo*Cout + co]
        #   = wt[co, ci, kh, wi-wo+1]   for |wi-wo| <= 1, zero otherwise.
        cout, cin = int(wt.shape[0]), int(wt.shape[1])
        wt_np = np.asarray(wt, np.float32)
        m = np.zeros((3 * W * cin, W * cout), np.float32)
        for kh in range(3):
            for wo in range(W):
                c0 = wo * cout
                for dw in (-1, 0, 1):
                    wi = wo + dw
                    if 0 <= wi < W:
                        r0 = kh * W * cin + wi * cin
                        m[r0:r0 + cin, c0:c0 + cout] = wt_np[:, :, kh, dw + 1].T
        return jnp.asarray(m, jnp.bfloat16)

    m1 = full_banded(w1)                                   # (H*W*Cin, H*W*C1)
    m2 = kh_banded(w2)                                     # (3*W*C1,  W*C2)

    # conv biases broadcast to the kernel's lane layouts
    b1_r = jnp.asarray(np.tile(np.asarray(b1, np.float32), H * W).reshape(1, H * W * C1))
    b2_r = jnp.asarray(np.tile(np.asarray(b2, np.float32), W).reshape(1, W * C2))

    # fc1: PyTorch flattens NCHW (c, h, w); kernel rows are (w, c) per image row h.
    wfc1_np = np.asarray(wfc1, np.float32).reshape(F1, C2, H, W)
    wfc1_k = jnp.asarray(np.transpose(wfc1_np, (2, 3, 1, 0)).reshape(H, W * C2, F1),
                         jnp.bfloat16)
    bfc1_r = jnp.asarray(np.asarray(bfc1, np.float32).reshape(1, F1))

    # fc2: pad N to a lane-dense 128 multiple (zero columns, sliced off in wrapper)
    Apad = max(128, _rup(A, 128))
    wfc2_t = np.asarray(wfc2, np.float32).T                # (F1, A)
    wfc2_pad = np.zeros((F1, Apad), np.float32)
    wfc2_pad[:, :A] = wfc2_t
    bfc2_pad = np.zeros((1, Apad), np.float32)
    bfc2_pad[0, :A] = np.asarray(bfc2, np.float32)
    wfc2_k = jnp.asarray(wfc2_pad, jnp.bfloat16)
    bfc2_r = jnp.asarray(bfc2_pad)

    return (m1, b1_r, m2, b2_r, wfc1_k, bfc1_r, wfc2_k, bfc2_r, A)


# --------------------------------------------------------------------------- #
# Forward wrapper
# --------------------------------------------------------------------------- #
def snake_ai_forward(x, prepared, *, block_b=512):
    """x: (B, Cin, 8, 8) float32 (NCHW). Returns (B, num_actions) float32."""
    (m1, b1_r, m2, b2_r, wfc1_k, bfc1_r, wfc2_k, bfc2_r, A) = prepared
    B, Cin = int(x.shape[0]), int(x.shape[1])
    HWCin = H * W * Cin
    HWC1 = int(m1.shape[1])
    WC1 = int(m2.shape[0]) // 3
    WC2 = int(m2.shape[1])
    F1 = int(wfc1_k.shape[2])
    Apad = int(wfc2_k.shape[1])

    # Batch tiling: tb multiple of 8; when the batch allows it, keep >=2 grid steps
    # so both v7x TensorCores get work (grid axis is "parallel").
    B8 = _rup(B, 8)
    tb = min(block_b, B8)
    if B8 > 8 and -(-B8 // tb) < 2:
        tb = _rup(-(-B8 // 2), 8)
    nblk = -(-B8 // tb)
    Bp = nblk * tb

    # One-time layout conversion: NCHW -> lane-dense (B, H*W*Cin) bf16,
    # lane index = (h*W + w)*Cin + ci.
    xh = jnp.transpose(x, (0, 2, 3, 1)).reshape(B, HWCin).astype(jnp.bfloat16)
    if Bp != B:
        xh = jnp.pad(xh, ((0, Bp - B), (0, 0)))

    out = pl.pallas_call(
        _snake_kernel,
        out_shape=jax.ShapeDtypeStruct((Bp, Apad), jnp.float32),
        grid_spec=pltpu.PrefetchScalarGridSpec(
            num_scalar_prefetch=0,
            grid=(nblk,),
            in_specs=[
                pl.BlockSpec((tb, HWCin), lambda i: (i, 0)),      # activations (bf16)
                pl.BlockSpec((HWCin, HWC1), lambda i: (0, 0)),    # conv1 banded matrix
                pl.BlockSpec((1, HWC1), lambda i: (0, 0)),
                pl.BlockSpec((3 * WC1, WC2), lambda i: (0, 0)),   # conv2 banded matrix
                pl.BlockSpec((1, WC2), lambda i: (0, 0)),
                pl.BlockSpec((H, WC2, F1), lambda i: (0, 0, 0)),  # fc1 chunks
                pl.BlockSpec((1, F1), lambda i: (0, 0)),
                pl.BlockSpec((F1, Apad), lambda i: (0, 0)),       # fc2 (padded N)
                pl.BlockSpec((1, Apad), lambda i: (0, 0)),
            ],
            out_specs=pl.BlockSpec((tb, Apad), lambda i: (i, 0)),
            scratch_shapes=[pltpu.VMEM((tb, (H + 2) * WC1), jnp.bfloat16)],  # padded h1
        ),
        compiler_params=pltpu.CompilerParams(
            dimension_semantics=("parallel",),        # megacore-shard batch tiles
            vmem_limit_bytes=32 * 1024 * 1024,        # ~actual need + headroom; fits v7x
        ),
    )(xh, m1, b1_r, m2, b2_r, wfc1_k, bfc1_r, wfc2_k, bfc2_r)
    return out[:B, :A]


# --------------------------------------------------------------------------- #
# Synthetic params + pure-JAX reference (PyTorch semantics) for validation
# --------------------------------------------------------------------------- #
def init_params(key, input_size, num_actions):
    ks = jax.random.split(key, 8)

    def u(k, shape, fan_in):
        bound = 1.0 / float(fan_in) ** 0.5
        return jax.random.uniform(k, shape, jnp.float32, -bound, bound)

    w1 = u(ks[0], (32, input_size, 3, 3), input_size * 9)
    b1 = u(ks[1], (32,), input_size * 9)
    w2 = u(ks[2], (64, 32, 3, 3), 32 * 9)
    b2 = u(ks[3], (64,), 32 * 9)
    wfc1 = u(ks[4], (128, 64 * H * W), 64 * H * W)
    bfc1 = u(ks[5], (128,), 64 * H * W)
    wfc2 = u(ks[6], (num_actions, 128), 128)
    bfc2 = u(ks[7], (num_actions,), 128)
    return (w1, b1, w2, b2, wfc1, bfc1, wfc2, bfc2)


def snake_ai_reference(x, params):
    (w1, b1, w2, b2, wfc1, bfc1, wfc2, bfc2) = params
    dn = ('NCHW', 'OIHW', 'NCHW')
    h = lax.conv_general_dilated(x, w1, (1, 1), 'SAME', dimension_numbers=dn,
                                 precision=lax.Precision.HIGHEST)
    h = jnp.maximum(h + b1[None, :, None, None], 0.0)
    h = lax.conv_general_dilated(h, w2, (1, 1), 'SAME', dimension_numbers=dn,
                                 precision=lax.Precision.HIGHEST)
    h = jnp.maximum(h + b2[None, :, None, None], 0.0)
    h = h.reshape(x.shape[0], -1)                      # NCHW flatten = (c, h, w)
    h = jnp.maximum(h @ wfc1.T + bfc1, 0.0)
    return h @ wfc2.T + bfc2


if __name__ == "__main__":
    key = jax.random.PRNGKey(0)
    kx, kp = jax.random.split(key)
    batch, input_size, num_actions = 2, 4, 4

    x = jax.random.normal(kx, (batch, input_size, H, W), jnp.float32)
    params = init_params(kp, input_size, num_actions)
    prepared = prepare_params(params)          # one-time parameter repacking

    out = snake_ai_forward(x, prepared)
    out = jax.block_until_ready(out)

    ref = snake_ai_reference(x, params)
    assert out.shape == (batch, num_actions)
    assert bool(jnp.allclose(out, ref, rtol=1e-2, atol=1e-2)), \
        "kernel output mismatch vs reference"
    print("KERNEL_OK")
</pallas_src>

<mosaic_0001>
module attributes {stable_mosaic.version = 11 : i64} {
  func.func @_snake_kernel(%arg0: i32, %arg1: memref<8x256xbf16, #tpu.memory_space<vmem>>, %arg2: memref<256x2048xbf16, #tpu.memory_space<vmem>>, %arg3: memref<1x2048xf32, #tpu.memory_space<vmem>>, %arg4: memref<768x512xbf16, #tpu.memory_space<vmem>>, %arg5: memref<1x512xf32, #tpu.memory_space<vmem>>, %arg6: memref<8x512x128xbf16, #tpu.memory_space<vmem>>, %arg7: memref<1x128xf32, #tpu.memory_space<vmem>>, %arg8: memref<128x128xbf16, #tpu.memory_space<vmem>>, %arg9: memref<1x128xf32, #tpu.memory_space<vmem>>, %arg10: memref<8x128xf32, #tpu.memory_space<vmem>>, %arg11: memref<8x2560xbf16, #tpu.memory_space<vmem>>) attributes {dimension_semantics = [#tpu.dimension_semantics<parallel>], iteration_bounds = array<i64: 1>, scalar_prefetch = 0 : i64, scratch_operands = 1 : i64, tpu.core_type = #tpu.core_type<tc>, window_params = [{transform_indices = @transform_0, window_bounds = array<i64: 8, 256>}, {pipeline_mode = #tpu.pipeline_mode<synchronous>, transform_indices = @transform_1, window_bounds = array<i64: 256, 2048>}, {pipeline_mode = #tpu.pipeline_mode<synchronous>, transform_indices = @transform_2, window_bounds = array<i64: 1, 2048>}, {pipeline_mode = #tpu.pipeline_mode<synchronous>, transform_indices = @transform_3, window_bounds = array<i64: 768, 512>}, {pipeline_mode = #tpu.pipeline_mode<synchronous>, transform_indices = @transform_4, window_bounds = array<i64: 1, 512>}, {pipeline_mode = #tpu.pipeline_mode<synchronous>, transform_indices = @transform_5, window_bounds = array<i64: 8, 512, 128>}, {pipeline_mode = #tpu.pipeline_mode<synchronous>, transform_indices = @transform_6, window_bounds = array<i64: 1, 128>}, {pipeline_mode = #tpu.pipeline_mode<synchronous>, transform_indices = @transform_7, window_bounds = array<i64: 128, 128>}, {pipeline_mode = #tpu.pipeline_mode<synchronous>, transform_indices = @transform_8, window_bounds = array<i64: 1, 128>}, {transform_indices = @transform_9, window_bounds = array<i64: 8, 128>}]} {
    %c0 = arith.constant 0 : index
    %c0_0 = arith.constant 0 : index
    %0 = vector.load %arg1[%c0, %c0_0] : memref<8x256xbf16, #tpu.memory_space<vmem>>, vector<8x256xbf16>
    %c0_1 = arith.constant 0 : index
    %c0_2 = arith.constant 0 : index
    %1 = vector.load %arg2[%c0_1, %c0_2] : memref<256x2048xbf16, #tpu.memory_space<vmem>>, vector<256x2048xbf16>
    %cst = arith.constant dense<0.000000e+00> : vector<8x2048xf32>
    %2 = tpu.matmul %0, %1, %cst {dimension_numbers = #tpu.dot_dimension_numbers<[1], [0], [0], [1], [0, 0, 1, 1], [], []>} : vector<8x256xbf16>, vector<256x2048xbf16>, vector<8x2048xf32> -> vector<8x2048xf32>
    %c0_3 = arith.constant 0 : index
    %c0_4 = arith.constant 0 : index
    %3 = vector.load %arg3[%c0_3, %c0_4] : memref<1x2048xf32, #tpu.memory_space<vmem>>, vector<1x2048xf32>
    %4 = vector.broadcast %3 : vector<1x2048xf32> to vector<8x2048xf32>
    %5 = arith.addf %2, %4 : vector<8x2048xf32>
    %cst_5 = arith.constant 0.000000e+00 : bf16
    %6 = vector.broadcast %cst_5 : bf16 to vector<8x256xbf16>
    %c0_6 = arith.constant 0 : index
    %c0_7 = arith.constant 0 : index
    %7 = vector.load %arg11[%c0_6, %c0_7] : memref<8x2560xbf16, #tpu.memory_space<vmem>>, vector<8x256xbf16>
    tpu.vector_store %arg11[%c0_6, %c0_7], %6 {strides = array<i32>} : memref<8x2560xbf16, #tpu.memory_space<vmem>>, vector<8x256xbf16>,
    %c0_8 = arith.constant 0 : index
    %c2304 = arith.constant 2304 : index
    %8 = vector.load %arg11[%c0_8, %c2304] : memref<8x2560xbf16, #tpu.memory_space<vmem>>, vector<8x256xbf16>
    tpu.vector_store %arg11[%c0_8, %c2304], %6 {strides = array<i32>} : memref<8x2560xbf16, #tpu.memory_space<vmem>>, vector<8x256xbf16>,
    %cst_9 = arith.constant 0.000000e+00 : f32
    %9 = vector.broadcast %cst_9 : f32 to vector<8x2048xf32>
    %10 = arith.maximumf %5, %9 : vector<8x2048xf32>
    %11 = arith.truncf %10 : vector<8x2048xf32> to vector<8x2048xbf16>
    %c0_10 = arith.constant 0 : index
    %c256 = arith.constant 256 : index
    %12 = vector.load %arg11[%c0_10, %c256] : memref<8x2560xbf16, #tpu.memory_space<vmem>>, vector<8x2048xbf16>
    tpu.vector_store %arg11[%c0_10, %c256], %11 {strides = array<i32>} : memref<8x2560xbf16, #tpu.memory_space<vmem>>, vector<8x2048xbf16>,
    %c0_11 = arith.constant 0 : index
    %c0_12 = arith.constant 0 : index
    %13 = vector.load %arg4[%c0_11, %c0_12] : memref<768x512xbf16, #tpu.memory_space<vmem>>, vector<768x512xbf16>
    %c0_13 = arith.constant 0 : index
    %c0_14 = arith.constant 0 : index
    %14 = vector.load %arg5[%c0_13, %c0_14] : memref<1x512xf32, #tpu.memory_space<vmem>>, vector<1x512xf32>
    %cst_15 = arith.constant 0.000000e+00 : f32
    %15 = vector.broadcast %cst_15 : f32 to vector<8x128xf32>
    %c0_16 = arith.constant 0 : index
    %c0_17 = arith.constant 0 : index
    %16 = vector.load %arg11[%c0_16, %c0_17] : memref<8x2560xbf16, #tpu.memory_space<vmem>>, vector<8x768xbf16>
    %cst_18 = arith.constant dense<0.000000e+00> : vector<8x512xf32>
    %17 = tpu.matmul %16, %13, %cst_18 {dimension_numbers = #tpu.dot_dimension_numbers<[1], [0], [0], [1], [0, 0, 1, 1], [], []>} : vector<8x768xbf16>, vector<768x512xbf16>, vector<8x512xf32> -> vector<8x512xf32>
    %18 = vector.broadcast %14 : vector<1x512xf32> to vector<8x512xf32>
    %19 = arith.addf %17, %18 : vector<8x512xf32>
    %cst_19 = arith.constant 0.000000e+00 : f32
    %20 = vector.broadcast %cst_19 : f32 to vector<8x512xf32>
    %21 = arith.maximumf %19, %20 : vector<8x512xf32>
    %c0_20 = arith.constant 0 : index
    %c0_21 = arith.constant 0 : index
    %c0_22 = arith.constant 0 : index
    %22 = vector.load %arg6[%c0_20, %c0_21, %c0_22] : memref<8x512x128xbf16, #tpu.memory_space<vmem>>, vector<1x512x128xbf16>
    %23 = vector.shape_cast %22 : vector<1x512x128xbf16> to vector<512x128xbf16>
    %24 = arith.truncf %21 : vector<8x512xf32> to vector<8x512xbf16>
    %cst_23 = arith.constant dense<0.000000e+00> : vector<8x128xf32>
    %25 = tpu.matmul %24, %23, %cst_23 {dimension_numbers = #tpu.dot_dimension_numbers<[1], [0], [0], [1], [0, 0, 1, 1], [], []>} : vector<8x512xbf16>, vector<512x128xbf16>, vector<8x128xf32> -> vector<8x128xf32>
    %26 = arith.addf %15, %25 : vector<8x128xf32>
    %c0_24 = arith.constant 0 : index
    %c256_25 = arith.constant 256 : index
    %27 = vector.load %arg11[%c0_24, %c256_25] : memref<8x2560xbf16, #tpu.memory_space<vmem>>, vector<8x768xbf16>
    %cst_26 = arith.constant dense<0.000000e+00> : vector<8x512xf32>
    %28 = tpu.matmul %27, %13, %cst_26 {dimension_numbers = #tpu.dot_dimension_numbers<[1], [0], [0], [1], [0, 0, 1, 1], [], []>} : vector<8x768xbf16>, vector<768x512xbf16>, vector<8x512xf32> -> vector<8x512xf32>
    %29 = vector.broadcast %14 : vector<1x512xf32> to vector<8x512xf32>
    %30 = arith.addf %28, %29 : vector<8x512xf32>
    %cst_27 = arith.constant 0.000000e+00 : f32
    %31 = vector.broadcast %cst_27 : f32 to vector<8x512xf32>
    %32 = arith.maximumf %30, %31 : vector<8x512xf32>
    %c1 = arith.constant 1 : index
    %c0_28 = arith.constant 0 : index
    %c0_29 = arith.constant 0 : index
    %33 = vector.load %arg6[%c1, %c0_28, %c0_29] : memref<8x512x128xbf16, #tpu.memory_space<vmem>>, vector<1x512x128xbf16>
    %34 = vector.shape_cast %33 : vector<1x512x128xbf16> to vector<512x128xbf16>
    %35 = arith.truncf %32 : vector<8x512xf32> to vector<8x512xbf16>
    %cst_30 = arith.constant dense<0.000000e+00> : vector<8x128xf32>
    %36 = tpu.matmul %35, %34, %cst_30 {dimension_numbers = #tpu.dot_dimension_numbers<[1], [0], [0], [1], [0, 0, 1, 1], [], []>} : vector<8x512xbf16>, vector<512x128xbf16>, vector<8x128xf32> -> vector<8x128xf32>
    %37 = arith.addf %26, %36 : vector<8x128xf32>
    %c0_31 = arith.constant 0 : index
    %c512 = arith.constant 512 : index
    %38 = vector.load %arg11[%c0_31, %c512] : memref<8x2560xbf16, #tpu.memory_space<vmem>>, vector<8x768xbf16>
    %cst_32 = arith.constant dense<0.000000e+00> : vector<8x512xf32>
    %39 = tpu.matmul %38, %13, %cst_32 {dimension_numbers = #tpu.dot_dimension_numbers<[1], [0], [0], [1], [0, 0, 1, 1], [], []>} : vector<8x768xbf16>, vector<768x512xbf16>, vector<8x512xf32> -> vector<8x512xf32>
    %40 = vector.broadcast %14 : vector<1x512xf32> to vector<8x512xf32>
    %41 = arith.addf %39, %40 : vector<8x512xf32>
    %cst_33 = arith.constant 0.000000e+00 : f32
    %42 = vector.broadcast %cst_33 : f32 to vector<8x512xf32>
    %43 = arith.maximumf %41, %42 : vector<8x512xf32>
    %c2 = arith.constant 2 : index
    %c0_34 = arith.constant 0 : index
    %c0_35 = arith.constant 0 : index
    %44 = vector.load %arg6[%c2, %c0_34, %c0_35] : memref<8x512x128xbf16, #tpu.memory_space<vmem>>, vector<1x512x128xbf16>
    %45 = vector.shape_cast %44 : vector<1x512x128xbf16> to vector<512x128xbf16>
    %46 = arith.truncf %43 : vector<8x512xf32> to vector<8x512xbf16>
    %cst_36 = arith.constant dense<0.000000e+00> : vector<8x128xf32>
    %47 = tpu.matmul %46, %45, %cst_36 {dimension_numbers = #tpu.dot_dimension_numbers<[1], [0], [0], [1], [0, 0, 1, 1], [], []>} : vector<8x512xbf16>, vector<512x128xbf16>, vector<8x128xf32> -> vector<8x128xf32>
    %48 = arith.addf %37, %47 : vector<8x128xf32>
    %c0_37 = arith.constant 0 : index
    %c768 = arith.constant 768 : index
    %49 = vector.load %arg11[%c0_37, %c768] : memref<8x2560xbf16, #tpu.memory_space<vmem>>, vector<8x768xbf16>
    %cst_38 = arith.constant dense<0.000000e+00> : vector<8x512xf32>
    %50 = tpu.matmul %49, %13, %cst_38 {dimension_numbers = #tpu.dot_dimension_numbers<[1], [0], [0], [1], [0, 0, 1, 1], [], []>} : vector<8x768xbf16>, vector<768x512xbf16>, vector<8x512xf32> -> vector<8x512xf32>
    %51 = vector.broadcast %14 : vector<1x512xf32> to vector<8x512xf32>
    %52 = arith.addf %50, %51 : vector<8x512xf32>
    %cst_39 = arith.constant 0.000000e+00 : f32
    %53 = vector.broadcast %cst_39 : f32 to vector<8x512xf32>
    %54 = arith.maximumf %52, %53 : vector<8x512xf32>
    %c3 = arith.constant 3 : index
    %c0_40 = arith.constant 0 : index
    %c0_41 = arith.constant 0 : index
    %55 = vector.load %arg6[%c3, %c0_40, %c0_41] : memref<8x512x128xbf16, #tpu.memory_space<vmem>>, vector<1x512x128xbf16>
    %56 = vector.shape_cast %55 : vector<1x512x128xbf16> to vector<512x128xbf16>
    %57 = arith.truncf %54 : vector<8x512xf32> to vector<8x512xbf16>
    %cst_42 = arith.constant dense<0.000000e+00> : vector<8x128xf32>
    %58 = tpu.matmul %57, %56, %cst_42 {dimension_numbers = #tpu.dot_dimension_numbers<[1], [0], [0], [1], [0, 0, 1, 1], [], []>} : vector<8x512xbf16>, vector<512x128xbf16>, vector<8x128xf32> -> vector<8x128xf32>
    %59 = arith.addf %48, %58 : vector<8x128xf32>
    %c0_43 = arith.constant 0 : index
    %c1024 = arith.constant 1024 : index
    %60 = vector.load %arg11[%c0_43, %c1024] : memref<8x2560xbf16, #tpu.memory_space<vmem>>, vector<8x768xbf16>
    %cst_44 = arith.constant dense<0.000000e+00> : vector<8x512xf32>
    %61 = tpu.matmul %60, %13, %cst_44 {dimension_numbers = #tpu.dot_dimension_numbers<[1], [0], [0], [1], [0, 0, 1, 1], [], []>} : vector<8x768xbf16>, vector<768x512xbf16>, vector<8x512xf32> -> vector<8x512xf32>
    %62 = vector.broadcast %14 : vector<1x512xf32> to vector<8x512xf32>
    %63 = arith.addf %61, %62 : vector<8x512xf32>
    %cst_45 = arith.constant 0.000000e+00 : f32
    %64 = vector.broadcast %cst_45 : f32 to vector<8x512xf32>
    %65 = arith.maximumf %63, %64 : vector<8x512xf32>
    %c4 = arith.constant 4 : index
    %c0_46 = arith.constant 0 : index
    %c0_47 = arith.constant 0 : index
    %66 = vector.load %arg6[%c4, %c0_46, %c0_47] : memref<8x512x128xbf16, #tpu.memory_space<vmem>>, vector<1x512x128xbf16>
    %67 = vector.shape_cast %66 : vector<1x512x128xbf16> to vector<512x128xbf16>
    %68 = arith.truncf %65 : vector<8x512xf32> to vector<8x512xbf16>
    %cst_48 = arith.constant dense<0.000000e+00> : vector<8x128xf32>
    %69 = tpu.matmul %68, %67, %cst_48 {dimension_numbers = #tpu.dot_dimension_numbers<[1], [0], [0], [1], [0, 0, 1, 1], [], []>} : vector<8x512xbf16>, vector<512x128xbf16>, vector<8x128xf32> -> vector<8x128xf32>
    %70 = arith.addf %59, %69 : vector<8x128xf32>
    %c0_49 = arith.constant 0 : index
    %c1280 = arith.constant 1280 : index
    %71 = vector.load %arg11[%c0_49, %c1280] : memref<8x2560xbf16, #tpu.memory_space<vmem>>, vector<8x768xbf16>
    %cst_50 = arith.constant dense<0.000000e+00> : vector<8x512xf32>
    %72 = tpu.matmul %71, %13, %cst_50 {dimension_numbers = #tpu.dot_dimension_numbers<[1], [0], [0], [1], [0, 0, 1, 1], [], []>} : vector<8x768xbf16>, vector<768x512xbf16>, vector<8x512xf32> -> vector<8x512xf32>
    %73 = vector.broadcast %14 : vector<1x512xf32> to vector<8x512xf32>
    %74 = arith.addf %72, %73 : vector<8x512xf32>
    %cst_51 = arith.constant 0.000000e+00 : f32
    %75 = vector.broadcast %cst_51 : f32 to vector<8x512xf32>
    %76 = arith.maximumf %74, %75 : vector<8x512xf32>
    %c5 = arith.constant 5 : index
    %c0_52 = arith.constant 0 : index
    %c0_53 = arith.constant 0 : index
    %77 = vector.load %arg6[%c5, %c0_52, %c0_53] : memref<8x512x128xbf16, #tpu.memory_space<vmem>>, vector<1x512x128xbf16>
    %78 = vector.shape_cast %77 : vector<1x512x128xbf16> to vector<512x128xbf16>
    %79 = arith.truncf %76 : vector<8x512xf32> to vector<8x512xbf16>
    %cst_54 = arith.constant dense<0.000000e+00> : vector<8x128xf32>
    %80 = tpu.matmul %79, %78, %cst_54 {dimension_numbers = #tpu.dot_dimension_numbers<[1], [0], [0], [1], [0, 0, 1, 1], [], []>} : vector<8x512xbf16>, vector<512x128xbf16>, vector<8x128xf32> -> vector<8x128xf32>
    %81 = arith.addf %70, %80 : vector<8x128xf32>
    %c0_55 = arith.constant 0 : index
    %c1536 = arith.constant 1536 : index
    %82 = vector.load %arg11[%c0_55, %c1536] : memref<8x2560xbf16, #tpu.memory_space<vmem>>, vector<8x768xbf16>
    %cst_56 = arith.constant dense<0.000000e+00> : vector<8x512xf32>
    %83 = tpu.matmul %82, %13, %cst_56 {dimension_numbers = #tpu.dot_dimension_numbers<[1], [0], [0], [1], [0, 0, 1, 1], [], []>} : vector<8x768xbf16>, vector<768x512xbf16>, vector<8x512xf32> -> vector<8x512xf32>
    %84 = vector.broadcast %14 : vector<1x512xf32> to vector<8x512xf32>
    %85 = arith.addf %83, %84 : vector<8x512xf32>
    %cst_57 = arith.constant 0.000000e+00 : f32
    %86 = vector.broadcast %cst_57 : f32 to vector<8x512xf32>
    %87 = arith.maximumf %85, %86 : vector<8x512xf32>
    %c6 = arith.constant 6 : index
    %c0_58 = arith.constant 0 : index
    %c0_59 = arith.constant 0 : index
    %88 = vector.load %arg6[%c6, %c0_58, %c0_59] : memref<8x512x128xbf16, #tpu.memory_space<vmem>>, vector<1x512x128xbf16>
    %89 = vector.shape_cast %88 : vector<1x512x128xbf16> to vector<512x128xbf16>
    %90 = arith.truncf %87 : vector<8x512xf32> to vector<8x512xbf16>
    %cst_60 = arith.constant dense<0.000000e+00> : vector<8x128xf32>
    %91 = tpu.matmul %90, %89, %cst_60 {dimension_numbers = #tpu.dot_dimension_numbers<[1], [0], [0], [1], [0, 0, 1, 1], [], []>} : vector<8x512xbf16>, vector<512x128xbf16>, vector<8x128xf32> -> vector<8x128xf32>
    %92 = arith.addf %81, %91 : vector<8x128xf32>
    %c0_61 = arith.constant 0 : index
    %c1792 = arith.constant 1792 : index
    %93 = vector.load %arg11[%c0_61, %c1792] : memref<8x2560xbf16, #tpu.memory_space<vmem>>, vector<8x768xbf16>
    %cst_62 = arith.constant dense<0.000000e+00> : vector<8x512xf32>
    %94 = tpu.matmul %93, %13, %cst_62 {dimension_numbers = #tpu.dot_dimension_numbers<[1], [0], [0], [1], [0, 0, 1, 1], [], []>} : vector<8x768xbf16>, vector<768x512xbf16>, vector<8x512xf32> -> vector<8x512xf32>
    %95 = vector.broadcast %14 : vector<1x512xf32> to vector<8x512xf32>
    %96 = arith.addf %94, %95 : vector<8x512xf32>
    %cst_63 = arith.constant 0.000000e+00 : f32
    %97 = vector.broadcast %cst_63 : f32 to vector<8x512xf32>
    %98 = arith.maximumf %96, %97 : vector<8x512xf32>
    %c7 = arith.constant 7 : index
    %c0_64 = arith.constant 0 : index
    %c0_65 = arith.constant 0 : index
    %99 = vector.load %arg6[%c7, %c0_64, %c0_65] : memref<8x512x128xbf16, #tpu.memory_space<vmem>>, vector<1x512x128xbf16>
    %100 = vector.shape_cast %99 : vector<1x512x128xbf16> to vector<512x128xbf16>
    %101 = arith.truncf %98 : vector<8x512xf32> to vector<8x512xbf16>
    %cst_66 = arith.constant dense<0.000000e+00> : vector<8x128xf32>
    %102 = tpu.matmul %101, %100, %cst_66 {dimension_numbers = #tpu.dot_dimension_numbers<[1], [0], [0], [1], [0, 0, 1, 1], [], []>} : vector<8x512xbf16>, vector<512x128xbf16>, vector<8x128xf32> -> vector<8x128xf32>
    %103 = arith.addf %92, %102 : vector<8x128xf32>
    %c0_67 = arith.constant 0 : index
    %c0_68 = arith.constant 0 : index
    %104 = vector.load %arg7[%c0_67, %c0_68] : memref<1x128xf32, #tpu.memory_space<vmem>>, vector<1x128xf32>
    %105 = vector.broadcast %104 : vector<1x128xf32> to vector<8x128xf32>
    %106 = arith.addf %103, %105 : vector<8x128xf32>
    %cst_69 = arith.constant 0.000000e+00 : f32
    %107 = vector.broadcast %cst_69 : f32 to vector<8x128xf32>
    %108 = arith.maximumf %106, %107 : vector<8x128xf32>
    %c0_70 = arith.constant 0 : index
    %c0_71 = arith.constant 0 : index
    %109 = vector.load %arg8[%c0_70, %c0_71] : memref<128x128xbf16, #tpu.memory_space<vmem>>, vector<128x128xbf16>
    %110 = arith.truncf %108 : vector<8x128xf32> to vector<8x128xbf16>
    %cst_72 = arith.constant dense<0.000000e+00> : vector<8x128xf32>
    %111 = tpu.matmul %110, %109, %cst_72 {dimension_numbers = #tpu.dot_dimension_numbers<[1], [0], [0], [1], [0, 0, 1, 1], [], []>} : vector<8x128xbf16>, vector<128x128xbf16>, vector<8x128xf32> -> vector<8x128xf32>
    %c0_73 = arith.constant 0 : index
    %c0_74 = arith.constant 0 : index
    %112 = vector.load %arg9[%c0_73, %c0_74] : memref<1x128xf32, #tpu.memory_space<vmem>>, vector<1x128xf32>
    %113 = vector.broadcast %112 : vector<1x128xf32> to vector<8x128xf32>
    %114 = arith.addf %111, %113 : vector<8x128xf32>
    %c0_75 = arith.constant 0 : index
    %c0_76 = arith.constant 0 : index
    %115 = vector.load %arg10[%c0_75, %c0_76] : memref<8x128xf32, #tpu.memory_space<vmem>>, vector<8x128xf32>
    tpu.vector_store %arg10[%c0_75, %c0_76], %114 {strides = array<i32>} : memref<8x128xf32, #tpu.memory_space<vmem>>, vector<8x128xf32>,
    return
  }
  func.func @transform_0(%arg0: i32) -> (i32, i32) {
    %c0_i32 = arith.constant 0 : i32
    %c0_i32_0 = arith.constant 0 : i32
    return %arg0, %c0_i32 : i32, i32
  }
  func.func @transform_1(%arg0: i32) -> (i32, i32) {
    %c0_i32 = arith.constant 0 : i32
    %c0_i32_0 = arith.constant 0 : i32
    %c0_i32_1 = arith.constant 0 : i32
    return %c0_i32, %c0_i32_0 : i32, i32
  }
  func.func @transform_2(%arg0: i32) -> (i32, i32) {
    %c0_i32 = arith.constant 0 : i32
    %c0_i32_0 = arith.constant 0 : i32
    %c0_i32_1 = arith.constant 0 : i32
    return %c0_i32, %c0_i32_0 : i32, i32
  }
  func.func @transform_3(%arg0: i32) -> (i32, i32) {
    %c0_i32 = arith.constant 0 : i32
    %c0_i32_0 = arith.constant 0 : i32
    %c0_i32_1 = arith.constant 0 : i32
    return %c0_i32, %c0_i32_0 : i32, i32
  }
  func.func @transform_4(%arg0: i32) -> (i32, i32) {
    %c0_i32 = arith.constant 0 : i32
    %c0_i32_0 = arith.constant 0 : i32
    %c0_i32_1 = arith.constant 0 : i32
    return %c0_i32, %c0_i32_0 : i32, i32
  }
  func.func @transform_5(%arg0: i32) -> (i32, i32, i32) {
    %c0_i32 = arith.constant 0 : i32
    %c0_i32_0 = arith.constant 0 : i32
    %c0_i32_1 = arith.constant 0 : i32
    %c0_i32_2 = arith.constant 0 : i32
    return %c0_i32, %c0_i32_0, %c0_i32_1 : i32, i32, i32
  }
  func.func @transform_6(%arg0: i32) -> (i32, i32) {
    %c0_i32 = arith.constant 0 : i32
    %c0_i32_0 = arith.constant 0 : i32
    %c0_i32_1 = arith.constant 0 : i32
    return %c0_i32, %c0_i32_0 : i32, i32
  }
  func.func @transform_7(%arg0: i32) -> (i32, i32) {
    %c0_i32 = arith.constant 0 : i32
    %c0_i32_0 = arith.constant 0 : i32
    %c0_i32_1 = arith.constant 0 : i32
    return %c0_i32, %c0_i32_0 : i32, i32
  }
  func.func @transform_8(%arg0: i32) -> (i32, i32) {
    %c0_i32 = arith.constant 0 : i32
    %c0_i32_0 = arith.constant 0 : i32
    %c0_i32_1 = arith.constant 0 : i32
    return %c0_i32, %c0_i32_0 : i32, i32
  }
  func.func @transform_9(%arg0: i32) -> (i32, i32) {
    %c0_i32 = arith.constant 0 : i32
    %c0_i32_0 = arith.constant 0 : i32
    return %arg0, %c0_i32 : i32, i32
  }
}

</mosaic_0001>

<bundles_post_ra>
// kernel: tpu_custom_call.1
= control target key start
LH: loop header
LB: loop body
LE: loop exit
PB: predicated region body
PF: predicated region fallthrough
CT: control target
= control target key end

     0   :  { %14 = vsyncpa [#allocation4], 0  ;;  %s14372_s0 = inlined_call_operand.hbm [shape: bf16[8,256], index: 0, kind: input, shape index: {}]   ;;  %s14373_s1 = inlined_call_operand.hbm [shape: bf16[256,2048], index: 1, kind: input, shape index: {}]   ;;  %s14374_s2 = inlined_call_operand.hbm [shape: f32[1,2048], index: 2, kind: input, shape index: {}]   ;;  %s14375_s3 = inlined_call_operand.hbm [shape: bf16[768,512], index: 3, kind: input, shape index: {}]   ;;  %s14376_s4 = inlined_call_operand.vmem [shape: f32[1,512], index: 4, kind: input, shape index: {}]   ;;  %s14377_s5 = inlined_call_operand.hbm [shape: bf16[8,512,128], index: 5, kind: input, shape index: {}]   ;;  %s14378_s6 = inlined_call_operand.vmem [shape: f32[1,128], index: 6, kind: input, shape index: {}]   ;;  %s14379_s7 = inlined_call_operand.hbm [shape: bf16[128,128], index: 7, kind: input, shape index: {}]   ;;  %s14380_s8 = inlined_call_operand.vmem [shape: f32[1,128], index: 8, kind: input, shape index: {}]   ;;  %s14381_s9 = inlined_call_operand.hbm [shape: f32[8,128], index: 9, kind: output, shape index: {}]  }
   0x1   :  { %15 = vsyncpa [#allocation7], 0 }
   0x2   :  { %16 = vsyncpa [#allocation10], 0 }
   0x3   :  { %17 = vsyncpa [#allocation13], 0 }
   0x4   :  { %18 = vsyncpa [#allocation5], 0  ;;  %s11136_s30 = smov [#allocation6]   ;;  %s10972_s13 = scalar_lea.hbm %s14373_s1, 32768 }
   0x5   :  { %s34_s10 = sshll.u32 %s11136_s30, 4  ;;  %p10973_p0 = scmp.ne.s32.totalorder %s14373_s1, %s10972_s13  ;;  %s35_s10 = int_to_ptr.vmem [resolvable:$true] %s34_s10 }
   0x6   :  { %p10976_p1 = scmp.lt.u32.totalorder %s10972_s13, %s14373_s1 }
   0x8   :  { %p10978_p2 = pnand %p10976_p1, %p10973_p0 }
   0xa   :  { %10981 = shalt.err (!%p10978_p2)
}
   0xb   :  { %s10982_s18 = scalar_lea.vmem %s35_s10, 32768  ;;  %p10987_p4 = scmp.lt.s32.totalorder %s35_s10, %s35_s10 }
   0xc   :  { %p10983_p3 = scmp.ne.s32.totalorder %s35_s10, %s10982_s18  ;;  %p10988_p5 = scmp.lt.s32.totalorder %s10982_s18, %s10982_s18 }
   0xe   :  { %p10989_p6 = por %p10988_p5, %p10987_p4 }
  0x10   :  { %p10990_p7 = pnand %p10989_p6, %p10983_p3 }
  0x12   :  { %10993 = shalt.err (!%p10990_p7)
}
  0x13   :  { %s11137_s19 = smov 1024   ;;  %s11138_s20 = smov 64  }
  0x14   :  { %40 = dma.hbm_to_vmem [thread:$0]  %s14373_s1, 32768, %s35_s10, [#allocation7], %s11137_s19, %s11137_s19, %s11138_s20  }
  0x15   :  { %s11139_s23 = smov [#allocation9]   ;;  %s10994_s27 = scalar_lea.hbm %s14375_s3, 24576 }
  0x16   :  { %s56_s24 = sshll.u32 %s11139_s23, 4  ;;  %p10995_p8 = scmp.ne.s32.totalorder %s14375_s3, %s10994_s27  ;;  %s57_s24 = int_to_ptr.vmem [resolvable:$true] %s56_s24 }
  0x17   :  { %p10998_p9 = scmp.lt.u32.totalorder %s10994_s27, %s14375_s3 }
  0x19   :  { %p11000_p10 = pnand %p10998_p9, %p10995_p8 }
  0x1b   :  { %11003 = shalt.err (!%p11000_p10)
}
  0x1c   :  { %s11004_s12 = scalar_lea.vmem %s57_s24, 24576  ;;  %p11009_p12 = scmp.lt.s32.totalorder %s57_s24, %s57_s24 }
  0x1d   :  { %p11005_p11 = scmp.ne.s32.totalorder %s57_s24, %s11004_s12  ;;  %p11010_p13 = scmp.lt.s32.totalorder %s11004_s12, %s11004_s12 }
  0x1f   :  { %p11011_p0 = por %p11010_p13, %p11009_p12 }
  0x21   :  { %p11012_p1 = pnand %p11011_p0, %p11005_p11 }
  0x23   :  { %11015 = shalt.err (!%p11012_p1)
}
  0x24   :  { %s11140_s1 = smov 256   ;;  %s11141_s10 = smov 16  }
  0x25   :  { %62 = dma.hbm_to_vmem [thread:$0]  %s14375_s3, 24576, %s57_s24, [#allocation10], %s11140_s1, %s11140_s1, %s11141_s10  }
  0x26   :  { %s11142_s15 = smov [#allocation3]   ;;  %s11143_s17 = smov [#allocation8]  }
  0x27   :  { %s25_s16 = sshll.u32 %s11142_s15, 4  ;;  %s47_s18 = sshll.u32 %s11143_s17, 4  ;;  %s26_s16 = int_to_ptr.vmem [resolvable:$true] %s25_s16  ;;  %s48_s18 = int_to_ptr.vmem [resolvable:$true] %s47_s18 }
  0x28   :  { %s11016_s22 = scalar_lea.hbm %s14372_s0, 128 }
  0x29   :  { %p11017_p2 = scmp.ne.s32.totalorder %s14372_s0, %s11016_s22  ;;  %p11020_p3 = scmp.lt.u32.totalorder %s11016_s22, %s14372_s0 }
  0x2b   :  { %p11022_p4 = pnand %p11020_p3, %p11017_p2 }
  0x2d   :  { %11025 = shalt.err (!%p11022_p4)
}
  0x2e   :  { %s11026_s3 = scalar_lea.vmem %s26_s16, 128  ;;  %p11031_p6 = scmp.lt.s32.totalorder %s26_s16, %s26_s16 }
  0x2f   :  { %p11027_p5 = scmp.ne.s32.totalorder %s26_s16, %s11026_s3  ;;  %p11032_p7 = scmp.lt.s32.totalorder %s11026_s3, %s11026_s3 }
  0x31   :  { %p11033_p8 = por %p11032_p7, %p11031_p6 }
  0x33   :  { %p11034_p9 = pnand %p11033_p8, %p11027_p5 }
  0x35   :  { %11037 = shalt.err (!%p11034_p9)
}
  0x36   :  { %28 = dma.hbm_to_vmem [thread:$0]  %s14372_s0, 128, %s26_s16, [#allocation4]  }
  0x37   :  { %s11038_s11 = scalar_lea.hbm %s14374_s2, 256 }
  0x38   :  { %p11039_p10 = scmp.ne.s32.totalorder %s14374_s2, %s11038_s11  ;;  %p11042_p11 = scmp.lt.u32.totalorder %s11038_s11, %s14374_s2 }
  0x3a   :  { %p11044_p12 = pnand %p11042_p11, %p11039_p10 }
  0x3c   :  { %11047 = shalt.err (!%p11044_p12)
}
  0x3d   :  { %s11048_s14 = scalar_lea.vmem %s48_s18, 256  ;;  %p11053_p0 = scmp.lt.s32.totalorder %s48_s18, %s48_s18 }
  0x3e   :  { %p11049_p13 = scmp.ne.s32.totalorder %s48_s18, %s11048_s14  ;;  %p11054_p1 = scmp.lt.s32.totalorder %s11048_s14, %s11048_s14 }
  0x40   :  { %p11055_p2 = por %p11054_p1, %p11053_p0 }
  0x42   :  { %p11056_p3 = pnand %p11055_p2, %p11049_p13 }
  0x44   :  { %11059 = shalt.err (!%p11056_p3)
}
  0x45   :  { %50 = dma.hbm_to_vmem [thread:$0]  %s14374_s2, 256, %s48_s18, [#allocation7]  }
  0x46   :  { %s11144_s16 = smov [#allocation11]   ;;  %s11145_s19 = smov [#allocation12]  }
  0x47   :  { %s70_s17 = sshll.u32 %s11144_s16, 4  ;;  %s84_s21 = sshll.u32 %s11145_s19, 4  ;;  %s71_s17 = int_to_ptr.vmem [resolvable:$true] %s70_s17  ;;  %s85_s21 = int_to_ptr.vmem [resolvable:$true] %s84_s21 }
  0x48   :  { %s11060_s25 = scalar_lea.hbm %s14377_s5, 32768 }
  0x49   :  { %p11061_p4 = scmp.ne.s32.totalorder %s14377_s5, %s11060_s25  ;;  %p11064_p5 = scmp.lt.u32.totalorder %s11060_s25, %s14377_s5 }
  0x4b   :  { %p11066_p6 = pnand %p11064_p5, %p11061_p4 }
  0x4d   :  { %11069 = shalt.err (!%p11066_p6)
}
  0x4e   :  { %s11070_s2 = scalar_lea.vmem %s71_s17, 32768  ;;  %p11075_p8 = scmp.lt.s32.totalorder %s71_s17, %s71_s17 }
  0x4f   :  { %p11071_p7 = scmp.ne.s32.totalorder %s71_s17, %s11070_s2  ;;  %p11076_p9 = scmp.lt.s32.totalorder %s11070_s2, %s11070_s2 }
  0x51   :  { %p11077_p10 = por %p11076_p9, %p11075_p8 }
  0x53   :  { %p11078_p11 = pnand %p11077_p10, %p11071_p7 }
  0x55   :  { %11081 = shalt.err (!%p11078_p11)
}
  0x56   :  { %s11146_s18 = smov 4   ;;  %s11082_s12 = scalar_lea.hbm %s14379_s7, 1024 }
  0x57   :  { %76 = dma.hbm_to_vmem [thread:$0]  %s14377_s5, 32768, %s71_s17, [#allocation10], %s11138_s20, %s11138_s20, %s11146_s18  }
  0x58   :  { %p11083_p12 = scmp.ne.s32.totalorder %s14379_s7, %s11082_s12  ;;  %p11086_p13 = scmp.lt.u32.totalorder %s11082_s12, %s14379_s7 }
  0x5a   :  { %p11088_p0 = pnand %p11086_p13, %p11083_p12 }
  0x5c   :  { %11091 = shalt.err (!%p11088_p0)
}
  0x5d   :  { %s11092_s0 = scalar_lea.vmem %s85_s21, 1024  ;;  %p11097_p2 = scmp.lt.s32.totalorder %s85_s21, %s85_s21 }
  0x5e   :  { %p11093_p1 = scmp.ne.s32.totalorder %s85_s21, %s11092_s0  ;;  %p11098_p3 = scmp.lt.s32.totalorder %s11092_s0, %s11092_s0 }
  0x60   :  { %p11099_p4 = por %p11098_p3, %p11097_p2 }
  0x62   :  { %p11100_p5 = pnand %p11099_p4, %p11093_p1 }
  0x64   :  { %11103 = shalt.err (!%p11100_p5)
}
  0x65   :  { %90 = dma.hbm_to_vmem [thread:$0]  %s14379_s7, 1024, %s85_s21, [#allocation13], %s11138_s20, %s11138_s20, %s11146_s18  }
  0x66   :  { %11126 = dma.done.wait [#allocation4], 128  }
  0x67   :  { %11127 = vsyncadd [#allocation4], 4294967168 }
  0x68   :  { %11128 = dma.done.wait [#allocation7], 33024  }
  0x69   :  { %11129 = vsyncadd [#allocation7], 4294934272 }
  0x6a   :  { %11130 = dma.done.wait [#allocation10], 57344  }
  0x6b   :  { %11131 = vsyncadd [#allocation10], 4294909952 }
  0x6c   :  { %11132 = dma.done.wait [#allocation13], 1024  }
  0x6d   :  { %11133 = vsyncadd [#allocation13], 4294966272  ;;  %v113_v0 = vld [vmem:[#allocation6] sm:$0xff]  ;;  %v114_v2 = vld [vmem:[#allocation6 + $0x8] sm:$0xff]  ;;  %vm11149_vm0 = vmmov 0   ;;  %s11150_s21 = smov [#allocation14]  }
  0x6e   :  { %v121_v1 = vld [vmem:[#allocation6 + $0x40] sm:$0xff]  ;;  %v122_v4 = vld [vmem:[#allocation6 + $0x48] sm:$0xff]  ;;  %v11278_v53 = vld [vmem:[#allocation3] sm:$0xff]  ;;  %s8385_s22 = sshll.u32 %s11150_s21, 4  ;;  %s8386_s22 = int_to_ptr.vmem [resolvable:$true] %s8385_s22 }
  0x6f   :  { %v8400_v3 = vcombine.high %v113_v0, %v121_v1  ;;  %v8399_v5 = vcombine.low %v113_v0, %v121_v1  ;;  %v129_v6 = vld [vmem:[#allocation6 + $0x80] sm:$0xff]  ;;  %v8402_v8 = vcombine.high %v114_v2, %v122_v4  ;;  %v8401_v9 = vcombine.low %v114_v2, %v122_v4  ;;  %v130_v11 = vld [vmem:[#allocation6 + $0x88] sm:$0xff]  ;;  %p11109_p7 = scmp.lt.s32.totalorder %s8386_s22, %s8386_s22 }
  0x70   :  { %v137_v7 = vld [vmem:[#allocation6 + $0xc0] sm:$0xff]  ;;  %v138_v12 = vld [vmem:[#allocation6 + $0xc8] sm:$0xff]  ;;  %v11282_v57 = vcombine.high %v11278_v53, %v11278_v53 }
  0x71   :  { %v8416_v10 = vcombine.high %v129_v6, %v137_v7  ;;  %v145_v13 = vld [vmem:[#allocation6 + $0x100] sm:$0xff]  ;;  %1740 = vmatprep.subr.bf16.mxu0 %v8400_v3  ;;  %v8418_v14 = vcombine.high %v130_v11, %v138_v12  ;;  %v146_v16 = vld [vmem:[#allocation6 + $0x108] sm:$0xff]  ;;  %1781 = vmatprep.subr.bf16.mxu1 %v8402_v8  ;;  %v8415_v18 = vcombine.low %v129_v6, %v137_v7 }
  0x72   :  { %v153_v15 = vld [vmem:[#allocation6 + $0x140] sm:$0xff]  ;;  %v154_v17 = vld [vmem:[#allocation6 + $0x148] sm:$0xff]  ;;  %1741 = vmatpush1.bf16.msra.mxu0 %v8399_v5  ;;  %1782 = vmatpush1.bf16.msra.mxu1 %v8401_v9  ;;  %v8417_v19 = vcombine.low %v130_v11, %v138_v12 }
  0x73   :  { %1742 = vmatprep.subr.bf16.mxu0 %v8416_v10  ;;  %v8432_v20 = vcombine.high %v145_v13, %v153_v15  ;;  %1783 = vmatprep.subr.bf16.mxu1 %v8418_v14  ;;  %v8434_v21 = vcombine.high %v146_v16, %v154_v17  ;;  %v161_v22 = vld [vmem:[#allocation6 + $0x180] sm:$0xff]  ;;  %v162_v24 = vld [vmem:[#allocation6 + $0x188] sm:$0xff]  ;;  %v8431_v26 = vcombine.low %v145_v13, %v153_v15 }
  0x74   :  { %v169_v23 = vld [vmem:[#allocation6 + $0x1c0] sm:$0xff]  ;;  %v170_v25 = vld [vmem:[#allocation6 + $0x1c8] sm:$0xff]  ;;  %v8433_v27 = vcombine.low %v146_v16, %v154_v17  ;;  %1772 = vmatprep.mubr.bf16.mxu0 %v11282_v57  ;;  %1813 = vmatprep.mubr.bf16.mxu1 %v11282_v57 }
  0x75   :  { %v8448_v28 = vcombine.high %v161_v22, %v169_v23  ;;  %v8450_v29 = vcombine.high %v162_v24, %v170_v25  ;;  %v177_v30 = vld [vmem:[#allocation6 + $0x200] sm:$0xff]  ;;  %v178_v32 = vld [vmem:[#allocation6 + $0x208] sm:$0xff]  ;;  %v8447_v34 = vcombine.low %v161_v22, %v169_v23  ;;  %v8449_v35 = vcombine.low %v162_v24, %v170_v25 }
  0x76   :  { %1743 = vmatpush1.bf16.msra.mxu0 %v8415_v18  ;;  %1784 = vmatpush1.bf16.msra.mxu1 %v8417_v19  ;;  %v185_v31 = vld [vmem:[#allocation6 + $0x240] sm:$0xff]  ;;  %v186_v33 = vld [vmem:[#allocation6 + $0x248] sm:$0xff] }
  0x77   :  { %1744 = vmatprep.subr.bf16.mxu0 %v8432_v20  ;;  %1785 = vmatprep.subr.bf16.mxu1 %v8434_v21  ;;  %v8464_v36 = vcombine.high %v177_v30, %v185_v31  ;;  %v8466_v37 = vcombine.high %v178_v32, %v186_v33  ;;  %v193_v38 = vld [vmem:[#allocation6 + $0x280] sm:$0xff]  ;;  %v194_v40 = vld [vmem:[#allocation6 + $0x288] sm:$0xff]  ;;  %v8463_v42 = vcombine.low %v177_v30, %v185_v31 }
  0x78   :  { %v201_v39 = vld [vmem:[#allocation6 + $0x2c0] sm:$0xff]  ;;  %v202_v41 = vld [vmem:[#allocation6 + $0x2c8] sm:$0xff]  ;;  %v8465_v43 = vcombine.low %v178_v32, %v186_v33 }
  0x79   :  { %v8480_v44 = vcombine.high %v193_v38, %v201_v39  ;;  %v8482_v45 = vcombine.high %v194_v40, %v202_v41  ;;  %v209_v46 = vld [vmem:[#allocation6 + $0x300] sm:$0xff]  ;;  %v210_v48 = vld [vmem:[#allocation6 + $0x308] sm:$0xff]  ;;  %v8479_v50 = vcombine.low %v193_v38, %v201_v39  ;;  %v8481_v51 = vcombine.low %v194_v40, %v202_v41 }
  0x7a   :  { %1745 = vmatpush1.bf16.msra.mxu0 %v8431_v26  ;;  %1786 = vmatpush1.bf16.msra.mxu1 %v8433_v27  ;;  %v217_v47 = vld [vmem:[#allocation6 + $0x340] sm:$0xff]  ;;  %v218_v49 = vld [vmem:[#allocation6 + $0x348] sm:$0xff] }
  0x7b   :  { %1746 = vmatprep.subr.bf16.mxu0 %v8448_v28  ;;  %1787 = vmatprep.subr.bf16.mxu1 %v8450_v29  ;;  %v8496_v52 = vcombine.high %v209_v46, %v217_v47  ;;  %v8498_v54 = vcombine.high %v210_v48, %v218_v49  ;;  %v225_v55 = vld [vmem:[#allocation6 + $0x380] sm:$0xff]  ;;  %v226_v58 = vld [vmem:[#allocation6 + $0x388] sm:$0xff]  ;;  %v8495_v60 = vcombine.low %v209_v46, %v217_v47 }
  0x7c   :  { %v233_v56 = vld [vmem:[#allocation6 + $0x3c0] sm:$0xff]  ;;  %v234_v59 = vld [vmem:[#allocation6 + $0x3c8] sm:$0xff]  ;;  %v8497_v61 = vcombine.low %v210_v48, %v218_v49 }
  0x7d   :  { %v8512_v62 = vcombine.high %v225_v55, %v233_v56  ;;  %v8514_v63 = vcombine.high %v226_v58, %v234_v59  ;;  %v241_v0 = vld [vmem:[#allocation6 + $0x400] sm:$0xff]  ;;  %v242_v2 = vld [vmem:[#allocation6 + $0x408] sm:$0xff]  ;;  %v8511_v4 = vcombine.low %v225_v55, %v233_v56  ;;  %v8513_v5 = vcombine.low %v226_v58, %v234_v59 }
  0x7e   :  { %1747 = vmatpush1.bf16.msra.mxu0 %v8447_v34  ;;  %1788 = vmatpush1.bf16.msra.mxu1 %v8449_v35  ;;  %v249_v1 = vld [vmem:[#allocation6 + $0x440] sm:$0xff]  ;;  %v250_v3 = vld [vmem:[#allocation6 + $0x448] sm:$0xff] }
  0x7f   :  { %1748 = vmatprep.subr.bf16.mxu0 %v8464_v36  ;;  %1789 = vmatprep.subr.bf16.mxu1 %v8466_v37  ;;  %v8528_v6 = vcombine.high %v241_v0, %v249_v1  ;;  %v8530_v7 = vcombine.high %v242_v2, %v250_v3  ;;  %v257_v8 = vld [vmem:[#allocation6 + $0x480] sm:$0xff]  ;;  %v258_v10 = vld [vmem:[#allocation6 + $0x488] sm:$0xff]  ;;  %v8527_v12 = vcombine.low %v241_v0, %v249_v1 }
  0x80   :  { %v265_v9 = vld [vmem:[#allocation6 + $0x4c0] sm:$0xff]  ;;  %v266_v11 = vld [vmem:[#allocation6 + $0x4c8] sm:$0xff]  ;;  %v8529_v13 = vcombine.low %v242_v2, %v250_v3  ;;  %v115_v2 = vld [vmem:[#allocation6 + $0x10] sm:$0xff] }
  0x81   :  { %v8544_v14 = vcombine.high %v257_v8, %v265_v9  ;;  %v8546_v15 = vcombine.high %v258_v10, %v266_v11  ;;  %v273_v16 = vld [vmem:[#allocation6 + $0x500] sm:$0xff]  ;;  %v274_v18 = vld [vmem:[#allocation6 + $0x508] sm:$0xff]  ;;  %v8543_v20 = vcombine.low %v257_v8, %v265_v9  ;;  %v8545_v21 = vcombine.low %v258_v10, %v266_v11  ;;  %v123_v3 = vld [vmem:[#allocation6 + $0x50] sm:$0xff] }
  0x82   :  { %1749 = vmatpush1.bf16.msra.mxu0 %v8463_v42  ;;  %1790 = vmatpush1.bf16.msra.mxu1 %v8465_v43  ;;  %v281_v17 = vld [vmem:[#allocation6 + $0x540] sm:$0xff]  ;;  %v282_v19 = vld [vmem:[#allocation6 + $0x548] sm:$0xff]  ;;  %v8404_v8 = vcombine.high %v115_v2, %v123_v3  ;;  %v131_v10 = vld [vmem:[#allocation6 + $0x90] sm:$0xff] }
  0x83   :  { %1750 = vmatprep.subr.bf16.mxu0 %v8480_v44  ;;  %1791 = vmatprep.subr.bf16.mxu1 %v8482_v45  ;;  %v8560_v22 = vcombine.high %v273_v16, %v281_v17  ;;  %v8562_v23 = vcombine.high %v274_v18, %v282_v19  ;;  %v289_v24 = vld [vmem:[#allocation6 + $0x580] sm:$0xff]  ;;  %v290_v26 = vld [vmem:[#allocation6 + $0x588] sm:$0xff]  ;;  %v8559_v28 = vcombine.low %v273_v16, %v281_v17  ;;  %v139_v11 = vld [vmem:[#allocation6 + $0xd0] sm:$0xff] }
  0x84   :  { %v297_v25 = vld [vmem:[#allocation6 + $0x5c0] sm:$0xff]  ;;  %v298_v27 = vld [vmem:[#allocation6 + $0x5c8] sm:$0xff]  ;;  %v8561_v29 = vcombine.low %v274_v18, %v282_v19  ;;  %v8420_v17 = vcombine.high %v131_v10, %v139_v11  ;;  %v147_v18 = vld [vmem:[#allocation6 + $0x110] sm:$0xff] }
  0x85   :  { %v8576_v30 = vcombine.high %v289_v24, %v297_v25  ;;  %v8578_v31 = vcombine.high %v290_v26, %v298_v27  ;;  %v305_v32 = vld [vmem:[#allocation6 + $0x600] sm:$0xff]  ;;  %v306_v34 = vld [vmem:[#allocation6 + $0x608] sm:$0xff]  ;;  %v8575_v36 = vcombine.low %v289_v24, %v297_v25  ;;  %v8577_v37 = vcombine.low %v290_v26, %v298_v27  ;;  %v155_v19 = vld [vmem:[#allocation6 + $0x150] sm:$0xff] }
  0x86   :  { %1751 = vmatpush1.bf16.msra.mxu0 %v8479_v50  ;;  %1792 = vmatpush1.bf16.msra.mxu1 %v8481_v51  ;;  %v313_v33 = vld [vmem:[#allocation6 + $0x640] sm:$0xff]  ;;  %v314_v35 = vld [vmem:[#allocation6 + $0x648] sm:$0xff]  ;;  %v8436_v24 = vcombine.high %v147_v18, %v155_v19  ;;  %v163_v25 = vld [vmem:[#allocation6 + $0x190] sm:$0xff] }
  0x87   :  { %1752 = vmatprep.subr.bf16.mxu0 %v8496_v52  ;;  %1793 = vmatprep.subr.bf16.mxu1 %v8498_v54  ;;  %v8592_v38 = vcombine.high %v305_v32, %v313_v33  ;;  %v8594_v39 = vcombine.high %v306_v34, %v314_v35  ;;  %v321_v40 = vld [vmem:[#allocation6 + $0x680] sm:$0xff]  ;;  %v322_v42 = vld [vmem:[#allocation6 + $0x688] sm:$0xff]  ;;  %v8591_v44 = vcombine.low %v305_v32, %v313_v33  ;;  %v171_v26 = vld [vmem:[#allocation6 + $0x1d0] sm:$0xff] }
  0x88   :  { %v329_v41 = vld [vmem:[#allocation6 + $0x6c0] sm:$0xff]  ;;  %v330_v43 = vld [vmem:[#allocation6 + $0x6c8] sm:$0xff]  ;;  %v8593_v45 = vcombine.low %v306_v34, %v314_v35  ;;  %v164_v27 = vld [vmem:[#allocation6 + $0x198] sm:$0xff]  ;;  %v8452_v32 = vcombine.high %v163_v25, %v171_v26 }
  0x89   :  { %v8608_v46 = vcombine.high %v321_v40, %v329_v41  ;;  %v8610_v47 = vcombine.high %v322_v42, %v330_v43  ;;  %v337_v48 = vld [vmem:[#allocation6 + $0x700] sm:$0xff]  ;;  %v338_v50 = vld [vmem:[#allocation6 + $0x708] sm:$0xff]  ;;  %v8607_v52 = vcombine.low %v321_v40, %v329_v41  ;;  %v8609_v54 = vcombine.low %v322_v42, %v330_v43  ;;  %v179_v33 = vld [vmem:[#allocation6 + $0x210] sm:$0xff] }
  0x8a   :  { %1753 = vmatpush1.bf16.msra.mxu0 %v8495_v60  ;;  %1794 = vmatpush1.bf16.msra.mxu1 %v8497_v61  ;;  %v345_v49 = vld [vmem:[#allocation6 + $0x740] sm:$0xff]  ;;  %v346_v51 = vld [vmem:[#allocation6 + $0x748] sm:$0xff]  ;;  %v187_v34 = vld [vmem:[#allocation6 + $0x250] sm:$0xff] }
  0x8b   :  { %1754 = vmatprep.subr.bf16.mxu0 %v8512_v62  ;;  %1795 = vmatprep.subr.bf16.mxu1 %v8514_v63  ;;  %v8624_v55 = vcombine.high %v337_v48, %v345_v49  ;;  %v8626_v56 = vcombine.high %v338_v50, %v346_v51  ;;  %v353_v58 = vld [vmem:[#allocation6 + $0x780] sm:$0xff]  ;;  %v354_v60 = vld [vmem:[#allocation6 + $0x788] sm:$0xff]  ;;  %v8623_v62 = vcombine.low %v337_v48, %v345_v49  ;;  %v180_v35 = vld [vmem:[#allocation6 + $0x218] sm:$0xff] }
  0x8c   :  { %v361_v59 = vld [vmem:[#allocation6 + $0x7c0] sm:$0xff]  ;;  %v362_v61 = vld [vmem:[#allocation6 + $0x7c8] sm:$0xff]  ;;  %v8625_v63 = vcombine.low %v338_v50, %v346_v51  ;;  %v8468_v40 = vcombine.high %v179_v33, %v187_v34  ;;  %v195_v41 = vld [vmem:[#allocation6 + $0x290] sm:$0xff] }
  0x8d   :  { %v8640_v0 = vcombine.high %v353_v58, %v361_v59  ;;  %v8642_v1 = vcombine.high %v354_v60, %v362_v61  ;;  %v203_v42 = vld [vmem:[#allocation6 + $0x2d0] sm:$0xff]  ;;  %v196_v43 = vld [vmem:[#allocation6 + $0x298] sm:$0xff] }
  0x8e   :  { %1755 = vmatpush1.bf16.msra.mxu0 %v8511_v4  ;;  %1796 = vmatpush1.bf16.msra.mxu1 %v8513_v5  ;;  %v116_v4 = vld [vmem:[#allocation6 + $0x18] sm:$0xff]  ;;  %v8484_v48 = vcombine.high %v195_v41, %v203_v42  ;;  %v211_v49 = vld [vmem:[#allocation6 + $0x310] sm:$0xff] }
  0x8f   :  { %1756 = vmatprep.subr.bf16.mxu0 %v8528_v6  ;;  %1797 = vmatprep.subr.bf16.mxu1 %v8530_v7  ;;  %v124_v5 = vld [vmem:[#allocation6 + $0x58] sm:$0xff]  ;;  %v8639_v6 = vcombine.low %v353_v58, %v361_v59  ;;  %v8641_v7 = vcombine.low %v354_v60, %v362_v61  ;;  %v219_v50 = vld [vmem:[#allocation6 + $0x350] sm:$0xff] }
  0x90   :  { %v8406_v9 = vcombine.high %v116_v4, %v124_v5  ;;  %v8405_v16 = vcombine.low %v116_v4, %v124_v5  ;;  %v212_v51 = vld [vmem:[#allocation6 + $0x318] sm:$0xff]  ;;  %v8500_v58 = vcombine.high %v211_v49, %v219_v50  ;;  %v227_v59 = vld [vmem:[#allocation6 + $0x390] sm:$0xff] }
  0x91   :  { %v235_v60 = vld [vmem:[#allocation6 + $0x3d0] sm:$0xff]  ;;  %v228_v61 = vld [vmem:[#allocation6 + $0x398] sm:$0xff] }
  0x92   :  { %1757 = vmatpush1.bf16.msra.mxu0 %v8527_v12  ;;  %1798 = vmatpush1.bf16.msra.mxu1 %v8529_v13  ;;  %v11288_v12 = vcombine.low %v11278_v53, %v11278_v53  ;;  %v132_v13 = vld [vmem:[#allocation6 + $0x98] sm:$0xff]  ;;  %v8419_v53 = vcombine.low %v131_v10, %v139_v11  ;;  %v251_v4 = vld [vmem:[#allocation6 + $0x450] sm:$0xff] }
  0x93   :  { %1758 = vmatprep.subr.bf16.mxu0 %v8544_v14  ;;  %1799 = vmatprep.subr.bf16.mxu1 %v8546_v15  ;;  %v140_v14 = vld [vmem:[#allocation6 + $0xd8] sm:$0xff]  ;;  %v8403_v15 = vcombine.low %v115_v2, %v123_v3  ;;  %v8516_v2 = vcombine.high %v227_v59, %v235_v60  ;;  %v243_v3 = vld [vmem:[#allocation6 + $0x410] sm:$0xff] }
  0x94   :  { %v244_v5 = vld [vmem:[#allocation6 + $0x418] sm:$0xff]  ;;  %v8532_v10 = vcombine.high %v243_v3, %v251_v4  ;;  %v259_v11 = vld [vmem:[#allocation6 + $0x490] sm:$0xff] }
  0x96   :  { %1759 = vmatpush1.bf16.msra.mxu0 %v8543_v20  ;;  %1800 = vmatpush1.bf16.msra.mxu1 %v8545_v21  ;;  %v148_v20 = vld [vmem:[#allocation6 + $0x118] sm:$0xff]  ;;  %v8422_v21 = vcombine.high %v132_v13, %v140_v14 }
  0x97   :  { %1760 = vmatprep.subr.bf16.mxu0 %v8560_v22  ;;  %1801 = vmatprep.subr.bf16.mxu1 %v8562_v23  ;;  %v156_v22 = vld [vmem:[#allocation6 + $0x158] sm:$0xff]  ;;  %v8421_v23 = vcombine.low %v132_v13, %v140_v14  ;;  %v267_v13 = vld [vmem:[#allocation6 + $0x4d0] sm:$0xff] }
  0x98   :  { %v260_v14 = vld [vmem:[#allocation6 + $0x498] sm:$0xff] }
  0x9a   :  { %1761 = vmatpush1.bf16.msra.mxu0 %v8559_v28  ;;  %1802 = vmatpush1.bf16.msra.mxu1 %v8561_v29  ;;  %v8438_v28 = vcombine.high %v148_v20, %v156_v22  ;;  %v172_v29 = vld [vmem:[#allocation6 + $0x1d8] sm:$0xff] }
  0x9b   :  { %1762 = vmatprep.subr.bf16.mxu0 %v8576_v30  ;;  %1803 = vmatprep.subr.bf16.mxu1 %v8578_v31  ;;  %v8435_v30 = vcombine.low %v147_v18, %v155_v19  ;;  %v8437_v31 = vcombine.low %v148_v20, %v156_v22  ;;  %v8548_v19 = vcombine.high %v259_v11, %v267_v13  ;;  %v275_v20 = vld [vmem:[#allocation6 + $0x510] sm:$0xff]  ;;  %v276_v22 = vld [vmem:[#allocation6 + $0x518] sm:$0xff] }
  0x9e   :  { %1763 = vmatpush1.bf16.msra.mxu0 %v8575_v36  ;;  %1804 = vmatpush1.bf16.msra.mxu1 %v8577_v37  ;;  %v8454_v36 = vcombine.high %v164_v27, %v172_v29  ;;  %v188_v37 = vld [vmem:[#allocation6 + $0x258] sm:$0xff] }
  0x9f   :  { %1764 = vmatprep.subr.bf16.mxu0 %v8592_v38  ;;  %1805 = vmatprep.subr.bf16.mxu1 %v8594_v39  ;;  %v8451_v38 = vcombine.low %v163_v25, %v171_v26  ;;  %v8453_v39 = vcombine.low %v164_v27, %v172_v29  ;;  %v291_v27 = vld [vmem:[#allocation6 + $0x590] sm:$0xff]  ;;  %v292_v29 = vld [vmem:[#allocation6 + $0x598] sm:$0xff] }
  0xa2   :  { %1765 = vmatpush1.bf16.msra.mxu0 %v8591_v44  ;;  %1806 = vmatpush1.bf16.msra.mxu1 %v8593_v45  ;;  %v8470_v44 = vcombine.high %v180_v35, %v188_v37  ;;  %v204_v45 = vld [vmem:[#allocation6 + $0x2d8] sm:$0xff] }
  0xa3   :  { %1766 = vmatprep.subr.bf16.mxu0 %v8608_v46  ;;  %1807 = vmatprep.subr.bf16.mxu1 %v8610_v47  ;;  %v8467_v46 = vcombine.low %v179_v33, %v187_v34  ;;  %v8469_v47 = vcombine.low %v180_v35, %v188_v37  ;;  %v307_v35 = vld [vmem:[#allocation6 + $0x610] sm:$0xff]  ;;  %v308_v37 = vld [vmem:[#allocation6 + $0x618] sm:$0xff] }
  0xa6   :  { %1767 = vmatpush1.bf16.msra.mxu0 %v8607_v52  ;;  %1808 = vmatpush1.bf16.msra.mxu1 %v8609_v54  ;;  %v8486_v52 = vcombine.high %v196_v43, %v204_v45  ;;  %v220_v54 = vld [vmem:[#allocation6 + $0x358] sm:$0xff] }
  0xa7   :  { %1768 = vmatprep.subr.bf16.mxu0 %v8624_v55  ;;  %1809 = vmatprep.subr.bf16.mxu1 %v8626_v56  ;;  %v8483_v55 = vcombine.low %v195_v41, %v203_v42  ;;  %v8485_v56 = vcombine.low %v196_v43, %v204_v45  ;;  %v323_v43 = vld [vmem:[#allocation6 + $0x690] sm:$0xff]  ;;  %v324_v45 = vld [vmem:[#allocation6 + $0x698] sm:$0xff] }
  0xaa   :  { %1769 = vmatpush1.bf16.msra.mxu0 %v8623_v62  ;;  %1810 = vmatpush1.bf16.msra.mxu1 %v8625_v63  ;;  %v8502_v62 = vcombine.high %v212_v51, %v220_v54  ;;  %v236_v63 = vld [vmem:[#allocation6 + $0x3d8] sm:$0xff] }
  0xab   :  { %1770 = vmatprep.subr.bf16.mxu0 %v8640_v0  ;;  %1811 = vmatprep.subr.bf16.mxu1 %v8642_v1  ;;  %v8499_v0 = vcombine.low %v211_v49, %v219_v50  ;;  %v8501_v1 = vcombine.low %v212_v51, %v220_v54  ;;  %v339_v51 = vld [vmem:[#allocation6 + $0x710] sm:$0xff]  ;;  %v340_v54 = vld [vmem:[#allocation6 + $0x718] sm:$0xff] }
  0xae   :  { %1771 = vmatpush1.bf16.msra.mxu0 %v8639_v6  ;;  %1812 = vmatpush1.bf16.msra.mxu1 %v8641_v7  ;;  %v8518_v6 = vcombine.high %v228_v61, %v236_v63  ;;  %v252_v7 = vld [vmem:[#allocation6 + $0x458] sm:$0xff] }
  0xaf   :  { %1822 = vmatprep.subr.bf16.mxu0 %v8404_v8  ;;  %1863 = vmatprep.subr.bf16.mxu1 %v8406_v9  ;;  %v8515_v8 = vcombine.low %v227_v59, %v235_v60  ;;  %v8517_v9 = vcombine.low %v228_v61, %v236_v63  ;;  %v8533_v18 = vcombine.low %v244_v5, %v252_v7  ;;  %v355_v61 = vld [vmem:[#allocation6 + $0x790] sm:$0xff]  ;;  %v356_v63 = vld [vmem:[#allocation6 + $0x798] sm:$0xff] }
  0xb1   :  { %1773 = vmatmul.mubr.bf16.vlgmr.msra.gmra.mrb[0].mxu0 %v11288_v12  ;;  %1814 = vmatmul.mubr.bf16.vlgmr.msra.gmra.mrb[0].mxu1 %v11288_v12 }
  0xb2   :  { %1823 = vmatpush1.bf16.msra.mxu0 %v8403_v15  ;;  %1864 = vmatpush1.bf16.msra.mxu1 %v8405_v16  ;;  %v8534_v15 = vcombine.high %v244_v5, %v252_v7  ;;  %v268_v16 = vld [vmem:[#allocation6 + $0x4d8] sm:$0xff]  ;;  %v117_v5 = vld [vmem:[#allocation6 + $0x20] sm:$0xff]  ;;  %v118_v7 = vld [vmem:[#allocation6 + $0x28] sm:$0xff] }
  0xb3   :  { %1824 = vmatprep.subr.bf16.mxu0 %v8420_v17  ;;  %1865 = vmatprep.subr.bf16.mxu1 %v8422_v21  ;;  %v8531_v17 = vcombine.low %v243_v3, %v251_v4  ;;  %v283_v21 = vld [vmem:[#allocation6 + $0x550] sm:$0xff]  ;;  %v8549_v25 = vcombine.low %v260_v14, %v268_v16 }
  0xb4   :  { %1854 = vmatprep.mubr.bf16.mxu0 %v11282_v57  ;;  %1895 = vmatprep.mubr.bf16.mxu1 %v11282_v57  ;;  %v8564_v26 = vcombine.high %v275_v20, %v283_v21 }
  0xb6   :  { %1825 = vmatpush1.bf16.msra.mxu0 %v8419_v53  ;;  %1866 = vmatpush1.bf16.msra.mxu1 %v8421_v23  ;;  %v8550_v53 = vcombine.high %v260_v14, %v268_v16  ;;  %v284_v23 = vld [vmem:[#allocation6 + $0x558] sm:$0xff]  ;;  %v133_v14 = vld [vmem:[#allocation6 + $0xa0] sm:$0xff]  ;;  %v134_v16 = vld [vmem:[#allocation6 + $0xa8] sm:$0xff] }
  0xb7   :  { %1826 = vmatprep.subr.bf16.mxu0 %v8436_v24  ;;  %1867 = vmatprep.subr.bf16.mxu1 %v8438_v28  ;;  %v8547_v24 = vcombine.low %v259_v11, %v267_v13  ;;  %v299_v28 = vld [vmem:[#allocation6 + $0x5d0] sm:$0xff]  ;;  %v8565_v33 = vcombine.low %v276_v22, %v284_v23 }
  0xb8   :  { %v8580_v34 = vcombine.high %v291_v27, %v299_v28 }
  0xba   :  { %1827 = vmatpush1.bf16.msra.mxu0 %v8435_v30  ;;  %1868 = vmatpush1.bf16.msra.mxu1 %v8437_v31  ;;  %v8566_v30 = vcombine.high %v276_v22, %v284_v23  ;;  %v300_v31 = vld [vmem:[#allocation6 + $0x5d8] sm:$0xff]  ;;  %v157_v23 = vld [vmem:[#allocation6 + $0x160] sm:$0xff] }
  0xbb   :  { %1828 = vmatprep.subr.bf16.mxu0 %v8452_v32  ;;  %1869 = vmatprep.subr.bf16.mxu1 %v8454_v36  ;;  %v8563_v32 = vcombine.low %v275_v20, %v283_v21  ;;  %v315_v36 = vld [vmem:[#allocation6 + $0x650] sm:$0xff]  ;;  %v8581_v41 = vcombine.low %v292_v29, %v300_v31 }
  0xbc   :  { %v8596_v42 = vcombine.high %v307_v35, %v315_v36 }
  0xbe   :  { %1829 = vmatpush1.bf16.msra.mxu0 %v8451_v38  ;;  %1870 = vmatpush1.bf16.msra.mxu1 %v8453_v39  ;;  %v8582_v38 = vcombine.high %v292_v29, %v300_v31  ;;  %v316_v39 = vld [vmem:[#allocation6 + $0x658] sm:$0xff]  ;;  %v165_v29 = vld [vmem:[#allocation6 + $0x1a0] sm:$0xff] }
  0xbf   :  { %1830 = vmatprep.subr.bf16.mxu0 %v8468_v40  ;;  %1871 = vmatprep.subr.bf16.mxu1 %v8470_v44  ;;  %v8579_v40 = vcombine.low %v291_v27, %v299_v28  ;;  %v331_v44 = vld [vmem:[#allocation6 + $0x6d0] sm:$0xff]  ;;  %v8597_v49 = vcombine.low %v308_v37, %v316_v39 }
  0xc0   :  { %v8612_v50 = vcombine.high %v323_v43, %v331_v44 }
  0xc2   :  { %1831 = vmatpush1.bf16.msra.mxu0 %v8467_v46  ;;  %1872 = vmatpush1.bf16.msra.mxu1 %v8469_v47  ;;  %v8598_v46 = vcombine.high %v308_v37, %v316_v39  ;;  %v332_v47 = vld [vmem:[#allocation6 + $0x6d8] sm:$0xff]  ;;  %v181_v37 = vld [vmem:[#allocation6 + $0x220] sm:$0xff] }
  0xc3   :  { %1832 = vmatprep.subr.bf16.mxu0 %v8484_v48  ;;  %1873 = vmatprep.subr.bf16.mxu1 %v8486_v52  ;;  %v8595_v48 = vcombine.low %v307_v35, %v315_v36  ;;  %v347_v52 = vld [vmem:[#allocation6 + $0x750] sm:$0xff]  ;;  %v8613_v59 = vcombine.low %v324_v45, %v332_v47 }
  0xc4   :  { %v8628_v60 = vcombine.high %v339_v51, %v347_v52 }
  0xc6   :  { %1833 = vmatpush1.bf16.msra.mxu0 %v8483_v55  ;;  %1874 = vmatpush1.bf16.msra.mxu1 %v8485_v56  ;;  %v8614_v55 = vcombine.high %v324_v45, %v332_v47  ;;  %v348_v56 = vld [vmem:[#allocation6 + $0x758] sm:$0xff]  ;;  %v197_v45 = vld [vmem:[#allocation6 + $0x2a0] sm:$0xff] }
  0xc7   :  { %1834 = vmatprep.subr.bf16.mxu0 %v8500_v58  ;;  %1875 = vmatprep.subr.bf16.mxu1 %v8502_v62  ;;  %v8611_v58 = vcombine.low %v323_v43, %v331_v44  ;;  %v363_v62 = vld [vmem:[#allocation6 + $0x7d0] sm:$0xff]  ;;  %v8629_v3 = vcombine.low %v340_v54, %v348_v56 }
  0xc8   :  { %v8644_v4 = vcombine.high %v355_v61, %v363_v62 }
  0xca   :  { %1835 = vmatpush1.bf16.msra.mxu0 %v8499_v0  ;;  %1876 = vmatpush1.bf16.msra.mxu1 %v8501_v1  ;;  %v8630_v0 = vcombine.high %v340_v54, %v348_v56  ;;  %v364_v1 = vld [vmem:[#allocation6 + $0x7d8] sm:$0xff]  ;;  %v213_v54 = vld [vmem:[#allocation6 + $0x320] sm:$0xff] }
  0xcb   :  { %1836 = vmatprep.subr.bf16.mxu0 %v8516_v2  ;;  %1877 = vmatprep.subr.bf16.mxu1 %v8518_v6  ;;  %v8627_v2 = vcombine.low %v339_v51, %v347_v52  ;;  %v125_v6 = vld [vmem:[#allocation6 + $0x60] sm:$0xff]  ;;  %v8645_v11 = vcombine.low %v356_v63, %v364_v1 }
  0xcc   :  { %v8408_v13 = vcombine.high %v117_v5, %v125_v6 }
  0xce   :  { %1837 = vmatpush1.bf16.msra.mxu0 %v8515_v8  ;;  %1878 = vmatpush1.bf16.msra.mxu1 %v8517_v9  ;;  %v8646_v8 = vcombine.high %v356_v63, %v364_v1  ;;  %v126_v9 = vld [vmem:[#allocation6 + $0x68] sm:$0xff]  ;;  %v237_v1 = vld [vmem:[#allocation6 + $0x3e0] sm:$0xff] }
  0xcf   :  { %1838 = vmatprep.subr.bf16.mxu0 %v8532_v10  ;;  %1879 = vmatprep.subr.bf16.mxu1 %v8534_v15  ;;  %v8643_v10 = vcombine.low %v355_v61, %v363_v62  ;;  %v141_v15 = vld [vmem:[#allocation6 + $0xe0] sm:$0xff]  ;;  %v8409_v20 = vcombine.low %v118_v7, %v126_v9 }
  0xd0   :  { %v8424_v21 = vcombine.high %v133_v14, %v141_v15 }
  0xd2   :  { %1839 = vmatpush1.bf16.msra.mxu0 %v8531_v17  ;;  %1880 = vmatpush1.bf16.msra.mxu1 %v8533_v18  ;;  %v8410_v17 = vcombine.high %v118_v7, %v126_v9  ;;  %v142_v18 = vld [vmem:[#allocation6 + $0xe8] sm:$0xff]  ;;  %v253_v9 = vld [vmem:[#allocation6 + $0x460] sm:$0xff] }
  0xd3   :  { %1840 = vmatprep.subr.bf16.mxu0 %v8548_v19  ;;  %1881 = vmatprep.subr.bf16.mxu1 %v8550_v53  ;;  %v8407_v19 = vcombine.low %v117_v5, %v125_v6  ;;  %v8426_v22 = vcombine.high %v134_v16, %v142_v18  ;;  %v149_v53 = vld [vmem:[#allocation6 + $0x120] sm:$0xff]  ;;  %v8425_v27 = vcombine.low %v134_v16, %v142_v18 }
  0xd4   :  { %v8440_v28 = vcombine.high %v149_v53, %v157_v23  ;;  %v261_v16 = vld [vmem:[#allocation6 + $0x4a0] sm:$0xff] }
  0xd6   :  { %1841 = vmatpush1.bf16.msra.mxu0 %v8547_v24  ;;  %1882 = vmatpush1.bf16.msra.mxu1 %v8549_v25  ;;  %v150_v24 = vld [vmem:[#allocation6 + $0x128] sm:$0xff] }
  0xd7   :  { %1842 = vmatprep.subr.bf16.mxu0 %v8564_v26  ;;  %1883 = vmatprep.subr.bf16.mxu1 %v8566_v30  ;;  %v158_v25 = vld [vmem:[#allocation6 + $0x168] sm:$0xff]  ;;  %v8423_v26 = vcombine.low %v133_v14, %v141_v15  ;;  %v173_v30 = vld [vmem:[#allocation6 + $0x1e0] sm:$0xff] }
  0xd8   :  { %v8442_v31 = vcombine.high %v150_v24, %v158_v25  ;;  %v8441_v35 = vcombine.low %v150_v24, %v158_v25  ;;  %v8456_v36 = vcombine.high %v165_v29, %v173_v30  ;;  %v285_v24 = vld [vmem:[#allocation6 + $0x560] sm:$0xff] }
  0xda   :  { %1843 = vmatpush1.bf16.msra.mxu0 %v8563_v32  ;;  %1884 = vmatpush1.bf16.msra.mxu1 %v8565_v33  ;;  %v166_v32 = vld [vmem:[#allocation6 + $0x1a8] sm:$0xff] }
  0xdb   :  { %1844 = vmatprep.subr.bf16.mxu0 %v8580_v34  ;;  %1885 = vmatprep.subr.bf16.mxu1 %v8582_v38  ;;  %v174_v33 = vld [vmem:[#allocation6 + $0x1e8] sm:$0xff]  ;;  %v8439_v34 = vcombine.low %v149_v53, %v157_v23  ;;  %v189_v38 = vld [vmem:[#allocation6 + $0x260] sm:$0xff] }
  0xdc   :  { %v8458_v39 = vcombine.high %v166_v32, %v174_v33  ;;  %v8457_v43 = vcombine.low %v166_v32, %v174_v33  ;;  %v8472_v44 = vcombine.high %v181_v37, %v189_v38  ;;  %v277_v23 = vld [vmem:[#allocation6 + $0x520] sm:$0xff] }
  0xdd   :  { %v301_v32 = vld [vmem:[#allocation6 + $0x5e0] sm:$0xff] }
  0xde   :  { %1845 = vmatpush1.bf16.msra.mxu0 %v8579_v40  ;;  %1886 = vmatpush1.bf16.msra.mxu1 %v8581_v41  ;;  %v182_v40 = vld [vmem:[#allocation6 + $0x228] sm:$0xff] }
  0xdf   :  { %1846 = vmatprep.subr.bf16.mxu0 %v8596_v42  ;;  %1887 = vmatprep.subr.bf16.mxu1 %v8598_v46  ;;  %v190_v41 = vld [vmem:[#allocation6 + $0x268] sm:$0xff]  ;;  %v8455_v42 = vcombine.low %v165_v29, %v173_v30  ;;  %v205_v46 = vld [vmem:[#allocation6 + $0x2e0] sm:$0xff]  ;;  %v8568_v30 = vcombine.high %v277_v23, %v285_v24 }
  0xe0   :  { %v8474_v47 = vcombine.high %v182_v40, %v190_v41  ;;  %v8473_v51 = vcombine.low %v182_v40, %v190_v41  ;;  %v8488_v52 = vcombine.high %v197_v45, %v205_v46  ;;  %v317_v40 = vld [vmem:[#allocation6 + $0x660] sm:$0xff] }
  0xe2   :  { %1847 = vmatpush1.bf16.msra.mxu0 %v8595_v48  ;;  %1888 = vmatpush1.bf16.msra.mxu1 %v8597_v49  ;;  %v198_v48 = vld [vmem:[#allocation6 + $0x2a8] sm:$0xff] }
  0xe3   :  { %1848 = vmatprep.subr.bf16.mxu0 %v8612_v50  ;;  %1889 = vmatprep.subr.bf16.mxu1 %v8614_v55  ;;  %v206_v49 = vld [vmem:[#allocation6 + $0x2e8] sm:$0xff]  ;;  %v8471_v50 = vcombine.low %v181_v37, %v189_v38  ;;  %v221_v55 = vld [vmem:[#allocation6 + $0x360] sm:$0xff] }
  0xe4   :  { %v8490_v56 = vcombine.high %v198_v48, %v206_v49  ;;  %v8489_v61 = vcombine.low %v198_v48, %v206_v49  ;;  %v8504_v62 = vcombine.high %v213_v54, %v221_v55  ;;  %v333_v48 = vld [vmem:[#allocation6 + $0x6e0] sm:$0xff] }
  0xe6   :  { %1849 = vmatpush1.bf16.msra.mxu0 %v8611_v58  ;;  %1890 = vmatpush1.bf16.msra.mxu1 %v8613_v59  ;;  %v214_v58 = vld [vmem:[#allocation6 + $0x328] sm:$0xff] }
  0xe7   :  { %1850 = vmatprep.subr.bf16.mxu0 %v8628_v60  ;;  %1891 = vmatprep.subr.bf16.mxu1 %v8630_v0  ;;  %v222_v59 = vld [vmem:[#allocation6 + $0x368] sm:$0xff]  ;;  %v8487_v60 = vcombine.low %v197_v45, %v205_v46  ;;  %v229_v0 = vld [vmem:[#allocation6 + $0x3a0] sm:$0xff] }
  0xe8   :  { %v8506_v63 = vcombine.high %v214_v58, %v222_v59  ;;  %v8505_v5 = vcombine.low %v214_v58, %v222_v59  ;;  %v8520_v6 = vcombine.high %v229_v0, %v237_v1  ;;  %v349_v58 = vld [vmem:[#allocation6 + $0x760] sm:$0xff] }
  0xea   :  { %1851 = vmatpush1.bf16.msra.mxu0 %v8627_v2  ;;  %1892 = vmatpush1.bf16.msra.mxu1 %v8629_v3  ;;  %v230_v2 = vld [vmem:[#allocation6 + $0x3a8] sm:$0xff] }
  0xeb   :  { %1852 = vmatprep.subr.bf16.mxu0 %v8644_v4  ;;  %1893 = vmatprep.subr.bf16.mxu1 %v8646_v8  ;;  %v238_v3 = vld [vmem:[#allocation6 + $0x3e8] sm:$0xff]  ;;  %v8503_v4 = vcombine.low %v213_v54, %v221_v55  ;;  %v245_v8 = vld [vmem:[#allocation6 + $0x420] sm:$0xff] }
  0xec   :  { %v8522_v7 = vcombine.high %v230_v2, %v238_v3  ;;  %v8521_v14 = vcombine.low %v230_v2, %v238_v3  ;;  %v8536_v15 = vcombine.high %v245_v8, %v253_v9  ;;  %v365_v2 = vld [vmem:[#allocation6 + $0x7e0] sm:$0xff] }
  0xee   :  { %1853 = vmatpush1.bf16.msra.mxu0 %v8643_v10  ;;  %1894 = vmatpush1.bf16.msra.mxu1 %v8645_v11  ;;  %v246_v10 = vld [vmem:[#allocation6 + $0x428] sm:$0xff] }
  0xef   :  { %1904 = vmatprep.subr.bf16.mxu0 %v8408_v13  ;;  %1945 = vmatprep.subr.bf16.mxu1 %v8410_v17  ;;  %v254_v11 = vld [vmem:[#allocation6 + $0x468] sm:$0xff]  ;;  %v8519_v13 = vcombine.low %v229_v0, %v237_v1  ;;  %v269_v17 = vld [vmem:[#allocation6 + $0x4e0] sm:$0xff] }
  0xf0   :  { %v8538_v18 = vcombine.high %v246_v10, %v254_v11  ;;  %v8552_v53 = vcombine.high %v261_v16, %v269_v17  ;;  %v357_v1 = vld [vmem:[#allocation6 + $0x7a0] sm:$0xff] }
  0xf1   :  { %1855 = vmatmul.mubr.bf16.vlgmr.msra.gmra.mrb[4].mxu0 %v11288_v12  ;;  %1896 = vmatmul.mubr.bf16.vlgmr.msra.gmra.mrb[4].mxu1 %v11288_v12 }
  0xf2   :  { %1905 = vmatpush1.bf16.msra.mxu0 %v8407_v19  ;;  %1946 = vmatpush1.bf16.msra.mxu1 %v8409_v20  ;;  %v262_v19 = vld [vmem:[#allocation6 + $0x4a8] sm:$0xff] }
  0xf3   :  { %1906 = vmatprep.subr.bf16.mxu0 %v8424_v21  ;;  %1947 = vmatprep.subr.bf16.mxu1 %v8426_v22  ;;  %v270_v20 = vld [vmem:[#allocation6 + $0x4e8] sm:$0xff]  ;;  %v8535_v21 = vcombine.low %v245_v8, %v253_v9  ;;  %v8537_v22 = vcombine.low %v246_v10, %v254_v11  ;;  %v8648_v8 = vcombine.high %v357_v1, %v365_v2  ;;  %v119_v9 = vld [vmem:[#allocation6 + $0x30] sm:$0xff] }
  0xf4   :  { %1936 = vmatprep.mubr.bf16.mxu0 %v11282_v57  ;;  %1977 = vmatprep.mubr.bf16.mxu1 %v11282_v57  ;;  %v8554_v25 = vcombine.high %v262_v19, %v270_v20  ;;  %v8553_v29 = vcombine.low %v262_v19, %v270_v20  ;;  %v127_v10 = vld [vmem:[#allocation6 + $0x70] sm:$0xff] }
  0xf5   :  { %v143_v19 = vld [vmem:[#allocation6 + $0xf0] sm:$0xff] }
  0xf6   :  { %1907 = vmatpush1.bf16.msra.mxu0 %v8423_v26  ;;  %1948 = vmatpush1.bf16.msra.mxu1 %v8425_v27  ;;  %v278_v26 = vld [vmem:[#allocation6 + $0x528] sm:$0xff] }
  0xf7   :  { %1908 = vmatprep.subr.bf16.mxu0 %v8440_v28  ;;  %1949 = vmatprep.subr.bf16.mxu1 %v8442_v31  ;;  %v286_v27 = vld [vmem:[#allocation6 + $0x568] sm:$0xff]  ;;  %v8551_v28 = vcombine.low %v261_v16, %v269_v17  ;;  %v293_v31 = vld [vmem:[#allocation6 + $0x5a0] sm:$0xff]  ;;  %v8412_v17 = vcombine.high %v119_v9, %v127_v10 }
  0xf8   :  { %v8570_v33 = vcombine.high %v278_v26, %v286_v27  ;;  %v8569_v37 = vcombine.low %v278_v26, %v286_v27  ;;  %v8584_v38 = vcombine.high %v293_v31, %v301_v32  ;;  %v151_v26 = vld [vmem:[#allocation6 + $0x130] sm:$0xff] }
  0xf9   :  { %v159_v27 = vld [vmem:[#allocation6 + $0x170] sm:$0xff] }
  0xfa   :  { %1909 = vmatpush1.bf16.msra.mxu0 %v8439_v34  ;;  %1950 = vmatpush1.bf16.msra.mxu1 %v8441_v35  ;;  %v294_v34 = vld [vmem:[#allocation6 + $0x5a8] sm:$0xff] }
  0xfb   :  { %1910 = vmatprep.subr.bf16.mxu0 %v8456_v36  ;;  %1951 = vmatprep.subr.bf16.mxu1 %v8458_v39  ;;  %v302_v35 = vld [vmem:[#allocation6 + $0x5e8] sm:$0xff]  ;;  %v8567_v36 = vcombine.low %v277_v23, %v285_v24  ;;  %v309_v39 = vld [vmem:[#allocation6 + $0x620] sm:$0xff] }
  0xfc   :  { %v8586_v41 = vcombine.high %v294_v34, %v302_v35  ;;  %v8585_v45 = vcombine.low %v294_v34, %v302_v35  ;;  %v8600_v46 = vcombine.high %v309_v39, %v317_v40  ;;  %v175_v35 = vld [vmem:[#allocation6 + $0x1f0] sm:$0xff] }
  0xfe   :  { %1911 = vmatpush1.bf16.msra.mxu0 %v8455_v42  ;;  %1952 = vmatpush1.bf16.msra.mxu1 %v8457_v43  ;;  %v310_v42 = vld [vmem:[#allocation6 + $0x628] sm:$0xff] }
  0xff   :  { %1912 = vmatprep.subr.bf16.mxu0 %v8472_v44  ;;  %1953 = vmatprep.subr.bf16.mxu1 %v8474_v47  ;;  %v318_v43 = vld [vmem:[#allocation6 + $0x668] sm:$0xff]  ;;  %v8583_v44 = vcombine.low %v293_v31, %v301_v32  ;;  %v325_v47 = vld [vmem:[#allocation6 + $0x6a0] sm:$0xff]  ;;  %v167_v31 = vld [vmem:[#allocation6 + $0x1b0] sm:$0xff] }
 0x100   :  { %v8602_v49 = vcombine.high %v310_v42, %v318_v43  ;;  %v8601_v54 = vcombine.low %v310_v42, %v318_v43  ;;  %v8616_v55 = vcombine.high %v325_v47, %v333_v48  ;;  %v191_v42 = vld [vmem:[#allocation6 + $0x270] sm:$0xff]  ;;  %v184_v43 = vld [vmem:[#allocation6 + $0x238] sm:$0xff] }
 0x102   :  { %1913 = vmatpush1.bf16.msra.mxu0 %v8471_v50  ;;  %1954 = vmatpush1.bf16.msra.mxu1 %v8473_v51  ;;  %v326_v50 = vld [vmem:[#allocation6 + $0x6a8] sm:$0xff] }
 0x103   :  { %1914 = vmatprep.subr.bf16.mxu0 %v8488_v52  ;;  %1955 = vmatprep.subr.bf16.mxu1 %v8490_v56  ;;  %v334_v51 = vld [vmem:[#allocation6 + $0x6e8] sm:$0xff]  ;;  %v8599_v52 = vcombine.low %v309_v39, %v317_v40  ;;  %v341_v56 = vld [vmem:[#allocation6 + $0x720] sm:$0xff]  ;;  %v183_v39 = vld [vmem:[#allocation6 + $0x230] sm:$0xff] }
 0x104   :  { %v8618_v59 = vcombine.high %v326_v50, %v334_v51  ;;  %v8632_v0 = vcombine.high %v341_v56, %v349_v58 }
 0x106   :  { %1915 = vmatpush1.bf16.msra.mxu0 %v8487_v60  ;;  %1956 = vmatpush1.bf16.msra.mxu1 %v8489_v61  ;;  %v342_v60 = vld [vmem:[#allocation6 + $0x728] sm:$0xff] }
 0x107   :  { %1916 = vmatprep.subr.bf16.mxu0 %v8504_v62  ;;  %1957 = vmatprep.subr.bf16.mxu1 %v8506_v63  ;;  %v350_v61 = vld [vmem:[#allocation6 + $0x768] sm:$0xff]  ;;  %v8615_v62 = vcombine.low %v325_v47, %v333_v48  ;;  %v8617_v63 = vcombine.low %v326_v50, %v334_v51  ;;  %v199_v47 = vld [vmem:[#allocation6 + $0x2b0] sm:$0xff]  ;;  %v200_v50 = vld [vmem:[#allocation6 + $0x2b8] sm:$0xff] }
 0x108   :  { %v8634_v3 = vcombine.high %v342_v60, %v350_v61 }
 0x10a   :  { %1917 = vmatpush1.bf16.msra.mxu0 %v8503_v4  ;;  %1958 = vmatpush1.bf16.msra.mxu1 %v8505_v5  ;;  %v358_v4 = vld [vmem:[#allocation6 + $0x7a8] sm:$0xff] }
 0x10b   :  { %1918 = vmatprep.subr.bf16.mxu0 %v8520_v6  ;;  %1959 = vmatprep.subr.bf16.mxu1 %v8522_v7  ;;  %v366_v5 = vld [vmem:[#allocation6 + $0x7e8] sm:$0xff]  ;;  %v8631_v6 = vcombine.low %v341_v56, %v349_v58  ;;  %v8633_v7 = vcombine.low %v342_v60, %v350_v61  ;;  %v216_v60 = vld [vmem:[#allocation6 + $0x338] sm:$0xff] }
 0x10c   :  { %v8650_v11 = vcombine.high %v358_v4, %v366_v5  ;;  %v8649_v16 = vcombine.low %v358_v4, %v366_v5  ;;  %v239_v4 = vld [vmem:[#allocation6 + $0x3f0] sm:$0xff]  ;;  %v232_v5 = vld [vmem:[#allocation6 + $0x3b8] sm:$0xff] }
 0x10e   :  { %1919 = vmatpush1.bf16.msra.mxu0 %v8519_v13  ;;  %1960 = vmatpush1.bf16.msra.mxu1 %v8521_v14  ;;  %v120_v13 = vld [vmem:[#allocation6 + $0x38] sm:$0xff] }
 0x10f   :  { %1920 = vmatprep.subr.bf16.mxu0 %v8536_v15  ;;  %1961 = vmatprep.subr.bf16.mxu1 %v8538_v18  ;;  %v128_v14 = vld [vmem:[#allocation6 + $0x78] sm:$0xff]  ;;  %v8647_v15 = vcombine.low %v357_v1, %v365_v2  ;;  %v135_v18 = vld [vmem:[#allocation6 + $0xb0] sm:$0xff] }
 0x110   :  { %v8414_v20 = vcombine.high %v120_v13, %v128_v14  ;;  %v8413_v23 = vcombine.low %v120_v13, %v128_v14  ;;  %v8428_v24 = vcombine.high %v135_v18, %v143_v19  ;;  %v248_v14 = vld [vmem:[#allocation6 + $0x438] sm:$0xff] }
 0x112   :  { %1921 = vmatpush1.bf16.msra.mxu0 %v8535_v21  ;;  %1962 = vmatpush1.bf16.msra.mxu1 %v8537_v22  ;;  %v136_v21 = vld [vmem:[#allocation6 + $0xb8] sm:$0xff] }
 0x113   :  { %1922 = vmatprep.subr.bf16.mxu0 %v8552_v53  ;;  %1963 = vmatprep.subr.bf16.mxu1 %v8554_v25  ;;  %v144_v22 = vld [vmem:[#allocation6 + $0xf8] sm:$0xff]  ;;  %v8411_v53 = vcombine.low %v119_v9, %v127_v10  ;;  %v255_v9 = vld [vmem:[#allocation6 + $0x470] sm:$0xff] }
 0x114   :  { %v8430_v25 = vcombine.high %v136_v21, %v144_v22  ;;  %v8429_v32 = vcombine.low %v136_v21, %v144_v22  ;;  %v264_v21 = vld [vmem:[#allocation6 + $0x4b8] sm:$0xff] }
 0x116   :  { %1923 = vmatpush1.bf16.msra.mxu0 %v8551_v28  ;;  %1964 = vmatpush1.bf16.msra.mxu1 %v8553_v29  ;;  %v152_v28 = vld [vmem:[#allocation6 + $0x138] sm:$0xff] }
 0x117   :  { %1924 = vmatprep.subr.bf16.mxu0 %v8568_v30  ;;  %1965 = vmatprep.subr.bf16.mxu1 %v8570_v33  ;;  %v160_v29 = vld [vmem:[#allocation6 + $0x178] sm:$0xff]  ;;  %v8427_v30 = vcombine.low %v135_v18, %v143_v19  ;;  %v8444_v33 = vcombine.high %v151_v26, %v159_v27 }
 0x118   :  { %v8446_v34 = vcombine.high %v152_v28, %v160_v29  ;;  %v8445_v40 = vcombine.low %v152_v28, %v160_v29  ;;  %v280_v28 = vld [vmem:[#allocation6 + $0x538] sm:$0xff] }
 0x11a   :  { %1925 = vmatpush1.bf16.msra.mxu0 %v8567_v36  ;;  %1966 = vmatpush1.bf16.msra.mxu1 %v8569_v37  ;;  %v168_v36 = vld [vmem:[#allocation6 + $0x1b8] sm:$0xff] }
 0x11b   :  { %1926 = vmatprep.subr.bf16.mxu0 %v8584_v38  ;;  %1967 = vmatprep.subr.bf16.mxu1 %v8586_v41  ;;  %v176_v37 = vld [vmem:[#allocation6 + $0x1f8] sm:$0xff]  ;;  %v8443_v38 = vcombine.low %v151_v26, %v159_v27  ;;  %v8460_v41 = vcombine.high %v167_v31, %v175_v35  ;;  %v287_v27 = vld [vmem:[#allocation6 + $0x570] sm:$0xff] }
 0x11c   :  { %v8461_v48 = vcombine.low %v168_v36, %v176_v37 }
 0x11e   :  { %1927 = vmatpush1.bf16.msra.mxu0 %v8583_v44  ;;  %1968 = vmatpush1.bf16.msra.mxu1 %v8585_v45  ;;  %v8462_v44 = vcombine.high %v168_v36, %v176_v37  ;;  %v192_v45 = vld [vmem:[#allocation6 + $0x278] sm:$0xff] }
 0x11f   :  { %1928 = vmatprep.subr.bf16.mxu0 %v8600_v46  ;;  %1969 = vmatprep.subr.bf16.mxu1 %v8602_v49  ;;  %v8459_v46 = vcombine.low %v167_v31, %v175_v35  ;;  %v8476_v49 = vcombine.high %v183_v39, %v191_v42  ;;  %v8478_v51 = vcombine.high %v184_v43, %v192_v45  ;;  %v303_v35 = vld [vmem:[#allocation6 + $0x5f0] sm:$0xff]  ;;  %v296_v36 = vld [vmem:[#allocation6 + $0x5b8] sm:$0xff] }
 0x120   :  { %v8477_v56 = vcombine.low %v184_v43, %v192_v45  ;;  %v319_v43 = vld [vmem:[#allocation6 + $0x670] sm:$0xff] }
 0x122   :  { %1929 = vmatpush1.bf16.msra.mxu0 %v8599_v52  ;;  %1970 = vmatpush1.bf16.msra.mxu1 %v8601_v54  ;;  %v208_v52 = vld [vmem:[#allocation6 + $0x2f8] sm:$0xff]  ;;  %v8475_v54 = vcombine.low %v183_v39, %v191_v42 }
 0x123   :  { %1930 = vmatprep.subr.bf16.mxu0 %v8616_v55  ;;  %1971 = vmatprep.subr.bf16.mxu1 %v8618_v59  ;;  %v215_v55 = vld [vmem:[#allocation6 + $0x330] sm:$0xff]  ;;  %v8494_v61 = vcombine.high %v200_v50, %v208_v52 }
 0x124   :  { %v223_v59 = vld [vmem:[#allocation6 + $0x370] sm:$0xff] }
 0x125   :  { %v8508_v1 = vcombine.high %v215_v55, %v223_v59 }
 0x126   :  { %1931 = vmatpush1.bf16.msra.mxu0 %v8615_v62  ;;  %1972 = vmatpush1.bf16.msra.mxu1 %v8617_v63  ;;  %v224_v62 = vld [vmem:[#allocation6 + $0x378] sm:$0xff] }
 0x127   :  { %1932 = vmatprep.subr.bf16.mxu0 %v8632_v0  ;;  %1973 = vmatprep.subr.bf16.mxu1 %v8634_v3  ;;  %v8493_v0 = vcombine.low %v200_v50, %v208_v52  ;;  %v8510_v2 = vcombine.high %v216_v60, %v224_v62  ;;  %v231_v3 = vld [vmem:[#allocation6 + $0x3b0] sm:$0xff]  ;;  %v8509_v10 = vcombine.low %v216_v60, %v224_v62 }
 0x128   :  { %v335_v50 = vld [vmem:[#allocation6 + $0x6f0] sm:$0xff] }
 0x129   :  { %v351_v60 = vld [vmem:[#allocation6 + $0x770] sm:$0xff] }
 0x12a   :  { %1933 = vmatpush1.bf16.msra.mxu0 %v8631_v6  ;;  %1974 = vmatpush1.bf16.msra.mxu1 %v8633_v7  ;;  %v240_v6 = vld [vmem:[#allocation6 + $0x3f8] sm:$0xff]  ;;  %v8507_v7 = vcombine.low %v215_v55, %v223_v59 }
 0x12b   :  { %1934 = vmatprep.subr.bf16.mxu0 %v8648_v8  ;;  %1975 = vmatprep.subr.bf16.mxu1 %v8650_v11  ;;  %v247_v8 = vld [vmem:[#allocation6 + $0x430] sm:$0xff]  ;;  %v8524_v11 = vcombine.high %v231_v3, %v239_v4  ;;  %v8526_v13 = vcombine.high %v232_v5, %v240_v6  ;;  %v8525_v18 = vcombine.low %v232_v5, %v240_v6  ;;  %v360_v5 = vld [vmem:[#allocation6 + $0x7b8] sm:$0xff] }
 0x12c   :  { %v8540_v19 = vcombine.high %v247_v8, %v255_v9 }
 0x12e   :  { %1935 = vmatpush1.bf16.msra.mxu0 %v8647_v15  ;;  %1976 = vmatpush1.bf16.msra.mxu1 %v8649_v16  ;;  %v256_v15 = vld [vmem:[#allocation6 + $0x478] sm:$0xff]  ;;  %v8523_v16 = vcombine.low %v231_v3, %v239_v4  ;;  %v367_v4 = vld [vmem:[#allocation6 + $0x7f0] sm:$0xff] }
 0x12f   :  { %1986 = vmatprep.subr.bf16.mxu0 %v8412_v17  ;;  %2027 = vmatprep.subr.bf16.mxu1 %v8414_v20  ;;  %v263_v17 = vld [vmem:[#allocation6 + $0x4b0] sm:$0xff]  ;;  %v8542_v22 = vcombine.high %v248_v14, %v256_v15 }
 0x130   :  { %v271_v20 = vld [vmem:[#allocation6 + $0x4f0] sm:$0xff] }
 0x131   :  { %1937 = vmatmul.mubr.bf16.vlgmr.msra.gmra.mrb[8].mxu0 %v11288_v12  ;;  %1978 = vmatmul.mubr.bf16.vlgmr.msra.gmra.mrb[8].mxu1 %v11288_v12  ;;  %v8556_v26 = vcombine.high %v263_v17, %v271_v20  ;;  %v8555_v31 = vcombine.low %v263_v17, %v271_v20  ;;  %v9755_v17 = vld [vmem:[#allocation9] ss:$16 sps:$4 sm:$0xff]   ;;  %v9759_v20 = vld [vmem:[#allocation9 + $0x2c] ss:$16 sps:$4 sm:$0xff]  }
 0x132   :  { %1987 = vmatpush1.bf16.msra.mxu0 %v8411_v53  ;;  %2028 = vmatpush1.bf16.msra.mxu1 %v8413_v23  ;;  %v272_v53 = vld [vmem:[#allocation6 + $0x4f8] sm:$0xff]  ;;  %v8539_v23 = vcombine.low %v247_v8, %v255_v9 }
 0x133   :  { %1988 = vmatprep.subr.bf16.mxu0 %v8428_v24  ;;  %2029 = vmatprep.subr.bf16.mxu1 %v8430_v25  ;;  %v279_v24 = vld [vmem:[#allocation6 + $0x530] sm:$0xff]  ;;  %v8541_v25 = vcombine.low %v248_v14, %v256_v15  ;;  %v8558_v29 = vcombine.high %v264_v21, %v272_v53 }
 0x134   :  { %2018 = vmatprep.mubr.bf16.mxu0 %v11282_v57  ;;  %2059 = vmatprep.mubr.bf16.mxu1 %v11282_v57  ;;  %v207_v57 = vld [vmem:[#allocation6 + $0x2f0] sm:$0xff]  ;;  %v8571_v39 = vcombine.low %v279_v24, %v287_v27 }
 0x135   :  { %v8492_v58 = vcombine.high %v199_v47, %v207_v57  ;;  %v8491_v63 = vcombine.low %v199_v47, %v207_v57  ;;  %v9751_v15 = vld [vmem:[#allocation9 + $0x4] ss:$16 sps:$4 sm:$0xff]  }
 0x136   :  { %1989 = vmatpush1.bf16.msra.mxu0 %v8427_v30  ;;  %2030 = vmatpush1.bf16.msra.mxu1 %v8429_v32  ;;  %v288_v30 = vld [vmem:[#allocation6 + $0x578] sm:$0xff]  ;;  %v295_v32 = vld [vmem:[#allocation6 + $0x5b0] sm:$0xff] }
 0x137   :  { %1990 = vmatprep.subr.bf16.mxu0 %v8444_v33  ;;  %2031 = vmatprep.subr.bf16.mxu1 %v8446_v34  ;;  %v8557_v33 = vcombine.low %v264_v21, %v272_v53  ;;  %v8572_v34 = vcombine.high %v279_v24, %v287_v27  ;;  %v8574_v37 = vcombine.high %v280_v28, %v288_v30  ;;  %v11147_v21 = vmov 0   ;;  %v9761_v53 = vld [vmem:[#allocation9 + $0x20] ss:$16 sps:$4 sm:$0xff]   ;;  %v9763_v24 = vld [vmem:[#allocation9 + $0x44] ss:$16 sps:$4 sm:$0xff]  }
 0x138   :  { %v8588_v42 = vcombine.high %v295_v32, %v303_v35  ;;  %v8587_v47 = vcombine.low %v295_v32, %v303_v35  ;;  %v9768_v27 = vld [vmem:[#allocation9 + $0x48] ss:$16 sps:$4 sm:$0xff]   ;;  %v9777_v32 = vld [vmem:[#allocation9 + $0x8c] ss:$16 sps:$4 sm:$0xff]   ;;  %v9781_v35 = vld [vmem:[#allocation9 + $0xa4] ss:$16 sps:$4 sm:$0xff]  }
 0x13a   :  { %1991 = vmatpush1.bf16.msra.mxu0 %v8443_v38  ;;  %2032 = vmatpush1.bf16.msra.mxu1 %v8445_v40  ;;  %v304_v38 = vld [vmem:[#allocation6 + $0x5f8] sm:$0xff]  ;;  %v311_v40 = vld [vmem:[#allocation6 + $0x630] sm:$0xff] }
 0x13b   :  { %1992 = vmatprep.subr.bf16.mxu0 %v8460_v41  ;;  %2033 = vmatprep.subr.bf16.mxu1 %v8462_v44  ;;  %v8573_v41 = vcombine.low %v280_v28, %v288_v30  ;;  %v312_v44 = vld [vmem:[#allocation6 + $0x638] sm:$0xff]  ;;  %v8590_v45 = vcombine.high %v296_v36, %v304_v38  ;;  %v8604_v57 = vcombine.high %v311_v40, %v319_v43  ;;  %v9769_v28 = vld [vmem:[#allocation9 + $0x64] ss:$16 sps:$4 sm:$0xff]  }
 0x13c   :  { %v8603_v55 = vcombine.low %v311_v40, %v319_v43  ;;  %v9774_v30 = vld [vmem:[#allocation9 + $0x68] ss:$16 sps:$4 sm:$0xff]   ;;  %v9787_v40 = vld [vmem:[#allocation9 + $0xc4] ss:$16 sps:$4 sm:$0xff]  }
 0x13e   :  { %1993 = vmatpush1.bf16.msra.mxu0 %v8459_v46  ;;  %2034 = vmatpush1.bf16.msra.mxu1 %v8461_v48  ;;  %v320_v46 = vld [vmem:[#allocation6 + $0x678] sm:$0xff]  ;;  %v327_v48 = vld [vmem:[#allocation6 + $0x6b0] sm:$0xff] }
 0x13f   :  { %1994 = vmatprep.subr.bf16.mxu0 %v8476_v49  ;;  %2035 = vmatprep.subr.bf16.mxu1 %v8478_v51  ;;  %v8589_v49 = vcombine.low %v296_v36, %v304_v38  ;;  %v328_v51 = vld [vmem:[#allocation6 + $0x6b8] sm:$0xff]  ;;  %v8606_v52 = vcombine.high %v312_v44, %v320_v46  ;;  %v8620_v59 = vcombine.high %v327_v48, %v335_v50  ;;  %v373_v38 = vlaneseq }
 0x140   :  { %v9783_v36 = vld [vmem:[#allocation9 + $0xac] ss:$16 sps:$4 sm:$0xff]  }
 0x141   :  { %v11312_v43 = vshrl.u32 %v373_v38, 7  ;;  %v9852_v38 = vld [vmem:[#allocation9 + $0x208] ss:$16 sps:$4 sm:$0xff]  }
 0x142   :  { %1995 = vmatpush1.bf16.msra.mxu0 %v8475_v54  ;;  %2036 = vmatpush1.bf16.msra.mxu1 %v8477_v56  ;;  %v336_v54 = vld [vmem:[#allocation6 + $0x6f8] sm:$0xff]  ;;  %v343_v56 = vld [vmem:[#allocation6 + $0x730] sm:$0xff] }
 0x143   :  { %1996 = vmatprep.subr.bf16.mxu0 %v8492_v58  ;;  %2037 = vmatprep.subr.bf16.mxu1 %v8494_v61  ;;  %v8605_v58 = vcombine.low %v312_v44, %v320_v46  ;;  %v344_v61 = vld [vmem:[#allocation6 + $0x738] sm:$0xff]  ;;  %v8622_v62 = vcombine.high %v328_v51, %v336_v54  ;;  %v8636_v3 = vcombine.high %v343_v56, %v351_v60 }
 0x144   :  { %v8635_v8 = vcombine.low %v343_v56, %v351_v60  ;;  %14875 = vst [vmem:[#allocation21_spill] sm:$0xff] %v11312_v43  ;;  %v11324_v56 = vsub.s32 1, %v11312_v43  ;;  %v9799_v60 = vld [vmem:[#allocation9 + $0x104] ss:$16 sps:$4 sm:$0xff]  }
 0x146   :  { %1997 = vmatpush1.bf16.msra.mxu0 %v8491_v63  ;;  %2038 = vmatpush1.bf16.msra.mxu1 %v8493_v0  ;;  %v352_v63 = vld [vmem:[#allocation6 + $0x778] sm:$0xff]  ;;  %v8619_v0 = vcombine.low %v327_v48, %v335_v50  ;;  %v9791_v48 = vld [vmem:[#allocation9 + $0xc0] ss:$16 sps:$4 sm:$0xff]   ;;  %14877 = vst [vmem:[#allocation23_spill] sm:$0xff] %v11324_v56 }
 0x147   :  { %1998 = vmatprep.subr.bf16.mxu0 %v8508_v1  ;;  %2039 = vmatprep.subr.bf16.mxu1 %v8510_v2  ;;  %v359_v1 = vld [vmem:[#allocation6 + $0x7b0] sm:$0xff]  ;;  %v8621_v2 = vcombine.low %v328_v51, %v336_v54  ;;  %v8638_v6 = vcombine.high %v344_v61, %v352_v63  ;;  %v8637_v9 = vcombine.low %v344_v61, %v352_v63  ;;  %v9795_v54 = vld [vmem:[#allocation9 + $0xec] ss:$16 sps:$4 sm:$0xff]   ;;  %v9804_v63 = vld [vmem:[#allocation9 + $0x108] ss:$16 sps:$4 sm:$0xff]  }
 0x148   :  { %v9793_v51 = vld [vmem:[#allocation9 + $0xe4] ss:$16 sps:$4 sm:$0xff]   ;;  %v9801_v61 = vld [vmem:[#allocation9 + $0x10c] ss:$16 sps:$4 sm:$0xff]  }
 0x14a   :  { %1999 = vmatpush1.bf16.msra.mxu0 %v8507_v7  ;;  %2040 = vmatpush1.bf16.msra.mxu1 %v8509_v10  ;;  %v368_v7 = vld [vmem:[#allocation6 + $0x7f8] sm:$0xff]  ;;  %v8652_v10 = vcombine.high %v359_v1, %v367_v4 }
 0x14b   :  { %2000 = vmatprep.subr.bf16.mxu0 %v8524_v11  ;;  %2041 = vmatprep.subr.bf16.mxu1 %v8526_v13  ;;  %v8654_v11 = vcombine.high %v360_v5, %v368_v7  ;;  %v8651_v13 = vcombine.low %v359_v1, %v367_v4  ;;  %v8653_v14 = vcombine.low %v360_v5, %v368_v7  ;;  %v9807_v1 = vld [vmem:[#allocation9 + $0x12c] ss:$16 sps:$4 sm:$0xff]   ;;  %v9811_v4 = vld [vmem:[#allocation9 + $0x144] ss:$16 sps:$4 sm:$0xff]   ;;  %v9816_v7 = vld [vmem:[#allocation9 + $0x148] ss:$16 sps:$4 sm:$0xff]  }
 0x14c   :  { %v9813_v5 = vld [vmem:[#allocation9 + $0x14c] ss:$16 sps:$4 sm:$0xff]  }
 0x14e   :  { %2001 = vmatpush1.bf16.msra.mxu0 %v8523_v16  ;;  %2042 = vmatpush1.bf16.msra.mxu1 %v8525_v18  ;;  %v9753_v16 = vld [vmem:[#allocation9 + $0xc] ss:$16 sps:$4 sm:$0xff]   ;;  %v9756_v18 = vld [vmem:[#allocation9 + $0x8] ss:$16 sps:$4 sm:$0xff]  }
 0x14f   :  { %2002 = vmatprep.subr.bf16.mxu0 %v8540_v19  ;;  %2043 = vmatprep.subr.bf16.mxu1 %v8542_v22  ;;  %v9757_v19 = vld [vmem:[#allocation9 + $0x24] ss:$16 sps:$4 sm:$0xff]   ;;  %v11304_v22 = vcombine.high %v11147_v21, %v11147_v21 }
 0x151   :  { %14874 = vst [vmem:[#allocation20_spill] sm:$0xff] %v11304_v22 }
 0x152   :  { %2003 = vmatpush1.bf16.msra.mxu0 %v8539_v23  ;;  %2044 = vmatpush1.bf16.msra.mxu1 %v8541_v25  ;;  %v9762_v23 = vld [vmem:[#allocation9 + $0x28] ss:$16 sps:$4 sm:$0xff]   ;;  %v9765_v25 = vld [vmem:[#allocation9 + $0x4c] ss:$16 sps:$4 sm:$0xff]  }
 0x153   :  { %2004 = vmatprep.subr.bf16.mxu0 %v8556_v26  ;;  %2045 = vmatprep.subr.bf16.mxu1 %v8558_v29  ;;  %v9767_v26 = vld [vmem:[#allocation9 + $0x40] ss:$16 sps:$4 sm:$0xff]   ;;  %v9771_v29 = vld [vmem:[#allocation9 + $0x6c] ss:$16 sps:$4 sm:$0xff]  }
 0x156   :  { %2005 = vmatpush1.bf16.msra.mxu0 %v8555_v31  ;;  %2046 = vmatpush1.bf16.msra.mxu1 %v8557_v33  ;;  %v9775_v31 = vld [vmem:[#allocation9 + $0x84] ss:$16 sps:$4 sm:$0xff]   ;;  %v9779_v33 = vld [vmem:[#allocation9 + $0x80] ss:$16 sps:$4 sm:$0xff]  }
 0x157   :  { %2006 = vmatprep.subr.bf16.mxu0 %v8572_v34  ;;  %2047 = vmatprep.subr.bf16.mxu1 %v8574_v37  ;;  %v9780_v34 = vld [vmem:[#allocation9 + $0x88] ss:$16 sps:$4 sm:$0xff]   ;;  %v9785_v37 = vld [vmem:[#allocation9 + $0xa0] ss:$16 sps:$4 sm:$0xff]  }
 0x15a   :  { %2007 = vmatpush1.bf16.msra.mxu0 %v8571_v39  ;;  %2048 = vmatpush1.bf16.msra.mxu1 %v8573_v41  ;;  %v9786_v39 = vld [vmem:[#allocation9 + $0xa8] ss:$16 sps:$4 sm:$0xff]   ;;  %v9789_v41 = vld [vmem:[#allocation9 + $0xcc] ss:$16 sps:$4 sm:$0xff]  }
 0x15b   :  { %2008 = vmatprep.subr.bf16.mxu0 %v8588_v42  ;;  %2049 = vmatprep.subr.bf16.mxu1 %v8590_v45 }
 0x15e   :  { %2009 = vmatpush1.bf16.msra.mxu0 %v8587_v47  ;;  %2050 = vmatpush1.bf16.msra.mxu1 %v8589_v49  ;;  %v9792_v49 = vld [vmem:[#allocation9 + $0xc8] ss:$16 sps:$4 sm:$0xff]  }
 0x15f   :  { %2010 = vmatprep.subr.bf16.mxu0 %v8604_v57  ;;  %2051 = vmatprep.subr.bf16.mxu1 %v8606_v52 }
 0x162   :  { %2011 = vmatpush1.bf16.msra.mxu0 %v8603_v55  ;;  %2052 = vmatpush1.bf16.msra.mxu1 %v8605_v58  ;;  %v11321_v55 = vsub.s32 0, %v11312_v43  ;;  %v9797_v58 = vld [vmem:[#allocation9 + $0xe0] ss:$16 sps:$4 sm:$0xff]  }
 0x163   :  { %2012 = vmatprep.subr.bf16.mxu0 %v8620_v59  ;;  %2053 = vmatprep.subr.bf16.mxu1 %v8622_v62  ;;  %v9798_v59 = vld [vmem:[#allocation9 + $0xe8] ss:$16 sps:$4 sm:$0xff]   ;;  %v9803_v62 = vld [vmem:[#allocation9 + $0x100] ss:$16 sps:$4 sm:$0xff]  }
 0x164   :  { %14876 = vst [vmem:[#allocation22_spill] sm:$0xff] %v11321_v55 }
 0x166   :  { %2013 = vmatpush1.bf16.msra.mxu0 %v8619_v0  ;;  %2054 = vmatpush1.bf16.msra.mxu1 %v8621_v2  ;;  %v9805_v0 = vld [vmem:[#allocation9 + $0x124] ss:$16 sps:$4 sm:$0xff]   ;;  %v9809_v2 = vld [vmem:[#allocation9 + $0x120] ss:$16 sps:$4 sm:$0xff]  }
 0x167   :  { %2014 = vmatprep.subr.bf16.mxu0 %v8636_v3  ;;  %2055 = vmatprep.subr.bf16.mxu1 %v8638_v6  ;;  %v9810_v3 = vld [vmem:[#allocation9 + $0x128] ss:$16 sps:$4 sm:$0xff]   ;;  %v9815_v6 = vld [vmem:[#allocation9 + $0x140] ss:$16 sps:$4 sm:$0xff]  }
 0x16a   :  { %2015 = vmatpush1.bf16.msra.mxu0 %v8635_v8  ;;  %2056 = vmatpush1.bf16.msra.mxu1 %v8637_v9  ;;  %v9817_v8 = vld [vmem:[#allocation9 + $0x164] ss:$16 sps:$4 sm:$0xff]   ;;  %v9819_v9 = vld [vmem:[#allocation9 + $0x16c] ss:$16 sps:$4 sm:$0xff]  }
 0x16b   :  { %2016 = vmatprep.subr.bf16.mxu0 %v8652_v10  ;;  %2057 = vmatprep.subr.bf16.mxu1 %v8654_v11  ;;  %v9821_v10 = vld [vmem:[#allocation9 + $0x160] ss:$16 sps:$4 sm:$0xff]   ;;  %v9822_v11 = vld [vmem:[#allocation9 + $0x168] ss:$16 sps:$4 sm:$0xff]  }
 0x16e   :  { %2017 = vmatpush1.bf16.msra.mxu0 %v8651_v13  ;;  %2058 = vmatpush1.bf16.msra.mxu1 %v8653_v14  ;;  %v9823_v13 = vld [vmem:[#allocation9 + $0x184] ss:$16 sps:$4 sm:$0xff]   ;;  %v9825_v14 = vld [vmem:[#allocation9 + $0x18c] ss:$16 sps:$4 sm:$0xff]  }
 0x16f   :  { %3356 = vmatprep.subr.bf16.mxu0 %v9751_v15  ;;  %3479 = vmatprep.subr.bf16.mxu1 %v9753_v16  ;;  %v9827_v15 = vld [vmem:[#allocation9 + $0x180] ss:$16 sps:$4 sm:$0xff]   ;;  %v9828_v16 = vld [vmem:[#allocation9 + $0x188] ss:$16 sps:$4 sm:$0xff]  }
 0x171   :  { %2019 = vmatmul.mubr.bf16.vlgmr.msra.gmra.mrb[12].mxu0 %v11288_v12  ;;  %2060 = vmatmul.mubr.bf16.vlgmr.msra.gmra.mrb[12].mxu1 %v11288_v12  ;;  %v9773_v12 = vld [vmem:[#allocation9 + $0x60] ss:$16 sps:$4 sm:$0xff]  }
 0x172   :  { %3357 = vmatpush1.bf16.msra.mxu0 %v9755_v17  ;;  %3480 = vmatpush1.bf16.msra.mxu1 %v9756_v18  ;;  %v11326_v17 = vld [vmem:[#allocation8] sm:$0xff] }
 0x173   :  { %3358 = vmatprep.subr.bf16.mxu0 %v9757_v19  ;;  %3481 = vmatprep.subr.bf16.mxu1 %v9759_v20  ;;  %v9829_v18 = vld [vmem:[#allocation9 + $0x1a4] ss:$16 sps:$4 sm:$0xff]   ;;  %v9831_v19 = vld [vmem:[#allocation9 + $0x1ac] ss:$16 sps:$4 sm:$0xff]   ;;  %v9833_v20 = vld [vmem:[#allocation9 + $0x1a0] ss:$16 sps:$4 sm:$0xff]  }
 0x174   :  { %3388 = vmatprep.mubr.bf16.mxu0 %v11304_v22  ;;  %3511 = vmatprep.mubr.bf16.mxu1 %v11304_v22  ;;  %v11525_v22 = vld [vmem:[#allocation9 + $0x46c] ss:$16 sps:$4 sm:$0xff]  }
 0x175   :  { %14889 = vst [vmem:[#allocation35_spill] sm:$0xff] %v11525_v22 }
 0x176   :  { %3359 = vmatpush1.bf16.msra.mxu0 %v9761_v53  ;;  %3482 = vmatpush1.bf16.msra.mxu1 %v9762_v23  ;;  %v9834_v53 = vld [vmem:[#allocation9 + $0x1a8] ss:$16 sps:$4 sm:$0xff]   ;;  %v9835_v23 = vld [vmem:[#allocation9 + $0x1c4] ss:$16 sps:$4 sm:$0xff]  }
 0x177   :  { %3360 = vmatprep.subr.bf16.mxu0 %v9763_v24  ;;  %3483 = vmatprep.subr.bf16.mxu1 %v9765_v25  ;;  %v9837_v24 = vld [vmem:[#allocation9 + $0x1cc] ss:$16 sps:$4 sm:$0xff]   ;;  %v380_v25 = vrot.slane %v11326_v17, %v11324_v56  ;;  %v11543_v56 = vld [vmem:[#allocation9 + $0x480] ss:$16 sps:$4 sm:$0xff]  }
 0x178   :  { %14894 = vst [vmem:[#allocation40_spill] sm:$0xff] %v11543_v56 }
 0x17a   :  { %3361 = vmatpush1.bf16.msra.mxu0 %v9767_v26  ;;  %3484 = vmatpush1.bf16.msra.mxu1 %v9768_v27  ;;  %v9839_v26 = vld [vmem:[#allocation9 + $0x1c0] ss:$16 sps:$4 sm:$0xff]   ;;  %v9840_v27 = vld [vmem:[#allocation9 + $0x1c8] ss:$16 sps:$4 sm:$0xff]  }
 0x17b   :  { %3362 = vmatprep.subr.bf16.mxu0 %v9769_v28  ;;  %3485 = vmatprep.subr.bf16.mxu1 %v9771_v29  ;;  %v9841_v28 = vld [vmem:[#allocation9 + $0x1e4] ss:$16 sps:$4 sm:$0xff]   ;;  %v9843_v29 = vld [vmem:[#allocation9 + $0x1ec] ss:$16 sps:$4 sm:$0xff]  }
 0x17e   :  { %3363 = vmatpush1.bf16.msra.mxu0 %v9773_v12  ;;  %3486 = vmatpush1.bf16.msra.mxu1 %v9774_v30  ;;  %v9845_v30 = vld [vmem:[#allocation9 + $0x1e0] ss:$16 sps:$4 sm:$0xff]  }
 0x17f   :  { %3364 = vmatprep.subr.bf16.mxu0 %v9775_v31  ;;  %3487 = vmatprep.subr.bf16.mxu1 %v9777_v32  ;;  %v9846_v31 = vld [vmem:[#allocation9 + $0x1e8] ss:$16 sps:$4 sm:$0xff]   ;;  %v9847_v32 = vld [vmem:[#allocation9 + $0x204] ss:$16 sps:$4 sm:$0xff]  }
 0x182   :  { %3365 = vmatpush1.bf16.msra.mxu0 %v9779_v33  ;;  %3488 = vmatpush1.bf16.msra.mxu1 %v9780_v34  ;;  %v9849_v33 = vld [vmem:[#allocation9 + $0x20c] ss:$16 sps:$4 sm:$0xff]  }
 0x183   :  { %3366 = vmatprep.subr.bf16.mxu0 %v9781_v35  ;;  %3489 = vmatprep.subr.bf16.mxu1 %v9783_v36  ;;  %v11332_v35 = vsub.s32 3, %v11312_v43  ;;  %v9851_v36 = vld [vmem:[#allocation9 + $0x200] ss:$16 sps:$4 sm:$0xff]  }
 0x184   :  { %v11310_v42 = vpop.f32.mrb[0].mxu0  ;;  %v11314_v44 = vpop.f32.mrb[0].mxu1 }
 0x185   :  { %v11316_v45 = vpop.f32.mrb[1].mxu0  ;;  %v11318_v46 = vpop.f32.mrb[1].mxu1  ;;  %14878 = vst [vmem:[#allocation24_spill] sm:$0xff] %v11332_v35 }
 0x186   :  { %v1778_v47 = vpop.f32.mrb[2].mxu0  ;;  %3367 = vmatpush1.bf16.msra.mxu0 %v9785_v37  ;;  %v1819_v57 = vpop.f32.mrb[2].mxu1  ;;  %3490 = vmatpush1.bf16.msra.mxu1 %v9786_v39  ;;  %v1777_v12 = vadd.f32 %v11316_v45, %v380_v25  ;;  %v11336_v37 = vcombine.low %v11147_v21, %v11147_v21  ;;  %v9853_v39 = vld [vmem:[#allocation9 + $0x224] ss:$16 sps:$4 sm:$0xff]   ;;  %v9863_v21 = vld [vmem:[#allocation9 + $0x240] ss:$16 sps:$4 sm:$0xff]  }
 0x187   :  { %v1779_v50 = vpop.f32.mrb[3].mxu0  ;;  %3368 = vmatprep.subr.bf16.mxu0 %v9787_v40  ;;  %v1820_v52 = vpop.f32.mrb[3].mxu1  ;;  %3491 = vmatprep.subr.bf16.mxu1 %v9789_v41  ;;  %v9855_v40 = vld [vmem:[#allocation9 + $0x22c] ss:$16 sps:$4 sm:$0xff]   ;;  %v9857_v41 = vld [vmem:[#allocation9 + $0x220] ss:$16 sps:$4 sm:$0xff]  }
 0x188   :  { %v2071_v34 = vmax.f32 %v1777_v12, 0.0  ;;  %14879 = vst [vmem:[#allocation25_spill] sm:$0xff] %v11336_v37  ;;  %v9858_v47 = vld [vmem:[#allocation9 + $0x228] ss:$16 sps:$4 sm:$0xff]   ;;  %v9865_v50 = vld [vmem:[#allocation9 + $0x264] ss:$16 sps:$4 sm:$0xff]  }
 0x189   :  { %v9864_v57 = vld [vmem:[#allocation9 + $0x248] ss:$16 sps:$4 sm:$0xff]   ;;  %v9869_v52 = vld [vmem:[#allocation9 + $0x260] ss:$16 sps:$4 sm:$0xff]   ;;  %v11379_v25 = vld [vmem:[#allocation9 + $0x30c] ss:$16 sps:$4 sm:$0xff]  }
 0x18a   :  { %3369 = vmatpush1.bf16.msra.mxu0 %v9791_v48  ;;  %3492 = vmatpush1.bf16.msra.mxu1 %v9792_v49  ;;  %v11338_v45 = vpack.c.bf16 %v2071_v34, %v2071_v34  ;;  %v9859_v48 = vld [vmem:[#allocation9 + $0x244] ss:$16 sps:$4 sm:$0xff]   ;;  %v9861_v49 = vld [vmem:[#allocation9 + $0x24c] ss:$16 sps:$4 sm:$0xff]   ;;  %v11396_v12 = vld [vmem:[#allocation9 + $0x320] ss:$16 sps:$4 sm:$0xff]  }
 0x18b   :  { %3370 = vmatprep.subr.bf16.mxu0 %v9793_v51  ;;  %3493 = vmatprep.subr.bf16.mxu1 %v9795_v54  ;;  %v9867_v51 = vld [vmem:[#allocation9 + $0x26c] ss:$16 sps:$4 sm:$0xff]   ;;  %v9870_v54 = vld [vmem:[#allocation9 + $0x268] ss:$16 sps:$4 sm:$0xff]  }
 0x18c   :  { %v11410_v34 = vld [vmem:[#allocation9 + $0x348] ss:$16 sps:$4 sm:$0xff]  }
 0x18e   :  { %3371 = vmatpush1.bf16.msra.mxu0 %v9797_v58  ;;  %3494 = vmatpush1.bf16.msra.mxu1 %v9798_v59  ;;  %v9871_v58 = vld [vmem:[#allocation9 + $0x284] ss:$16 sps:$4 sm:$0xff]   ;;  %v9873_v59 = vld [vmem:[#allocation9 + $0x28c] ss:$16 sps:$4 sm:$0xff]  }
 0x18f   :  { %3372 = vmatprep.subr.bf16.mxu0 %v9799_v60  ;;  %3495 = vmatprep.subr.bf16.mxu1 %v9801_v61  ;;  %v9875_v60 = vld [vmem:[#allocation9 + $0x280] ss:$16 sps:$4 sm:$0xff]   ;;  %v9876_v61 = vld [vmem:[#allocation9 + $0x288] ss:$16 sps:$4 sm:$0xff]  }
 0x192   :  { %3373 = vmatpush1.bf16.msra.mxu0 %v9803_v62  ;;  %3496 = vmatpush1.bf16.msra.mxu1 %v9804_v63  ;;  %v9877_v62 = vld [vmem:[#allocation9 + $0x2a4] ss:$16 sps:$4 sm:$0xff]   ;;  %v9879_v63 = vld [vmem:[#allocation9 + $0x2ac] ss:$16 sps:$4 sm:$0xff]  }
 0x193   :  { %3374 = vmatprep.subr.bf16.mxu0 %v9805_v0  ;;  %3497 = vmatprep.subr.bf16.mxu1 %v9807_v1  ;;  %v9881_v0 = vld [vmem:[#allocation9 + $0x2a0] ss:$16 sps:$4 sm:$0xff]   ;;  %v376_v1 = vrot.slane %v11326_v17, %v11321_v55  ;;  %v11537_v55 = vld [vmem:[#allocation9 + $0x484] ss:$16 sps:$4 sm:$0xff]  }
 0x194   :  { %14892 = vst [vmem:[#allocation38_spill] sm:$0xff] %v11537_v55 }
 0x196   :  { %3375 = vmatpush1.bf16.msra.mxu0 %v9809_v2  ;;  %3498 = vmatpush1.bf16.msra.mxu1 %v9810_v3  ;;  %v388_v2 = vrot.slane %v11326_v17, %v11332_v35  ;;  %v9882_v3 = vld [vmem:[#allocation9 + $0x2a8] ss:$16 sps:$4 sm:$0xff]   ;;  %v11540_v35 = vld [vmem:[#allocation9 + $0x48c] ss:$16 sps:$4 sm:$0xff]  }
 0x197   :  { %3376 = vmatprep.subr.bf16.mxu0 %v9811_v4  ;;  %3499 = vmatprep.subr.bf16.mxu1 %v9813_v5  ;;  %v9883_v4 = vld [vmem:[#allocation9 + $0x2c4] ss:$16 sps:$4 sm:$0xff]   ;;  %v9885_v5 = vld [vmem:[#allocation9 + $0x2cc] ss:$16 sps:$4 sm:$0xff]   ;;  %14893 = vst [vmem:[#allocation39_spill] sm:$0xff] %v11540_v35 }
 0x19a   :  { %3377 = vmatpush1.bf16.msra.mxu0 %v9815_v6  ;;  %3500 = vmatpush1.bf16.msra.mxu1 %v9816_v7  ;;  %v11350_v7 = vld [vmem:[#allocation9 + $0x2c0] ss:$16 sps:$4 sm:$0xff]  }
 0x19b   :  { %3378 = vmatprep.subr.bf16.mxu0 %v9817_v8  ;;  %3501 = vmatprep.subr.bf16.mxu1 %v9819_v9  ;;  %v11353_v8 = vadd.f32 %v11310_v42, %v376_v1  ;;  %v11356_v9 = vadd.f32 %v11318_v46, %v388_v2  ;;  %v11368_v42 = vld [vmem:[#allocation9 + $0x2ec] ss:$16 sps:$4 sm:$0xff]   ;;  %v11480_v2 = vld [vmem:[#allocation9 + $0x400] ss:$16 sps:$4 sm:$0xff]  }
 0x19c   :  { %v11475_v1 = vld [vmem:[#allocation9 + $0x40c] ss:$16 sps:$4 sm:$0xff]  }
 0x19e   :  { %3379 = vmatpush1.bf16.msra.mxu0 %v9821_v10  ;;  %3502 = vmatpush1.bf16.msra.mxu1 %v9822_v11 }
 0x19f   :  { %3380 = vmatprep.subr.bf16.mxu0 %v9823_v13  ;;  %3503 = vmatprep.subr.bf16.mxu1 %v9825_v14  ;;  %v11362_v13 = vld [vmem:[#allocation9 + $0x2c8] ss:$16 sps:$4 sm:$0xff]   ;;  %v11364_v14 = vld [vmem:[#allocation9 + $0x2e4] ss:$16 sps:$4 sm:$0xff]  }
 0x1a2   :  { %3381 = vmatpush1.bf16.msra.mxu0 %v9827_v15  ;;  %3504 = vmatpush1.bf16.msra.mxu1 %v9828_v16 }
 0x1a3   :  { %3382 = vmatprep.subr.bf16.mxu0 %v9829_v18  ;;  %3505 = vmatprep.subr.bf16.mxu1 %v9831_v19  ;;  %v11370_v19 = vld [vmem:[#allocation9 + $0x2e0] ss:$16 sps:$4 sm:$0xff]  }
 0x1a6   :  { %3383 = vmatpush1.bf16.msra.mxu0 %v9833_v20  ;;  %3506 = vmatpush1.bf16.msra.mxu1 %v9834_v53  ;;  %v2070_v20 = vmax.f32 %v11353_v8, 0.0  ;;  %v2073_v53 = vmax.f32 %v11356_v9, 0.0  ;;  %v11505_v8 = vld [vmem:[#allocation9 + $0x428] ss:$16 sps:$4 sm:$0xff]   ;;  %v11517_v9 = vld [vmem:[#allocation9 + $0x440] ss:$16 sps:$4 sm:$0xff]  }
 0x1a7   :  { %3384 = vmatprep.subr.bf16.mxu0 %v9835_v23  ;;  %3507 = vmatprep.subr.bf16.mxu1 %v9837_v24  ;;  %v11374_v23 = vld [vmem:[#allocation9 + $0x2e8] ss:$16 sps:$4 sm:$0xff]   ;;  %v11376_v24 = vld [vmem:[#allocation9 + $0x304] ss:$16 sps:$4 sm:$0xff]   ;;  %14883 = vst [vmem:[#allocation29_spill] sm:$0xff] %v11505_v8  ;;  %14886 = vst [vmem:[#allocation32_spill] sm:$0xff] %v11517_v9 }
 0x1aa   :  { %3385 = vmatpush1.bf16.msra.mxu0 %v9839_v26  ;;  %3508 = vmatpush1.bf16.msra.mxu1 %v9840_v27  ;;  %v11384_v26 = vld [vmem:[#allocation9 + $0x300] ss:$16 sps:$4 sm:$0xff]   ;;  %v11386_v27 = vld [vmem:[#allocation9 + $0x308] ss:$16 sps:$4 sm:$0xff]  }
 0x1ab   :  { %3386 = vmatprep.subr.bf16.mxu0 %v9841_v28  ;;  %3509 = vmatprep.subr.bf16.mxu1 %v9843_v29  ;;  %v11388_v28 = vld [vmem:[#allocation9 + $0x324] ss:$16 sps:$4 sm:$0xff]   ;;  %v11391_v29 = vld [vmem:[#allocation9 + $0x32c] ss:$16 sps:$4 sm:$0xff]  }
 0x1ae   :  { %3387 = vmatpush1.bf16.msra.mxu0 %v9845_v30  ;;  %3510 = vmatpush1.bf16.msra.mxu1 %v9846_v31  ;;  %v11398_v30 = vld [vmem:[#allocation9 + $0x328] ss:$16 sps:$4 sm:$0xff]   ;;  %v11400_v31 = vld [vmem:[#allocation9 + $0x344] ss:$16 sps:$4 sm:$0xff]  }
 0x1af   :  { %3397 = vmatprep.subr.bf16.mxu0 %v9847_v32  ;;  %3520 = vmatprep.subr.bf16.mxu1 %v9849_v33  ;;  %v11403_v32 = vld [vmem:[#allocation9 + $0x34c] ss:$16 sps:$4 sm:$0xff]   ;;  %v11408_v33 = vld [vmem:[#allocation9 + $0x340] ss:$16 sps:$4 sm:$0xff]  }
 0x1b1   :  { %3389 = vmatmul.mubr.bf16.vlgmr.msra.gmra.mrb[16].mxu0 %v11336_v37  ;;  %3512 = vmatmul.mubr.bf16.vlgmr.msra.gmra.mrb[16].mxu1 %v11336_v37  ;;  %v11522_v37 = vld [vmem:[#allocation9 + $0x464] ss:$16 sps:$4 sm:$0xff]  }
 0x1b2   :  { %3398 = vmatpush1.bf16.msra.mxu0 %v9851_v36  ;;  %3429 = vmatprep.mubr.bf16.mxu0 %v11338_v45  ;;  %v11412_v36 = vld [vmem:[#allocation9 + $0x364] ss:$16 sps:$4 sm:$0xff]   ;;  %14888 = vst [vmem:[#allocation34_spill] sm:$0xff] %v11522_v37 }
 0x1b3   :  { %3521 = vmatpush1.bf16.msra.mxu1 %v9852_v38  ;;  %3552 = vmatprep.mubr.bf16.mxu1 %v11338_v45  ;;  %v11415_v38 = vld [vmem:[#allocation9 + $0x36c] ss:$16 sps:$4 sm:$0xff]  }
 0x1b4   :  { %3399 = vmatprep.subr.bf16.mxu0 %v9853_v39  ;;  %3522 = vmatprep.subr.bf16.mxu1 %v9855_v40  ;;  %v11420_v39 = vld [vmem:[#allocation9 + $0x360] ss:$16 sps:$4 sm:$0xff]   ;;  %v11422_v40 = vld [vmem:[#allocation9 + $0x368] ss:$16 sps:$4 sm:$0xff]  }
 0x1b6   :  { %3400 = vmatpush1.bf16.msra.mxu0 %v9857_v41  ;;  %v11424_v41 = vld [vmem:[#allocation9 + $0x384] ss:$16 sps:$4 sm:$0xff]  }
 0x1b7   :  { %3523 = vmatpush1.bf16.msra.mxu1 %v9858_v47  ;;  %3401 = vmatprep.subr.bf16.mxu0 %v9859_v48  ;;  %v11427_v47 = vld [vmem:[#allocation9 + $0x38c] ss:$16 sps:$4 sm:$0xff]   ;;  %v11432_v48 = vld [vmem:[#allocation9 + $0x380] ss:$16 sps:$4 sm:$0xff]  }
 0x1b8   :  { %3524 = vmatprep.subr.bf16.mxu1 %v9861_v49  ;;  %v11434_v49 = vld [vmem:[#allocation9 + $0x388] ss:$16 sps:$4 sm:$0xff]  }
 0x1ba   :  { %3402 = vmatpush1.bf16.msra.mxu0 %v9863_v21  ;;  %v11436_v21 = vld [vmem:[#allocation9 + $0x3a4] ss:$16 sps:$4 sm:$0xff]  }
 0x1bb   :  { %3525 = vmatpush1.bf16.msra.mxu1 %v9864_v57  ;;  %3403 = vmatprep.subr.bf16.mxu0 %v9865_v50  ;;  %v11439_v57 = vld [vmem:[#allocation9 + $0x3ac] ss:$16 sps:$4 sm:$0xff]   ;;  %v11444_v50 = vld [vmem:[#allocation9 + $0x3a0] ss:$16 sps:$4 sm:$0xff]  }
 0x1bc   :  { %3526 = vmatprep.subr.bf16.mxu1 %v9867_v51  ;;  %v11446_v51 = vld [vmem:[#allocation9 + $0x3a8] ss:$16 sps:$4 sm:$0xff]  }
 0x1be   :  { %3404 = vmatpush1.bf16.msra.mxu0 %v9869_v52  ;;  %v11448_v52 = vld [vmem:[#allocation9 + $0x3c4] ss:$16 sps:$4 sm:$0xff]  }
 0x1bf   :  { %3527 = vmatpush1.bf16.msra.mxu1 %v9870_v54  ;;  %3405 = vmatprep.subr.bf16.mxu0 %v9871_v58  ;;  %v11451_v54 = vld [vmem:[#allocation9 + $0x3cc] ss:$16 sps:$4 sm:$0xff]   ;;  %v11456_v58 = vld [vmem:[#allocation9 + $0x3c0] ss:$16 sps:$4 sm:$0xff]  }
 0x1c0   :  { %3528 = vmatprep.subr.bf16.mxu1 %v9873_v59  ;;  %v11458_v59 = vld [vmem:[#allocation9 + $0x3c8] ss:$16 sps:$4 sm:$0xff]  }
 0x1c2   :  { %3406 = vmatpush1.bf16.msra.mxu0 %v9875_v60  ;;  %v11460_v60 = vld [vmem:[#allocation9 + $0x3e4] ss:$16 sps:$4 sm:$0xff]  }
 0x1c3   :  { %3529 = vmatpush1.bf16.msra.mxu1 %v9876_v61  ;;  %3407 = vmatprep.subr.bf16.mxu0 %v9877_v62  ;;  %v11463_v61 = vld [vmem:[#allocation9 + $0x3ec] ss:$16 sps:$4 sm:$0xff]   ;;  %v11468_v62 = vld [vmem:[#allocation9 + $0x3e0] ss:$16 sps:$4 sm:$0xff]  }
 0x1c4   :  { %v11348_v6 = vpop.f32.mrb[4].mxu0  ;;  %3530 = vmatprep.subr.bf16.mxu1 %v9879_v63  ;;  %v11358_v10 = vpop.f32.mrb[4].mxu1  ;;  %v11470_v63 = vld [vmem:[#allocation9 + $0x3e8] ss:$16 sps:$4 sm:$0xff]  }
 0x1c5   :  { %14880 = vst [vmem:[#allocation26_spill] sm:$0xff] %v11348_v6  ;;  %14881 = vst [vmem:[#allocation27_spill] sm:$0xff] %v11358_v10  ;;  %v11360_v11 = vpop.f32.mrb[5].mxu0  ;;  %v11366_v15 = vpop.f32.mrb[5].mxu1  ;;  %v11530_v10 = vld [vmem:[#allocation9 + $0x460] ss:$16 sps:$4 sm:$0xff]  }
 0x1c6   :  { %14882 = vst [vmem:[#allocation28_spill] sm:$0xff] %v11366_v15  ;;  %v1860_v16 = vpop.f32.mrb[6].mxu0  ;;  %3408 = vmatpush1.bf16.msra.mxu0 %v9881_v0  ;;  %v1901_v17 = vpop.f32.mrb[6].mxu1  ;;  %v11472_v0 = vld [vmem:[#allocation9 + $0x404] ss:$16 sps:$4 sm:$0xff]   ;;  %14890 = vst [vmem:[#allocation36_spill] sm:$0xff] %v11530_v10 }
 0x1c7   :  { %3531 = vmatpush1.bf16.msra.mxu1 %v9882_v3  ;;  %v1861_v18 = vpop.f32.mrb[7].mxu0  ;;  %3409 = vmatprep.subr.bf16.mxu0 %v9883_v4  ;;  %v1902_v46 = vpop.f32.mrb[7].mxu1  ;;  %v11482_v3 = vld [vmem:[#allocation9 + $0x408] ss:$16 sps:$4 sm:$0xff]   ;;  %v11485_v4 = vld [vmem:[#allocation9 + $0x424] ss:$16 sps:$4 sm:$0xff]  }
 0x1c8   :  { %3532 = vmatprep.subr.bf16.mxu1 %v9885_v5  ;;  %v11490_v5 = vpack.c.bf16 %v2070_v20, %v2070_v20  ;;  %v11494_v16 = vld [vmem:[#allocation9 + $0x42c] ss:$16 sps:$4 sm:$0xff]   ;;  %v11497_v17 = vld [vmem:[#allocation9 + $0x420] ss:$16 sps:$4 sm:$0xff]   ;;  %v11502_v18 = vpack.c.bf16 %v2073_v53, %v2073_v53  ;;  %v11507_v46 = vld [vmem:[#allocation9 + $0x444] ss:$16 sps:$4 sm:$0xff]  }
 0x1c9   :  { %14884 = vst [vmem:[#allocation30_spill] sm:$0xff] %v11507_v46  ;;  %v11511_v20 = vld [vmem:[#allocation9 + $0x44c] ss:$16 sps:$4 sm:$0xff]   ;;  %v11520_v53 = vld [vmem:[#allocation9 + $0x448] ss:$16 sps:$4 sm:$0xff]  }
 0x1ca   :  { %3410 = vmatpush1.bf16.msra.mxu0 %v11350_v7  ;;  %14885 = vst [vmem:[#allocation31_spill] sm:$0xff] %v11511_v20  ;;  %14887 = vst [vmem:[#allocation33_spill] sm:$0xff] %v11520_v53  ;;  %v11532_v15 = vld [vmem:[#allocation9 + $0x468] ss:$16 sps:$4 sm:$0xff]  }
 0x1cb   :  { %3533 = vmatpush1.bf16.msra.mxu1 %v11362_v13  ;;  %3411 = vmatprep.subr.bf16.mxu0 %v11364_v14  ;;  %14891 = vst [vmem:[#allocation37_spill] sm:$0xff] %v11532_v15  ;;  %v11547_v6 = vld [vmem:[#allocation9 + $0x488] ss:$16 sps:$4 sm:$0xff]  }
 0x1cc   :  { %3534 = vmatprep.subr.bf16.mxu1 %v11368_v42  ;;  %14895 = vst [vmem:[#allocation41_spill] sm:$0xff] %v11547_v6 }
 0x1ce   :  { %3412 = vmatpush1.bf16.msra.mxu0 %v11370_v19 }
 0x1cf   :  { %3535 = vmatpush1.bf16.msra.mxu1 %v11374_v23  ;;  %3413 = vmatprep.subr.bf16.mxu0 %v11376_v24 }
 0x1d0   :  { %3536 = vmatprep.subr.bf16.mxu1 %v11379_v25 }
 0x1d2   :  { %3414 = vmatpush1.bf16.msra.mxu0 %v11384_v26 }
 0x1d3   :  { %3537 = vmatpush1.bf16.msra.mxu1 %v11386_v27  ;;  %3415 = vmatprep.subr.bf16.mxu0 %v11388_v28 }
 0x1d4   :  { %3538 = vmatprep.subr.bf16.mxu1 %v11391_v29 }
 0x1d6   :  { %3416 = vmatpush1.bf16.msra.mxu0 %v11396_v12 }
 0x1d7   :  { %3539 = vmatpush1.bf16.msra.mxu1 %v11398_v30  ;;  %3417 = vmatprep.subr.bf16.mxu0 %v11400_v31 }
 0x1d8   :  { %3540 = vmatprep.subr.bf16.mxu1 %v11403_v32 }
 0x1da   :  { %3418 = vmatpush1.bf16.msra.mxu0 %v11408_v33 }
 0x1db   :  { %3541 = vmatpush1.bf16.msra.mxu1 %v11410_v34  ;;  %3419 = vmatprep.subr.bf16.mxu0 %v11412_v36 }
 0x1dc   :  { %3542 = vmatprep.subr.bf16.mxu1 %v11415_v38 }
 0x1de   :  { %3420 = vmatpush1.bf16.msra.mxu0 %v11420_v39 }
 0x1df   :  { %3543 = vmatpush1.bf16.msra.mxu1 %v11422_v40  ;;  %3421 = vmatprep.subr.bf16.mxu0 %v11424_v41 }
 0x1e0   :  { %3544 = vmatprep.subr.bf16.mxu1 %v11427_v47 }
 0x1e2   :  { %3422 = vmatpush1.bf16.msra.mxu0 %v11432_v48 }
 0x1e3   :  { %3545 = vmatpush1.bf16.msra.mxu1 %v11434_v49  ;;  %3423 = vmatprep.subr.bf16.mxu0 %v11436_v21 }
 0x1e4   :  { %3546 = vmatprep.subr.bf16.mxu1 %v11439_v57 }
 0x1e6   :  { %3424 = vmatpush1.bf16.msra.mxu0 %v11444_v50 }
 0x1e7   :  { %3547 = vmatpush1.bf16.msra.mxu1 %v11446_v51  ;;  %3425 = vmatprep.subr.bf16.mxu0 %v11448_v52 }
 0x1e8   :  { %3548 = vmatprep.subr.bf16.mxu1 %v11451_v54 }
 0x1ea   :  { %3426 = vmatpush1.bf16.msra.mxu0 %v11456_v58 }
 0x1eb   :  { %3549 = vmatpush1.bf16.msra.mxu1 %v11458_v59  ;;  %3427 = vmatprep.subr.bf16.mxu0 %v11460_v60 }
 0x1ec   :  { %3550 = vmatprep.subr.bf16.mxu1 %v11463_v61 }
 0x1ee   :  { %3428 = vmatpush1.bf16.msra.mxu0 %v11468_v62 }
 0x1ef   :  { %3551 = vmatpush1.bf16.msra.mxu1 %v11470_v63  ;;  %3438 = vmatprep.subr.bf16.mxu0 %v11472_v0 }
 0x1f0   :  { %3561 = vmatprep.subr.bf16.mxu1 %v11475_v1 }
 0x1f1   :  { %3430 = vmatmul.mubr.bf16.vlgmr.msra.gmra.mrb[16].mxu0 %v11490_v5 }
 0x1f2   :  { %3553 = vmatmul.mubr.bf16.vlgmr.msra.gmra.mrb[16].mxu1 %v11490_v5  ;;  %3439 = vmatpush1.bf16.msra.mxu0 %v11480_v2 }
 0x1f3   :  { %3470 = vmatprep.mubr.bf16.mxu0 %v11502_v18  ;;  %3562 = vmatpush1.bf16.msra.mxu1 %v11482_v3 }
 0x1f4   :  { %3593 = vmatprep.mubr.bf16.mxu1 %v11502_v18  ;;  %3440 = vmatprep.subr.bf16.mxu0 %v11485_v4 }
 0x1f5   :  { %3563 = vmatprep.subr.bf16.mxu1 %v11494_v16 }
 0x1f6   :  { %3441 = vmatpush1.bf16.msra.mxu0 %v11497_v17 }
 0x1f7   :  { %3564 = vmatpush1.bf16.msra.mxu1 %v11505_v8  ;;  %3442 = vmatprep.subr.bf16.mxu0 %v11507_v46 }
 0x1f8   :  { %3565 = vmatprep.subr.bf16.mxu1 %v11511_v20 }
 0x1fa   :  { %3443 = vmatpush1.bf16.msra.mxu0 %v11517_v9  ;;  %v11549_v9 = vld [vmem:[#allocation9 + $0x4a4] ss:$16 sps:$4 sm:$0xff]  }
 0x1fb   :  { %3566 = vmatpush1.bf16.msra.mxu1 %v11520_v53  ;;  %3444 = vmatprep.subr.bf16.mxu0 %v11522_v37  ;;  %14896 = vst [vmem:[#allocation42_spill] sm:$0xff] %v11549_v9  ;;  %v11552_v37 = vld [vmem:[#allocation9 + $0x4ac] ss:$16 sps:$4 sm:$0xff]  }
 0x1fc   :  { %3567 = vmatprep.subr.bf16.mxu1 %v11525_v22  ;;  %14897 = vst [vmem:[#allocation43_spill] sm:$0xff] %v11552_v37  ;;  %v11555_v22 = vld [vmem:[#allocation9 + $0x4a0] ss:$16 sps:$4 sm:$0xff]   ;;  %v11566_v53 = vld [vmem:[#allocation9 + $0x4cc] ss:$16 sps:$4 sm:$0xff]  }
 0x1fd   :  { %14901 = vst [vmem:[#allocation47_spill] sm:$0xff] %v11566_v53 }
 0x1fe   :  { %3445 = vmatpush1.bf16.msra.mxu0 %v11530_v10  ;;  %v11559_v10 = vld [vmem:[#allocation9 + $0x4a8] ss:$16 sps:$4 sm:$0xff]  }
 0x1ff   :  { %3568 = vmatpush1.bf16.msra.mxu1 %v11532_v15  ;;  %3446 = vmatprep.subr.bf16.mxu0 %v11537_v55  ;;  %14898 = vst [vmem:[#allocation44_spill] sm:$0xff] %v11559_v10  ;;  %v11561_v15 = vld [vmem:[#allocation9 + $0x4c4] ss:$16 sps:$4 sm:$0xff]  }
 0x200   :  { %3569 = vmatprep.subr.bf16.mxu1 %v11540_v35  ;;  %14899 = vst [vmem:[#allocation45_spill] sm:$0xff] %v11561_v15 }
 0x202   :  { %3447 = vmatpush1.bf16.msra.mxu0 %v11543_v56 }
 0x203   :  { %3570 = vmatpush1.bf16.msra.mxu1 %v11547_v6  ;;  %3448 = vmatprep.subr.bf16.mxu0 %v11549_v9  ;;  %v11575_v9 = vld [vmem:[#allocation9 + $0x4c0] ss:$16 sps:$4 sm:$0xff]  }
 0x204   :  { %v11563_v55 = vpop.f32.mrb[8].mxu0  ;;  %3571 = vmatprep.subr.bf16.mxu1 %v11552_v37  ;;  %v11568_v35 = vpop.f32.mrb[8].mxu1  ;;  %14905 = vst [vmem:[#allocation51_spill] sm:$0xff] %v11575_v9  ;;  %v11581_v37 = vld [vmem:[#allocation9 + $0x4e4] ss:$16 sps:$4 sm:$0xff]  }
 0x205   :  { %14900 = vst [vmem:[#allocation46_spill] sm:$0xff] %v11563_v55  ;;  %14902 = vst [vmem:[#allocation48_spill] sm:$0xff] %v11568_v35  ;;  %v11570_v20 = vpop.f32.mrb[9].mxu0  ;;  %v11572_v56 = vpop.f32.mrb[9].mxu1  ;;  %v11579_v55 = vld [vmem:[#allocation9 + $0x4c8] ss:$16 sps:$4 sm:$0xff]  }
 0x206   :  { %14903 = vst [vmem:[#allocation49_spill] sm:$0xff] %v11570_v20  ;;  %14904 = vst [vmem:[#allocation50_spill] sm:$0xff] %v11572_v56  ;;  %v1942_v46 = vpop.f32.mrb[10].mxu0  ;;  %3449 = vmatpush1.bf16.msra.mxu0 %v11555_v22  ;;  %v1983_v6 = vpop.f32.mrb[10].mxu1  ;;  %v11584_v20 = vld [vmem:[#allocation9 + $0x4ec] ss:$16 sps:$4 sm:$0xff]  }
 0x207   :  { %3572 = vmatpush1.bf16.msra.mxu1 %v11559_v10  ;;  %v1943_v8 = vpop.f32.mrb[11].mxu0  ;;  %3450 = vmatprep.subr.bf16.mxu0 %v11561_v15  ;;  %14906 = vst [vmem:[#allocation52_spill] sm:$0xff] %v11579_v55  ;;  %14907 = vst [vmem:[#allocation53_spill] sm:$0xff] %v11581_v37  ;;  %v1984_v35 = vpop.f32.mrb[11].mxu1  ;;  %v11587_v46 = vld [vmem:[#allocation9 + $0x4e0] ss:$16 sps:$4 sm:$0xff]  }
 0x208   :  { %3573 = vmatprep.subr.bf16.mxu1 %v11566_v53  ;;  %14908 = vst [vmem:[#allocation54_spill] sm:$0xff] %v11584_v20  ;;  %14909 = vst [vmem:[#allocation55_spill] sm:$0xff] %v11587_v46  ;;  %v11591_v6 = vld [vmem:[#allocation9 + $0x4e8] ss:$16 sps:$4 sm:$0xff]   ;;  %v11593_v8 = vld [vmem:[#allocation9 + $0x504] ss:$16 sps:$4 sm:$0xff]  }
 0x209   :  { %14910 = vst [vmem:[#allocation56_spill] sm:$0xff] %v11591_v6  ;;  %14911 = vst [vmem:[#allocation57_spill] sm:$0xff] %v11593_v8  ;;  %v11596_v56 = vld [vmem:[#allocation9 + $0x50c] ss:$16 sps:$4 sm:$0xff]   ;;  %v11599_v35 = vld [vmem:[#allocation9 + $0x500] ss:$16 sps:$4 sm:$0xff]  }
 0x20a   :  { %3451 = vmatpush1.bf16.msra.mxu0 %v11575_v9  ;;  %14912 = vst [vmem:[#allocation58_spill] sm:$0xff] %v11596_v56  ;;  %14913 = vst [vmem:[#allocation59_spill] sm:$0xff] %v11599_v35  ;;  %v11603_v9 = vld [vmem:[#allocation9 + $0x508] ss:$16 sps:$4 sm:$0xff]   ;;  %v11664_v53 = vld [vmem:[#allocation8] sm:$0xff] }
 0x20b   :  { %3574 = vmatpush1.bf16.msra.mxu1 %v11579_v55  ;;  %3452 = vmatprep.subr.bf16.mxu0 %v11581_v37  ;;  %14914 = vst [vmem:[#allocation60_spill] sm:$0xff] %v11603_v9  ;;  %v11605_v55 = vld [vmem:[#allocation9 + $0x524] ss:$16 sps:$4 sm:$0xff]   ;;  %v11608_v37 = vld [vmem:[#allocation9 + $0x52c] ss:$16 sps:$4 sm:$0xff]  }
 0x20c   :  { %3575 = vmatprep.subr.bf16.mxu1 %v11584_v20  ;;  %14915 = vst [vmem:[#allocation61_spill] sm:$0xff] %v11605_v55  ;;  %14916 = vst [vmem:[#allocation62_spill] sm:$0xff] %v11608_v37  ;;  %v11611_v20 = vld [vmem:[#allocation9 + $0x520] ss:$16 sps:$4 sm:$0xff]  }
 0x20d   :  { %14917 = vst [vmem:[#allocation63_spill] sm:$0xff] %v11611_v20 }
 0x20e   :  { %3453 = vmatpush1.bf16.msra.mxu0 %v11587_v46  ;;  %v11615_v46 = vld [vmem:[#allocation9 + $0x528] ss:$16 sps:$4 sm:$0xff]  }
 0x20f   :  { %3576 = vmatpush1.bf16.msra.mxu1 %v11591_v6  ;;  %3454 = vmatprep.subr.bf16.mxu0 %v11593_v8  ;;  %14918 = vst [vmem:[#allocation64_spill] sm:$0xff] %v11615_v46  ;;  %v11617_v6 = vld [vmem:[#allocation9 + $0x544] ss:$16 sps:$4 sm:$0xff]   ;;  %v11620_v8 = vld [vmem:[#allocation9 + $0x54c] ss:$16 sps:$4 sm:$0xff]  }
 0x210   :  { %3577 = vmatprep.subr.bf16.mxu1 %v11596_v56  ;;  %14919 = vst [vmem:[#allocation65_spill] sm:$0xff] %v11617_v6  ;;  %14920 = vst [vmem:[#allocation66_spill] sm:$0xff] %v11620_v8  ;;  %v11623_v56 = vld [vmem:[#allocation9 + $0x540] ss:$16 sps:$4 sm:$0xff]  }
 0x211   :  { %14921 = vst [vmem:[#allocation67_spill] sm:$0xff] %v11623_v56 }
 0x212   :  { %3455 = vmatpush1.bf16.msra.mxu0 %v11599_v35  ;;  %v11627_v35 = vld [vmem:[#allocation9 + $0x548] ss:$16 sps:$4 sm:$0xff]  }
 0x213   :  { %3578 = vmatpush1.bf16.msra.mxu1 %v11603_v9  ;;  %3456 = vmatprep.subr.bf16.mxu0 %v11605_v55  ;;  %14922 = vst [vmem:[#allocation68_spill] sm:$0xff] %v11627_v35  ;;  %v11629_v9 = vld [vmem:[#allocation9 + $0x564] ss:$16 sps:$4 sm:$0xff]   ;;  %v11632_v55 = vld [vmem:[#allocation9 + $0x56c] ss:$16 sps:$4 sm:$0xff]  }
 0x214   :  { %3579 = vmatprep.subr.bf16.mxu1 %v11608_v37  ;;  %14923 = vst [vmem:[#allocation69_spill] sm:$0xff] %v11629_v9  ;;  %14924 = vst [vmem:[#allocation70_spill] sm:$0xff] %v11632_v55  ;;  %v11635_v37 = vld [vmem:[#allocation9 + $0x560] ss:$16 sps:$4 sm:$0xff]  }
 0x215   :  { %14925 = vst [vmem:[#allocation71_spill] sm:$0xff] %v11635_v37 }
 0x216   :  { %3457 = vmatpush1.bf16.msra.mxu0 %v11611_v20  ;;  %v11639_v20 = vld [vmem:[#allocation9 + $0x568] ss:$16 sps:$4 sm:$0xff]  }
 0x217   :  { %3580 = vmatpush1.bf16.msra.mxu1 %v11615_v46  ;;  %3458 = vmatprep.subr.bf16.mxu0 %v11617_v6  ;;  %14926 = vst [vmem:[#allocation72_spill] sm:$0xff] %v11639_v20  ;;  %v11641_v46 = vld [vmem:[#allocation9 + $0x584] ss:$16 sps:$4 sm:$0xff]   ;;  %v11644_v6 = vld [vmem:[#allocation9 + $0x58c] ss:$16 sps:$4 sm:$0xff]  }
 0x218   :  { %3581 = vmatprep.subr.bf16.mxu1 %v11620_v8  ;;  %14927 = vst [vmem:[#allocation73_spill] sm:$0xff] %v11641_v46  ;;  %14928 = vst [vmem:[#allocation74_spill] sm:$0xff] %v11644_v6  ;;  %v11647_v8 = vld [vmem:[#allocation9 + $0x580] ss:$16 sps:$4 sm:$0xff]  }
 0x219   :  { %14929 = vst [vmem:[#allocation75_spill] sm:$0xff] %v11647_v8 }
 0x21a   :  { %3459 = vmatpush1.bf16.msra.mxu0 %v11623_v56  ;;  %v11650_v56 = vsub.s32 2, %v11312_v43 }
 0x21b   :  { %3582 = vmatpush1.bf16.msra.mxu1 %v11627_v35  ;;  %3460 = vmatprep.subr.bf16.mxu0 %v11629_v9  ;;  %v11654_v9 = vld [vmem:[#allocation9 + $0x588] ss:$16 sps:$4 sm:$0xff]   ;;  %v11656_v35 = vld [vmem:[#allocation9 + $0x5a4] ss:$16 sps:$4 sm:$0xff]  }
 0x21c   :  { %3583 = vmatprep.subr.bf16.mxu1 %v11632_v55  ;;  %14930 = vst [vmem:[#allocation76_spill] sm:$0xff] %v11650_v56  ;;  %14931 = vst [vmem:[#allocation77_spill] sm:$0xff] %v11654_v9  ;;  %v11659_v55 = vld [vmem:[#allocation9 + $0x5ac] ss:$16 sps:$4 sm:$0xff]   ;;  %v384_v15 = vrot.slane %v11664_v53, %v11650_v56  ;;  %v11683_v56 = vld [vmem:[#allocation9 + $0x5c8] ss:$16 sps:$4 sm:$0xff]  }
 0x21d   :  { %14932 = vst [vmem:[#allocation78_spill] sm:$0xff] %v11656_v35  ;;  %14933 = vst [vmem:[#allocation79_spill] sm:$0xff] %v11659_v55 }
 0x21e   :  { %3461 = vmatpush1.bf16.msra.mxu0 %v11635_v37  ;;  %v11662_v37 = vld [vmem:[#allocation9 + $0x5a0] ss:$16 sps:$4 sm:$0xff]   ;;  %v1816_v10 = vadd.f32 %v11314_v44, %v384_v15  ;;  %14937 = vst [vmem:[#allocation83_spill] sm:$0xff] %v11683_v56  ;;  %v11695_v44 = vld [vmem:[#allocation9 + $0x5e8] ss:$16 sps:$4 sm:$0xff]  }
 0x21f   :  { %3584 = vmatpush1.bf16.msra.mxu1 %v11639_v20  ;;  %3462 = vmatprep.subr.bf16.mxu0 %v11641_v46  ;;  %14934 = vst [vmem:[#allocation80_spill] sm:$0xff] %v11662_v37  ;;  %v11670_v46 = vld [vmem:[#allocation9 + $0x5a8] ss:$16 sps:$4 sm:$0xff]   ;;  %v11672_v20 = vld [vmem:[#allocation9 + $0x5c4] ss:$16 sps:$4 sm:$0xff]   ;;  %14941 = vst [vmem:[#allocation87_spill] sm:$0xff] %v11695_v44 }
 0x220   :  { %3585 = vmatprep.subr.bf16.mxu1 %v11644_v6  ;;  %v11675_v6 = vld [vmem:[#allocation9 + $0x5cc] ss:$16 sps:$4 sm:$0xff]  }
 0x221   :  { %14935 = vst [vmem:[#allocation81_spill] sm:$0xff] %v11675_v6 }
 0x222   :  { %3463 = vmatpush1.bf16.msra.mxu0 %v11647_v8  ;;  %v11678_v8 = vld [vmem:[#allocation9 + $0x5c0] ss:$16 sps:$4 sm:$0xff]  }
 0x223   :  { %3586 = vmatpush1.bf16.msra.mxu1 %v11654_v9  ;;  %3464 = vmatprep.subr.bf16.mxu0 %v11656_v35  ;;  %14936 = vst [vmem:[#allocation82_spill] sm:$0xff] %v11678_v8  ;;  %v11685_v35 = vld [vmem:[#allocation9 + $0x5e4] ss:$16 sps:$4 sm:$0xff]   ;;  %v11688_v9 = vld [vmem:[#allocation9 + $0x5ec] ss:$16 sps:$4 sm:$0xff]  }
 0x224   :  { %3587 = vmatprep.subr.bf16.mxu1 %v11659_v55  ;;  %14938 = vst [vmem:[#allocation84_spill] sm:$0xff] %v11685_v35  ;;  %14939 = vst [vmem:[#allocation85_spill] sm:$0xff] %v11688_v9  ;;  %v11691_v55 = vld [vmem:[#allocation9 + $0x5e0] ss:$16 sps:$4 sm:$0xff]  }
 0x225   :  { %14940 = vst [vmem:[#allocation86_spill] sm:$0xff] %v11691_v55 }
 0x226   :  { %3465 = vmatpush1.bf16.msra.mxu0 %v11662_v37  ;;  %v2072_v37 = vmax.f32 %v1816_v10, 0.0  ;;  %v11710_v10 = vld [vmem:[#allocation9] ss:$16 sps:$4 sm:$0xff]  }
 0x227   :  { %3588 = vmatpush1.bf16.msra.mxu1 %v11670_v46  ;;  %3466 = vmatprep.subr.bf16.mxu0 %v11672_v20  ;;  %14944 = vst [vmem:[#allocation90_spill] sm:$0xff] %v11710_v10 }
 0x228   :  { %3589 = vmatprep.subr.bf16.mxu1 %v11675_v6  ;;  %v11699_v15 = vpack.c.bf16 %v2072_v37, %v2072_v37  ;;  %v11702_v6 = vld [vmem:[#allocation9 + $0x4] ss:$16 sps:$4 sm:$0xff]   ;;  %v11714_v37 = vld [vmem:[#allocation9 + $0x8] ss:$16 sps:$4 sm:$0xff]  }
 0x229   :  { %14942 = vst [vmem:[#allocation88_spill] sm:$0xff] %v11702_v6  ;;  %14945 = vst [vmem:[#allocation91_spill] sm:$0xff] %v11714_v37 }
 0x22a   :  { %3467 = vmatpush1.bf16.msra.mxu0 %v11678_v8  ;;  %v11705_v8 = vld [vmem:[#allocation9 + $0xc] ss:$16 sps:$4 sm:$0xff]  }
 0x22b   :  { %3590 = vmatpush1.bf16.msra.mxu1 %v11683_v56  ;;  %3468 = vmatprep.subr.bf16.mxu0 %v11685_v35  ;;  %14943 = vst [vmem:[#allocation89_spill] sm:$0xff] %v11705_v8  ;;  %v11780_v35 = vld [vmem:[#allocation9 + $0xa0] ss:$16 sps:$4 sm:$0xff]   ;;  %v11783_v56 = vld [vmem:[#allocation9 + $0xa8] ss:$16 sps:$4 sm:$0xff]  }
 0x22c   :  { %3591 = vmatprep.subr.bf16.mxu1 %v11688_v9 }
 0x22e   :  { %3469 = vmatpush1.bf16.msra.mxu0 %v11691_v55  ;;  %v11730_v55 = vld [vmem:[#allocation9 + $0x44] ss:$16 sps:$4 sm:$0xff]  }
 0x22f   :  { %3592 = vmatpush1.bf16.msra.mxu1 %v11695_v44  ;;  %3698 = vmatprep.subr.bf16.mxu0 %v11702_v6  ;;  %v11718_v6 = vld [vmem:[#allocation9 + $0x24] ss:$16 sps:$4 sm:$0xff]   ;;  %v11724_v44 = vld [vmem:[#allocation9 + $0x20] ss:$16 sps:$4 sm:$0xff]   ;;  %14950 = vst [vmem:[#allocation96_spill] sm:$0xff] %v11730_v55 }
 0x230   :  { %3821 = vmatprep.subr.bf16.mxu1 %v11705_v8  ;;  %14946 = vst [vmem:[#allocation92_spill] sm:$0xff] %v11718_v6  ;;  %v11721_v8 = vld [vmem:[#allocation9 + $0x2c] ss:$16 sps:$4 sm:$0xff]   ;;  %14948 = vst [vmem:[#allocation94_spill] sm:$0xff] %v11724_v44 }
 0x231   :  { %3471 = vmatmul.mubr.bf16.vlgmr.msra.gmra.mrb[16].mxu0 %v11699_v15  ;;  %14947 = vst [vmem:[#allocation93_spill] sm:$0xff] %v11721_v8 }
 0x232   :  { %3594 = vmatmul.mubr.bf16.vlgmr.msra.gmra.mrb[16].mxu1 %v11699_v15  ;;  %3699 = vmatpush1.bf16.msra.mxu0 %v11710_v10  ;;  %v11727_v10 = vld [vmem:[#allocation9 + $0x28] ss:$16 sps:$4 sm:$0xff]  }
 0x233   :  { %3730 = vmatprep.mubr.bf16.mxu0 %v11338_v45  ;;  %3822 = vmatpush1.bf16.msra.mxu1 %v11714_v37  ;;  %14949 = vst [vmem:[#allocation95_spill] sm:$0xff] %v11727_v10  ;;  %v11771_v37 = vld [vmem:[#allocation9 + $0xac] ss:$16 sps:$4 sm:$0xff]  }
 0x234   :  { %3853 = vmatprep.mubr.bf16.mxu1 %v11338_v45  ;;  %3700 = vmatprep.subr.bf16.mxu0 %v11718_v6  ;;  %v11733_v45 = vld [vmem:[#allocation9 + $0x4c] ss:$16 sps:$4 sm:$0xff]   ;;  %v11736_v6 = vld [vmem:[#allocation9 + $0x40] ss:$16 sps:$4 sm:$0xff]   ;;  %14964 = vst [vmem:[#allocation110_spill] sm:$0xff] %v11771_v37 }
 0x235   :  { %3823 = vmatprep.subr.bf16.mxu1 %v11721_v8  ;;  %14951 = vst [vmem:[#allocation97_spill] sm:$0xff] %v11733_v45  ;;  %14952 = vst [vmem:[#allocation98_spill] sm:$0xff] %v11736_v6  ;;  %v11739_v8 = vld [vmem:[#allocation9 + $0x48] ss:$16 sps:$4 sm:$0xff]  }
 0x236   :  { %3701 = vmatpush1.bf16.msra.mxu0 %v11724_v44  ;;  %14953 = vst [vmem:[#allocation99_spill] sm:$0xff] %v11739_v8  ;;  %v11742_v44 = vld [vmem:[#allocation9 + $0x64] ss:$16 sps:$4 sm:$0xff]  }
 0x237   :  { %3824 = vmatpush1.bf16.msra.mxu1 %v11727_v10  ;;  %3702 = vmatprep.subr.bf16.mxu0 %v11730_v55  ;;  %14954 = vst [vmem:[#allocation100_spill] sm:$0xff] %v11742_v44  ;;  %v11745_v10 = vld [vmem:[#allocation9 + $0x6c] ss:$16 sps:$4 sm:$0xff]   ;;  %v11748_v55 = vld [vmem:[#allocation9 + $0x60] ss:$16 sps:$4 sm:$0xff]  }
 0x238   :  { %3825 = vmatprep.subr.bf16.mxu1 %v11733_v45  ;;  %14955 = vst [vmem:[#allocation101_spill] sm:$0xff] %v11745_v10  ;;  %14956 = vst [vmem:[#allocation102_spill] sm:$0xff] %v11748_v55  ;;  %v11751_v45 = vld [vmem:[#allocation9 + $0x68] ss:$16 sps:$4 sm:$0xff]  }
 0x239   :  { %14957 = vst [vmem:[#allocation103_spill] sm:$0xff] %v11751_v45 }
 0x23a   :  { %3703 = vmatpush1.bf16.msra.mxu0 %v11736_v6  ;;  %v11754_v6 = vld [vmem:[#allocation9 + $0x84] ss:$16 sps:$4 sm:$0xff]  }
 0x23b   :  { %3826 = vmatpush1.bf16.msra.mxu1 %v11739_v8  ;;  %3704 = vmatprep.subr.bf16.mxu0 %v11742_v44  ;;  %14958 = vst [vmem:[#allocation104_spill] sm:$0xff] %v11754_v6  ;;  %v11757_v8 = vld [vmem:[#allocation9 + $0x8c] ss:$16 sps:$4 sm:$0xff]   ;;  %v11760_v44 = vld [vmem:[#allocation9 + $0x80] ss:$16 sps:$4 sm:$0xff]  }
 0x23c   :  { %3827 = vmatprep.subr.bf16.mxu1 %v11745_v10  ;;  %14959 = vst [vmem:[#allocation105_spill] sm:$0xff] %v11757_v8  ;;  %14960 = vst [vmem:[#allocation106_spill] sm:$0xff] %v11760_v44  ;;  %v11763_v10 = vld [vmem:[#allocation9 + $0x88] ss:$16 sps:$4 sm:$0xff]  }
 0x23d   :  { %14961 = vst [vmem:[#allocation107_spill] sm:$0xff] %v11763_v10 }
 0x23e   :  { %3705 = vmatpush1.bf16.msra.mxu0 %v11748_v55  ;;  %v11766_v55 = vld [vmem:[#allocation9 + $0xa4] ss:$16 sps:$4 sm:$0xff]  }
 0x23f   :  { %3828 = vmatpush1.bf16.msra.mxu1 %v11751_v45  ;;  %3706 = vmatprep.subr.bf16.mxu0 %v11754_v6  ;;  %14962 = vst [vmem:[#allocation108_spill] sm:$0xff] %v11766_v55 }
 0x240   :  { %3829 = vmatprep.subr.bf16.mxu1 %v11757_v8 }
 0x242   :  { %3707 = vmatpush1.bf16.msra.mxu0 %v11760_v44 }
 0x243   :  { %3830 = vmatpush1.bf16.msra.mxu1 %v11763_v10  ;;  %3708 = vmatprep.subr.bf16.mxu0 %v11766_v55  ;;  %v11786_v55 = vld [vmem:[#allocation9 + $0xc4] ss:$16 sps:$4 sm:$0xff]  }
 0x244   :  { %v11769_v45 = vpop.f32.mrb[12].mxu0  ;;  %3831 = vmatprep.subr.bf16.mxu1 %v11771_v37  ;;  %v11774_v6 = vpop.f32.mrb[12].mxu1  ;;  %v11789_v37 = vld [vmem:[#allocation9 + $0xcc] ss:$16 sps:$4 sm:$0xff]  }
 0x245   :  { %14963 = vst [vmem:[#allocation109_spill] sm:$0xff] %v11769_v45  ;;  %14965 = vst [vmem:[#allocation111_spill] sm:$0xff] %v11774_v6  ;;  %v11776_v8 = vpop.f32.mrb[13].mxu0  ;;  %v11778_v9 = vpop.f32.mrb[13].mxu1 }
 0x246   :  { %14966 = vst [vmem:[#allocation112_spill] sm:$0xff] %v11776_v8  ;;  %14967 = vst [vmem:[#allocation113_spill] sm:$0xff] %v11778_v9  ;;  %v2024_v44 = vpop.f32.mrb[14].mxu0  ;;  %3709 = vmatpush1.bf16.msra.mxu0 %v11780_v35  ;;  %v2065_v10 = vpop.f32.mrb[14].mxu1  ;;  %v11795_v9 = vld [vmem:[#allocation9 + $0xc8] ss:$16 sps:$4 sm:$0xff]  }
 0x247   :  { %3832 = vmatpush1.bf16.msra.mxu1 %v11783_v56  ;;  %v2025_v45 = vpop.f32.mrb[15].mxu0  ;;  %3710 = vmatprep.subr.bf16.mxu0 %v11786_v55  ;;  %v2066_v6 = vpop.f32.mrb[15].mxu1  ;;  %v11792_v44 = vld [vmem:[#allocation9 + $0xc0] ss:$16 sps:$4 sm:$0xff]   ;;  %14969 = vst [vmem:[#allocation115_spill] sm:$0xff] %v11795_v9 }
 0x248   :  { %3833 = vmatprep.subr.bf16.mxu1 %v11789_v37  ;;  %14968 = vst [vmem:[#allocation114_spill] sm:$0xff] %v11792_v44  ;;  %v11798_v10 = vld [vmem:[#allocation9 + $0xe4] ss:$16 sps:$4 sm:$0xff]   ;;  %v11801_v45 = vld [vmem:[#allocation9 + $0xec] ss:$16 sps:$4 sm:$0xff]  }
 0x249   :  { %14970 = vst [vmem:[#allocation116_spill] sm:$0xff] %v11798_v10  ;;  %14971 = vst [vmem:[#allocation117_spill] sm:$0xff] %v11801_v45  ;;  %v11804_v6 = vld [vmem:[#allocation9 + $0xe0] ss:$16 sps:$4 sm:$0xff]   ;;  %v11807_v8 = vld [vmem:[#allocation9 + $0xe8] ss:$16 sps:$4 sm:$0xff]  }
 0x24a   :  { %3711 = vmatpush1.bf16.msra.mxu0 %v11792_v44  ;;  %14972 = vst [vmem:[#allocation118_spill] sm:$0xff] %v11804_v6  ;;  %14973 = vst [vmem:[#allocation119_spill] sm:$0xff] %v11807_v8  ;;  %v11810_v44 = vld [vmem:[#allocation9 + $0x104] ss:$16 sps:$4 sm:$0xff]  }
 0x24b   :  { %3834 = vmatpush1.bf16.msra.mxu1 %v11795_v9  ;;  %3712 = vmatprep.subr.bf16.mxu0 %v11798_v10  ;;  %14974 = vst [vmem:[#allocation120_spill] sm:$0xff] %v11810_v44  ;;  %v11813_v9 = vld [vmem:[#allocation9 + $0x10c] ss:$16 sps:$4 sm:$0xff]   ;;  %v11816_v10 = vld [vmem:[#allocation9 + $0x100] ss:$16 sps:$4 sm:$0xff]  }
 0x24c   :  { %3835 = vmatprep.subr.bf16.mxu1 %v11801_v45  ;;  %14975 = vst [vmem:[#allocation121_spill] sm:$0xff] %v11813_v9  ;;  %14976 = vst [vmem:[#allocation122_spill] sm:$0xff] %v11816_v10  ;;  %v11819_v45 = vld [vmem:[#allocation9 + $0x108] ss:$16 sps:$4 sm:$0xff]  }
 0x24d   :  { %14977 = vst [vmem:[#allocation123_spill] sm:$0xff] %v11819_v45 }
 0x24e   :  { %3713 = vmatpush1.bf16.msra.mxu0 %v11804_v6  ;;  %v11822_v6 = vld [vmem:[#allocation9 + $0x124] ss:$16 sps:$4 sm:$0xff]  }
 0x24f   :  { %3836 = vmatpush1.bf16.msra.mxu1 %v11807_v8  ;;  %3714 = vmatprep.subr.bf16.mxu0 %v11810_v44  ;;  %14978 = vst [vmem:[#allocation124_spill] sm:$0xff] %v11822_v6  ;;  %v11825_v8 = vld [vmem:[#allocation9 + $0x12c] ss:$16 sps:$4 sm:$0xff]   ;;  %v11828_v44 = vld [vmem:[#allocation9 + $0x120] ss:$16 sps:$4 sm:$0xff]  }
 0x250   :  { %3837 = vmatprep.subr.bf16.mxu1 %v11813_v9  ;;  %14979 = vst [vmem:[#allocation125_spill] sm:$0xff] %v11825_v8  ;;  %14980 = vst [vmem:[#allocation126_spill] sm:$0xff] %v11828_v44  ;;  %v11831_v9 = vld [vmem:[#allocation9 + $0x128] ss:$16 sps:$4 sm:$0xff]  }
 0x251   :  { %14981 = vst [vmem:[#allocation127_spill] sm:$0xff] %v11831_v9 }
 0x252   :  { %3715 = vmatpush1.bf16.msra.mxu0 %v11816_v10  ;;  %v11834_v10 = vld [vmem:[#allocation9 + $0x144] ss:$16 sps:$4 sm:$0xff]  }
 0x253   :  { %3838 = vmatpush1.bf16.msra.mxu1 %v11819_v45  ;;  %3716 = vmatprep.subr.bf16.mxu0 %v11822_v6  ;;  %14982 = vst [vmem:[#allocation128_spill] sm:$0xff] %v11834_v10  ;;  %v11837_v45 = vld [vmem:[#allocation9 + $0x14c] ss:$16 sps:$4 sm:$0xff]   ;;  %v11840_v6 = vld [vmem:[#allocation9 + $0x140] ss:$16 sps:$4 sm:$0xff]  }
 0x254   :  { %3839 = vmatprep.subr.bf16.mxu1 %v11825_v8  ;;  %14983 = vst [vmem:[#allocation129_spill] sm:$0xff] %v11837_v45  ;;  %14984 = vst [vmem:[#allocation130_spill] sm:$0xff] %v11840_v6  ;;  %v11843_v8 = vld [vmem:[#allocation9 + $0x148] ss:$16 sps:$4 sm:$0xff]  }
 0x255   :  { %14985 = vst [vmem:[#allocation131_spill] sm:$0xff] %v11843_v8 }
 0x256   :  { %3717 = vmatpush1.bf16.msra.mxu0 %v11828_v44  ;;  %v11846_v44 = vld [vmem:[#allocation9 + $0x164] ss:$16 sps:$4 sm:$0xff]  }
 0x257   :  { %3840 = vmatpush1.bf16.msra.mxu1 %v11831_v9  ;;  %3718 = vmatprep.subr.bf16.mxu0 %v11834_v10  ;;  %14986 = vst [vmem:[#allocation132_spill] sm:$0xff] %v11846_v44  ;;  %v11849_v9 = vld [vmem:[#allocation9 + $0x16c] ss:$16 sps:$4 sm:$0xff]   ;;  %v11852_v10 = vld [vmem:[#allocation9 + $0x160] ss:$16 sps:$4 sm:$0xff]  }
 0x258   :  { %3841 = vmatprep.subr.bf16.mxu1 %v11837_v45  ;;  %14987 = vst [vmem:[#allocation133_spill] sm:$0xff] %v11849_v9  ;;  %14988 = vst [vmem:[#allocation134_spill] sm:$0xff] %v11852_v10  ;;  %v11855_v45 = vld [vmem:[#allocation9 + $0x168] ss:$16 sps:$4 sm:$0xff]  }
 0x259   :  { %14989 = vst [vmem:[#allocation135_spill] sm:$0xff] %v11855_v45 }
 0x25a   :  { %3719 = vmatpush1.bf16.msra.mxu0 %v11840_v6  ;;  %v11858_v6 = vld [vmem:[#allocation9 + $0x184] ss:$16 sps:$4 sm:$0xff]  }
 0x25b   :  { %3842 = vmatpush1.bf16.msra.mxu1 %v11843_v8  ;;  %3720 = vmatprep.subr.bf16.mxu0 %v11846_v44  ;;  %14990 = vst [vmem:[#allocation136_spill] sm:$0xff] %v11858_v6  ;;  %v11861_v8 = vld [vmem:[#allocation9 + $0x18c] ss:$16 sps:$4 sm:$0xff]   ;;  %v11864_v44 = vld [vmem:[#allocation9 + $0x180] ss:$16 sps:$4 sm:$0xff]  }
 0x25c   :  { %3843 = vmatprep.subr.bf16.mxu1 %v11849_v9  ;;  %14991 = vst [vmem:[#allocation137_spill] sm:$0xff] %v11861_v8  ;;  %14992 = vst [vmem:[#allocation138_spill] sm:$0xff] %v11864_v44  ;;  %v11867_v9 = vld [vmem:[#allocation9 + $0x188] ss:$16 sps:$4 sm:$0xff]  }
 0x25d   :  { %14993 = vst [vmem:[#allocation139_spill] sm:$0xff] %v11867_v9 }
 0x25e   :  { %3721 = vmatpush1.bf16.msra.mxu0 %v11852_v10  ;;  %v11870_v10 = vld [vmem:[#allocation9 + $0x1a4] ss:$16 sps:$4 sm:$0xff]  }
 0x25f   :  { %3844 = vmatpush1.bf16.msra.mxu1 %v11855_v45  ;;  %3722 = vmatprep.subr.bf16.mxu0 %v11858_v6  ;;  %14994 = vst [vmem:[#allocation140_spill] sm:$0xff] %v11870_v10  ;;  %v11873_v45 = vld [vmem:[#allocation9 + $0x1ac] ss:$16 sps:$4 sm:$0xff]   ;;  %v11876_v6 = vld [vmem:[#allocation9 + $0x1a0] ss:$16 sps:$4 sm:$0xff]  }
 0x260   :  { %3845 = vmatprep.subr.bf16.mxu1 %v11861_v8  ;;  %14995 = vst [vmem:[#allocation141_spill] sm:$0xff] %v11873_v45  ;;  %14996 = vst [vmem:[#allocation142_spill] sm:$0xff] %v11876_v6  ;;  %v11879_v8 = vld [vmem:[#allocation9 + $0x1a8] ss:$16 sps:$4 sm:$0xff]  }
 0x261   :  { %14997 = vst [vmem:[#allocation143_spill] sm:$0xff] %v11879_v8 }
 0x262   :  { %3723 = vmatpush1.bf16.msra.mxu0 %v11864_v44  ;;  %v11882_v44 = vld [vmem:[#allocation9 + $0x1c4] ss:$16 sps:$4 sm:$0xff]  }
 0x263   :  { %3846 = vmatpush1.bf16.msra.mxu1 %v11867_v9  ;;  %3724 = vmatprep.subr.bf16.mxu0 %v11870_v10  ;;  %14998 = vst [vmem:[#allocation144_spill] sm:$0xff] %v11882_v44  ;;  %v11885_v9 = vld [vmem:[#allocation9 + $0x1cc] ss:$16 sps:$4 sm:$0xff]   ;;  %v11888_v10 = vld [vmem:[#allocation9 + $0x1c0] ss:$16 sps:$4 sm:$0xff]  }
 0x264   :  { %3847 = vmatprep.subr.bf16.mxu1 %v11873_v45  ;;  %14999 = vst [vmem:[#allocation145_spill] sm:$0xff] %v11885_v9  ;;  %15000 = vst [vmem:[#allocation146_spill] sm:$0xff] %v11888_v10  ;;  %v11891_v45 = vld [vmem:[#allocation9 + $0x1c8] ss:$16 sps:$4 sm:$0xff]  }
 0x265   :  { %15001 = vst [vmem:[#allocation147_spill] sm:$0xff] %v11891_v45 }
 0x266   :  { %3725 = vmatpush1.bf16.msra.mxu0 %v11876_v6  ;;  %v11894_v6 = vld [vmem:[#allocation9 + $0x1e4] ss:$16 sps:$4 sm:$0xff]  }
 0x267   :  { %3848 = vmatpush1.bf16.msra.mxu1 %v11879_v8  ;;  %3726 = vmatprep.subr.bf16.mxu0 %v11882_v44  ;;  %v11897_v8 = vld [vmem:[#allocation9 + $0x1ec] ss:$16 sps:$4 sm:$0xff]   ;;  %v11900_v44 = vld [vmem:[#allocation9 + $0x1e0] ss:$16 sps:$4 sm:$0xff]  }
 0x268   :  { %3849 = vmatprep.subr.bf16.mxu1 %v11885_v9  ;;  %15002 = vst [vmem:[#allocation148_spill] sm:$0xff] %v11897_v8  ;;  %15003 = vst [vmem:[#allocation149_spill] sm:$0xff] %v11900_v44  ;;  %v11903_v9 = vld [vmem:[#allocation9 + $0x1e8] ss:$16 sps:$4 sm:$0xff]  }
 0x269   :  { %15004 = vst [vmem:[#allocation150_spill] sm:$0xff] %v11903_v9 }
 0x26a   :  { %3727 = vmatpush1.bf16.msra.mxu0 %v11888_v10  ;;  %v11906_v10 = vld [vmem:[#allocation9 + $0x204] ss:$16 sps:$4 sm:$0xff]  }
 0x26b   :  { %3850 = vmatpush1.bf16.msra.mxu1 %v11891_v45  ;;  %3728 = vmatprep.subr.bf16.mxu0 %v11894_v6  ;;  %15005 = vst [vmem:[#allocation151_spill] sm:$0xff] %v11906_v10  ;;  %v11909_v45 = vld [vmem:[#allocation9 + $0x20c] ss:$16 sps:$4 sm:$0xff]  }
 0x26c   :  { %3851 = vmatprep.subr.bf16.mxu1 %v11897_v8  ;;  %15006 = vst [vmem:[#allocation152_spill] sm:$0xff] %v11909_v45  ;;  %v11914_v8 = vld [vmem:[#allocation9 + $0x200] ss:$16 sps:$4 sm:$0xff]  }
 0x26d   :  { %15007 = vst [vmem:[#allocation153_spill] sm:$0xff] %v11914_v8 }
 0x26e   :  { %3729 = vmatpush1.bf16.msra.mxu0 %v11900_v44  ;;  %v11918_v44 = vld [vmem:[#allocation9 + $0x208] ss:$16 sps:$4 sm:$0xff]  }
 0x26f   :  { %3852 = vmatpush1.bf16.msra.mxu1 %v11903_v9  ;;  %3739 = vmatprep.subr.bf16.mxu0 %v11906_v10  ;;  %15008 = vst [vmem:[#allocation154_spill] sm:$0xff] %v11918_v44  ;;  %v11922_v10 = vld [vmem:[#allocation9 + $0x224] ss:$16 sps:$4 sm:$0xff]  }
 0x270   :  { %3862 = vmatprep.subr.bf16.mxu1 %v11909_v45  ;;  %15009 = vst [vmem:[#allocation155_spill] sm:$0xff] %v11922_v10  ;;  %v11925_v45 = vld [vmem:[#allocation9 + $0x22c] ss:$16 sps:$4 sm:$0xff]   ;;  %v11934_v9 = vld [vmem:[#allocation9 + $0x244] ss:$16 sps:$4 sm:$0xff]  }
 0x271   :  { %3731 = vmatmul.mubr.bf16.vlgmr.msra.gmra.mrb[20].mxu0 %v11490_v5  ;;  %15010 = vst [vmem:[#allocation156_spill] sm:$0xff] %v11925_v45  ;;  %15013 = vst [vmem:[#allocation159_spill] sm:$0xff] %v11934_v9 }
 0x272   :  { %3854 = vmatmul.mubr.bf16.vlgmr.msra.gmra.mrb[20].mxu1 %v11490_v5  ;;  %3740 = vmatpush1.bf16.msra.mxu0 %v11914_v8  ;;  %v11928_v5 = vld [vmem:[#allocation9 + $0x220] ss:$16 sps:$4 sm:$0xff]   ;;  %v11931_v8 = vld [vmem:[#allocation9 + $0x228] ss:$16 sps:$4 sm:$0xff]  }
 0x273   :  { %3771 = vmatprep.mubr.bf16.mxu0 %v11502_v18  ;;  %3863 = vmatpush1.bf16.msra.mxu1 %v11918_v44  ;;  %15011 = vst [vmem:[#allocation157_spill] sm:$0xff] %v11928_v5  ;;  %15012 = vst [vmem:[#allocation158_spill] sm:$0xff] %v11931_v8  ;;  %v11937_v44 = vld [vmem:[#allocation9 + $0x24c] ss:$16 sps:$4 sm:$0xff]  }
 0x274   :  { %3894 = vmatprep.mubr.bf16.mxu1 %v11502_v18  ;;  %3741 = vmatprep.subr.bf16.mxu0 %v11922_v10  ;;  %15014 = vst [vmem:[#allocation160_spill] sm:$0xff] %v11937_v44  ;;  %v11940_v10 = vld [vmem:[#allocation9 + $0x240] ss:$16 sps:$4 sm:$0xff]  }
 0x275   :  { %3864 = vmatprep.subr.bf16.mxu1 %v11925_v45  ;;  %15015 = vst [vmem:[#allocation161_spill] sm:$0xff] %v11940_v10  ;;  %v11943_v45 = vld [vmem:[#allocation9 + $0x248] ss:$16 sps:$4 sm:$0xff]  }
 0x276   :  { %3742 = vmatpush1.bf16.msra.mxu0 %v11928_v5  ;;  %15016 = vst [vmem:[#allocation162_spill] sm:$0xff] %v11943_v45  ;;  %v11946_v5 = vld [vmem:[#allocation9 + $0x264] ss:$16 sps:$4 sm:$0xff]  }
 0x277   :  { %3865 = vmatpush1.bf16.msra.mxu1 %v11931_v8  ;;  %3743 = vmatprep.subr.bf16.mxu0 %v11934_v9  ;;  %15017 = vst [vmem:[#allocation163_spill] sm:$0xff] %v11946_v5  ;;  %v11949_v8 = vld [vmem:[#allocation9 + $0x26c] ss:$16 sps:$4 sm:$0xff]   ;;  %v11952_v9 = vld [vmem:[#allocation9 + $0x260] ss:$16 sps:$4 sm:$0xff]  }
 0x278   :  { %3866 = vmatprep.subr.bf16.mxu1 %v11937_v44  ;;  %15018 = vst [vmem:[#allocation164_spill] sm:$0xff] %v11949_v8  ;;  %15019 = vst [vmem:[#allocation165_spill] sm:$0xff] %v11952_v9  ;;  %v11955_v44 = vld [vmem:[#allocation9 + $0x268] ss:$16 sps:$4 sm:$0xff]  }
 0x279   :  { %15020 = vst [vmem:[#allocation166_spill] sm:$0xff] %v11955_v44 }
 0x27a   :  { %3744 = vmatpush1.bf16.msra.mxu0 %v11940_v10  ;;  %v11958_v10 = vld [vmem:[#allocation9 + $0x284] ss:$16 sps:$4 sm:$0xff]  }
 0x27b   :  { %3867 = vmatpush1.bf16.msra.mxu1 %v11943_v45  ;;  %3745 = vmatprep.subr.bf16.mxu0 %v11946_v5  ;;  %15021 = vst [vmem:[#allocation167_spill] sm:$0xff] %v11958_v10  ;;  %v11961_v45 = vld [vmem:[#allocation9 + $0x28c] ss:$16 sps:$4 sm:$0xff]   ;;  %v11964_v5 = vld [vmem:[#allocation9 + $0x280] ss:$16 sps:$4 sm:$0xff]  }
 0x27c   :  { %3868 = vmatprep.subr.bf16.mxu1 %v11949_v8  ;;  %15022 = vst [vmem:[#allocation168_spill] sm:$0xff] %v11961_v45  ;;  %15023 = vst [vmem:[#allocation169_spill] sm:$0xff] %v11964_v5  ;;  %v11967_v8 = vld [vmem:[#allocation9 + $0x288] ss:$16 sps:$4 sm:$0xff]  }
 0x27d   :  { %15024 = vst [vmem:[#allocation170_spill] sm:$0xff] %v11967_v8 }
 0x27e   :  { %3746 = vmatpush1.bf16.msra.mxu0 %v11952_v9  ;;  %v11970_v9 = vld [vmem:[#allocation9 + $0x2a4] ss:$16 sps:$4 sm:$0xff]  }
 0x27f   :  { %3869 = vmatpush1.bf16.msra.mxu1 %v11955_v44  ;;  %3747 = vmatprep.subr.bf16.mxu0 %v11958_v10  ;;  %v11973_v44 = vld [vmem:[#allocation9 + $0x2ac] ss:$16 sps:$4 sm:$0xff]   ;;  %v11976_v10 = vld [vmem:[#allocation9 + $0x2a0] ss:$16 sps:$4 sm:$0xff]  }
 0x280   :  { %3870 = vmatprep.subr.bf16.mxu1 %v11961_v45  ;;  %v11979_v45 = vld [vmem:[#allocation9 + $0x2a8] ss:$16 sps:$4 sm:$0xff]  }
 0x282   :  { %3748 = vmatpush1.bf16.msra.mxu0 %v11964_v5  ;;  %v11982_v5 = vld [vmem:[#allocation9 + $0x2c4] ss:$16 sps:$4 sm:$0xff]  }
 0x283   :  { %3871 = vmatpush1.bf16.msra.mxu1 %v11967_v8  ;;  %3749 = vmatprep.subr.bf16.mxu0 %v11970_v9  ;;  %v11985_v8 = vld [vmem:[#allocation9 + $0x2cc] ss:$16 sps:$4 sm:$0xff]  }
 0x284   :  { %3872 = vmatprep.subr.bf16.mxu1 %v11973_v44 }
 0x286   :  { %3750 = vmatpush1.bf16.msra.mxu0 %v11976_v10 }
 0x287   :  { %3873 = vmatpush1.bf16.msra.mxu1 %v11979_v45  ;;  %3751 = vmatprep.subr.bf16.mxu0 %v11982_v5 }
 0x288   :  { %3874 = vmatprep.subr.bf16.mxu1 %v11985_v8 }
 0x28a   :  { %3752 = vmatpush1.bf16.msra.mxu0 %v11350_v7  ;;  %v14529_v7 = vsub.s32 5, %v11312_v43 }
 0x28b   :  { %3875 = vmatpush1.bf16.msra.mxu1 %v11362_v13  ;;  %3753 = vmatprep.subr.bf16.mxu0 %v11364_v14 }
 0x28c   :  { %3876 = vmatprep.subr.bf16.mxu1 %v11368_v42  ;;  %v396_v13 = vrot.slane %v11664_v53, %v14529_v7  ;;  %v12398_v7 = vld [vmem:[#allocation9 + $0x464] ss:$16 sps:$4 sm:$0xff]  }
 0x28e   :  { %3754 = vmatpush1.bf16.msra.mxu0 %v11370_v19  ;;  %v1859_v14 = vadd.f32 %v11360_v11, %v396_v13  ;;  %v15025_v11 = vld [vmem:[#allocation29_spill] sm:$0xff]  ;;  %v15066_v13 = vld [vmem:[#allocation74_spill] sm:$0xff] }
 0x28f   :  { %3877 = vmatpush1.bf16.msra.mxu1 %v11374_v23  ;;  %3755 = vmatprep.subr.bf16.mxu0 %v11376_v24  ;;  %v15026_v23 = vld [vmem:[#allocation30_spill] sm:$0xff]  ;;  %v15027_v24 = vld [vmem:[#allocation31_spill] sm:$0xff] }
 0x290   :  { %3878 = vmatprep.subr.bf16.mxu1 %v11379_v25  ;;  %v2075_v42 = vmax.f32 %v1859_v14, 0.0  ;;  %v15028_v25 = vld [vmem:[#allocation32_spill] sm:$0xff]  ;;  %v15067_v14 = vld [vmem:[#allocation75_spill] sm:$0xff] }
 0x292   :  { %3756 = vmatpush1.bf16.msra.mxu0 %v11384_v26  ;;  %v12033_v19 = vpack.c.bf16 %v2075_v42, %v2075_v42  ;;  %v15029_v26 = vld [vmem:[#allocation33_spill] sm:$0xff] }
 0x293   :  { %3879 = vmatpush1.bf16.msra.mxu1 %v11386_v27  ;;  %3757 = vmatprep.subr.bf16.mxu0 %v11388_v28  ;;  %v15030_v27 = vld [vmem:[#allocation34_spill] sm:$0xff]  ;;  %v15031_v28 = vld [vmem:[#allocation35_spill] sm:$0xff] }
 0x294   :  { %3880 = vmatprep.subr.bf16.mxu1 %v11391_v29  ;;  %v15032_v29 = vld [vmem:[#allocation36_spill] sm:$0xff] }
 0x296   :  { %3758 = vmatpush1.bf16.msra.mxu0 %v11396_v12  ;;  %v15033_v12 = vld [vmem:[#allocation37_spill] sm:$0xff] }
 0x297   :  { %3881 = vmatpush1.bf16.msra.mxu1 %v11398_v30  ;;  %3759 = vmatprep.subr.bf16.mxu0 %v11400_v31  ;;  %v15034_v30 = vld [vmem:[#allocation38_spill] sm:$0xff]  ;;  %v15035_v31 = vld [vmem:[#allocation39_spill] sm:$0xff] }
 0x298   :  { %3882 = vmatprep.subr.bf16.mxu1 %v11403_v32  ;;  %v15036_v32 = vld [vmem:[#allocation40_spill] sm:$0xff] }
 0x29a   :  { %3760 = vmatpush1.bf16.msra.mxu0 %v11408_v33  ;;  %v15037_v33 = vld [vmem:[#allocation41_spill] sm:$0xff] }
 0x29b   :  { %3883 = vmatpush1.bf16.msra.mxu1 %v11410_v34  ;;  %3761 = vmatprep.subr.bf16.mxu0 %v11412_v36  ;;  %v15038_v34 = vld [vmem:[#allocation42_spill] sm:$0xff]  ;;  %v15039_v36 = vld [vmem:[#allocation43_spill] sm:$0xff] }
 0x29c   :  { %3884 = vmatprep.subr.bf16.mxu1 %v11415_v38  ;;  %v15040_v38 = vld [vmem:[#allocation44_spill] sm:$0xff] }
 0x29d   :  { %15179 = vst [vmem:[#allocation44_spill] sm:$0xff] %v12398_v7 }
 0x29e   :  { %3762 = vmatpush1.bf16.msra.mxu0 %v11420_v39  ;;  %v15041_v39 = vld [vmem:[#allocation45_spill] sm:$0xff] }
 0x29f   :  { %3885 = vmatpush1.bf16.msra.mxu1 %v11422_v40  ;;  %3763 = vmatprep.subr.bf16.mxu0 %v11424_v41  ;;  %v15042_v40 = vld [vmem:[#allocation47_spill] sm:$0xff] }
 0x2a0   :  { %3886 = vmatprep.subr.bf16.mxu1 %v11427_v47  ;;  %v15043_v41 = vld [vmem:[#allocation51_spill] sm:$0xff]  ;;  %v15044_v47 = vld [vmem:[#allocation52_spill] sm:$0xff] }
 0x2a2   :  { %3764 = vmatpush1.bf16.msra.mxu0 %v11432_v48  ;;  %v15045_v48 = vld [vmem:[#allocation53_spill] sm:$0xff] }
 0x2a3   :  { %3887 = vmatpush1.bf16.msra.mxu1 %v11434_v49  ;;  %3765 = vmatprep.subr.bf16.mxu0 %v11436_v21  ;;  %v15046_v49 = vld [vmem:[#allocation54_spill] sm:$0xff]  ;;  %v15047_v21 = vld [vmem:[#allocation55_spill] sm:$0xff] }
 0x2a4   :  { %3888 = vmatprep.subr.bf16.mxu1 %v11439_v57  ;;  %v15048_v57 = vld [vmem:[#allocation56_spill] sm:$0xff] }
 0x2a6   :  { %3766 = vmatpush1.bf16.msra.mxu0 %v11444_v50  ;;  %v15049_v50 = vld [vmem:[#allocation57_spill] sm:$0xff] }
 0x2a7   :  { %3889 = vmatpush1.bf16.msra.mxu1 %v11446_v51  ;;  %3767 = vmatprep.subr.bf16.mxu0 %v11448_v52  ;;  %v15051_v51 = vld [vmem:[#allocation59_spill] sm:$0xff]  ;;  %v15052_v52 = vld [vmem:[#allocation60_spill] sm:$0xff] }
 0x2a8   :  { %3890 = vmatprep.subr.bf16.mxu1 %v11451_v54  ;;  %v15053_v54 = vld [vmem:[#allocation61_spill] sm:$0xff] }
 0x2aa   :  { %3768 = vmatpush1.bf16.msra.mxu0 %v11456_v58  ;;  %v15054_v58 = vld [vmem:[#allocation62_spill] sm:$0xff] }
 0x2ab   :  { %3891 = vmatpush1.bf16.msra.mxu1 %v11458_v59  ;;  %3769 = vmatprep.subr.bf16.mxu0 %v11460_v60  ;;  %v15055_v59 = vld [vmem:[#allocation63_spill] sm:$0xff]  ;;  %v15056_v60 = vld [vmem:[#allocation64_spill] sm:$0xff] }
 0x2ac   :  { %3892 = vmatprep.subr.bf16.mxu1 %v11463_v61  ;;  %v15057_v61 = vld [vmem:[#allocation65_spill] sm:$0xff] }
 0x2ae   :  { %3770 = vmatpush1.bf16.msra.mxu0 %v11468_v62  ;;  %v15058_v62 = vld [vmem:[#allocation66_spill] sm:$0xff] }
 0x2af   :  { %3893 = vmatpush1.bf16.msra.mxu1 %v11470_v63  ;;  %3780 = vmatprep.subr.bf16.mxu0 %v11472_v0  ;;  %v15059_v63 = vld [vmem:[#allocation67_spill] sm:$0xff]  ;;  %v15060_v0 = vld [vmem:[#allocation68_spill] sm:$0xff] }
 0x2b0   :  { %3903 = vmatprep.subr.bf16.mxu1 %v11475_v1  ;;  %v15061_v1 = vld [vmem:[#allocation69_spill] sm:$0xff] }
 0x2b1   :  { %3772 = vmatmul.mubr.bf16.vlgmr.msra.gmra.mrb[20].mxu0 %v11699_v15 }
 0x2b2   :  { %3895 = vmatmul.mubr.bf16.vlgmr.msra.gmra.mrb[20].mxu1 %v11699_v15  ;;  %3781 = vmatpush1.bf16.msra.mxu0 %v11480_v2  ;;  %v15062_v2 = vld [vmem:[#allocation70_spill] sm:$0xff] }
 0x2b3   :  { %3812 = vmatprep.mubr.bf16.mxu0 %v12033_v19  ;;  %3904 = vmatpush1.bf16.msra.mxu1 %v11482_v3  ;;  %v15063_v3 = vld [vmem:[#allocation71_spill] sm:$0xff] }
 0x2b4   :  { %3935 = vmatprep.mubr.bf16.mxu1 %v12033_v19  ;;  %3782 = vmatprep.subr.bf16.mxu0 %v11485_v4  ;;  %v14528_v4 = vsub.s32 4, %v11312_v43 }
 0x2b5   :  { %3905 = vmatprep.subr.bf16.mxu1 %v11494_v16  ;;  %v15064_v16 = vld [vmem:[#allocation72_spill] sm:$0xff] }
 0x2b6   :  { %3783 = vmatpush1.bf16.msra.mxu0 %v11497_v17  ;;  %v15065_v17 = vld [vmem:[#allocation73_spill] sm:$0xff]  ;;  %v392_v42 = vrot.slane %v11664_v53, %v14528_v4  ;;  %v15075_v53 = vld [vmem:[#allocation83_spill] sm:$0xff]  ;;  %v12395_v4 = vld [vmem:[#allocation9 + $0x448] ss:$16 sps:$4 sm:$0xff]  }
 0x2b7   :  { %3906 = vmatpush1.bf16.msra.mxu1 %v15025_v11  ;;  %3784 = vmatprep.subr.bf16.mxu0 %v15026_v23  ;;  %v15068_v11 = vld [vmem:[#allocation77_spill] sm:$0xff]  ;;  %v15069_v23 = vld [vmem:[#allocation78_spill] sm:$0xff]  ;;  %15178 = vst [vmem:[#allocation43_spill] sm:$0xff] %v12395_v4 }
 0x2b8   :  { %3907 = vmatprep.subr.bf16.mxu1 %v15027_v24  ;;  %v15070_v24 = vld [vmem:[#allocation79_spill] sm:$0xff] }
 0x2ba   :  { %3785 = vmatpush1.bf16.msra.mxu0 %v15028_v25  ;;  %v15071_v25 = vld [vmem:[#allocation80_spill] sm:$0xff] }
 0x2bb   :  { %3908 = vmatpush1.bf16.msra.mxu1 %v15029_v26  ;;  %3786 = vmatprep.subr.bf16.mxu0 %v15030_v27  ;;  %v15072_v26 = vld [vmem:[#allocation26_spill] sm:$0xff] }
 0x2bc   :  { %3909 = vmatprep.subr.bf16.mxu1 %v15031_v28  ;;  %v1857_v27 = vadd.f32 %v15072_v26, %v392_v42  ;;  %v15073_v28 = vld [vmem:[#allocation81_spill] sm:$0xff]  ;;  %v10067_v26 = vld [vmem:[#allocation11 + $0x178] sm:$0xff]  }
 0x2be   :  { %3787 = vmatpush1.bf16.msra.mxu0 %v15032_v29  ;;  %v15074_v29 = vld [vmem:[#allocation82_spill] sm:$0xff] }
 0x2bf   :  { %3910 = vmatpush1.bf16.msra.mxu1 %v15033_v12  ;;  %3788 = vmatprep.subr.bf16.mxu0 %v15034_v30  ;;  %v2074_v12 = vmax.f32 %v1857_v27, 0.0  ;;  %v15076_v30 = vld [vmem:[#allocation84_spill] sm:$0xff]  ;;  %v10068_v27 = vld [vmem:[#allocation11 + $0x1f8] sm:$0xff]  }
 0x2c0   :  { %3911 = vmatprep.subr.bf16.mxu1 %v15035_v31  ;;  %v10039_v31 = vld [vmem:[#allocation11 + $0x140] sm:$0xff]  }
 0x2c2   :  { %3789 = vmatpush1.bf16.msra.mxu0 %v15036_v32  ;;  %v15077_v32 = vld [vmem:[#allocation85_spill] sm:$0xff] }
 0x2c3   :  { %3912 = vmatpush1.bf16.msra.mxu1 %v15037_v33  ;;  %3790 = vmatprep.subr.bf16.mxu0 %v15038_v34  ;;  %v10040_v33 = vld [vmem:[#allocation11 + $0x1c0] sm:$0xff]   ;;  %v15078_v34 = vld [vmem:[#allocation86_spill] sm:$0xff] }
 0x2c4   :  { %3913 = vmatprep.subr.bf16.mxu1 %v15039_v36  ;;  %v10041_v36 = vld [vmem:[#allocation11 + $0x100] sm:$0xff]  }
 0x2c6   :  { %3791 = vmatpush1.bf16.msra.mxu0 %v11555_v22  ;;  %v15050_v22 = vld [vmem:[#allocation58_spill] sm:$0xff] }
 0x2c7   :  { %3914 = vmatpush1.bf16.msra.mxu1 %v15040_v38  ;;  %3792 = vmatprep.subr.bf16.mxu0 %v15041_v39  ;;  %v12105_v38 = vpack.c.bf16 %v2074_v12, %v2074_v12  ;;  %v10043_v39 = vld [vmem:[#allocation11 + $0x148] sm:$0xff]   ;;  %v10071_v12 = vld [vmem:[#allocation11 + $0x40] sm:$0xff]  }
 0x2c8   :  { %3915 = vmatprep.subr.bf16.mxu1 %v15042_v40  ;;  %v10044_v40 = vld [vmem:[#allocation11 + $0x1c8] sm:$0xff]  }
 0x2ca   :  { %3793 = vmatpush1.bf16.msra.mxu0 %v15043_v41  ;;  %v10045_v41 = vld [vmem:[#allocation11 + $0x108] sm:$0xff]  }
 0x2cb   :  { %3916 = vmatpush1.bf16.msra.mxu1 %v15044_v47  ;;  %3794 = vmatprep.subr.bf16.mxu0 %v15045_v48  ;;  %v10046_v47 = vld [vmem:[#allocation11 + $0x188] sm:$0xff]   ;;  %v10047_v48 = vld [vmem:[#allocation11 + $0x150] sm:$0xff]  }
 0x2cc   :  { %3917 = vmatprep.subr.bf16.mxu1 %v15046_v49  ;;  %v10048_v49 = vld [vmem:[#allocation11 + $0x1d0] sm:$0xff]  }
 0x2ce   :  { %3795 = vmatpush1.bf16.msra.mxu0 %v15047_v21  ;;  %v10049_v21 = vld [vmem:[#allocation11 + $0x110] sm:$0xff]  }
 0x2cf   :  { %3918 = vmatpush1.bf16.msra.mxu1 %v15048_v57  ;;  %3796 = vmatprep.subr.bf16.mxu0 %v15049_v50  ;;  %v10050_v57 = vld [vmem:[#allocation11 + $0x190] sm:$0xff]   ;;  %v10051_v50 = vld [vmem:[#allocation11 + $0x158] sm:$0xff]  }
 0x2d0   :  { %3919 = vmatprep.subr.bf16.mxu1 %v15050_v22  ;;  %v10052_v22 = vld [vmem:[#allocation11 + $0x1d8] sm:$0xff]  }
 0x2d2   :  { %3797 = vmatpush1.bf16.msra.mxu0 %v15051_v51  ;;  %v10053_v51 = vld [vmem:[#allocation11 + $0x118] sm:$0xff]  }
 0x2d3   :  { %3920 = vmatpush1.bf16.msra.mxu1 %v15052_v52  ;;  %3798 = vmatprep.subr.bf16.mxu0 %v15053_v54  ;;  %v10054_v52 = vld [vmem:[#allocation11 + $0x198] sm:$0xff]   ;;  %v10055_v54 = vld [vmem:[#allocation11 + $0x160] sm:$0xff]  }
 0x2d4   :  { %3921 = vmatprep.subr.bf16.mxu1 %v15054_v58  ;;  %v10056_v58 = vld [vmem:[#allocation11 + $0x1e0] sm:$0xff]  }
 0x2d6   :  { %3799 = vmatpush1.bf16.msra.mxu0 %v15055_v59  ;;  %v10057_v59 = vld [vmem:[#allocation11 + $0x120] sm:$0xff]  }
 0x2d7   :  { %3922 = vmatpush1.bf16.msra.mxu1 %v15056_v60  ;;  %3800 = vmatprep.subr.bf16.mxu0 %v15057_v61  ;;  %v10058_v60 = vld [vmem:[#allocation11 + $0x1a0] sm:$0xff]   ;;  %v10059_v61 = vld [vmem:[#allocation11 + $0x168] sm:$0xff]  }
 0x2d8   :  { %3923 = vmatprep.subr.bf16.mxu1 %v15058_v62  ;;  %v10060_v62 = vld [vmem:[#allocation11 + $0x1e8] sm:$0xff]  }
 0x2da   :  { %3801 = vmatpush1.bf16.msra.mxu0 %v15059_v63  ;;  %v10061_v63 = vld [vmem:[#allocation11 + $0x128] sm:$0xff]  }
 0x2db   :  { %3924 = vmatpush1.bf16.msra.mxu1 %v15060_v0  ;;  %3802 = vmatprep.subr.bf16.mxu0 %v15061_v1  ;;  %v10062_v0 = vld [vmem:[#allocation11 + $0x1a8] sm:$0xff]  }
 0x2dc   :  { %3925 = vmatprep.subr.bf16.mxu1 %v15062_v2 }
 0x2de   :  { %3803 = vmatpush1.bf16.msra.mxu0 %v15063_v3 }
 0x2df   :  { %3926 = vmatpush1.bf16.msra.mxu1 %v15064_v16  ;;  %3804 = vmatprep.subr.bf16.mxu0 %v15065_v17 }
 0x2e0   :  { %3927 = vmatprep.subr.bf16.mxu1 %v15066_v13 }
 0x2e2   :  { %3805 = vmatpush1.bf16.msra.mxu0 %v15067_v14 }
 0x2e3   :  { %3928 = vmatpush1.bf16.msra.mxu1 %v15068_v11  ;;  %3806 = vmatprep.subr.bf16.mxu0 %v15069_v23  ;;  %v10063_v11 = vld [vmem:[#allocation11 + $0x170] sm:$0xff]  }
 0x2e4   :  { %3929 = vmatprep.subr.bf16.mxu1 %v15070_v24  ;;  %v10064_v23 = vld [vmem:[#allocation11 + $0x1f0] sm:$0xff]  }
 0x2e5   :  { %v10065_v24 = vld [vmem:[#allocation11 + $0x130] sm:$0xff]  }
 0x2e6   :  { %3807 = vmatpush1.bf16.msra.mxu0 %v15071_v25  ;;  %v10066_v25 = vld [vmem:[#allocation11 + $0x1b0] sm:$0xff]  }
 0x2e7   :  { %3930 = vmatpush1.bf16.msra.mxu1 %v11670_v46  ;;  %3808 = vmatprep.subr.bf16.mxu0 %v11672_v20  ;;  %v15079_v46 = vld [vmem:[#allocation87_spill] sm:$0xff] }
 0x2e8   :  { %3931 = vmatprep.subr.bf16.mxu1 %v15073_v28  ;;  %v10042_v20 = vld [vmem:[#allocation11 + $0x180] sm:$0xff]   ;;  %v10069_v28 = vld [vmem:[#allocation11 + $0x138] sm:$0xff]  }
 0x2ea   :  { %3809 = vmatpush1.bf16.msra.mxu0 %v15074_v29  ;;  %v10070_v29 = vld [vmem:[#allocation11 + $0x1b8] sm:$0xff]  }
 0x2eb   :  { %3932 = vmatpush1.bf16.msra.mxu1 %v15075_v53  ;;  %3810 = vmatprep.subr.bf16.mxu0 %v15076_v30  ;;  %v10072_v53 = vld [vmem:[#allocation11 + $0xc0] sm:$0xff]   ;;  %v2350_v30 = vld [vmem:[%s14376_s4] sm:$0xf] }
 0x2ec   :  { %3933 = vmatprep.subr.bf16.mxu1 %v15077_v32 }
 0x2ee   :  { %3811 = vmatpush1.bf16.msra.mxu0 %v15078_v34 }
 0x2ef   :  { %3934 = vmatpush1.bf16.msra.mxu1 %v15079_v46  ;;  %9193 = vmatprep.subr.bf16.mxu0 %v10039_v31  ;;  %v15080_v31 = vld [vmem:[#allocation23_spill] sm:$0xff] }
 0x2f0   :  { %9215 = vmatprep.subr.bf16.mxu1 %v10040_v33  ;;  %v12118_v32 = vrot.slane %v2350_v30, %v15080_v31  ;;  %v15081_v33 = vld [vmem:[#allocation24_spill] sm:$0xff] }
 0x2f1   :  { %3813 = vmatmul.mubr.bf16.vlgmr.msra.gmra.mrb[20].mxu0 %v12105_v38  ;;  %v12121_v34 = vrot.slane %v2350_v30, %v15081_v33  ;;  %v12404_v33 = vld [vmem:[#allocation9 + $0x460] ss:$16 sps:$4 sm:$0xff]  }
 0x2f2   :  { %3936 = vmatmul.mubr.bf16.vlgmr.msra.gmra.mrb[20].mxu1 %v12105_v38  ;;  %9194 = vmatpush3.bf16.msra.mxu0 %v10041_v36  ;;  %v15082_v36 = vld [vmem:[#allocation22_spill] sm:$0xff]  ;;  %15181 = vst [vmem:[#allocation47_spill] sm:$0xff] %v12404_v33 }
 0x2f3   :  { %9216 = vmatpush3.bf16.msra.mxu1 %v10042_v20  ;;  %9195 = vmatprep.subr.bf16.mxu0 %v10043_v39  ;;  %v12124_v46 = vrot.slane %v2350_v30, %v15082_v36  ;;  %v15084_v20 = vld [vmem:[#allocation76_spill] sm:$0xff] }
 0x2f4   :  { %9217 = vmatprep.subr.bf16.mxu1 %v10044_v40  ;;  %v12127_v39 = vrot.slane %v2350_v30, %v15084_v20  ;;  %v10082_v30 = vld [vmem:[#allocation11 + $0x90] sm:$0xff]   ;;  %v12401_v20 = vld [vmem:[#allocation9 + $0x46c] ss:$16 sps:$4 sm:$0xff]   ;;  %v12407_v36 = vld [vmem:[#allocation9 + $0x468] ss:$16 sps:$4 sm:$0xff]  }
 0x2f5   :  { %15083 = vst [vmem:[#allocation29_spill] sm:$0xff] %v12124_v46  ;;  %15180 = vst [vmem:[#allocation45_spill] sm:$0xff] %v12401_v20 }
 0x2f6   :  { %9196 = vmatpush3.bf16.msra.mxu0 %v10045_v41  ;;  %15182 = vst [vmem:[#allocation51_spill] sm:$0xff] %v12407_v36 }
 0x2f7   :  { %9218 = vmatpush3.bf16.msra.mxu1 %v10046_v47  ;;  %9197 = vmatprep.subr.bf16.mxu0 %v10047_v48 }
 0x2f8   :  { %9219 = vmatprep.subr.bf16.mxu1 %v10048_v49 }
 0x2fa   :  { %9198 = vmatpush3.bf16.msra.mxu0 %v10049_v21 }
 0x2fb   :  { %9220 = vmatpush3.bf16.msra.mxu1 %v10050_v57  ;;  %9199 = vmatprep.subr.bf16.mxu0 %v10051_v50 }
 0x2fc   :  { %9221 = vmatprep.subr.bf16.mxu1 %v10052_v22 }
 0x2fe   :  { %9200 = vmatpush3.bf16.msra.mxu0 %v10053_v51 }
 0x2ff   :  { %9222 = vmatpush3.bf16.msra.mxu1 %v10054_v52  ;;  %9201 = vmatprep.subr.bf16.mxu0 %v10055_v54 }
 0x300   :  { %9223 = vmatprep.subr.bf16.mxu1 %v10056_v58 }
 0x302   :  { %9202 = vmatpush3.bf16.msra.mxu0 %v10057_v59 }
 0x303   :  { %9224 = vmatpush3.bf16.msra.mxu1 %v10058_v60  ;;  %9203 = vmatprep.subr.bf16.mxu0 %v10059_v61 }
 0x304   :  { %v12110_v1 = vpop.f32.mrb[16].mxu0  ;;  %9225 = vmatprep.subr.bf16.mxu1 %v10060_v62 }
 0x305   :  { %v12112_v2 = vpop.f32.mrb[16].mxu1  ;;  %v3474_v3 = vpop.f32.mrb[17].mxu0 }
 0x306   :  { %v3597_v16 = vpop.f32.mrb[17].mxu1  ;;  %v3476_v17 = vpop.f32.mrb[18].mxu0  ;;  %9204 = vmatpush3.bf16.msra.mxu0 %v10061_v63  ;;  %v9575_v41 = vadd.f32 %v3474_v3, %v12118_v32 }
 0x307   :  { %v3599_v13 = vpop.f32.mrb[18].mxu1  ;;  %v3477_v14 = vpop.f32.mrb[19].mxu0  ;;  %9226 = vmatpush3.bf16.msra.mxu1 %v10062_v0  ;;  %9205 = vmatprep.subr.bf16.mxu0 %v10063_v11  ;;  %v9577_v21 = vadd.f32 %v3597_v16, %v12121_v34 }
 0x308   :  { %v3600_v42 = vpop.f32.mrb[19].mxu1  ;;  %9227 = vmatprep.subr.bf16.mxu1 %v10064_v23  ;;  %v3603_v63 = vmax.f32 %v9575_v41, 0.0  ;;  %v10073_v13 = vld [vmem:[#allocation11] sm:$0xff]   ;;  %v10075_v23 = vld [vmem:[#allocation11 + $0x48] sm:$0xff]   ;;  %v10084_v41 = vld [vmem:[#allocation11 + $0xd8] sm:$0xff]  }
 0x309   :  { %v3605_v3 = vmax.f32 %v9577_v21, 0.0  ;;  %v10074_v42 = vld [vmem:[#allocation11 + $0x80] sm:$0xff]  }
 0x30a   :  { %9206 = vmatpush3.bf16.msra.mxu0 %v10065_v24  ;;  %v3671_v24 = vpack.c.bf16 %v3603_v63, %v3603_v63  ;;  %v10088_v21 = vld [vmem:[#allocation11 + $0xe0] sm:$0xff]   ;;  %v10099_v63 = vld [vmem:[#allocation11 + $0x78] sm:$0xff]  }
 0x30b   :  { %9228 = vmatpush3.bf16.msra.mxu1 %v10066_v25  ;;  %9207 = vmatprep.subr.bf16.mxu0 %v10067_v26  ;;  %v10076_v25 = vld [vmem:[#allocation11 + $0xc8] sm:$0xff]   ;;  %v3673_v26 = vpack.c.bf16 %v3605_v3, %v3605_v3  ;;  %v10100_v3 = vld [vmem:[#allocation11 + $0xf8] sm:$0xff]  }
 0x30c   :  { %9229 = vmatprep.subr.bf16.mxu1 %v10068_v27  ;;  %v10077_v27 = vld [vmem:[#allocation11 + $0x8] sm:$0xff]  }
 0x30e   :  { %9208 = vmatpush3.bf16.msra.mxu0 %v10069_v28  ;;  %v10078_v28 = vld [vmem:[#allocation11 + $0x88] sm:$0xff]  }
 0x30f   :  { %9230 = vmatpush3.bf16.msra.mxu1 %v10070_v29  ;;  %9237 = vmatprep.subr.bf16.mxu0 %v10071_v12  ;;  %v10079_v29 = vld [vmem:[#allocation11 + $0x50] sm:$0xff]  }
 0x310   :  { %9259 = vmatprep.subr.bf16.mxu1 %v10072_v53  ;;  %v10080_v12 = vld [vmem:[#allocation11 + $0xd0] sm:$0xff]  }
 0x311   :  { %v10081_v53 = vld [vmem:[#allocation11 + $0x10] sm:$0xff]  }
 0x3c4   :  { %v3814_v40 = vpop.f32.mrb[20].mxu0 }
 0x3c5   :  { %v9578_v47 = vadd.f32 %v3814_v40, %v12124_v46  ;;  %v3937_v48 = vpop.f32.mrb[20].mxu1  ;;  %v3816_v49 = vpop.f32.mrb[21].mxu0  ;;  %v10083_v40 = vld [vmem:[#allocation11 + $0x58] sm:$0xff]  }
 0x3c6   :  { %v9580_v57 = vadd.f32 %v3937_v48, %v12127_v39  ;;  %v9579_v50 = vadd.f32 %v3816_v49, %v12118_v32  ;;  %v3939_v22 = vpop.f32.mrb[21].mxu1  ;;  %v3818_v51 = vpop.f32.mrb[22].mxu0  ;;  %v10086_v48 = vld [vmem:[#allocation11 + $0x98] sm:$0xff]   ;;  %v10087_v49 = vld [vmem:[#allocation11 + $0x60] sm:$0xff]  }
 0x3c7   :  { %v3944_v52 = vmax.f32 %v9578_v47, 0.0  ;;  %v9581_v54 = vadd.f32 %v3939_v22, %v12121_v34  ;;  %v3941_v58 = vpop.f32.mrb[22].mxu1  ;;  %v3819_v59 = vpop.f32.mrb[23].mxu0  ;;  %v10085_v47 = vld [vmem:[#allocation11 + $0x18] sm:$0xff]   ;;  %v10091_v22 = vld [vmem:[#allocation11 + $0x68] sm:$0xff]  }
 0x3c8   :  { %v3946_v60 = vmax.f32 %v9580_v57, 0.0  ;;  %v3945_v61 = vmax.f32 %v9579_v50, 0.0  ;;  %v3942_v62 = vpop.f32.mrb[23].mxu1  ;;  %v10089_v57 = vld [vmem:[#allocation11 + $0x20] sm:$0xff]   ;;  %v10092_v51 = vld [vmem:[#allocation11 + $0xe8] sm:$0xff]   ;;  %v10095_v58 = vld [vmem:[#allocation11 + $0x70] sm:$0xff]  }
 0x3c9   :  { %v3947_v0 = vmax.f32 %v9581_v54, 0.0  ;;  %v4013_v16 = vpack.c.bf16 %v3944_v52, %v3944_v52  ;;  %v10090_v50 = vld [vmem:[#allocation11 + $0xa0] sm:$0xff]   ;;  %v10093_v52 = vld [vmem:[#allocation11 + $0x28] sm:$0xff]   ;;  %v10096_v59 = vld [vmem:[#allocation11 + $0xf0] sm:$0xff]  }
 0x3ca   :  { %v4014_v17 = vpack.c.bf16 %v3945_v61, %v3945_v61  ;;  %v4015_v11 = vpack.c.bf16 %v3946_v60, %v3946_v60  ;;  %v10094_v54 = vld [vmem:[#allocation11 + $0xa8] sm:$0xff]   ;;  %v10097_v60 = vld [vmem:[#allocation11 + $0x30] sm:$0xff]   ;;  %v9574_v61 = vadd.f32 %v12110_v1, %v12124_v46 }
 0x3cb   :  { %v4016_v14 = vpack.c.bf16 %v3947_v0, %v3947_v0  ;;  %v10098_v62 = vld [vmem:[#allocation11 + $0xb0] sm:$0xff]   ;;  %v9576_v0 = vadd.f32 %v12112_v2, %v12127_v39  ;;  %v15085_v1 = vld [vmem:[#allocation88_spill] sm:$0xff]  ;;  %v15087_v2 = vld [vmem:[#allocation90_spill] sm:$0xff] }
 0x3cc   :  { %4241 = vmatprep.mubr.bf16.mxu0 %v4014_v17  ;;  %v10101_v17 = vld [vmem:[#allocation11 + $0x38] sm:$0xff]  }
 0x3cd   :  { %4281 = vmatprep.mubr.bf16.mxu1 %v4016_v14  ;;  %4242 = vmatmul.mubr.bf16.vlgmr.msra.gmra.mrb[24].mxu0 %v4013_v16  ;;  %v10102_v16 = vld [vmem:[#allocation11 + $0xb8] sm:$0xff]   ;;  %v3604_v14 = vmax.f32 %v9576_v0, 0.0  ;;  %v15120_v0 = vld [vmem:[#allocation127_spill] sm:$0xff] }
 0x3ce   :  { %4282 = vmatmul.mubr.bf16.vlgmr.msra.gmra.mrb[24].mxu1 %v4015_v11  ;;  %9238 = vmatpush3.bf16.msra.mxu0 %v10073_v13  ;;  %v3602_v13 = vmax.f32 %v9574_v61, 0.0  ;;  %v15113_v61 = vld [vmem:[#allocation120_spill] sm:$0xff] }
 0x3cf   :  { %9260 = vmatpush3.bf16.msra.mxu1 %v10074_v42  ;;  %4513 = vmatprep.mubr.bf16.mxu0 %v3671_v24  ;;  %v3672_v11 = vpack.c.bf16 %v3604_v14, %v3604_v14  ;;  %v15088_v24 = vld [vmem:[#allocation91_spill] sm:$0xff]  ;;  %v15125_v14 = vld [vmem:[#allocation132_spill] sm:$0xff] }
 0x3d0   :  { %4553 = vmatprep.mubr.bf16.mxu1 %v3673_v26  ;;  %9239 = vmatprep.subr.bf16.mxu0 %v10075_v23  ;;  %v3670_v42 = vpack.c.bf16 %v3602_v13, %v3602_v13  ;;  %v15086_v23 = vld [vmem:[#allocation89_spill] sm:$0xff]  ;;  %v15123_v13 = vld [vmem:[#allocation130_spill] sm:$0xff] }
 0x3d1   :  { %9261 = vmatprep.subr.bf16.mxu1 %v10076_v25  ;;  %v15089_v25 = vld [vmem:[#allocation92_spill] sm:$0xff]  ;;  %v15090_v26 = vld [vmem:[#allocation93_spill] sm:$0xff] }
 0x3d2   :  { %9240 = vmatpush3.bf16.msra.mxu0 %v10077_v27  ;;  %v15091_v27 = vld [vmem:[#allocation94_spill] sm:$0xff] }
 0x3d3   :  { %9262 = vmatpush3.bf16.msra.mxu1 %v10078_v28  ;;  %9241 = vmatprep.subr.bf16.mxu0 %v10079_v29  ;;  %v15092_v28 = vld [vmem:[#allocation95_spill] sm:$0xff]  ;;  %v15093_v29 = vld [vmem:[#allocation96_spill] sm:$0xff] }
 0x3d4   :  { %9263 = vmatprep.subr.bf16.mxu1 %v10080_v12  ;;  %v15094_v12 = vld [vmem:[#allocation97_spill] sm:$0xff] }
 0x3d6   :  { %9242 = vmatpush3.bf16.msra.mxu0 %v10081_v53  ;;  %v15095_v53 = vld [vmem:[#allocation98_spill] sm:$0xff] }
 0x3d7   :  { %9264 = vmatpush3.bf16.msra.mxu1 %v10082_v30  ;;  %9243 = vmatprep.subr.bf16.mxu0 %v10083_v40  ;;  %v15096_v30 = vld [vmem:[#allocation99_spill] sm:$0xff]  ;;  %v15097_v40 = vld [vmem:[#allocation100_spill] sm:$0xff] }
 0x3d8   :  { %9265 = vmatprep.subr.bf16.mxu1 %v10084_v41  ;;  %v15098_v41 = vld [vmem:[#allocation101_spill] sm:$0xff] }
 0x3da   :  { %9244 = vmatpush3.bf16.msra.mxu0 %v10085_v47  ;;  %v15100_v47 = vld [vmem:[#allocation103_spill] sm:$0xff] }
 0x3db   :  { %9266 = vmatpush3.bf16.msra.mxu1 %v10086_v48  ;;  %9245 = vmatprep.subr.bf16.mxu0 %v10087_v49  ;;  %v15101_v48 = vld [vmem:[#allocation104_spill] sm:$0xff]  ;;  %v15102_v49 = vld [vmem:[#allocation105_spill] sm:$0xff] }
 0x3dc   :  { %9267 = vmatprep.subr.bf16.mxu1 %v10088_v21  ;;  %v15103_v21 = vld [vmem:[#allocation106_spill] sm:$0xff] }
 0x3de   :  { %9246 = vmatpush3.bf16.msra.mxu0 %v10089_v57  ;;  %v15104_v57 = vld [vmem:[#allocation107_spill] sm:$0xff] }
 0x3df   :  { %9268 = vmatpush3.bf16.msra.mxu1 %v10090_v50  ;;  %9247 = vmatprep.subr.bf16.mxu0 %v10091_v22  ;;  %v15105_v50 = vld [vmem:[#allocation108_spill] sm:$0xff]  ;;  %v15106_v22 = vld [vmem:[#allocation110_spill] sm:$0xff] }
 0x3e0   :  { %9269 = vmatprep.subr.bf16.mxu1 %v10092_v51  ;;  %v15107_v51 = vld [vmem:[#allocation114_spill] sm:$0xff] }
 0x3e2   :  { %9248 = vmatpush3.bf16.msra.mxu0 %v10093_v52  ;;  %v15108_v52 = vld [vmem:[#allocation115_spill] sm:$0xff] }
 0x3e3   :  { %9270 = vmatpush3.bf16.msra.mxu1 %v10094_v54  ;;  %9249 = vmatprep.subr.bf16.mxu0 %v10095_v58  ;;  %v15109_v54 = vld [vmem:[#allocation116_spill] sm:$0xff]  ;;  %v15110_v58 = vld [vmem:[#allocation117_spill] sm:$0xff] }
 0x3e4   :  { %9271 = vmatprep.subr.bf16.mxu1 %v10096_v59  ;;  %v15111_v59 = vld [vmem:[#allocation118_spill] sm:$0xff] }
 0x3e6   :  { %9250 = vmatpush3.bf16.msra.mxu0 %v10097_v60  ;;  %v15112_v60 = vld [vmem:[#allocation119_spill] sm:$0xff] }
 0x3e7   :  { %9272 = vmatpush3.bf16.msra.mxu1 %v10098_v62  ;;  %9251 = vmatprep.subr.bf16.mxu0 %v10099_v63  ;;  %v15118_v62 = vld [vmem:[#allocation125_spill] sm:$0xff]  ;;  %v15119_v63 = vld [vmem:[#allocation126_spill] sm:$0xff] }
 0x3e8   :  { %9273 = vmatprep.subr.bf16.mxu1 %v10100_v3  ;;  %v15121_v3 = vld [vmem:[#allocation128_spill] sm:$0xff] }
 0x3ea   :  { %9252 = vmatpush3.bf16.msra.mxu0 %v10101_v17  ;;  %v15122_v17 = vld [vmem:[#allocation129_spill] sm:$0xff] }
 0x3eb   :  { %9274 = vmatpush3.bf16.msra.mxu1 %v10102_v16  ;;  %4585 = vmatprep.subr.bf16.mxu0 %v15085_v1  ;;  %v15124_v16 = vld [vmem:[#allocation131_spill] sm:$0xff]  ;;  %v15127_v1 = vld [vmem:[#allocation134_spill] sm:$0xff] }
 0x3ec   :  { %4708 = vmatprep.subr.bf16.mxu1 %v15086_v23  ;;  %v15129_v23 = vld [vmem:[#allocation136_spill] sm:$0xff] }
 0x3ed   :  { %4514 = vmatmul.mubr.bf16.vlgmr.msra.gmra.mrb[28].mxu0 %v3670_v42  ;;  %v15126_v42 = vld [vmem:[#allocation133_spill] sm:$0xff] }
 0x3ee   :  { %4554 = vmatmul.mubr.bf16.vlgmr.msra.gmra.mrb[28].mxu1 %v3672_v11  ;;  %4586 = vmatpush1.bf16.msra.mxu0 %v15087_v2  ;;  %v15128_v11 = vld [vmem:[#allocation135_spill] sm:$0xff]  ;;  %v15130_v2 = vld [vmem:[#allocation137_spill] sm:$0xff] }
 0x3ef   :  { %4617 = vmatprep.mubr.bf16.mxu0 %v11502_v18  ;;  %4709 = vmatpush1.bf16.msra.mxu1 %v15088_v24  ;;  %v15131_v24 = vld [vmem:[#allocation138_spill] sm:$0xff] }
 0x3f0   :  { %4740 = vmatprep.mubr.bf16.mxu1 %v11502_v18  ;;  %4587 = vmatprep.subr.bf16.mxu0 %v15089_v25  ;;  %v15099_v18 = vld [vmem:[#allocation102_spill] sm:$0xff]  ;;  %v15132_v25 = vld [vmem:[#allocation139_spill] sm:$0xff] }
 0x3f1   :  { %4710 = vmatprep.subr.bf16.mxu1 %v15090_v26  ;;  %v15133_v26 = vld [vmem:[#allocation140_spill] sm:$0xff] }
 0x3f2   :  { %4588 = vmatpush1.bf16.msra.mxu0 %v15091_v27  ;;  %v15134_v27 = vld [vmem:[#allocation141_spill] sm:$0xff] }
 0x3f3   :  { %4711 = vmatpush1.bf16.msra.mxu1 %v15092_v28  ;;  %4589 = vmatprep.subr.bf16.mxu0 %v15093_v29  ;;  %v15135_v28 = vld [vmem:[#allocation142_spill] sm:$0xff]  ;;  %v15136_v29 = vld [vmem:[#allocation143_spill] sm:$0xff] }
 0x3f4   :  { %4712 = vmatprep.subr.bf16.mxu1 %v15094_v12  ;;  %v15137_v12 = vld [vmem:[#allocation144_spill] sm:$0xff] }
 0x3f6   :  { %4590 = vmatpush1.bf16.msra.mxu0 %v15095_v53  ;;  %v15138_v53 = vld [vmem:[#allocation145_spill] sm:$0xff] }
 0x3f7   :  { %4713 = vmatpush1.bf16.msra.mxu1 %v15096_v30  ;;  %4591 = vmatprep.subr.bf16.mxu0 %v15097_v40  ;;  %v15139_v30 = vld [vmem:[#allocation146_spill] sm:$0xff]  ;;  %v15140_v40 = vld [vmem:[#allocation147_spill] sm:$0xff] }
 0x3f8   :  { %4714 = vmatprep.subr.bf16.mxu1 %v15098_v41  ;;  %v15141_v41 = vld [vmem:[#allocation148_spill] sm:$0xff] }
 0x3fa   :  { %4592 = vmatpush1.bf16.msra.mxu0 %v15099_v18  ;;  %v15142_v18 = vld [vmem:[#allocation149_spill] sm:$0xff] }
 0x3fb   :  { %4715 = vmatpush1.bf16.msra.mxu1 %v15100_v47  ;;  %4593 = vmatprep.subr.bf16.mxu0 %v15101_v48  ;;  %v15143_v47 = vld [vmem:[#allocation150_spill] sm:$0xff]  ;;  %v15144_v48 = vld [vmem:[#allocation151_spill] sm:$0xff] }
 0x3fc   :  { %4716 = vmatprep.subr.bf16.mxu1 %v15102_v49  ;;  %v15145_v49 = vld [vmem:[#allocation152_spill] sm:$0xff] }
 0x3fe   :  { %4594 = vmatpush1.bf16.msra.mxu0 %v15103_v21  ;;  %v15146_v21 = vld [vmem:[#allocation153_spill] sm:$0xff] }
 0x3ff   :  { %4717 = vmatpush1.bf16.msra.mxu1 %v15104_v57  ;;  %4595 = vmatprep.subr.bf16.mxu0 %v15105_v50  ;;  %v15147_v57 = vld [vmem:[#allocation154_spill] sm:$0xff]  ;;  %v15149_v50 = vld [vmem:[#allocation156_spill] sm:$0xff] }
 0x400   :  { %4718 = vmatprep.subr.bf16.mxu1 %v15106_v22  ;;  %v15150_v22 = vld [vmem:[#allocation157_spill] sm:$0xff] }
 0x402   :  { %4596 = vmatpush1.bf16.msra.mxu0 %v11780_v35  ;;  %v15114_v35 = vld [vmem:[#allocation121_spill] sm:$0xff] }
 0x403   :  { %4719 = vmatpush1.bf16.msra.mxu1 %v11783_v56  ;;  %4597 = vmatprep.subr.bf16.mxu0 %v11786_v55  ;;  %v15115_v56 = vld [vmem:[#allocation122_spill] sm:$0xff]  ;;  %v15116_v55 = vld [vmem:[#allocation123_spill] sm:$0xff] }
 0x404   :  { %4720 = vmatprep.subr.bf16.mxu1 %v11789_v37  ;;  %v15117_v37 = vld [vmem:[#allocation124_spill] sm:$0xff] }
 0x406   :  { %4598 = vmatpush1.bf16.msra.mxu0 %v15107_v51  ;;  %v15151_v51 = vld [vmem:[#allocation158_spill] sm:$0xff] }
 0x407   :  { %4721 = vmatpush1.bf16.msra.mxu1 %v15108_v52  ;;  %4599 = vmatprep.subr.bf16.mxu0 %v15109_v54  ;;  %v15152_v52 = vld [vmem:[#allocation159_spill] sm:$0xff]  ;;  %v15153_v54 = vld [vmem:[#allocation160_spill] sm:$0xff] }
 0x408   :  { %4722 = vmatprep.subr.bf16.mxu1 %v15110_v58  ;;  %v15155_v58 = vld [vmem:[#allocation162_spill] sm:$0xff] }
 0x40a   :  { %4600 = vmatpush1.bf16.msra.mxu0 %v15111_v59  ;;  %v15156_v59 = vld [vmem:[#allocation163_spill] sm:$0xff] }
 0x40b   :  { %4723 = vmatpush1.bf16.msra.mxu1 %v15112_v60  ;;  %4601 = vmatprep.subr.bf16.mxu0 %v15113_v61  ;;  %v15157_v60 = vld [vmem:[#allocation164_spill] sm:$0xff]  ;;  %v15158_v61 = vld [vmem:[#allocation165_spill] sm:$0xff] }
 0x40c   :  { %4724 = vmatprep.subr.bf16.mxu1 %v15114_v35  ;;  %v15159_v35 = vld [vmem:[#allocation166_spill] sm:$0xff] }
 0x40e   :  { %4602 = vmatpush1.bf16.msra.mxu0 %v15115_v56  ;;  %v15160_v56 = vld [vmem:[#allocation167_spill] sm:$0xff] }
 0x40f   :  { %4725 = vmatpush1.bf16.msra.mxu1 %v15116_v55  ;;  %4603 = vmatprep.subr.bf16.mxu0 %v15117_v37  ;;  %v15161_v55 = vld [vmem:[#allocation168_spill] sm:$0xff]  ;;  %v15162_v37 = vld [vmem:[#allocation169_spill] sm:$0xff] }
 0x410   :  { %4726 = vmatprep.subr.bf16.mxu1 %v15118_v62  ;;  %v15163_v62 = vld [vmem:[#allocation170_spill] sm:$0xff] }
 0x412   :  { %4604 = vmatpush1.bf16.msra.mxu0 %v15119_v63  ;;  %v12235_v63 = vld [vmem:[#allocation9 + $0x2c0] ss:$16 sps:$4 sm:$0xff]  }
 0x413   :  { %4727 = vmatpush1.bf16.msra.mxu1 %v15120_v0  ;;  %4605 = vmatprep.subr.bf16.mxu0 %v15121_v3  ;;  %v12238_v0 = vld [vmem:[#allocation9 + $0x2c8] ss:$16 sps:$4 sm:$0xff]   ;;  %v12241_v3 = vld [vmem:[#allocation9 + $0x2e4] ss:$16 sps:$4 sm:$0xff]  }
 0x414   :  { %4728 = vmatprep.subr.bf16.mxu1 %v15122_v17  ;;  %v12262_v17 = vld [vmem:[#allocation9 + $0x308] ss:$16 sps:$4 sm:$0xff]  }
 0x416   :  { %4606 = vmatpush1.bf16.msra.mxu0 %v15123_v13  ;;  %v12265_v13 = vld [vmem:[#allocation9 + $0x324] ss:$16 sps:$4 sm:$0xff]  }
 0x417   :  { %4729 = vmatpush1.bf16.msra.mxu1 %v15124_v16  ;;  %4607 = vmatprep.subr.bf16.mxu0 %v15125_v14  ;;  %v12268_v16 = vld [vmem:[#allocation9 + $0x32c] ss:$16 sps:$4 sm:$0xff]   ;;  %v12271_v14 = vld [vmem:[#allocation9 + $0x320] ss:$16 sps:$4 sm:$0xff]  }
 0x418   :  { %4730 = vmatprep.subr.bf16.mxu1 %v15126_v42  ;;  %v12274_v42 = vld [vmem:[#allocation9 + $0x328] ss:$16 sps:$4 sm:$0xff]  }
 0x41a   :  { %4608 = vmatpush1.bf16.msra.mxu0 %v15127_v1  ;;  %v12277_v1 = vld [vmem:[#allocation9 + $0x344] ss:$16 sps:$4 sm:$0xff]  }
 0x41b   :  { %4731 = vmatpush1.bf16.msra.mxu1 %v15128_v11  ;;  %4609 = vmatprep.subr.bf16.mxu0 %v15129_v23  ;;  %v12280_v11 = vld [vmem:[#allocation9 + $0x34c] ss:$16 sps:$4 sm:$0xff]   ;;  %v12283_v23 = vld [vmem:[#allocation9 + $0x340] ss:$16 sps:$4 sm:$0xff]  }
 0x41c   :  { %4732 = vmatprep.subr.bf16.mxu1 %v15130_v2  ;;  %v12286_v2 = vld [vmem:[#allocation9 + $0x348] ss:$16 sps:$4 sm:$0xff]  }
 0x41e   :  { %4610 = vmatpush1.bf16.msra.mxu0 %v15131_v24  ;;  %v12289_v24 = vld [vmem:[#allocation9 + $0x364] ss:$16 sps:$4 sm:$0xff]  }
 0x41f   :  { %4733 = vmatpush1.bf16.msra.mxu1 %v15132_v25  ;;  %4611 = vmatprep.subr.bf16.mxu0 %v15133_v26  ;;  %v12292_v25 = vld [vmem:[#allocation9 + $0x36c] ss:$16 sps:$4 sm:$0xff]   ;;  %v12295_v26 = vld [vmem:[#allocation9 + $0x360] ss:$16 sps:$4 sm:$0xff]  }
 0x420   :  { %4734 = vmatprep.subr.bf16.mxu1 %v15134_v27  ;;  %v12298_v27 = vld [vmem:[#allocation9 + $0x368] ss:$16 sps:$4 sm:$0xff]  }
 0x422   :  { %4612 = vmatpush1.bf16.msra.mxu0 %v15135_v28  ;;  %v12301_v28 = vld [vmem:[#allocation9 + $0x384] ss:$16 sps:$4 sm:$0xff]  }
 0x423   :  { %4735 = vmatpush1.bf16.msra.mxu1 %v15136_v29  ;;  %4613 = vmatprep.subr.bf16.mxu0 %v15137_v12  ;;  %v12304_v29 = vld [vmem:[#allocation9 + $0x38c] ss:$16 sps:$4 sm:$0xff]   ;;  %v14527_v12 = vsub.s32 7, %v11312_v43 }
 0x424   :  { %4736 = vmatprep.subr.bf16.mxu1 %v15138_v53  ;;  %v12308_v53 = vld [vmem:[#allocation9 + $0x380] ss:$16 sps:$4 sm:$0xff]  }
 0x426   :  { %4614 = vmatpush1.bf16.msra.mxu0 %v15139_v30  ;;  %v12311_v30 = vld [vmem:[#allocation9 + $0x388] ss:$16 sps:$4 sm:$0xff]  }
 0x427   :  { %4737 = vmatpush1.bf16.msra.mxu1 %v15140_v40  ;;  %4615 = vmatprep.subr.bf16.mxu0 %v11894_v6  ;;  %v15148_v6 = vld [vmem:[#allocation155_spill] sm:$0xff] }
 0x428   :  { %4738 = vmatprep.subr.bf16.mxu1 %v15141_v41  ;;  %v12314_v40 = vld [vmem:[#allocation9 + $0x3a4] ss:$16 sps:$4 sm:$0xff]   ;;  %v12317_v41 = vld [vmem:[#allocation9 + $0x3ac] ss:$16 sps:$4 sm:$0xff]  }
 0x42a   :  { %4616 = vmatpush1.bf16.msra.mxu0 %v15142_v18  ;;  %v12320_v18 = vld [vmem:[#allocation8] sm:$0xff] }
 0x42b   :  { %4739 = vmatpush1.bf16.msra.mxu1 %v15143_v47  ;;  %4626 = vmatprep.subr.bf16.mxu0 %v15144_v48  ;;  %v404_v47 = vrot.slane %v12320_v18, %v14527_v12  ;;  %v12325_v48 = vld [vmem:[#allocation9 + $0x3a0] ss:$16 sps:$4 sm:$0xff]  }
 0x42c   :  { %4749 = vmatprep.subr.bf16.mxu1 %v15145_v49  ;;  %v12328_v49 = vld [vmem:[#allocation9 + $0x3a8] ss:$16 sps:$4 sm:$0xff]   ;;  %v12392_v12 = vld [vmem:[#allocation9 + $0x440] ss:$16 sps:$4 sm:$0xff]  }
 0x42d   :  { %4618 = vmatmul.mubr.bf16.vlgmr.msra.gmra.mrb[32].mxu0 %v11699_v15  ;;  %15177 = vst [vmem:[#allocation42_spill] sm:$0xff] %v12392_v12 }
 0x42e   :  { %4741 = vmatmul.mubr.bf16.vlgmr.msra.gmra.mrb[32].mxu1 %v11699_v15  ;;  %4627 = vmatpush1.bf16.msra.mxu0 %v15146_v21  ;;  %v15154_v15 = vld [vmem:[#allocation161_spill] sm:$0xff] }
 0x42f   :  { %4658 = vmatprep.mubr.bf16.mxu0 %v12033_v19  ;;  %4750 = vmatpush1.bf16.msra.mxu1 %v15147_v57  ;;  %v12331_v21 = vld [vmem:[#allocation9 + $0x3c4] ss:$16 sps:$4 sm:$0xff]   ;;  %v12334_v57 = vld [vmem:[#allocation9 + $0x3cc] ss:$16 sps:$4 sm:$0xff]  }
 0x430   :  { %4781 = vmatprep.mubr.bf16.mxu1 %v12033_v19  ;;  %4628 = vmatprep.subr.bf16.mxu0 %v15148_v6  ;;  %v15164_v6 = vld [vmem:[#allocation28_spill] sm:$0xff] }
 0x431   :  { %4751 = vmatprep.subr.bf16.mxu1 %v15149_v50  ;;  %v1900_v50 = vadd.f32 %v15164_v6, %v404_v47  ;;  %v12380_v47 = vld [vmem:[#allocation9 + $0x420] ss:$16 sps:$4 sm:$0xff]   ;;  %v12383_v6 = vld [vmem:[#allocation9 + $0x428] ss:$16 sps:$4 sm:$0xff]  }
 0x432   :  { %4629 = vmatpush1.bf16.msra.mxu0 %v15150_v22  ;;  %v12338_v22 = vld [vmem:[#allocation9 + $0x3c0] ss:$16 sps:$4 sm:$0xff]   ;;  %15173 = vst [vmem:[#allocation38_spill] sm:$0xff] %v12380_v47  ;;  %15174 = vst [vmem:[#allocation39_spill] sm:$0xff] %v12383_v6 }
 0x433   :  { %4752 = vmatpush1.bf16.msra.mxu1 %v15151_v51  ;;  %4630 = vmatprep.subr.bf16.mxu0 %v15152_v52  ;;  %v12341_v51 = vld [vmem:[#allocation9 + $0x3c8] ss:$16 sps:$4 sm:$0xff]   ;;  %v12344_v52 = vld [vmem:[#allocation9 + $0x3e4] ss:$16 sps:$4 sm:$0xff]  }
 0x434   :  { %4753 = vmatprep.subr.bf16.mxu1 %v15153_v54  ;;  %v12347_v54 = vld [vmem:[#allocation9 + $0x3ec] ss:$16 sps:$4 sm:$0xff]  }
 0x436   :  { %4631 = vmatpush1.bf16.msra.mxu0 %v15154_v15  ;;  %v2077_v15 = vmax.f32 %v1900_v50, 0.0  ;;  %v12386_v50 = vld [vmem:[#allocation9 + $0x444] ss:$16 sps:$4 sm:$0xff]  }
 0x437   :  { %4754 = vmatpush1.bf16.msra.mxu1 %v15155_v58  ;;  %4632 = vmatprep.subr.bf16.mxu0 %v15156_v59  ;;  %v12350_v58 = vld [vmem:[#allocation9 + $0x3e0] ss:$16 sps:$4 sm:$0xff]   ;;  %v12353_v59 = vld [vmem:[#allocation9 + $0x3e8] ss:$16 sps:$4 sm:$0xff]   ;;  %15175 = vst [vmem:[#allocation40_spill] sm:$0xff] %v12386_v50 }
 0x438   :  { %4755 = vmatprep.subr.bf16.mxu1 %v15157_v60  ;;  %15165 = vst [vmem:[#allocation30_spill] sm:$0xff] %v12350_v58  ;;  %15166 = vst [vmem:[#allocation31_spill] sm:$0xff] %v12353_v59  ;;  %v12356_v60 = vld [vmem:[#allocation9 + $0x404] ss:$16 sps:$4 sm:$0xff]  }
 0x439   :  { %15167 = vst [vmem:[#allocation32_spill] sm:$0xff] %v12356_v60 }
 0x43a   :  { %4633 = vmatpush1.bf16.msra.mxu0 %v15158_v61  ;;  %v12359_v61 = vld [vmem:[#allocation9 + $0x40c] ss:$16 sps:$4 sm:$0xff]  }
 0x43b   :  { %4756 = vmatpush1.bf16.msra.mxu1 %v15159_v35  ;;  %4634 = vmatprep.subr.bf16.mxu0 %v15160_v56  ;;  %15168 = vst [vmem:[#allocation33_spill] sm:$0xff] %v12359_v61  ;;  %v12362_v35 = vpack.c.bf16 %v2077_v15, %v2077_v15  ;;  %v12366_v56 = vld [vmem:[#allocation9 + $0x400] ss:$16 sps:$4 sm:$0xff]   ;;  %v12389_v15 = vld [vmem:[#allocation9 + $0x44c] ss:$16 sps:$4 sm:$0xff]  }
 0x43c   :  { %4757 = vmatprep.subr.bf16.mxu1 %v15161_v55  ;;  %15169 = vst [vmem:[#allocation34_spill] sm:$0xff] %v12366_v56  ;;  %v12370_v55 = vld [vmem:[#allocation9 + $0x408] ss:$16 sps:$4 sm:$0xff]   ;;  %15176 = vst [vmem:[#allocation41_spill] sm:$0xff] %v12389_v15 }
 0x43d   :  { %15170 = vst [vmem:[#allocation35_spill] sm:$0xff] %v12370_v55 }
 0x43e   :  { %4635 = vmatpush1.bf16.msra.mxu0 %v15162_v37  ;;  %v12374_v37 = vld [vmem:[#allocation9 + $0x424] ss:$16 sps:$4 sm:$0xff]  }
 0x43f   :  { %4758 = vmatpush1.bf16.msra.mxu1 %v15163_v62  ;;  %4636 = vmatprep.subr.bf16.mxu0 %v11970_v9  ;;  %v12244_v9 = vld [vmem:[#allocation9 + $0x2ec] ss:$16 sps:$4 sm:$0xff]   ;;  %15171 = vst [vmem:[#allocation36_spill] sm:$0xff] %v12374_v37 }
 0x440   :  { %4759 = vmatprep.subr.bf16.mxu1 %v11973_v44  ;;  %v12247_v44 = vld [vmem:[#allocation9 + $0x2e0] ss:$16 sps:$4 sm:$0xff]   ;;  %v12377_v62 = vld [vmem:[#allocation9 + $0x42c] ss:$16 sps:$4 sm:$0xff]  }
 0x441   :  { %15172 = vst [vmem:[#allocation37_spill] sm:$0xff] %v12377_v62 }
 0x442   :  { %4637 = vmatpush1.bf16.msra.mxu0 %v11976_v10  ;;  %v12253_v10 = vld [vmem:[#allocation9 + $0x304] ss:$16 sps:$4 sm:$0xff]  }
 0x443   :  { %4760 = vmatpush1.bf16.msra.mxu1 %v11979_v45  ;;  %4638 = vmatprep.subr.bf16.mxu0 %v11982_v5  ;;  %v12256_v45 = vld [vmem:[#allocation9 + $0x30c] ss:$16 sps:$4 sm:$0xff]   ;;  %v12259_v5 = vld [vmem:[#allocation9 + $0x300] ss:$16 sps:$4 sm:$0xff]  }
 0x444   :  { %4761 = vmatprep.subr.bf16.mxu1 %v11985_v8  ;;  %v12250_v8 = vld [vmem:[#allocation9 + $0x2e8] ss:$16 sps:$4 sm:$0xff]  }
 0x446   :  { %4639 = vmatpush1.bf16.msra.mxu0 %v12235_v63 }
 0x447   :  { %4762 = vmatpush1.bf16.msra.mxu1 %v12238_v0  ;;  %4640 = vmatprep.subr.bf16.mxu0 %v12241_v3 }
 0x448   :  { %4763 = vmatprep.subr.bf16.mxu1 %v12244_v9 }
 0x44a   :  { %4641 = vmatpush1.bf16.msra.mxu0 %v12247_v44 }
 0x44b   :  { %4764 = vmatpush1.bf16.msra.mxu1 %v12250_v8  ;;  %4642 = vmatprep.subr.bf16.mxu0 %v12253_v10 }
 0x44c   :  { %4765 = vmatprep.subr.bf16.mxu1 %v12256_v45 }
 0x44e   :  { %4643 = vmatpush1.bf16.msra.mxu0 %v12259_v5 }
 0x44f   :  { %4766 = vmatpush1.bf16.msra.mxu1 %v12262_v17  ;;  %4644 = vmatprep.subr.bf16.mxu0 %v12265_v13 }
 0x450   :  { %4767 = vmatprep.subr.bf16.mxu1 %v12268_v16 }
 0x452   :  { %4645 = vmatpush1.bf16.msra.mxu0 %v12271_v14 }
 0x453   :  { %4768 = vmatpush1.bf16.msra.mxu1 %v12274_v42  ;;  %4646 = vmatprep.subr.bf16.mxu0 %v12277_v1 }
 0x454   :  { %4769 = vmatprep.subr.bf16.mxu1 %v12280_v11 }
 0x456   :  { %4647 = vmatpush1.bf16.msra.mxu0 %v12283_v23 }
 0x457   :  { %4770 = vmatpush1.bf16.msra.mxu1 %v12286_v2  ;;  %4648 = vmatprep.subr.bf16.mxu0 %v12289_v24 }
 0x458   :  { %4771 = vmatprep.subr.bf16.mxu1 %v12292_v25 }
 0x45a   :  { %4649 = vmatpush1.bf16.msra.mxu0 %v12295_v26 }
 0x45b   :  { %4772 = vmatpush1.bf16.msra.mxu1 %v12298_v27  ;;  %4650 = vmatprep.subr.bf16.mxu0 %v12301_v28 }
 0x45c   :  { %4773 = vmatprep.subr.bf16.mxu1 %v12304_v29 }
 0x45e   :  { %4651 = vmatpush1.bf16.msra.mxu0 %v12308_v53 }
 0x45f   :  { %4774 = vmatpush1.bf16.msra.mxu1 %v12311_v30  ;;  %4652 = vmatprep.subr.bf16.mxu0 %v12314_v40 }
 0x460   :  { %4775 = vmatprep.subr.bf16.mxu1 %v12317_v41 }
 0x462   :  { %4653 = vmatpush1.bf16.msra.mxu0 %v12325_v48 }
 0x463   :  { %4776 = vmatpush1.bf16.msra.mxu1 %v12328_v49  ;;  %4654 = vmatprep.subr.bf16.mxu0 %v12331_v21 }
 0x464   :  { %4777 = vmatprep.subr.bf16.mxu1 %v12334_v57 }
 0x466   :  { %4655 = vmatpush1.bf16.msra.mxu0 %v12338_v22 }
 0x467   :  { %4778 = vmatpush1.bf16.msra.mxu1 %v12341_v51  ;;  %4656 = vmatprep.subr.bf16.mxu0 %v12344_v52 }
 0x468   :  { %4779 = vmatprep.subr.bf16.mxu1 %v12347_v54 }
 0x46a   :  { %4657 = vmatpush1.bf16.msra.mxu0 %v12350_v58  ;;  %v10130_v58 = vld [vmem:[#allocation11 + $0x2b0] sm:$0xff]  }
 0x46b   :  { %4780 = vmatpush1.bf16.msra.mxu1 %v12353_v59  ;;  %4667 = vmatprep.subr.bf16.mxu0 %v12356_v60  ;;  %v10129_v59 = vld [vmem:[#allocation11 + $0x230] sm:$0xff]  }
 0x46c   :  { %4790 = vmatprep.subr.bf16.mxu1 %v12359_v61 }
 0x46d   :  { %4659 = vmatmul.mubr.bf16.vlgmr.msra.gmra.mrb[32].mxu0 %v12105_v38 }
 0x46e   :  { %4782 = vmatmul.mubr.bf16.vlgmr.msra.gmra.mrb[32].mxu1 %v12105_v38  ;;  %4668 = vmatpush1.bf16.msra.mxu0 %v12366_v56  ;;  %v12535_v56 = vld [vmem:[#allocation9 + $0x5c4] ss:$16 sps:$4 sm:$0xff]  }
 0x46f   :  { %4699 = vmatprep.mubr.bf16.mxu0 %v12362_v35  ;;  %4791 = vmatpush1.bf16.msra.mxu1 %v12370_v55  ;;  %15224 = vst [vmem:[#allocation91_spill] sm:$0xff] %v12535_v56 }
 0x470   :  { %4822 = vmatprep.mubr.bf16.mxu1 %v12362_v35  ;;  %4669 = vmatprep.subr.bf16.mxu0 %v12374_v37  ;;  %v12532_v37 = vld [vmem:[#allocation9 + $0x5a8] ss:$16 sps:$4 sm:$0xff]  }
 0x471   :  { %4792 = vmatprep.subr.bf16.mxu1 %v12377_v62  ;;  %15223 = vst [vmem:[#allocation90_spill] sm:$0xff] %v12532_v37 }
 0x472   :  { %4670 = vmatpush1.bf16.msra.mxu0 %v12380_v47 }
 0x473   :  { %4793 = vmatpush1.bf16.msra.mxu1 %v12383_v6  ;;  %4671 = vmatprep.subr.bf16.mxu0 %v12386_v50  ;;  %v12525_v50 = vld [vmem:[#allocation9 + $0x5ac] ss:$16 sps:$4 sm:$0xff]  }
 0x474   :  { %4794 = vmatprep.subr.bf16.mxu1 %v12389_v15  ;;  %v12504_v15 = vld [vmem:[#allocation9 + $0x568] ss:$16 sps:$4 sm:$0xff]   ;;  %15220 = vst [vmem:[#allocation88_spill] sm:$0xff] %v12525_v50 }
 0x475   :  { %15214 = vst [vmem:[#allocation83_spill] sm:$0xff] %v12504_v15 }
 0x476   :  { %4672 = vmatpush1.bf16.msra.mxu0 %v12392_v12  ;;  %v12410_v12 = vld [vmem:[#allocation9 + $0x484] ss:$16 sps:$4 sm:$0xff]  }
 0x477   :  { %4795 = vmatpush1.bf16.msra.mxu1 %v12395_v4  ;;  %4673 = vmatprep.subr.bf16.mxu0 %v12398_v7  ;;  %15183 = vst [vmem:[#allocation52_spill] sm:$0xff] %v12410_v12  ;;  %v12413_v4 = vld [vmem:[#allocation9 + $0x48c] ss:$16 sps:$4 sm:$0xff]   ;;  %v12416_v7 = vld [vmem:[#allocation9 + $0x480] ss:$16 sps:$4 sm:$0xff]  }
 0x478   :  { %4796 = vmatprep.subr.bf16.mxu1 %v12401_v20  ;;  %15184 = vst [vmem:[#allocation53_spill] sm:$0xff] %v12413_v4  ;;  %15185 = vst [vmem:[#allocation54_spill] sm:$0xff] %v12416_v7  ;;  %v12419_v20 = vld [vmem:[#allocation9 + $0x488] ss:$16 sps:$4 sm:$0xff]  }
 0x479   :  { %15186 = vst [vmem:[#allocation55_spill] sm:$0xff] %v12419_v20 }
 0x47a   :  { %4674 = vmatpush1.bf16.msra.mxu0 %v12404_v33  ;;  %v12422_v33 = vld [vmem:[#allocation9 + $0x4a4] ss:$16 sps:$4 sm:$0xff]  }
 0x47b   :  { %4797 = vmatpush1.bf16.msra.mxu1 %v12407_v36  ;;  %4675 = vmatprep.subr.bf16.mxu0 %v12410_v12  ;;  %15187 = vst [vmem:[#allocation56_spill] sm:$0xff] %v12422_v33  ;;  %v12425_v36 = vld [vmem:[#allocation9 + $0x4ac] ss:$16 sps:$4 sm:$0xff]   ;;  %v12428_v12 = vld [vmem:[#allocation9 + $0x4a0] ss:$16 sps:$4 sm:$0xff]  }
 0x47c   :  { %4798 = vmatprep.subr.bf16.mxu1 %v12413_v4  ;;  %15188 = vst [vmem:[#allocation57_spill] sm:$0xff] %v12425_v36  ;;  %15189 = vst [vmem:[#allocation58_spill] sm:$0xff] %v12428_v12  ;;  %v12431_v4 = vld [vmem:[#allocation9 + $0x4a8] ss:$16 sps:$4 sm:$0xff]  }
 0x47d   :  { %15190 = vst [vmem:[#allocation59_spill] sm:$0xff] %v12431_v4 }
 0x47e   :  { %4676 = vmatpush1.bf16.msra.mxu0 %v12416_v7  ;;  %v12434_v7 = vld [vmem:[#allocation9 + $0x4c4] ss:$16 sps:$4 sm:$0xff]  }
 0x47f   :  { %4799 = vmatpush1.bf16.msra.mxu1 %v12419_v20  ;;  %4677 = vmatprep.subr.bf16.mxu0 %v12422_v33  ;;  %15191 = vst [vmem:[#allocation60_spill] sm:$0xff] %v12434_v7  ;;  %v12437_v20 = vld [vmem:[#allocation9 + $0x4cc] ss:$16 sps:$4 sm:$0xff]   ;;  %v12440_v33 = vld [vmem:[#allocation9 + $0x4c0] ss:$16 sps:$4 sm:$0xff]  }
 0x480   :  { %4800 = vmatprep.subr.bf16.mxu1 %v12425_v36  ;;  %15192 = vst [vmem:[#allocation61_spill] sm:$0xff] %v12437_v20  ;;  %15193 = vst [vmem:[#allocation62_spill] sm:$0xff] %v12440_v33  ;;  %v12443_v36 = vld [vmem:[#allocation9 + $0x4c8] ss:$16 sps:$4 sm:$0xff]  }
 0x481   :  { %15194 = vst [vmem:[#allocation63_spill] sm:$0xff] %v12443_v36 }
 0x482   :  { %4678 = vmatpush1.bf16.msra.mxu0 %v12428_v12  ;;  %v12446_v12 = vld [vmem:[#allocation9 + $0x4e4] ss:$16 sps:$4 sm:$0xff]  }
 0x483   :  { %4801 = vmatpush1.bf16.msra.mxu1 %v12431_v4  ;;  %4679 = vmatprep.subr.bf16.mxu0 %v12434_v7  ;;  %15195 = vst [vmem:[#allocation64_spill] sm:$0xff] %v12446_v12  ;;  %v12449_v4 = vld [vmem:[#allocation9 + $0x4ec] ss:$16 sps:$4 sm:$0xff]   ;;  %v12452_v7 = vld [vmem:[#allocation9 + $0x4e0] ss:$16 sps:$4 sm:$0xff]  }
 0x484   :  { %4802 = vmatprep.subr.bf16.mxu1 %v12437_v20  ;;  %15196 = vst [vmem:[#allocation65_spill] sm:$0xff] %v12449_v4  ;;  %15197 = vst [vmem:[#allocation66_spill] sm:$0xff] %v12452_v7  ;;  %v12455_v20 = vld [vmem:[#allocation9 + $0x4e8] ss:$16 sps:$4 sm:$0xff]  }
 0x485   :  { %15198 = vst [vmem:[#allocation67_spill] sm:$0xff] %v12455_v20 }
 0x486   :  { %4680 = vmatpush1.bf16.msra.mxu0 %v12440_v33  ;;  %v12458_v33 = vld [vmem:[#allocation9 + $0x504] ss:$16 sps:$4 sm:$0xff]  }
 0x487   :  { %4803 = vmatpush1.bf16.msra.mxu1 %v12443_v36  ;;  %4681 = vmatprep.subr.bf16.mxu0 %v12446_v12  ;;  %15199 = vst [vmem:[#allocation68_spill] sm:$0xff] %v12458_v33  ;;  %v12461_v36 = vld [vmem:[#allocation9 + $0x50c] ss:$16 sps:$4 sm:$0xff]   ;;  %v12464_v12 = vld [vmem:[#allocation9 + $0x500] ss:$16 sps:$4 sm:$0xff]  }
 0x488   :  { %4804 = vmatprep.subr.bf16.mxu1 %v12449_v4  ;;  %15200 = vst [vmem:[#allocation69_spill] sm:$0xff] %v12461_v36  ;;  %15201 = vst [vmem:[#allocation70_spill] sm:$0xff] %v12464_v12  ;;  %v12467_v4 = vld [vmem:[#allocation9 + $0x508] ss:$16 sps:$4 sm:$0xff]  }
 0x489   :  { %15202 = vst [vmem:[#allocation71_spill] sm:$0xff] %v12467_v4 }
 0x48a   :  { %4682 = vmatpush1.bf16.msra.mxu0 %v12452_v7  ;;  %v12470_v7 = vld [vmem:[#allocation9 + $0x524] ss:$16 sps:$4 sm:$0xff]  }
 0x48b   :  { %4805 = vmatpush1.bf16.msra.mxu1 %v12455_v20  ;;  %4683 = vmatprep.subr.bf16.mxu0 %v12458_v33  ;;  %15203 = vst [vmem:[#allocation72_spill] sm:$0xff] %v12470_v7  ;;  %v12473_v20 = vld [vmem:[#allocation9 + $0x52c] ss:$16 sps:$4 sm:$0xff]   ;;  %v12476_v33 = vld [vmem:[#allocation9 + $0x520] ss:$16 sps:$4 sm:$0xff]  }
 0x48c   :  { %4806 = vmatprep.subr.bf16.mxu1 %v12461_v36  ;;  %15204 = vst [vmem:[#allocation73_spill] sm:$0xff] %v12473_v20  ;;  %15205 = vst [vmem:[#allocation74_spill] sm:$0xff] %v12476_v33  ;;  %v12479_v36 = vld [vmem:[#allocation9 + $0x528] ss:$16 sps:$4 sm:$0xff]  }
 0x48d   :  { %15206 = vst [vmem:[#allocation75_spill] sm:$0xff] %v12479_v36 }
 0x48e   :  { %4684 = vmatpush1.bf16.msra.mxu0 %v12464_v12  ;;  %v12482_v12 = vld [vmem:[#allocation9 + $0x544] ss:$16 sps:$4 sm:$0xff]  }
 0x48f   :  { %4807 = vmatpush1.bf16.msra.mxu1 %v12467_v4  ;;  %4685 = vmatprep.subr.bf16.mxu0 %v12470_v7  ;;  %15207 = vst [vmem:[#allocation77_spill] sm:$0xff] %v12482_v12  ;;  %v12485_v4 = vld [vmem:[#allocation9 + $0x54c] ss:$16 sps:$4 sm:$0xff]   ;;  %v12488_v7 = vld [vmem:[#allocation9 + $0x540] ss:$16 sps:$4 sm:$0xff]  }
 0x490   :  { %4808 = vmatprep.subr.bf16.mxu1 %v12473_v20  ;;  %15208 = vst [vmem:[#allocation78_spill] sm:$0xff] %v12485_v4  ;;  %15209 = vst [vmem:[#allocation79_spill] sm:$0xff] %v12488_v7  ;;  %v12491_v20 = vld [vmem:[#allocation9 + $0x548] ss:$16 sps:$4 sm:$0xff]  }
 0x491   :  { %15210 = vst [vmem:[#allocation80_spill] sm:$0xff] %v12491_v20 }
 0x492   :  { %4686 = vmatpush1.bf16.msra.mxu0 %v12476_v33  ;;  %v12494_v33 = vld [vmem:[#allocation9 + $0x564] ss:$16 sps:$4 sm:$0xff]  }
 0x493   :  { %4809 = vmatpush1.bf16.msra.mxu1 %v12479_v36  ;;  %4687 = vmatprep.subr.bf16.mxu0 %v12482_v12  ;;  %15211 = vst [vmem:[#allocation26_spill] sm:$0xff] %v12494_v33  ;;  %v12497_v36 = vld [vmem:[#allocation9 + $0x56c] ss:$16 sps:$4 sm:$0xff]   ;;  %v12500_v12 = vld [vmem:[#allocation9 + $0x560] ss:$16 sps:$4 sm:$0xff]  }
 0x494   :  { %4810 = vmatprep.subr.bf16.mxu1 %v12485_v4  ;;  %15212 = vst [vmem:[#allocation81_spill] sm:$0xff] %v12497_v36  ;;  %15213 = vst [vmem:[#allocation82_spill] sm:$0xff] %v12500_v12  ;;  %v14577_v4 = vsub.s32 6, %v11312_v43  ;;  %v12528_v43 = vld [vmem:[#allocation9 + $0x5a0] ss:$16 sps:$4 sm:$0xff]  }
 0x495   :  { %15221 = vst [vmem:[#allocation89_spill] sm:$0xff] %v12528_v43 }
 0x496   :  { %4688 = vmatpush1.bf16.msra.mxu0 %v12488_v7  ;;  %v12507_v7 = vld [vmem:[#allocation9 + $0x584] ss:$16 sps:$4 sm:$0xff]  }
 0x497   :  { %4811 = vmatpush1.bf16.msra.mxu1 %v12491_v20  ;;  %4689 = vmatprep.subr.bf16.mxu0 %v12494_v33  ;;  %15215 = vst [vmem:[#allocation84_spill] sm:$0xff] %v12507_v7  ;;  %v12510_v20 = vld [vmem:[#allocation9 + $0x58c] ss:$16 sps:$4 sm:$0xff]   ;;  %v12513_v33 = vld [vmem:[#allocation9 + $0x580] ss:$16 sps:$4 sm:$0xff]  }
 0x498   :  { %4812 = vmatprep.subr.bf16.mxu1 %v12497_v36  ;;  %15216 = vst [vmem:[#allocation85_spill] sm:$0xff] %v12510_v20  ;;  %15217 = vst [vmem:[#allocation86_spill] sm:$0xff] %v12513_v33  ;;  %v12519_v36 = vld [vmem:[#allocation9 + $0x588] ss:$16 sps:$4 sm:$0xff]  }
 0x499   :  { %15218 = vst [vmem:[#allocation87_spill] sm:$0xff] %v12519_v36 }
 0x49a   :  { %4690 = vmatpush1.bf16.msra.mxu0 %v12500_v12  ;;  %v400_v12 = vrot.slane %v12320_v18, %v14577_v4  ;;  %v15222_v4 = vld [vmem:[#allocation27_spill] sm:$0xff] }
 0x49b   :  { %4813 = vmatpush1.bf16.msra.mxu1 %v12504_v15  ;;  %4691 = vmatprep.subr.bf16.mxu0 %v12507_v7  ;;  %v12522_v15 = vld [vmem:[#allocation9 + $0x5a4] ss:$16 sps:$4 sm:$0xff]  }
 0x49c   :  { %4814 = vmatprep.subr.bf16.mxu1 %v12510_v20  ;;  %15219 = vst [vmem:[#allocation23_spill] sm:$0xff] %v12522_v15 }
 0x49e   :  { %4692 = vmatpush1.bf16.msra.mxu0 %v12513_v33 }
 0x49f   :  { %4815 = vmatpush1.bf16.msra.mxu1 %v12519_v36  ;;  %4693 = vmatprep.subr.bf16.mxu0 %v12522_v15  ;;  %v1898_v36 = vadd.f32 %v15222_v4, %v400_v12  ;;  %v12549_v12 = vld [vmem:[#allocation9 + $0x5e4] ss:$16 sps:$4 sm:$0xff]  }
 0x4a0   :  { %v9209_v7 = vpop.f32.mrb[24].mxu0  ;;  %4816 = vmatprep.subr.bf16.mxu1 %v12525_v50  ;;  %15228 = vst [vmem:[#allocation95_spill] sm:$0xff] %v12549_v12  ;;  %v10119_v50 = vld [vmem:[#allocation11 + $0x260] sm:$0xff]  }
 0x4a1   :  { %v9231_v20 = vpop.f32.mrb[24].mxu1  ;;  %v9210_v6 = vpop.f32.mrb[25].mxu0  ;;  %v2076_v4 = vmax.f32 %v1898_v36, 0.0 }
 0x4a2   :  { %v9211_v33 = vadd.f32 %v9210_v6, %v9209_v7  ;;  %v9232_v47 = vpop.f32.mrb[25].mxu1  ;;  %4694 = vmatpush1.bf16.msra.mxu0 %v12528_v43  ;;  %v9212_v18 = vpop.f32.mrb[26].mxu0  ;;  %v12538_v6 = vld [vmem:[#allocation9 + $0x5cc] ss:$16 sps:$4 sm:$0xff]  }
 0x4a3   :  { %v9233_v62 = vadd.f32 %v9232_v47, %v9231_v20  ;;  %4817 = vmatpush1.bf16.msra.mxu1 %v12532_v37  ;;  %v9234_v15 = vpop.f32.mrb[26].mxu1  ;;  %v9213_v55 = vpop.f32.mrb[27].mxu0  ;;  %4695 = vmatprep.subr.bf16.mxu0 %v12535_v56  ;;  %15225 = vst [vmem:[#allocation92_spill] sm:$0xff] %v12538_v6  ;;  %v12543_v18 = vld [vmem:[#allocation9 + $0x5c0] ss:$16 sps:$4 sm:$0xff]   ;;  %v12558_v36 = vpack.c.bf16 %v2076_v4, %v2076_v4  ;;  %v10117_v37 = vld [vmem:[#allocation11 + $0x218] sm:$0xff]  }
 0x4a4   :  { %v9235_v7 = vpop.f32.mrb[27].mxu1  ;;  %4818 = vmatprep.subr.bf16.mxu1 %v12538_v6  ;;  %15226 = vst [vmem:[#allocation93_spill] sm:$0xff] %v12543_v18  ;;  %v12546_v20 = vld [vmem:[#allocation9 + $0x5c8] ss:$16 sps:$4 sm:$0xff]   ;;  %v10103_v55 = vld [vmem:[#allocation11 + $0x240] sm:$0xff]   ;;  %v10111_v4 = vld [vmem:[#allocation11 + $0x250] sm:$0xff]  }
 0x4a5   :  { %v12541_v43 = vadd.f32 %v9233_v62, %v9211_v33  ;;  %15227 = vst [vmem:[#allocation94_spill] sm:$0xff] %v12546_v20  ;;  %v12552_v47 = vld [vmem:[#allocation9 + $0x5ec] ss:$16 sps:$4 sm:$0xff]   ;;  %v10104_v33 = vld [vmem:[#allocation11 + $0x2c0] sm:$0xff]   ;;  %15231 = vst [vmem:[#allocation98_spill] sm:$0xff] %v12558_v36 }
 0x4a6   :  { %4696 = vmatpush1.bf16.msra.mxu0 %v12543_v18  ;;  %15229 = vst [vmem:[#allocation96_spill] sm:$0xff] %v12552_v47  ;;  %v12555_v62 = vld [vmem:[#allocation9 + $0x5e0] ss:$16 sps:$4 sm:$0xff]   ;;  %v12560_v7 = vld [vmem:[#allocation9 + $0x5e8] ss:$16 sps:$4 sm:$0xff]  }
 0x4a7   :  { %4819 = vmatpush1.bf16.msra.mxu1 %v12546_v20  ;;  %4697 = vmatprep.subr.bf16.mxu0 %v12549_v12  ;;  %15230 = vst [vmem:[#allocation97_spill] sm:$0xff] %v12555_v62  ;;  %v10105_v15 = vld [vmem:[#allocation11 + $0x200] sm:$0xff]   ;;  %15232 = vst [vmem:[#allocation99_spill] sm:$0xff] %v12560_v7  ;;  %v10107_v12 = vld [vmem:[#allocation11 + $0x248] sm:$0xff]  }
 0x4a8   :  { %4820 = vmatprep.subr.bf16.mxu1 %v12552_v47  ;;  %v10106_v20 = vld [vmem:[#allocation11 + $0x280] sm:$0xff]   ;;  %v10108_v18 = vld [vmem:[#allocation11 + $0x2c8] sm:$0xff]   ;;  %v10112_v6 = vld [vmem:[#allocation11 + $0x2d0] sm:$0xff]  }
 0x4a9   :  { %v10109_v47 = vld [vmem:[#allocation11 + $0x208] sm:$0xff]   ;;  %v10113_v56 = vld [vmem:[#allocation11 + $0x210] sm:$0xff]  }
 0x4aa   :  { %4698 = vmatpush1.bf16.msra.mxu0 %v12555_v62  ;;  %v10110_v62 = vld [vmem:[#allocation11 + $0x288] sm:$0xff]  }
 0x4ab   :  { %4821 = vmatpush1.bf16.msra.mxu1 %v12560_v7  ;;  %9281 = vmatprep.subr.bf16.mxu0 %v10103_v55  ;;  %v10114_v55 = vld [vmem:[#allocation11 + $0x290] sm:$0xff]   ;;  %v10115_v7 = vld [vmem:[#allocation11 + $0x258] sm:$0xff]  }
 0x4ac   :  { %9303 = vmatprep.subr.bf16.mxu1 %v10104_v33  ;;  %v10116_v33 = vld [vmem:[#allocation11 + $0x2d8] sm:$0xff]  }
 0x4ad   :  { %4700 = vmatmul.mubr.bf16.vlgmr.msra.gmra.mrb[32].mxu0 %v12558_v36 }
 0x4ae   :  { %4823 = vmatmul.mubr.bf16.vlgmr.msra.gmra.mrb[32].mxu1 %v12558_v36  ;;  %9282 = vmatpush3.bf16.msra.mxu0 %v10105_v15  ;;  %v10118_v15 = vld [vmem:[#allocation11 + $0x298] sm:$0xff]  }
 0x4af   :  { %9304 = vmatpush3.bf16.msra.mxu1 %v10106_v20  ;;  %9283 = vmatprep.subr.bf16.mxu0 %v10107_v12  ;;  %v10120_v20 = vld [vmem:[#allocation11 + $0x2e0] sm:$0xff]  }
 0x4b0   :  { %9305 = vmatprep.subr.bf16.mxu1 %v10108_v18  ;;  %v10121_v12 = vld [vmem:[#allocation11 + $0x220] sm:$0xff]  }
 0x4b1   :  { %v10122_v18 = vld [vmem:[#allocation11 + $0x2a0] sm:$0xff]  }
 0x4b2   :  { %9284 = vmatpush3.bf16.msra.mxu0 %v10109_v47  ;;  %v10123_v47 = vld [vmem:[#allocation11 + $0x268] sm:$0xff]  }
 0x4b3   :  { %9306 = vmatpush3.bf16.msra.mxu1 %v10110_v62  ;;  %9285 = vmatprep.subr.bf16.mxu0 %v10111_v4  ;;  %v10124_v62 = vld [vmem:[#allocation11 + $0x2e8] sm:$0xff]  }
 0x4b4   :  { %9307 = vmatprep.subr.bf16.mxu1 %v10112_v6  ;;  %v10125_v4 = vld [vmem:[#allocation11 + $0x228] sm:$0xff]  }
 0x4b6   :  { %9286 = vmatpush3.bf16.msra.mxu0 %v10113_v56  ;;  %v10126_v56 = vld [vmem:[#allocation11 + $0x2a8] sm:$0xff]  }
 0x4b7   :  { %9308 = vmatpush3.bf16.msra.mxu1 %v10114_v55  ;;  %9287 = vmatprep.subr.bf16.mxu0 %v10115_v7 }
 0x4b8   :  { %9309 = vmatprep.subr.bf16.mxu1 %v10116_v33 }
 0x4ba   :  { %9288 = vmatpush3.bf16.msra.mxu0 %v10117_v37 }
 0x4bb   :  { %9310 = vmatpush3.bf16.msra.mxu1 %v10118_v15  ;;  %9289 = vmatprep.subr.bf16.mxu0 %v10119_v50 }
 0x4bc   :  { %9311 = vmatprep.subr.bf16.mxu1 %v10120_v20 }
 0x4be   :  { %9290 = vmatpush3.bf16.msra.mxu0 %v10121_v12 }
 0x4bf   :  { %9312 = vmatpush3.bf16.msra.mxu1 %v10122_v18  ;;  %9291 = vmatprep.subr.bf16.mxu0 %v10123_v47  ;;  %v10127_v18 = vld [vmem:[#allocation11 + $0x270] sm:$0xff]  }
 0x4c0   :  { %v9253_v6 = vpop.f32.mrb[28].mxu0  ;;  %9313 = vmatprep.subr.bf16.mxu1 %v10124_v62  ;;  %v10128_v47 = vld [vmem:[#allocation11 + $0x2f0] sm:$0xff]   ;;  %v10131_v62 = vld [vmem:[#allocation11 + $0x278] sm:$0xff]  }
 0x4c1   :  { %v9275_v7 = vpop.f32.mrb[28].mxu1  ;;  %v9254_v55 = vpop.f32.mrb[29].mxu0 }
 0x4c2   :  { %v9255_v36 = vadd.f32 %v9254_v55, %v9253_v6  ;;  %v9276_v33 = vpop.f32.mrb[29].mxu1  ;;  %v9256_v61 = vpop.f32.mrb[30].mxu0  ;;  %9292 = vmatpush3.bf16.msra.mxu0 %v10125_v4  ;;  %v10133_v4 = vld [vmem:[#allocation11 + $0x238] sm:$0xff]  }
 0x4c3   :  { %v9277_v37 = vadd.f32 %v9276_v33, %v9275_v7  ;;  %v9278_v15 = vpop.f32.mrb[30].mxu1  ;;  %v9257_v50 = vpop.f32.mrb[31].mxu0  ;;  %9314 = vmatpush3.bf16.msra.mxu1 %v10126_v56  ;;  %9293 = vmatprep.subr.bf16.mxu0 %v10127_v18  ;;  %v10132_v61 = vld [vmem:[#allocation11 + $0x2f8] sm:$0xff]  }
 0x4c4   :  { %v4516_v20 = vadd.f32 %v9255_v36, %v12541_v43  ;;  %v9279_v60 = vpop.f32.mrb[31].mxu1  ;;  %9315 = vmatprep.subr.bf16.mxu1 %v10128_v47  ;;  %v10134_v6 = vld [vmem:[#allocation11 + $0x2b8] sm:$0xff]   ;;  %v12568_v43 = vld [vmem:[#allocation9 + $0x4] ss:$16 sps:$4 sm:$0xff]  }
 0x4c5   :  { %v12571_v60 = vld [vmem:[#allocation9 + $0xc] ss:$16 sps:$4 sm:$0xff]  }
 0x4c6   :  { %v12566_v12 = vadd.f32 %v9277_v37, %v4516_v20  ;;  %9294 = vmatpush3.bf16.msra.mxu0 %v10129_v59  ;;  %15233 = vst [vmem:[#allocation100_spill] sm:$0xff] %v12571_v60 }
 0x4c7   :  { %9316 = vmatpush3.bf16.msra.mxu1 %v10130_v58  ;;  %9295 = vmatprep.subr.bf16.mxu0 %v10131_v62 }
 0x4c8   :  { %9317 = vmatprep.subr.bf16.mxu1 %v10132_v61 }
 0x4ca   :  { %9296 = vmatpush3.bf16.msra.mxu0 %v10133_v4 }
 0x4cb   :  { %9318 = vmatpush3.bf16.msra.mxu1 %v10134_v6  ;;  %5201 = vmatprep.subr.bf16.mxu0 %v12568_v43 }
 0x4cc   :  { %5324 = vmatprep.subr.bf16.mxu1 %v12571_v60 }
 0x580   :  { %v4701_v36 = vpop.f32.mrb[32].mxu0 }
 0x581   :  { %v9582_v59 = vadd.f32 %v4701_v36, %v12124_v46  ;;  %v4824_v58 = vpop.f32.mrb[32].mxu1  ;;  %v4703_v56 = vpop.f32.mrb[33].mxu0 }
 0x582   :  { %v9584_v7 = vadd.f32 %v4824_v58, %v12127_v39  ;;  %v9583_v55 = vadd.f32 %v4703_v56, %v12118_v32  ;;  %v4826_v33 = vpop.f32.mrb[33].mxu1  ;;  %v4705_v37 = vpop.f32.mrb[34].mxu0  ;;  %v12578_v58 = vld [vmem:[#allocation9] ss:$16 sps:$4 sm:$0xff]   ;;  %v12586_v56 = vld [vmem:[#allocation9 + $0x24] ss:$16 sps:$4 sm:$0xff]  }
 0x583   :  { %v4831_v15 = vmax.f32 %v9582_v59, 0.0  ;;  %v9585_v50 = vadd.f32 %v4826_v33, %v12121_v34  ;;  %v4828_v20 = vpop.f32.mrb[34].mxu1  ;;  %v4706_v18 = vpop.f32.mrb[35].mxu0  ;;  %v12581_v59 = vld [vmem:[#allocation9 + $0x8] ss:$16 sps:$4 sm:$0xff]  }
 0x584   :  { %v4833_v47 = vmax.f32 %v9584_v7, 0.0  ;;  %v4832_v62 = vmax.f32 %v9583_v55, 0.0  ;;  %v4829_v61 = vpop.f32.mrb[35].mxu1  ;;  %v12589_v7 = vld [vmem:[#allocation9 + $0x2c] ss:$16 sps:$4 sm:$0xff]  }
 0x585   :  { %v4834_v4 = vmax.f32 %v9585_v50, 0.0  ;;  %v4900_v60 = vpack.c.bf16 %v4831_v15, %v4831_v15  ;;  %v12598_v55 = vld [vmem:[#allocation9 + $0x44] ss:$16 sps:$4 sm:$0xff]   ;;  %v12604_v33 = vld [vmem:[#allocation9 + $0x40] ss:$16 sps:$4 sm:$0xff]  }
 0x586   :  { %v4901_v6 = vpack.c.bf16 %v4832_v62, %v4832_v62  ;;  %v4902_v46 = vpack.c.bf16 %v4833_v47, %v4833_v47  ;;  %v12607_v37 = vld [vmem:[#allocation9 + $0x48] ss:$16 sps:$4 sm:$0xff]   ;;  %v12610_v15 = vld [vmem:[#allocation9 + $0x64] ss:$16 sps:$4 sm:$0xff]   ;;  %v12613_v50 = vld [vmem:[#allocation9 + $0x6c] ss:$16 sps:$4 sm:$0xff]  }
 0x587   :  { %v4903_v36 = vpack.c.bf16 %v4834_v4, %v4834_v4  ;;  %v12616_v20 = vld [vmem:[#allocation9 + $0x60] ss:$16 sps:$4 sm:$0xff]   ;;  %v12619_v18 = vld [vmem:[#allocation9 + $0x68] ss:$16 sps:$4 sm:$0xff]   ;;  %v12622_v47 = vld [vmem:[#allocation9 + $0x84] ss:$16 sps:$4 sm:$0xff]  }
 0x588   :  { %5128 = vmatprep.mubr.bf16.mxu0 %v4901_v6  ;;  %15234 = vst [vmem:[#allocation101_spill] sm:$0xff] %v12622_v47  ;;  %v12625_v62 = vld [vmem:[#allocation9 + $0x8c] ss:$16 sps:$4 sm:$0xff]   ;;  %v12628_v61 = vld [vmem:[#allocation9 + $0x80] ss:$16 sps:$4 sm:$0xff]  }
 0x589   :  { %5168 = vmatprep.mubr.bf16.mxu1 %v4903_v36  ;;  %5129 = vmatmul.mubr.bf16.vlgmr.msra.gmra.mrb[36].mxu0 %v4900_v60  ;;  %v12595_v60 = vld [vmem:[#allocation9 + $0x28] ss:$16 sps:$4 sm:$0xff]   ;;  %15235 = vst [vmem:[#allocation102_spill] sm:$0xff] %v12625_v62  ;;  %15236 = vst [vmem:[#allocation103_spill] sm:$0xff] %v12628_v61  ;;  %v12634_v6 = vld [vmem:[#allocation9 + $0xa4] ss:$16 sps:$4 sm:$0xff]  }
 0x58a   :  { %5169 = vmatmul.mubr.bf16.vlgmr.msra.gmra.mrb[36].mxu1 %v4902_v46  ;;  %5202 = vmatpush1.bf16.msra.mxu0 %v12578_v58  ;;  %v12592_v46 = vld [vmem:[#allocation9 + $0x20] ss:$16 sps:$4 sm:$0xff]   ;;  %v12631_v4 = vld [vmem:[#allocation9 + $0x88] ss:$16 sps:$4 sm:$0xff]   ;;  %15238 = vst [vmem:[#allocation105_spill] sm:$0xff] %v12634_v6 }
 0x58b   :  { %5325 = vmatpush1.bf16.msra.mxu1 %v12581_v59  ;;  %5233 = vmatprep.mubr.bf16.mxu0 %v12033_v19  ;;  %15237 = vst [vmem:[#allocation104_spill] sm:$0xff] %v12631_v4  ;;  %v12637_v36 = vld [vmem:[#allocation9 + $0xac] ss:$16 sps:$4 sm:$0xff]  }
 0x58c   :  { %5356 = vmatprep.mubr.bf16.mxu1 %v12033_v19  ;;  %5203 = vmatprep.subr.bf16.mxu0 %v12586_v56  ;;  %v12601_v19 = vld [vmem:[#allocation9 + $0x4c] ss:$16 sps:$4 sm:$0xff]   ;;  %15239 = vst [vmem:[#allocation106_spill] sm:$0xff] %v12637_v36 }
 0x58d   :  { %5326 = vmatprep.subr.bf16.mxu1 %v12589_v7 }
 0x58e   :  { %5204 = vmatpush1.bf16.msra.mxu0 %v12592_v46 }
 0x58f   :  { %5327 = vmatpush1.bf16.msra.mxu1 %v12595_v60  ;;  %5205 = vmatprep.subr.bf16.mxu0 %v12598_v55 }
 0x590   :  { %5328 = vmatprep.subr.bf16.mxu1 %v12601_v19 }
 0x592   :  { %5206 = vmatpush1.bf16.msra.mxu0 %v12604_v33 }
 0x593   :  { %5329 = vmatpush1.bf16.msra.mxu1 %v12607_v37  ;;  %5207 = vmatprep.subr.bf16.mxu0 %v12610_v15 }
 0x594   :  { %5330 = vmatprep.subr.bf16.mxu1 %v12613_v50 }
 0x596   :  { %5208 = vmatpush1.bf16.msra.mxu0 %v12616_v20 }
 0x597   :  { %5331 = vmatpush1.bf16.msra.mxu1 %v12619_v18  ;;  %5209 = vmatprep.subr.bf16.mxu0 %v12622_v47  ;;  %v12640_v47 = vld [vmem:[#allocation9 + $0xa0] ss:$16 sps:$4 sm:$0xff]  }
 0x598   :  { %5332 = vmatprep.subr.bf16.mxu1 %v12625_v62  ;;  %15240 = vst [vmem:[#allocation107_spill] sm:$0xff] %v12640_v47  ;;  %v12643_v62 = vld [vmem:[#allocation9 + $0xa8] ss:$16 sps:$4 sm:$0xff]  }
 0x599   :  { %15241 = vst [vmem:[#allocation108_spill] sm:$0xff] %v12643_v62 }
 0x59a   :  { %5210 = vmatpush1.bf16.msra.mxu0 %v12628_v61  ;;  %v12646_v61 = vld [vmem:[#allocation9 + $0xc4] ss:$16 sps:$4 sm:$0xff]  }
 0x59b   :  { %5333 = vmatpush1.bf16.msra.mxu1 %v12631_v4  ;;  %5211 = vmatprep.subr.bf16.mxu0 %v12634_v6  ;;  %15242 = vst [vmem:[#allocation110_spill] sm:$0xff] %v12646_v61  ;;  %v12649_v4 = vld [vmem:[#allocation9 + $0xcc] ss:$16 sps:$4 sm:$0xff]   ;;  %v12652_v6 = vld [vmem:[#allocation9 + $0xc0] ss:$16 sps:$4 sm:$0xff]  }
 0x59c   :  { %5334 = vmatprep.subr.bf16.mxu1 %v12637_v36  ;;  %15243 = vst [vmem:[#allocation114_spill] sm:$0xff] %v12649_v4  ;;  %15244 = vst [vmem:[#allocation115_spill] sm:$0xff] %v12652_v6  ;;  %v12655_v36 = vld [vmem:[#allocation9 + $0xc8] ss:$16 sps:$4 sm:$0xff]  }
 0x59d   :  { %15245 = vst [vmem:[#allocation116_spill] sm:$0xff] %v12655_v36 }
 0x59e   :  { %5212 = vmatpush1.bf16.msra.mxu0 %v12640_v47  ;;  %v12658_v47 = vld [vmem:[#allocation9 + $0xe4] ss:$16 sps:$4 sm:$0xff]  }
 0x59f   :  { %5335 = vmatpush1.bf16.msra.mxu1 %v12643_v62  ;;  %5213 = vmatprep.subr.bf16.mxu0 %v12646_v61  ;;  %15246 = vst [vmem:[#allocation117_spill] sm:$0xff] %v12658_v47  ;;  %v12661_v62 = vld [vmem:[#allocation9 + $0xec] ss:$16 sps:$4 sm:$0xff]   ;;  %v12664_v61 = vld [vmem:[#allocation9 + $0xe0] ss:$16 sps:$4 sm:$0xff]  }
 0x5a0   :  { %5336 = vmatprep.subr.bf16.mxu1 %v12649_v4  ;;  %15247 = vst [vmem:[#allocation118_spill] sm:$0xff] %v12661_v62  ;;  %15248 = vst [vmem:[#allocation119_spill] sm:$0xff] %v12664_v61  ;;  %v12667_v4 = vld [vmem:[#allocation9 + $0xe8] ss:$16 sps:$4 sm:$0xff]  }
 0x5a1   :  { %15249 = vst [vmem:[#allocation120_spill] sm:$0xff] %v12667_v4 }
 0x5a2   :  { %5214 = vmatpush1.bf16.msra.mxu0 %v12652_v6  ;;  %v12670_v6 = vld [vmem:[#allocation9 + $0x104] ss:$16 sps:$4 sm:$0xff]  }
 0x5a3   :  { %5337 = vmatpush1.bf16.msra.mxu1 %v12655_v36  ;;  %5215 = vmatprep.subr.bf16.mxu0 %v12658_v47  ;;  %15250 = vst [vmem:[#allocation121_spill] sm:$0xff] %v12670_v6  ;;  %v12673_v36 = vld [vmem:[#allocation9 + $0x10c] ss:$16 sps:$4 sm:$0xff]   ;;  %v12676_v47 = vld [vmem:[#allocation9 + $0x100] ss:$16 sps:$4 sm:$0xff]  }
 0x5a4   :  { %5338 = vmatprep.subr.bf16.mxu1 %v12661_v62  ;;  %15251 = vst [vmem:[#allocation122_spill] sm:$0xff] %v12673_v36  ;;  %15252 = vst [vmem:[#allocation123_spill] sm:$0xff] %v12676_v47  ;;  %v12679_v62 = vld [vmem:[#allocation9 + $0x108] ss:$16 sps:$4 sm:$0xff]  }
 0x5a5   :  { %15253 = vst [vmem:[#allocation124_spill] sm:$0xff] %v12679_v62 }
 0x5a6   :  { %5216 = vmatpush1.bf16.msra.mxu0 %v12664_v61  ;;  %v12682_v61 = vld [vmem:[#allocation9 + $0x124] ss:$16 sps:$4 sm:$0xff]  }
 0x5a7   :  { %5339 = vmatpush1.bf16.msra.mxu1 %v12667_v4  ;;  %5217 = vmatprep.subr.bf16.mxu0 %v12670_v6  ;;  %15254 = vst [vmem:[#allocation125_spill] sm:$0xff] %v12682_v61  ;;  %v12685_v4 = vld [vmem:[#allocation9 + $0x12c] ss:$16 sps:$4 sm:$0xff]   ;;  %v12688_v6 = vld [vmem:[#allocation9 + $0x120] ss:$16 sps:$4 sm:$0xff]  }
 0x5a8   :  { %5340 = vmatprep.subr.bf16.mxu1 %v12673_v36  ;;  %15255 = vst [vmem:[#allocation126_spill] sm:$0xff] %v12685_v4  ;;  %15256 = vst [vmem:[#allocation127_spill] sm:$0xff] %v12688_v6  ;;  %v12691_v36 = vld [vmem:[#allocation9 + $0x128] ss:$16 sps:$4 sm:$0xff]  }
 0x5a9   :  { %15257 = vst [vmem:[#allocation128_spill] sm:$0xff] %v12691_v36 }
 0x5aa   :  { %5218 = vmatpush1.bf16.msra.mxu0 %v12676_v47  ;;  %v12694_v47 = vld [vmem:[#allocation9 + $0x144] ss:$16 sps:$4 sm:$0xff]  }
 0x5ab   :  { %5341 = vmatpush1.bf16.msra.mxu1 %v12679_v62  ;;  %5219 = vmatprep.subr.bf16.mxu0 %v12682_v61  ;;  %15258 = vst [vmem:[#allocation129_spill] sm:$0xff] %v12694_v47  ;;  %v12697_v62 = vld [vmem:[#allocation9 + $0x14c] ss:$16 sps:$4 sm:$0xff]   ;;  %v12700_v61 = vld [vmem:[#allocation9 + $0x140] ss:$16 sps:$4 sm:$0xff]  }
 0x5ac   :  { %5342 = vmatprep.subr.bf16.mxu1 %v12685_v4  ;;  %15259 = vst [vmem:[#allocation130_spill] sm:$0xff] %v12697_v62  ;;  %15260 = vst [vmem:[#allocation131_spill] sm:$0xff] %v12700_v61  ;;  %v12703_v4 = vld [vmem:[#allocation9 + $0x148] ss:$16 sps:$4 sm:$0xff]  }
 0x5ad   :  { %15261 = vst [vmem:[#allocation132_spill] sm:$0xff] %v12703_v4 }
 0x5ae   :  { %5220 = vmatpush1.bf16.msra.mxu0 %v12688_v6  ;;  %v12706_v6 = vld [vmem:[#allocation9 + $0x164] ss:$16 sps:$4 sm:$0xff]  }
 0x5af   :  { %5343 = vmatpush1.bf16.msra.mxu1 %v12691_v36  ;;  %5221 = vmatprep.subr.bf16.mxu0 %v12694_v47  ;;  %15262 = vst [vmem:[#allocation133_spill] sm:$0xff] %v12706_v6  ;;  %v12709_v36 = vld [vmem:[#allocation9 + $0x16c] ss:$16 sps:$4 sm:$0xff]   ;;  %v12712_v47 = vld [vmem:[#allocation9 + $0x160] ss:$16 sps:$4 sm:$0xff]  }
 0x5b0   :  { %5344 = vmatprep.subr.bf16.mxu1 %v12697_v62  ;;  %15263 = vst [vmem:[#allocation134_spill] sm:$0xff] %v12709_v36  ;;  %15264 = vst [vmem:[#allocation135_spill] sm:$0xff] %v12712_v47  ;;  %v12715_v62 = vld [vmem:[#allocation9 + $0x168] ss:$16 sps:$4 sm:$0xff]  }
 0x5b1   :  { %15265 = vst [vmem:[#allocation136_spill] sm:$0xff] %v12715_v62 }
 0x5b2   :  { %5222 = vmatpush1.bf16.msra.mxu0 %v12700_v61  ;;  %v12718_v61 = vld [vmem:[#allocation9 + $0x184] ss:$16 sps:$4 sm:$0xff]  }
 0x5b3   :  { %5345 = vmatpush1.bf16.msra.mxu1 %v12703_v4  ;;  %5223 = vmatprep.subr.bf16.mxu0 %v12706_v6  ;;  %15266 = vst [vmem:[#allocation137_spill] sm:$0xff] %v12718_v61  ;;  %v12721_v4 = vld [vmem:[#allocation9 + $0x18c] ss:$16 sps:$4 sm:$0xff]   ;;  %v12724_v6 = vld [vmem:[#allocation9 + $0x180] ss:$16 sps:$4 sm:$0xff]  }
 0x5b4   :  { %5346 = vmatprep.subr.bf16.mxu1 %v12709_v36  ;;  %15267 = vst [vmem:[#allocation138_spill] sm:$0xff] %v12721_v4  ;;  %15268 = vst [vmem:[#allocation139_spill] sm:$0xff] %v12724_v6  ;;  %v12727_v36 = vld [vmem:[#allocation9 + $0x188] ss:$16 sps:$4 sm:$0xff]  }
 0x5b5   :  { %15269 = vst [vmem:[#allocation140_spill] sm:$0xff] %v12727_v36 }
 0x5b6   :  { %5224 = vmatpush1.bf16.msra.mxu0 %v12712_v47  ;;  %v12730_v47 = vld [vmem:[#allocation9 + $0x1a4] ss:$16 sps:$4 sm:$0xff]  }
 0x5b7   :  { %5347 = vmatpush1.bf16.msra.mxu1 %v12715_v62  ;;  %5225 = vmatprep.subr.bf16.mxu0 %v12718_v61  ;;  %15270 = vst [vmem:[#allocation141_spill] sm:$0xff] %v12730_v47  ;;  %v12733_v62 = vld [vmem:[#allocation9 + $0x1ac] ss:$16 sps:$4 sm:$0xff]   ;;  %v12736_v61 = vld [vmem:[#allocation9 + $0x1a0] ss:$16 sps:$4 sm:$0xff]  }
 0x5b8   :  { %5348 = vmatprep.subr.bf16.mxu1 %v12721_v4  ;;  %15271 = vst [vmem:[#allocation142_spill] sm:$0xff] %v12733_v62  ;;  %15272 = vst [vmem:[#allocation143_spill] sm:$0xff] %v12736_v61  ;;  %v12739_v4 = vld [vmem:[#allocation9 + $0x1a8] ss:$16 sps:$4 sm:$0xff]  }
 0x5b9   :  { %15273 = vst [vmem:[#allocation144_spill] sm:$0xff] %v12739_v4 }
 0x5ba   :  { %5226 = vmatpush1.bf16.msra.mxu0 %v12724_v6  ;;  %v12742_v6 = vld [vmem:[#allocation9 + $0x1c4] ss:$16 sps:$4 sm:$0xff]  }
 0x5bb   :  { %5349 = vmatpush1.bf16.msra.mxu1 %v12727_v36  ;;  %5227 = vmatprep.subr.bf16.mxu0 %v12730_v47  ;;  %15274 = vst [vmem:[#allocation145_spill] sm:$0xff] %v12742_v6  ;;  %v12745_v36 = vld [vmem:[#allocation9 + $0x1cc] ss:$16 sps:$4 sm:$0xff]   ;;  %v12748_v47 = vld [vmem:[#allocation9 + $0x1c0] ss:$16 sps:$4 sm:$0xff]  }
 0x5bc   :  { %5350 = vmatprep.subr.bf16.mxu1 %v12733_v62  ;;  %15275 = vst [vmem:[#allocation146_spill] sm:$0xff] %v12745_v36  ;;  %15276 = vst [vmem:[#allocation147_spill] sm:$0xff] %v12748_v47  ;;  %v12751_v62 = vld [vmem:[#allocation9 + $0x1c8] ss:$16 sps:$4 sm:$0xff]  }
 0x5bd   :  { %15277 = vst [vmem:[#allocation148_spill] sm:$0xff] %v12751_v62 }
 0x5be   :  { %5228 = vmatpush1.bf16.msra.mxu0 %v12736_v61  ;;  %v12754_v61 = vld [vmem:[#allocation9 + $0x1e4] ss:$16 sps:$4 sm:$0xff]  }
 0x5bf   :  { %5351 = vmatpush1.bf16.msra.mxu1 %v12739_v4  ;;  %5229 = vmatprep.subr.bf16.mxu0 %v12742_v6  ;;  %v12757_v4 = vld [vmem:[#allocation9 + $0x1ec] ss:$16 sps:$4 sm:$0xff]   ;;  %v12760_v6 = vld [vmem:[#allocation9 + $0x1e0] ss:$16 sps:$4 sm:$0xff]  }
 0x5c0   :  { %5352 = vmatprep.subr.bf16.mxu1 %v12745_v36  ;;  %15278 = vst [vmem:[#allocation149_spill] sm:$0xff] %v12757_v4  ;;  %15279 = vst [vmem:[#allocation150_spill] sm:$0xff] %v12760_v6  ;;  %v12763_v36 = vld [vmem:[#allocation9 + $0x1e8] ss:$16 sps:$4 sm:$0xff]  }
 0x5c1   :  { %15280 = vst [vmem:[#allocation151_spill] sm:$0xff] %v12763_v36 }
 0x5c2   :  { %5230 = vmatpush1.bf16.msra.mxu0 %v12748_v47  ;;  %v12766_v47 = vld [vmem:[#allocation9 + $0x204] ss:$16 sps:$4 sm:$0xff]  }
 0x5c3   :  { %5353 = vmatpush1.bf16.msra.mxu1 %v12751_v62  ;;  %5231 = vmatprep.subr.bf16.mxu0 %v12754_v61  ;;  %15281 = vst [vmem:[#allocation152_spill] sm:$0xff] %v12766_v47  ;;  %v12769_v62 = vld [vmem:[#allocation9 + $0x20c] ss:$16 sps:$4 sm:$0xff]  }
 0x5c4   :  { %5354 = vmatprep.subr.bf16.mxu1 %v12757_v4  ;;  %15282 = vst [vmem:[#allocation153_spill] sm:$0xff] %v12769_v62  ;;  %v12774_v4 = vld [vmem:[#allocation9 + $0x200] ss:$16 sps:$4 sm:$0xff]  }
 0x5c5   :  { %15283 = vst [vmem:[#allocation154_spill] sm:$0xff] %v12774_v4 }
 0x5c6   :  { %5232 = vmatpush1.bf16.msra.mxu0 %v12760_v6  ;;  %v12778_v6 = vld [vmem:[#allocation9 + $0x208] ss:$16 sps:$4 sm:$0xff]  }
 0x5c7   :  { %5355 = vmatpush1.bf16.msra.mxu1 %v12763_v36  ;;  %5242 = vmatprep.subr.bf16.mxu0 %v12766_v47  ;;  %15284 = vst [vmem:[#allocation155_spill] sm:$0xff] %v12778_v6  ;;  %v12782_v47 = vld [vmem:[#allocation9 + $0x224] ss:$16 sps:$4 sm:$0xff]  }
 0x5c8   :  { %5365 = vmatprep.subr.bf16.mxu1 %v12769_v62  ;;  %15285 = vst [vmem:[#allocation156_spill] sm:$0xff] %v12782_v47  ;;  %v12785_v62 = vld [vmem:[#allocation9 + $0x22c] ss:$16 sps:$4 sm:$0xff]   ;;  %v12794_v36 = vld [vmem:[#allocation9 + $0x244] ss:$16 sps:$4 sm:$0xff]  }
 0x5c9   :  { %5234 = vmatmul.mubr.bf16.vlgmr.msra.gmra.mrb[40].mxu0 %v12105_v38  ;;  %15286 = vst [vmem:[#allocation157_spill] sm:$0xff] %v12785_v62  ;;  %15289 = vst [vmem:[#allocation160_spill] sm:$0xff] %v12794_v36 }
 0x5ca   :  { %5357 = vmatmul.mubr.bf16.vlgmr.msra.gmra.mrb[40].mxu1 %v12105_v38  ;;  %5243 = vmatpush1.bf16.msra.mxu0 %v12774_v4  ;;  %v12788_v38 = vld [vmem:[#allocation9 + $0x220] ss:$16 sps:$4 sm:$0xff]   ;;  %v12791_v4 = vld [vmem:[#allocation9 + $0x228] ss:$16 sps:$4 sm:$0xff]  }
 0x5cb   :  { %5274 = vmatprep.mubr.bf16.mxu0 %v12362_v35  ;;  %5366 = vmatpush1.bf16.msra.mxu1 %v12778_v6  ;;  %15287 = vst [vmem:[#allocation158_spill] sm:$0xff] %v12788_v38  ;;  %15288 = vst [vmem:[#allocation159_spill] sm:$0xff] %v12791_v4  ;;  %v12797_v6 = vld [vmem:[#allocation9 + $0x24c] ss:$16 sps:$4 sm:$0xff]  }
 0x5cc   :  { %5397 = vmatprep.mubr.bf16.mxu1 %v12362_v35  ;;  %5244 = vmatprep.subr.bf16.mxu0 %v12782_v47  ;;  %15290 = vst [vmem:[#allocation161_spill] sm:$0xff] %v12797_v6  ;;  %v12800_v47 = vld [vmem:[#allocation9 + $0x240] ss:$16 sps:$4 sm:$0xff]  }
 0x5cd   :  { %5367 = vmatprep.subr.bf16.mxu1 %v12785_v62  ;;  %15291 = vst [vmem:[#allocation162_spill] sm:$0xff] %v12800_v47  ;;  %v12803_v62 = vld [vmem:[#allocation9 + $0x248] ss:$16 sps:$4 sm:$0xff]  }
 0x5ce   :  { %5245 = vmatpush1.bf16.msra.mxu0 %v12788_v38  ;;  %15292 = vst [vmem:[#allocation163_spill] sm:$0xff] %v12803_v62  ;;  %v12806_v38 = vld [vmem:[#allocation9 + $0x264] ss:$16 sps:$4 sm:$0xff]  }
 0x5cf   :  { %5368 = vmatpush1.bf16.msra.mxu1 %v12791_v4  ;;  %5246 = vmatprep.subr.bf16.mxu0 %v12794_v36  ;;  %15293 = vst [vmem:[#allocation164_spill] sm:$0xff] %v12806_v38  ;;  %v12809_v4 = vld [vmem:[#allocation9 + $0x26c] ss:$16 sps:$4 sm:$0xff]   ;;  %v12812_v36 = vld [vmem:[#allocation9 + $0x260] ss:$16 sps:$4 sm:$0xff]  }
 0x5d0   :  { %5369 = vmatprep.subr.bf16.mxu1 %v12797_v6  ;;  %15294 = vst [vmem:[#allocation165_spill] sm:$0xff] %v12809_v4  ;;  %15295 = vst [vmem:[#allocation166_spill] sm:$0xff] %v12812_v36  ;;  %v12815_v6 = vld [vmem:[#allocation9 + $0x268] ss:$16 sps:$4 sm:$0xff]  }
 0x5d1   :  { %15296 = vst [vmem:[#allocation167_spill] sm:$0xff] %v12815_v6 }
 0x5d2   :  { %5247 = vmatpush1.bf16.msra.mxu0 %v12800_v47  ;;  %v12818_v47 = vld [vmem:[#allocation9 + $0x284] ss:$16 sps:$4 sm:$0xff]  }
 0x5d3   :  { %5370 = vmatpush1.bf16.msra.mxu1 %v12803_v62  ;;  %5248 = vmatprep.subr.bf16.mxu0 %v12806_v38  ;;  %15297 = vst [vmem:[#allocation168_spill] sm:$0xff] %v12818_v47  ;;  %v12821_v62 = vld [vmem:[#allocation9 + $0x28c] ss:$16 sps:$4 sm:$0xff]   ;;  %v12824_v38 = vld [vmem:[#allocation9 + $0x280] ss:$16 sps:$4 sm:$0xff]  }
 0x5d4   :  { %5371 = vmatprep.subr.bf16.mxu1 %v12809_v4  ;;  %15298 = vst [vmem:[#allocation169_spill] sm:$0xff] %v12821_v62  ;;  %15299 = vst [vmem:[#allocation170_spill] sm:$0xff] %v12824_v38  ;;  %v12827_v4 = vld [vmem:[#allocation9 + $0x288] ss:$16 sps:$4 sm:$0xff]  }
 0x5d5   :  { %15300 = vst [vmem:[#allocation28_spill] sm:$0xff] %v12827_v4 }
 0x5d6   :  { %5249 = vmatpush1.bf16.msra.mxu0 %v12812_v36  ;;  %v12830_v36 = vld [vmem:[#allocation9 + $0x2a4] ss:$16 sps:$4 sm:$0xff]  }
 0x5d7   :  { %5372 = vmatpush1.bf16.msra.mxu1 %v12815_v6  ;;  %5250 = vmatprep.subr.bf16.mxu0 %v12818_v47  ;;  %v12833_v6 = vld [vmem:[#allocation9 + $0x2ac] ss:$16 sps:$4 sm:$0xff]   ;;  %v12836_v47 = vld [vmem:[#allocation9 + $0x2a0] ss:$16 sps:$4 sm:$0xff]  }
 0x5d8   :  { %5373 = vmatprep.subr.bf16.mxu1 %v12821_v62  ;;  %v12839_v62 = vld [vmem:[#allocation9 + $0x2a8] ss:$16 sps:$4 sm:$0xff]  }
 0x5da   :  { %5251 = vmatpush1.bf16.msra.mxu0 %v12824_v38  ;;  %v12842_v38 = vld [vmem:[#allocation9 + $0x2c4] ss:$16 sps:$4 sm:$0xff]  }
 0x5db   :  { %5374 = vmatpush1.bf16.msra.mxu1 %v12827_v4  ;;  %5252 = vmatprep.subr.bf16.mxu0 %v12830_v36  ;;  %v12845_v4 = vld [vmem:[#allocation9 + $0x2cc] ss:$16 sps:$4 sm:$0xff]  }
 0x5dc   :  { %5375 = vmatprep.subr.bf16.mxu1 %v12833_v6 }
 0x5de   :  { %5253 = vmatpush1.bf16.msra.mxu0 %v12836_v47 }
 0x5df   :  { %5376 = vmatpush1.bf16.msra.mxu1 %v12839_v62  ;;  %5254 = vmatprep.subr.bf16.mxu0 %v12842_v38 }
 0x5e0   :  { %5377 = vmatprep.subr.bf16.mxu1 %v12845_v4 }
 0x5e2   :  { %5255 = vmatpush1.bf16.msra.mxu0 %v12235_v63  ;;  %v12872_v63 = vld [vmem:[#allocation8 + $0x8] sm:$0xff] }
 0x5e3   :  { %5378 = vmatpush1.bf16.msra.mxu1 %v12238_v0  ;;  %5256 = vmatprep.subr.bf16.mxu0 %v12241_v3  ;;  %v412_v0 = vrot.slane %v12872_v63, %v15080_v31  ;;  %v15301_v3 = vld [vmem:[#allocation49_spill] sm:$0xff]  ;;  %v15302_v31 = vld [vmem:[#allocation30_spill] sm:$0xff] }
 0x5e4   :  { %5379 = vmatprep.subr.bf16.mxu1 %v12244_v9 }
 0x5e5   :  { %v1941_v9 = vadd.f32 %v15301_v3, %v412_v0  ;;  %v15333_v0 = vld [vmem:[#allocation64_spill] sm:$0xff]  ;;  %v15334_v3 = vld [vmem:[#allocation65_spill] sm:$0xff] }
 0x5e6   :  { %5257 = vmatpush1.bf16.msra.mxu0 %v12247_v44 }
 0x5e7   :  { %5380 = vmatpush1.bf16.msra.mxu1 %v12250_v8  ;;  %5258 = vmatprep.subr.bf16.mxu0 %v12253_v10  ;;  %v2079_v44 = vmax.f32 %v1941_v9, 0.0  ;;  %v15303_v8 = vld [vmem:[#allocation31_spill] sm:$0xff]  ;;  %v15304_v10 = vld [vmem:[#allocation32_spill] sm:$0xff]  ;;  %v15335_v9 = vld [vmem:[#allocation66_spill] sm:$0xff] }
 0x5e8   :  { %5381 = vmatprep.subr.bf16.mxu1 %v12256_v45  ;;  %v15305_v45 = vld [vmem:[#allocation33_spill] sm:$0xff] }
 0x5ea   :  { %5259 = vmatpush1.bf16.msra.mxu0 %v12259_v5  ;;  %v12893_v5 = vpack.c.bf16 %v2079_v44, %v2079_v44  ;;  %v15336_v44 = vld [vmem:[#allocation67_spill] sm:$0xff] }
 0x5eb   :  { %5382 = vmatpush1.bf16.msra.mxu1 %v12262_v17  ;;  %5260 = vmatprep.subr.bf16.mxu0 %v12265_v13  ;;  %v15306_v17 = vld [vmem:[#allocation98_spill] sm:$0xff] }
 0x5ec   :  { %5383 = vmatprep.subr.bf16.mxu1 %v12268_v16  ;;  %v15307_v13 = vld [vmem:[#allocation34_spill] sm:$0xff]  ;;  %v15308_v16 = vld [vmem:[#allocation35_spill] sm:$0xff] }
 0x5ee   :  { %5261 = vmatpush1.bf16.msra.mxu0 %v12271_v14  ;;  %v15309_v14 = vld [vmem:[#allocation36_spill] sm:$0xff] }
 0x5ef   :  { %5384 = vmatpush1.bf16.msra.mxu1 %v12274_v42  ;;  %5262 = vmatprep.subr.bf16.mxu0 %v12277_v1  ;;  %v15310_v42 = vld [vmem:[#allocation37_spill] sm:$0xff]  ;;  %v15311_v1 = vld [vmem:[#allocation38_spill] sm:$0xff] }
 0x5f0   :  { %5385 = vmatprep.subr.bf16.mxu1 %v12280_v11  ;;  %v15312_v11 = vld [vmem:[#allocation39_spill] sm:$0xff] }
 0x5f2   :  { %5263 = vmatpush1.bf16.msra.mxu0 %v12283_v23  ;;  %v15313_v23 = vld [vmem:[#allocation40_spill] sm:$0xff] }
 0x5f3   :  { %5386 = vmatpush1.bf16.msra.mxu1 %v12286_v2  ;;  %5264 = vmatprep.subr.bf16.mxu0 %v12289_v24  ;;  %v15314_v2 = vld [vmem:[#allocation41_spill] sm:$0xff]  ;;  %v15315_v24 = vld [vmem:[#allocation42_spill] sm:$0xff] }
 0x5f4   :  { %5387 = vmatprep.subr.bf16.mxu1 %v12292_v25  ;;  %v15316_v25 = vld [vmem:[#allocation43_spill] sm:$0xff] }
 0x5f6   :  { %5265 = vmatpush1.bf16.msra.mxu0 %v12295_v26  ;;  %v15317_v26 = vld [vmem:[#allocation44_spill] sm:$0xff] }
 0x5f7   :  { %5388 = vmatpush1.bf16.msra.mxu1 %v12298_v27  ;;  %5266 = vmatprep.subr.bf16.mxu0 %v12301_v28  ;;  %v15318_v27 = vld [vmem:[#allocation45_spill] sm:$0xff]  ;;  %v15319_v28 = vld [vmem:[#allocation47_spill] sm:$0xff] }
 0x5f8   :  { %5389 = vmatprep.subr.bf16.mxu1 %v12304_v29  ;;  %v15320_v29 = vld [vmem:[#allocation51_spill] sm:$0xff] }
 0x5fa   :  { %5267 = vmatpush1.bf16.msra.mxu0 %v12308_v53  ;;  %v15321_v53 = vld [vmem:[#allocation52_spill] sm:$0xff] }
 0x5fb   :  { %5390 = vmatpush1.bf16.msra.mxu1 %v12311_v30  ;;  %5268 = vmatprep.subr.bf16.mxu0 %v12314_v40  ;;  %v15322_v30 = vld [vmem:[#allocation53_spill] sm:$0xff]  ;;  %v15323_v40 = vld [vmem:[#allocation54_spill] sm:$0xff] }
 0x5fc   :  { %5391 = vmatprep.subr.bf16.mxu1 %v12317_v41  ;;  %v15324_v41 = vld [vmem:[#allocation55_spill] sm:$0xff] }
 0x5fe   :  { %5269 = vmatpush1.bf16.msra.mxu0 %v12325_v48  ;;  %v15325_v48 = vld [vmem:[#allocation56_spill] sm:$0xff] }
 0x5ff   :  { %5392 = vmatpush1.bf16.msra.mxu1 %v12328_v49  ;;  %5270 = vmatprep.subr.bf16.mxu0 %v12331_v21  ;;  %v15326_v49 = vld [vmem:[#allocation57_spill] sm:$0xff]  ;;  %v15327_v21 = vld [vmem:[#allocation58_spill] sm:$0xff] }
 0x600   :  { %5393 = vmatprep.subr.bf16.mxu1 %v12334_v57  ;;  %v15328_v57 = vld [vmem:[#allocation59_spill] sm:$0xff] }
 0x602   :  { %5271 = vmatpush1.bf16.msra.mxu0 %v12338_v22  ;;  %v15329_v22 = vld [vmem:[#allocation60_spill] sm:$0xff] }
 0x603   :  { %5394 = vmatpush1.bf16.msra.mxu1 %v12341_v51  ;;  %5272 = vmatprep.subr.bf16.mxu0 %v12344_v52  ;;  %v15330_v51 = vld [vmem:[#allocation61_spill] sm:$0xff]  ;;  %v15331_v52 = vld [vmem:[#allocation62_spill] sm:$0xff] }
 0x604   :  { %5395 = vmatprep.subr.bf16.mxu1 %v12347_v54  ;;  %v15332_v54 = vld [vmem:[#allocation63_spill] sm:$0xff] }
 0x606   :  { %5273 = vmatpush1.bf16.msra.mxu0 %v15302_v31  ;;  %v15337_v31 = vld [vmem:[#allocation68_spill] sm:$0xff] }
 0x607   :  { %5396 = vmatpush1.bf16.msra.mxu1 %v15303_v8  ;;  %5283 = vmatprep.subr.bf16.mxu0 %v15304_v10  ;;  %v15338_v8 = vld [vmem:[#allocation69_spill] sm:$0xff]  ;;  %v15339_v10 = vld [vmem:[#allocation70_spill] sm:$0xff] }
 0x608   :  { %5406 = vmatprep.subr.bf16.mxu1 %v15305_v45  ;;  %v15340_v45 = vld [vmem:[#allocation71_spill] sm:$0xff] }
 0x609   :  { %5275 = vmatmul.mubr.bf16.vlgmr.msra.gmra.mrb[40].mxu0 %v15306_v17 }
 0x60a   :  { %5398 = vmatmul.mubr.bf16.vlgmr.msra.gmra.mrb[40].mxu1 %v15306_v17  ;;  %5284 = vmatpush1.bf16.msra.mxu0 %v15307_v13  ;;  %v15341_v13 = vld [vmem:[#allocation72_spill] sm:$0xff] }
 0x60b   :  { %5315 = vmatprep.mubr.bf16.mxu0 %v12893_v5  ;;  %5407 = vmatpush1.bf16.msra.mxu1 %v15308_v16  ;;  %v15342_v16 = vld [vmem:[#allocation73_spill] sm:$0xff] }
 0x60c   :  { %5438 = vmatprep.mubr.bf16.mxu1 %v12893_v5  ;;  %5285 = vmatprep.subr.bf16.mxu0 %v15309_v14  ;;  %v15343_v14 = vld [vmem:[#allocation74_spill] sm:$0xff] }
 0x60d   :  { %5408 = vmatprep.subr.bf16.mxu1 %v15310_v42  ;;  %v15344_v42 = vld [vmem:[#allocation75_spill] sm:$0xff] }
 0x60e   :  { %5286 = vmatpush1.bf16.msra.mxu0 %v15311_v1  ;;  %v15345_v1 = vld [vmem:[#allocation77_spill] sm:$0xff] }
 0x60f   :  { %5409 = vmatpush1.bf16.msra.mxu1 %v15312_v11  ;;  %5287 = vmatprep.subr.bf16.mxu0 %v15313_v23  ;;  %v15346_v11 = vld [vmem:[#allocation78_spill] sm:$0xff]  ;;  %v15347_v23 = vld [vmem:[#allocation79_spill] sm:$0xff] }
 0x610   :  { %5410 = vmatprep.subr.bf16.mxu1 %v15314_v2  ;;  %v15348_v2 = vld [vmem:[#allocation80_spill] sm:$0xff] }
 0x612   :  { %5288 = vmatpush1.bf16.msra.mxu0 %v15315_v24  ;;  %v15349_v24 = vld [vmem:[#allocation26_spill] sm:$0xff] }
 0x613   :  { %5411 = vmatpush1.bf16.msra.mxu1 %v15316_v25  ;;  %5289 = vmatprep.subr.bf16.mxu0 %v15317_v26  ;;  %v15350_v25 = vld [vmem:[#allocation81_spill] sm:$0xff]  ;;  %v15351_v26 = vld [vmem:[#allocation82_spill] sm:$0xff] }
 0x614   :  { %5412 = vmatprep.subr.bf16.mxu1 %v15318_v27  ;;  %v15352_v27 = vld [vmem:[#allocation83_spill] sm:$0xff] }
 0x616   :  { %5290 = vmatpush1.bf16.msra.mxu0 %v15319_v28  ;;  %v15353_v28 = vld [vmem:[#allocation84_spill] sm:$0xff] }
 0x617   :  { %5413 = vmatpush1.bf16.msra.mxu1 %v15320_v29  ;;  %5291 = vmatprep.subr.bf16.mxu0 %v15321_v53  ;;  %v15354_v29 = vld [vmem:[#allocation85_spill] sm:$0xff]  ;;  %v15355_v53 = vld [vmem:[#allocation86_spill] sm:$0xff] }
 0x618   :  { %5414 = vmatprep.subr.bf16.mxu1 %v15322_v30  ;;  %v15356_v30 = vld [vmem:[#allocation22_spill] sm:$0xff] }
 0x61a   :  { %5292 = vmatpush1.bf16.msra.mxu0 %v15323_v40  ;;  %v408_v40 = vrot.slane %v12872_v63, %v15356_v30  ;;  %v10150_v30 = vld [vmem:[#allocation11 + $0x398] sm:$0xff]  }
 0x61b   :  { %5415 = vmatpush1.bf16.msra.mxu1 %v15324_v41  ;;  %5293 = vmatprep.subr.bf16.mxu0 %v15325_v48  ;;  %v15357_v41 = vld [vmem:[#allocation87_spill] sm:$0xff] }
 0x61c   :  { %5416 = vmatprep.subr.bf16.mxu1 %v15326_v49  ;;  %v15358_v48 = vld [vmem:[#allocation23_spill] sm:$0xff]  ;;  %v15359_v49 = vld [vmem:[#allocation88_spill] sm:$0xff] }
 0x61e   :  { %5294 = vmatpush1.bf16.msra.mxu0 %v15327_v21  ;;  %v15360_v21 = vld [vmem:[#allocation89_spill] sm:$0xff] }
 0x61f   :  { %5417 = vmatpush1.bf16.msra.mxu1 %v15328_v57  ;;  %5295 = vmatprep.subr.bf16.mxu0 %v15329_v22  ;;  %v15361_v57 = vld [vmem:[#allocation46_spill] sm:$0xff] }
 0x620   :  { %5418 = vmatprep.subr.bf16.mxu1 %v15330_v51  ;;  %v1939_v22 = vadd.f32 %v15361_v57, %v408_v40  ;;  %v15362_v51 = vld [vmem:[#allocation90_spill] sm:$0xff]  ;;  %v10151_v40 = vld [vmem:[#allocation11 + $0x360] sm:$0xff]   ;;  %v10156_v57 = vld [vmem:[#allocation11 + $0x3e8] sm:$0xff]  }
 0x622   :  { %5296 = vmatpush1.bf16.msra.mxu0 %v15331_v52  ;;  %v15363_v52 = vld [vmem:[#allocation91_spill] sm:$0xff] }
 0x623   :  { %5419 = vmatpush1.bf16.msra.mxu1 %v15332_v54  ;;  %5297 = vmatprep.subr.bf16.mxu0 %v15333_v0  ;;  %v15364_v54 = vld [vmem:[#allocation92_spill] sm:$0xff]  ;;  %v15365_v0 = vld [vmem:[#allocation93_spill] sm:$0xff] }
 0x624   :  { %5420 = vmatprep.subr.bf16.mxu1 %v15334_v3  ;;  %v2078_v3 = vmax.f32 %v1939_v22, 0.0  ;;  %v10157_v22 = vld [vmem:[#allocation11 + $0x328] sm:$0xff]  }
 0x626   :  { %5298 = vmatpush1.bf16.msra.mxu0 %v15335_v9  ;;  %v15366_v9 = vld [vmem:[#allocation94_spill] sm:$0xff] }
 0x627   :  { %5421 = vmatpush1.bf16.msra.mxu1 %v15336_v44  ;;  %5299 = vmatprep.subr.bf16.mxu0 %v15337_v31  ;;  %v15367_v44 = vld [vmem:[#allocation95_spill] sm:$0xff] }
 0x628   :  { %5422 = vmatprep.subr.bf16.mxu1 %v15338_v8  ;;  %v10135_v31 = vld [vmem:[#allocation11 + $0x340] sm:$0xff]   ;;  %v15368_v8 = vld [vmem:[#allocation96_spill] sm:$0xff] }
 0x62a   :  { %5300 = vmatpush1.bf16.msra.mxu0 %v15339_v10  ;;  %v10136_v10 = vld [vmem:[#allocation11 + $0x3c0] sm:$0xff]  }
 0x62b   :  { %5423 = vmatpush1.bf16.msra.mxu1 %v15340_v45  ;;  %5301 = vmatprep.subr.bf16.mxu0 %v15341_v13  ;;  %v15369_v45 = vld [vmem:[#allocation97_spill] sm:$0xff]  ;;  %v10137_v13 = vld [vmem:[#allocation11 + $0x300] sm:$0xff]  }
 0x62c   :  { %5424 = vmatprep.subr.bf16.mxu1 %v15342_v16  ;;  %v12963_v16 = vpack.c.bf16 %v2078_v3, %v2078_v3 }
 0x62e   :  { %5302 = vmatpush1.bf16.msra.mxu0 %v15343_v14  ;;  %v15370_v14 = vld [vmem:[#allocation99_spill] sm:$0xff] }
 0x62f   :  { %5425 = vmatpush1.bf16.msra.mxu1 %v15344_v42  ;;  %5303 = vmatprep.subr.bf16.mxu0 %v15345_v1  ;;  %v10138_v42 = vld [vmem:[#allocation11 + $0x380] sm:$0xff]   ;;  %v10139_v1 = vld [vmem:[#allocation11 + $0x348] sm:$0xff]  }
 0x630   :  { %5426 = vmatprep.subr.bf16.mxu1 %v15346_v11  ;;  %v10140_v11 = vld [vmem:[#allocation11 + $0x3c8] sm:$0xff]  }
 0x632   :  { %5304 = vmatpush1.bf16.msra.mxu0 %v15347_v23  ;;  %v10141_v23 = vld [vmem:[#allocation11 + $0x308] sm:$0xff]  }
 0x633   :  { %5427 = vmatpush1.bf16.msra.mxu1 %v15348_v2  ;;  %5305 = vmatprep.subr.bf16.mxu0 %v15349_v24  ;;  %v10142_v2 = vld [vmem:[#allocation11 + $0x388] sm:$0xff]   ;;  %v10143_v24 = vld [vmem:[#allocation11 + $0x350] sm:$0xff]  }
 0x634   :  { %5428 = vmatprep.subr.bf16.mxu1 %v15350_v25  ;;  %v10144_v25 = vld [vmem:[#allocation11 + $0x3d0] sm:$0xff]  }
 0x636   :  { %5306 = vmatpush1.bf16.msra.mxu0 %v15351_v26  ;;  %v10145_v26 = vld [vmem:[#allocation11 + $0x310] sm:$0xff]  }
 0x637   :  { %5429 = vmatpush1.bf16.msra.mxu1 %v15352_v27  ;;  %5307 = vmatprep.subr.bf16.mxu0 %v15353_v28  ;;  %v10146_v27 = vld [vmem:[#allocation11 + $0x390] sm:$0xff]   ;;  %v10147_v28 = vld [vmem:[#allocation11 + $0x358] sm:$0xff]  }
 0x638   :  { %5430 = vmatprep.subr.bf16.mxu1 %v15354_v29  ;;  %v10148_v29 = vld [vmem:[#allocation11 + $0x3d8] sm:$0xff]  }
 0x63a   :  { %5308 = vmatpush1.bf16.msra.mxu0 %v15355_v53  ;;  %v10149_v53 = vld [vmem:[#allocation11 + $0x318] sm:$0xff]  }
 0x63b   :  { %5431 = vmatpush1.bf16.msra.mxu1 %v15357_v41  ;;  %5309 = vmatprep.subr.bf16.mxu0 %v15358_v48  ;;  %v10152_v41 = vld [vmem:[#allocation11 + $0x3e0] sm:$0xff]  }
 0x63c   :  { %5432 = vmatprep.subr.bf16.mxu1 %v15359_v49  ;;  %v10153_v48 = vld [vmem:[#allocation11 + $0x320] sm:$0xff]  }
 0x63d   :  { %v10154_v49 = vld [vmem:[#allocation11 + $0x3a0] sm:$0xff]  }
 0x63e   :  { %5310 = vmatpush1.bf16.msra.mxu0 %v15360_v21  ;;  %v10155_v21 = vld [vmem:[#allocation11 + $0x368] sm:$0xff]  }
 0x63f   :  { %5433 = vmatpush1.bf16.msra.mxu1 %v15362_v51  ;;  %5311 = vmatprep.subr.bf16.mxu0 %v15363_v52  ;;  %v10158_v51 = vld [vmem:[#allocation11 + $0x3a8] sm:$0xff]  }
 0x640   :  { %5434 = vmatprep.subr.bf16.mxu1 %v15364_v54 }
 0x642   :  { %5312 = vmatpush1.bf16.msra.mxu0 %v15365_v0 }
 0x643   :  { %5435 = vmatpush1.bf16.msra.mxu1 %v15366_v9  ;;  %5313 = vmatprep.subr.bf16.mxu0 %v15367_v44 }
 0x644   :  { %5436 = vmatprep.subr.bf16.mxu1 %v15368_v8 }
 0x646   :  { %5314 = vmatpush1.bf16.msra.mxu0 %v15369_v45 }
 0x647   :  { %5437 = vmatpush1.bf16.msra.mxu1 %v15370_v14  ;;  %9325 = vmatprep.subr.bf16.mxu0 %v10135_v31 }
 0x648   :  { %9347 = vmatprep.subr.bf16.mxu1 %v10136_v10 }
 0x649   :  { %5316 = vmatmul.mubr.bf16.vlgmr.msra.gmra.mrb[40].mxu0 %v12963_v16 }
 0x64a   :  { %5439 = vmatmul.mubr.bf16.vlgmr.msra.gmra.mrb[40].mxu1 %v12963_v16  ;;  %9326 = vmatpush3.bf16.msra.mxu0 %v10137_v13 }
 0x64b   :  { %9348 = vmatpush3.bf16.msra.mxu1 %v10138_v42  ;;  %9327 = vmatprep.subr.bf16.mxu0 %v10139_v1  ;;  %v10159_v42 = vld [vmem:[#allocation11 + $0x370] sm:$0xff]  }
 0x64c   :  { %9349 = vmatprep.subr.bf16.mxu1 %v10140_v11  ;;  %v10160_v1 = vld [vmem:[#allocation11 + $0x3f0] sm:$0xff]  }
 0x64d   :  { %v10161_v11 = vld [vmem:[#allocation11 + $0x330] sm:$0xff]  }
 0x64e   :  { %9328 = vmatpush3.bf16.msra.mxu0 %v10141_v23  ;;  %v10162_v23 = vld [vmem:[#allocation11 + $0x3b0] sm:$0xff]  }
 0x64f   :  { %9350 = vmatpush3.bf16.msra.mxu1 %v10142_v2  ;;  %9329 = vmatprep.subr.bf16.mxu0 %v10143_v24  ;;  %v10163_v2 = vld [vmem:[#allocation11 + $0x378] sm:$0xff]  }
 0x650   :  { %9351 = vmatprep.subr.bf16.mxu1 %v10144_v25  ;;  %v10164_v24 = vld [vmem:[#allocation11 + $0x3f8] sm:$0xff]  }
 0x651   :  { %v10165_v25 = vld [vmem:[#allocation11 + $0x338] sm:$0xff]  }
 0x652   :  { %9330 = vmatpush3.bf16.msra.mxu0 %v10145_v26  ;;  %v10166_v26 = vld [vmem:[#allocation11 + $0x3b8] sm:$0xff]  }
 0x653   :  { %9352 = vmatpush3.bf16.msra.mxu1 %v10146_v27  ;;  %9331 = vmatprep.subr.bf16.mxu0 %v10147_v28  ;;  %v15372_v28 = vld [vmem:[#allocation29_spill] sm:$0xff] }
 0x654   :  { %9353 = vmatprep.subr.bf16.mxu1 %v10148_v29 }
 0x656   :  { %9332 = vmatpush3.bf16.msra.mxu0 %v10149_v53 }
 0x657   :  { %9354 = vmatpush3.bf16.msra.mxu1 %v10150_v30  ;;  %9333 = vmatprep.subr.bf16.mxu0 %v10151_v40 }
 0x658   :  { %9355 = vmatprep.subr.bf16.mxu1 %v10152_v41 }
 0x65a   :  { %9334 = vmatpush3.bf16.msra.mxu0 %v10153_v48 }
 0x65b   :  { %9356 = vmatpush3.bf16.msra.mxu1 %v10154_v49  ;;  %9335 = vmatprep.subr.bf16.mxu0 %v10155_v21 }
 0x65c   :  { %v9297_v52 = vpop.f32.mrb[36].mxu0  ;;  %9357 = vmatprep.subr.bf16.mxu1 %v10156_v57 }
 0x65d   :  { %v9319_v54 = vpop.f32.mrb[36].mxu1  ;;  %v9298_v0 = vpop.f32.mrb[37].mxu0 }
 0x65e   :  { %v9299_v3 = vadd.f32 %v9298_v0, %v9297_v52  ;;  %v9320_v9 = vpop.f32.mrb[37].mxu1  ;;  %v9300_v44 = vpop.f32.mrb[38].mxu0  ;;  %9336 = vmatpush3.bf16.msra.mxu0 %v10157_v22 }
 0x65f   :  { %v9321_v31 = vadd.f32 %v9320_v9, %v9319_v54  ;;  %v9322_v8 = vpop.f32.mrb[38].mxu1  ;;  %v9301_v10 = vpop.f32.mrb[39].mxu0  ;;  %9358 = vmatpush3.bf16.msra.mxu1 %v10158_v51  ;;  %9337 = vmatprep.subr.bf16.mxu0 %v10159_v42  ;;  %v15392_v42 = vld [vmem:[#allocation124_spill] sm:$0xff] }
 0x660   :  { %v9323_v45 = vpop.f32.mrb[39].mxu1  ;;  %9359 = vmatprep.subr.bf16.mxu1 %v10160_v1  ;;  %v15388_v8 = vld [vmem:[#allocation120_spill] sm:$0xff]  ;;  %v15389_v10 = vld [vmem:[#allocation121_spill] sm:$0xff] }
 0x661   :  { %v5171_v13 = vadd.f32 %v9321_v31, %v9299_v3  ;;  %v15390_v45 = vld [vmem:[#allocation122_spill] sm:$0xff]  ;;  %v15393_v1 = vld [vmem:[#allocation125_spill] sm:$0xff] }
 0x662   :  { %9338 = vmatpush3.bf16.msra.mxu0 %v10161_v11  ;;  %v15394_v11 = vld [vmem:[#allocation126_spill] sm:$0xff] }
 0x663   :  { %v12969_v14 = vadd.f32 %v5171_v13, %v12566_v12  ;;  %9360 = vmatpush3.bf16.msra.mxu1 %v10162_v23  ;;  %9339 = vmatprep.subr.bf16.mxu0 %v10163_v2  ;;  %v15371_v12 = vld [vmem:[#allocation100_spill] sm:$0xff]  ;;  %v15391_v13 = vld [vmem:[#allocation123_spill] sm:$0xff] }
 0x664   :  { %9361 = vmatprep.subr.bf16.mxu1 %v10164_v24  ;;  %v15395_v23 = vld [vmem:[#allocation127_spill] sm:$0xff]  ;;  %v15396_v2 = vld [vmem:[#allocation128_spill] sm:$0xff]  ;;  %v15397_v24 = vld [vmem:[#allocation129_spill] sm:$0xff] }
 0x666   :  { %9340 = vmatpush3.bf16.msra.mxu0 %v10165_v25  ;;  %v15398_v25 = vld [vmem:[#allocation130_spill] sm:$0xff] }
 0x667   :  { %9362 = vmatpush3.bf16.msra.mxu1 %v10166_v26  ;;  %5817 = vmatprep.subr.bf16.mxu0 %v12568_v43  ;;  %v15399_v26 = vld [vmem:[#allocation131_spill] sm:$0xff] }
 0x668   :  { %5940 = vmatprep.subr.bf16.mxu1 %v15371_v12  ;;  %v15400_v12 = vld [vmem:[#allocation132_spill] sm:$0xff] }
 0x71c   :  { %v5317_v27 = vpop.f32.mrb[40].mxu0 }
 0x71d   :  { %v9586_v29 = vadd.f32 %v5317_v27, %v15372_v28  ;;  %v5440_v53 = vpop.f32.mrb[40].mxu1  ;;  %v5319_v30 = vpop.f32.mrb[41].mxu0  ;;  %v15401_v27 = vld [vmem:[#allocation133_spill] sm:$0xff] }
 0x71e   :  { %v9588_v40 = vadd.f32 %v5440_v53, %v12127_v39  ;;  %v9587_v41 = vadd.f32 %v5319_v30, %v12118_v32  ;;  %v5442_v48 = vpop.f32.mrb[41].mxu1  ;;  %v5321_v49 = vpop.f32.mrb[42].mxu0  ;;  %v15403_v53 = vld [vmem:[#allocation135_spill] sm:$0xff]  ;;  %v15404_v30 = vld [vmem:[#allocation136_spill] sm:$0xff] }
 0x71f   :  { %v5447_v21 = vmax.f32 %v9586_v29, 0.0  ;;  %v9589_v57 = vadd.f32 %v5442_v48, %v12121_v34  ;;  %v5444_v22 = vpop.f32.mrb[42].mxu1  ;;  %v5322_v51 = vpop.f32.mrb[43].mxu0  ;;  %v15402_v29 = vld [vmem:[#allocation134_spill] sm:$0xff]  ;;  %v15407_v48 = vld [vmem:[#allocation139_spill] sm:$0xff]  ;;  %v15408_v49 = vld [vmem:[#allocation140_spill] sm:$0xff] }
 0x720   :  { %v5449_v52 = vmax.f32 %v9588_v40, 0.0  ;;  %v5448_v43 = vmax.f32 %v9587_v41, 0.0  ;;  %v5445_v54 = vpop.f32.mrb[43].mxu1  ;;  %v15405_v40 = vld [vmem:[#allocation137_spill] sm:$0xff]  ;;  %v15406_v41 = vld [vmem:[#allocation138_spill] sm:$0xff]  ;;  %v15411_v22 = vld [vmem:[#allocation143_spill] sm:$0xff] }
 0x721   :  { %v5450_v0 = vmax.f32 %v9589_v57, 0.0  ;;  %v5516_v9 = vpack.c.bf16 %v5447_v21, %v5447_v21  ;;  %v15409_v21 = vld [vmem:[#allocation141_spill] sm:$0xff]  ;;  %v15410_v57 = vld [vmem:[#allocation142_spill] sm:$0xff]  ;;  %v15412_v51 = vld [vmem:[#allocation144_spill] sm:$0xff] }
 0x722   :  { %v5517_v3 = vpack.c.bf16 %v5448_v43, %v5448_v43  ;;  %v5518_v31 = vpack.c.bf16 %v5449_v52, %v5449_v52  ;;  %v15413_v52 = vld [vmem:[#allocation145_spill] sm:$0xff]  ;;  %v15414_v43 = vld [vmem:[#allocation146_spill] sm:$0xff]  ;;  %v15415_v54 = vld [vmem:[#allocation147_spill] sm:$0xff] }
 0x723   :  { %v5519_v44 = vpack.c.bf16 %v5450_v0, %v5450_v0  ;;  %v15416_v0 = vld [vmem:[#allocation148_spill] sm:$0xff] }
 0x724   :  { %5744 = vmatprep.mubr.bf16.mxu0 %v5517_v3  ;;  %v15417_v3 = vld [vmem:[#allocation149_spill] sm:$0xff] }
 0x725   :  { %5784 = vmatprep.mubr.bf16.mxu1 %v5519_v44  ;;  %5745 = vmatmul.mubr.bf16.vlgmr.msra.gmra.mrb[44].mxu0 %v5516_v9  ;;  %v15418_v9 = vld [vmem:[#allocation150_spill] sm:$0xff]  ;;  %v15419_v44 = vld [vmem:[#allocation151_spill] sm:$0xff] }
 0x726   :  { %5785 = vmatmul.mubr.bf16.vlgmr.msra.gmra.mrb[44].mxu1 %v5518_v31  ;;  %5818 = vmatpush1.bf16.msra.mxu0 %v12578_v58  ;;  %v15374_v58 = vld [vmem:[#allocation102_spill] sm:$0xff]  ;;  %v15420_v31 = vld [vmem:[#allocation152_spill] sm:$0xff] }
 0x727   :  { %5941 = vmatpush1.bf16.msra.mxu1 %v12581_v59  ;;  %5849 = vmatprep.mubr.bf16.mxu0 %v12362_v35  ;;  %v15375_v59 = vld [vmem:[#allocation103_spill] sm:$0xff] }
 0x728   :  { %5972 = vmatprep.mubr.bf16.mxu1 %v12362_v35  ;;  %5819 = vmatprep.subr.bf16.mxu0 %v12586_v56  ;;  %v15373_v35 = vld [vmem:[#allocation101_spill] sm:$0xff]  ;;  %v15376_v56 = vld [vmem:[#allocation104_spill] sm:$0xff] }
 0x729   :  { %5942 = vmatprep.subr.bf16.mxu1 %v12589_v7  ;;  %v15377_v7 = vld [vmem:[#allocation105_spill] sm:$0xff] }
 0x72a   :  { %5820 = vmatpush1.bf16.msra.mxu0 %v12592_v46  ;;  %v15378_v46 = vld [vmem:[#allocation106_spill] sm:$0xff] }
 0x72b   :  { %5943 = vmatpush1.bf16.msra.mxu1 %v12595_v60  ;;  %5821 = vmatprep.subr.bf16.mxu0 %v12598_v55  ;;  %v15379_v60 = vld [vmem:[#allocation107_spill] sm:$0xff]  ;;  %v15380_v55 = vld [vmem:[#allocation108_spill] sm:$0xff] }
 0x72c   :  { %5944 = vmatprep.subr.bf16.mxu1 %v12601_v19  ;;  %v15381_v19 = vld [vmem:[#allocation110_spill] sm:$0xff] }
 0x72e   :  { %5822 = vmatpush1.bf16.msra.mxu0 %v12604_v33  ;;  %v15382_v33 = vld [vmem:[#allocation114_spill] sm:$0xff] }
 0x72f   :  { %5945 = vmatpush1.bf16.msra.mxu1 %v12607_v37  ;;  %5823 = vmatprep.subr.bf16.mxu0 %v12610_v15  ;;  %v15383_v37 = vld [vmem:[#allocation115_spill] sm:$0xff]  ;;  %v15384_v15 = vld [vmem:[#allocation116_spill] sm:$0xff] }
 0x730   :  { %5946 = vmatprep.subr.bf16.mxu1 %v12613_v50  ;;  %v15385_v50 = vld [vmem:[#allocation117_spill] sm:$0xff] }
 0x732   :  { %5824 = vmatpush1.bf16.msra.mxu0 %v12616_v20  ;;  %v15386_v20 = vld [vmem:[#allocation118_spill] sm:$0xff] }
 0x733   :  { %5947 = vmatpush1.bf16.msra.mxu1 %v12619_v18  ;;  %5825 = vmatprep.subr.bf16.mxu0 %v15373_v35  ;;  %v15387_v18 = vld [vmem:[#allocation119_spill] sm:$0xff]  ;;  %v15421_v35 = vld [vmem:[#allocation153_spill] sm:$0xff] }
 0x734   :  { %5948 = vmatprep.subr.bf16.mxu1 %v15374_v58  ;;  %v15422_v58 = vld [vmem:[#allocation154_spill] sm:$0xff] }
 0x736   :  { %5826 = vmatpush1.bf16.msra.mxu0 %v15375_v59  ;;  %v15423_v59 = vld [vmem:[#allocation155_spill] sm:$0xff] }
 0x737   :  { %5949 = vmatpush1.bf16.msra.mxu1 %v15376_v56  ;;  %5827 = vmatprep.subr.bf16.mxu0 %v15377_v7  ;;  %v15425_v56 = vld [vmem:[#allocation157_spill] sm:$0xff]  ;;  %v15426_v7 = vld [vmem:[#allocation158_spill] sm:$0xff] }
 0x738   :  { %5950 = vmatprep.subr.bf16.mxu1 %v15378_v46  ;;  %v15427_v46 = vld [vmem:[#allocation159_spill] sm:$0xff] }
 0x73a   :  { %5828 = vmatpush1.bf16.msra.mxu0 %v15379_v60  ;;  %v15428_v60 = vld [vmem:[#allocation160_spill] sm:$0xff] }
 0x73b   :  { %5951 = vmatpush1.bf16.msra.mxu1 %v15380_v55  ;;  %5829 = vmatprep.subr.bf16.mxu0 %v15381_v19  ;;  %v15429_v55 = vld [vmem:[#allocation161_spill] sm:$0xff]  ;;  %v15431_v19 = vld [vmem:[#allocation163_spill] sm:$0xff] }
 0x73c   :  { %5952 = vmatprep.subr.bf16.mxu1 %v15382_v33  ;;  %v15432_v33 = vld [vmem:[#allocation164_spill] sm:$0xff] }
 0x73e   :  { %5830 = vmatpush1.bf16.msra.mxu0 %v15383_v37  ;;  %v15433_v37 = vld [vmem:[#allocation165_spill] sm:$0xff] }
 0x73f   :  { %5953 = vmatpush1.bf16.msra.mxu1 %v15384_v15  ;;  %5831 = vmatprep.subr.bf16.mxu0 %v15385_v50  ;;  %v15434_v15 = vld [vmem:[#allocation166_spill] sm:$0xff]  ;;  %v15435_v50 = vld [vmem:[#allocation167_spill] sm:$0xff] }
 0x740   :  { %5954 = vmatprep.subr.bf16.mxu1 %v15386_v20  ;;  %v15436_v20 = vld [vmem:[#allocation168_spill] sm:$0xff] }
 0x742   :  { %5832 = vmatpush1.bf16.msra.mxu0 %v15387_v18  ;;  %v15437_v18 = vld [vmem:[#allocation169_spill] sm:$0xff] }
 0x743   :  { %5955 = vmatpush1.bf16.msra.mxu1 %v15388_v8  ;;  %5833 = vmatprep.subr.bf16.mxu0 %v15389_v10  ;;  %v15438_v8 = vld [vmem:[#allocation170_spill] sm:$0xff]  ;;  %v15439_v10 = vld [vmem:[#allocation28_spill] sm:$0xff] }
 0x744   :  { %5956 = vmatprep.subr.bf16.mxu1 %v15390_v45  ;;  %v13071_v45 = vld [vmem:[#allocation9 + $0x2c0] ss:$16 sps:$4 sm:$0xff]  }
 0x746   :  { %5834 = vmatpush1.bf16.msra.mxu0 %v15391_v13  ;;  %v13074_v13 = vld [vmem:[#allocation9 + $0x2c8] ss:$16 sps:$4 sm:$0xff]  }
 0x747   :  { %5957 = vmatpush1.bf16.msra.mxu1 %v15392_v42  ;;  %5835 = vmatprep.subr.bf16.mxu0 %v15393_v1  ;;  %v13077_v42 = vld [vmem:[#allocation9 + $0x2e4] ss:$16 sps:$4 sm:$0xff]   ;;  %v13098_v1 = vld [vmem:[#allocation9 + $0x308] ss:$16 sps:$4 sm:$0xff]  }
 0x748   :  { %5958 = vmatprep.subr.bf16.mxu1 %v15394_v11  ;;  %v13101_v11 = vld [vmem:[#allocation9 + $0x324] ss:$16 sps:$4 sm:$0xff]  }
 0x74a   :  { %5836 = vmatpush1.bf16.msra.mxu0 %v15395_v23  ;;  %v13104_v23 = vld [vmem:[#allocation9 + $0x32c] ss:$16 sps:$4 sm:$0xff]  }
 0x74b   :  { %5959 = vmatpush1.bf16.msra.mxu1 %v15396_v2  ;;  %5837 = vmatprep.subr.bf16.mxu0 %v15397_v24  ;;  %v13107_v2 = vld [vmem:[#allocation9 + $0x320] ss:$16 sps:$4 sm:$0xff]   ;;  %v13110_v24 = vld [vmem:[#allocation9 + $0x328] ss:$16 sps:$4 sm:$0xff]  }
 0x74c   :  { %5960 = vmatprep.subr.bf16.mxu1 %v15398_v25  ;;  %v13113_v25 = vld [vmem:[#allocation9 + $0x344] ss:$16 sps:$4 sm:$0xff]  }
 0x74e   :  { %5838 = vmatpush1.bf16.msra.mxu0 %v15399_v26  ;;  %v13116_v26 = vld [vmem:[#allocation9 + $0x34c] ss:$16 sps:$4 sm:$0xff]  }
 0x74f   :  { %5961 = vmatpush1.bf16.msra.mxu1 %v15400_v12  ;;  %5839 = vmatprep.subr.bf16.mxu0 %v15401_v27  ;;  %v13119_v12 = vld [vmem:[#allocation9 + $0x340] ss:$16 sps:$4 sm:$0xff]   ;;  %v13122_v27 = vld [vmem:[#allocation9 + $0x348] ss:$16 sps:$4 sm:$0xff]  }
 0x750   :  { %5962 = vmatprep.subr.bf16.mxu1 %v15402_v29  ;;  %v13125_v29 = vld [vmem:[#allocation9 + $0x364] ss:$16 sps:$4 sm:$0xff]  }
 0x752   :  { %5840 = vmatpush1.bf16.msra.mxu0 %v15403_v53  ;;  %v13128_v53 = vld [vmem:[#allocation9 + $0x36c] ss:$16 sps:$4 sm:$0xff]  }
 0x753   :  { %5963 = vmatpush1.bf16.msra.mxu1 %v15404_v30  ;;  %5841 = vmatprep.subr.bf16.mxu0 %v15405_v40  ;;  %v13131_v30 = vld [vmem:[#allocation9 + $0x360] ss:$16 sps:$4 sm:$0xff]   ;;  %v13134_v40 = vld [vmem:[#allocation9 + $0x368] ss:$16 sps:$4 sm:$0xff]  }
 0x754   :  { %5964 = vmatprep.subr.bf16.mxu1 %v15406_v41  ;;  %v13137_v41 = vld [vmem:[#allocation9 + $0x384] ss:$16 sps:$4 sm:$0xff]  }
 0x756   :  { %5842 = vmatpush1.bf16.msra.mxu0 %v15407_v48  ;;  %v13140_v48 = vld [vmem:[#allocation9 + $0x38c] ss:$16 sps:$4 sm:$0xff]  }
 0x757   :  { %5965 = vmatpush1.bf16.msra.mxu1 %v15408_v49  ;;  %5843 = vmatprep.subr.bf16.mxu0 %v15409_v21  ;;  %v13143_v49 = vld [vmem:[#allocation9 + $0x380] ss:$16 sps:$4 sm:$0xff]   ;;  %v13146_v21 = vld [vmem:[#allocation9 + $0x388] ss:$16 sps:$4 sm:$0xff]  }
 0x758   :  { %5966 = vmatprep.subr.bf16.mxu1 %v15410_v57  ;;  %v13149_v57 = vld [vmem:[#allocation9 + $0x3a4] ss:$16 sps:$4 sm:$0xff]  }
 0x75a   :  { %5844 = vmatpush1.bf16.msra.mxu0 %v15411_v22  ;;  %v13152_v22 = vld [vmem:[#allocation9 + $0x3ac] ss:$16 sps:$4 sm:$0xff]  }
 0x75b   :  { %5967 = vmatpush1.bf16.msra.mxu1 %v15412_v51  ;;  %5845 = vmatprep.subr.bf16.mxu0 %v15413_v52  ;;  %v15440_v51 = vld [vmem:[#allocation24_spill] sm:$0xff] }
 0x75c   :  { %5968 = vmatprep.subr.bf16.mxu1 %v15414_v43  ;;  %v420_v52 = vrot.slane %v12872_v63, %v15440_v51  ;;  %v13157_v43 = vld [vmem:[#allocation9 + $0x3a0] ss:$16 sps:$4 sm:$0xff]   ;;  %v13230_v51 = vld [vmem:[#allocation9 + $0x464] ss:$16 sps:$4 sm:$0xff]  }
 0x75d   :  { %15455 = vst [vmem:[#allocation40_spill] sm:$0xff] %v13230_v51 }
 0x75e   :  { %5846 = vmatpush1.bf16.msra.mxu0 %v15415_v54  ;;  %v13160_v54 = vld [vmem:[#allocation9 + $0x3a8] ss:$16 sps:$4 sm:$0xff]  }
 0x75f   :  { %5969 = vmatpush1.bf16.msra.mxu1 %v15416_v0  ;;  %5847 = vmatprep.subr.bf16.mxu0 %v12754_v61  ;;  %v15424_v61 = vld [vmem:[#allocation156_spill] sm:$0xff]  ;;  %v13163_v0 = vld [vmem:[#allocation9 + $0x3c4] ss:$16 sps:$4 sm:$0xff]  }
 0x760   :  { %5970 = vmatprep.subr.bf16.mxu1 %v15417_v3  ;;  %v13166_v3 = vld [vmem:[#allocation9 + $0x3cc] ss:$16 sps:$4 sm:$0xff]  }
 0x762   :  { %5848 = vmatpush1.bf16.msra.mxu0 %v15418_v9  ;;  %v15441_v9 = vld [vmem:[#allocation50_spill] sm:$0xff] }
 0x763   :  { %5971 = vmatpush1.bf16.msra.mxu1 %v15419_v44  ;;  %5858 = vmatprep.subr.bf16.mxu0 %v15420_v31  ;;  %v1982_v44 = vadd.f32 %v15441_v9, %v420_v52  ;;  %v13170_v31 = vld [vmem:[#allocation9 + $0x3c0] ss:$16 sps:$4 sm:$0xff]   ;;  %v13233_v52 = vld [vmem:[#allocation9 + $0x46c] ss:$16 sps:$4 sm:$0xff]  }
 0x764   :  { %5981 = vmatprep.subr.bf16.mxu1 %v15421_v35  ;;  %v13173_v35 = vld [vmem:[#allocation9 + $0x3c8] ss:$16 sps:$4 sm:$0xff]   ;;  %15456 = vst [vmem:[#allocation41_spill] sm:$0xff] %v13233_v52  ;;  %v13236_v9 = vld [vmem:[#allocation9 + $0x460] ss:$16 sps:$4 sm:$0xff]  }
 0x765   :  { %5850 = vmatmul.mubr.bf16.vlgmr.msra.gmra.mrb[48].mxu0 %v15306_v17  ;;  %15457 = vst [vmem:[#allocation42_spill] sm:$0xff] %v13236_v9 }
 0x766   :  { %5973 = vmatmul.mubr.bf16.vlgmr.msra.gmra.mrb[48].mxu1 %v15306_v17  ;;  %5859 = vmatpush1.bf16.msra.mxu0 %v15422_v58  ;;  %v15430_v17 = vld [vmem:[#allocation162_spill] sm:$0xff]  ;;  %v13176_v58 = vld [vmem:[#allocation9 + $0x3e4] ss:$16 sps:$4 sm:$0xff]  }
 0x767   :  { %5890 = vmatprep.mubr.bf16.mxu0 %v12893_v5  ;;  %5982 = vmatpush1.bf16.msra.mxu1 %v15423_v59  ;;  %v13179_v59 = vld [vmem:[#allocation9 + $0x3ec] ss:$16 sps:$4 sm:$0xff]  }
 0x768   :  { %6013 = vmatprep.mubr.bf16.mxu1 %v12893_v5  ;;  %5860 = vmatprep.subr.bf16.mxu0 %v15424_v61  ;;  %v2081_v61 = vmax.f32 %v1982_v44, 0.0  ;;  %v13239_v44 = vld [vmem:[#allocation9 + $0x468] ss:$16 sps:$4 sm:$0xff]  }
 0x769   :  { %5983 = vmatprep.subr.bf16.mxu1 %v15425_v56  ;;  %v13182_v56 = vld [vmem:[#allocation9 + $0x3e0] ss:$16 sps:$4 sm:$0xff]   ;;  %15458 = vst [vmem:[#allocation43_spill] sm:$0xff] %v13239_v44 }
 0x76a   :  { %5861 = vmatpush1.bf16.msra.mxu0 %v15426_v7  ;;  %v13185_v7 = vld [vmem:[#allocation9 + $0x3e8] ss:$16 sps:$4 sm:$0xff]  }
 0x76b   :  { %5984 = vmatpush1.bf16.msra.mxu1 %v15427_v46  ;;  %5862 = vmatprep.subr.bf16.mxu0 %v15428_v60  ;;  %15442 = vst [vmem:[#allocation27_spill] sm:$0xff] %v13185_v7  ;;  %v13188_v46 = vld [vmem:[#allocation9 + $0x404] ss:$16 sps:$4 sm:$0xff]   ;;  %v13191_v60 = vld [vmem:[#allocation9 + $0x40c] ss:$16 sps:$4 sm:$0xff]  }
 0x76c   :  { %5985 = vmatprep.subr.bf16.mxu1 %v15429_v55  ;;  %15443 = vst [vmem:[#allocation49_spill] sm:$0xff] %v13188_v46  ;;  %15444 = vst [vmem:[#allocation30_spill] sm:$0xff] %v13191_v60  ;;  %v13194_v55 = vpack.c.bf16 %v2081_v61, %v2081_v61  ;;  %v13242_v61 = vld [vmem:[#allocation9 + $0x484] ss:$16 sps:$4 sm:$0xff]  }
 0x76d   :  { %15459 = vst [vmem:[#allocation44_spill] sm:$0xff] %v13242_v61 }
 0x76e   :  { %5863 = vmatpush1.bf16.msra.mxu0 %v15430_v17  ;;  %v13198_v17 = vld [vmem:[#allocation9 + $0x400] ss:$16 sps:$4 sm:$0xff]  }
 0x76f   :  { %5986 = vmatpush1.bf16.msra.mxu1 %v15431_v19  ;;  %5864 = vmatprep.subr.bf16.mxu0 %v15432_v33  ;;  %15445 = vst [vmem:[#allocation31_spill] sm:$0xff] %v13198_v17  ;;  %v13202_v19 = vld [vmem:[#allocation9 + $0x408] ss:$16 sps:$4 sm:$0xff]   ;;  %v13206_v33 = vld [vmem:[#allocation9 + $0x424] ss:$16 sps:$4 sm:$0xff]  }
 0x770   :  { %5987 = vmatprep.subr.bf16.mxu1 %v15433_v37  ;;  %15446 = vst [vmem:[#allocation32_spill] sm:$0xff] %v13202_v19  ;;  %15447 = vst [vmem:[#allocation33_spill] sm:$0xff] %v13206_v33  ;;  %v13209_v37 = vld [vmem:[#allocation9 + $0x42c] ss:$16 sps:$4 sm:$0xff]  }
 0x771   :  { %15448 = vst [vmem:[#allocation98_spill] sm:$0xff] %v13209_v37 }
 0x772   :  { %5865 = vmatpush1.bf16.msra.mxu0 %v15434_v15  ;;  %v13212_v15 = vld [vmem:[#allocation9 + $0x420] ss:$16 sps:$4 sm:$0xff]  }
 0x773   :  { %5988 = vmatpush1.bf16.msra.mxu1 %v15435_v50  ;;  %5866 = vmatprep.subr.bf16.mxu0 %v15436_v20  ;;  %15449 = vst [vmem:[#allocation34_spill] sm:$0xff] %v13212_v15  ;;  %v13215_v50 = vld [vmem:[#allocation9 + $0x428] ss:$16 sps:$4 sm:$0xff]   ;;  %v13218_v20 = vld [vmem:[#allocation9 + $0x444] ss:$16 sps:$4 sm:$0xff]  }
 0x774   :  { %5989 = vmatprep.subr.bf16.mxu1 %v15437_v18  ;;  %15450 = vst [vmem:[#allocation35_spill] sm:$0xff] %v13215_v50  ;;  %15451 = vst [vmem:[#allocation36_spill] sm:$0xff] %v13218_v20  ;;  %v13221_v18 = vld [vmem:[#allocation9 + $0x44c] ss:$16 sps:$4 sm:$0xff]  }
 0x775   :  { %15452 = vst [vmem:[#allocation37_spill] sm:$0xff] %v13221_v18 }
 0x776   :  { %5867 = vmatpush1.bf16.msra.mxu0 %v15438_v8  ;;  %v13224_v8 = vld [vmem:[#allocation9 + $0x440] ss:$16 sps:$4 sm:$0xff]  }
 0x777   :  { %5990 = vmatpush1.bf16.msra.mxu1 %v15439_v10  ;;  %5868 = vmatprep.subr.bf16.mxu0 %v12830_v36  ;;  %v13092_v36 = vld [vmem:[#allocation9 + $0x30c] ss:$16 sps:$4 sm:$0xff]   ;;  %15453 = vst [vmem:[#allocation38_spill] sm:$0xff] %v13224_v8  ;;  %v13227_v10 = vld [vmem:[#allocation9 + $0x448] ss:$16 sps:$4 sm:$0xff]  }
 0x778   :  { %5991 = vmatprep.subr.bf16.mxu1 %v12833_v6  ;;  %v13080_v6 = vld [vmem:[#allocation9 + $0x2ec] ss:$16 sps:$4 sm:$0xff]   ;;  %15454 = vst [vmem:[#allocation39_spill] sm:$0xff] %v13227_v10 }
 0x77a   :  { %5869 = vmatpush1.bf16.msra.mxu0 %v12836_v47  ;;  %v13083_v47 = vld [vmem:[#allocation9 + $0x2e0] ss:$16 sps:$4 sm:$0xff]  }
 0x77b   :  { %5992 = vmatpush1.bf16.msra.mxu1 %v12839_v62  ;;  %5870 = vmatprep.subr.bf16.mxu0 %v12842_v38  ;;  %v13086_v62 = vld [vmem:[#allocation9 + $0x2e8] ss:$16 sps:$4 sm:$0xff]   ;;  %v13095_v38 = vld [vmem:[#allocation9 + $0x300] ss:$16 sps:$4 sm:$0xff]  }
 0x77c   :  { %5993 = vmatprep.subr.bf16.mxu1 %v12845_v4  ;;  %v13089_v4 = vld [vmem:[#allocation9 + $0x304] ss:$16 sps:$4 sm:$0xff]  }
 0x77e   :  { %5871 = vmatpush1.bf16.msra.mxu0 %v13071_v45 }
 0x77f   :  { %5994 = vmatpush1.bf16.msra.mxu1 %v13074_v13  ;;  %5872 = vmatprep.subr.bf16.mxu0 %v13077_v42 }
 0x780   :  { %5995 = vmatprep.subr.bf16.mxu1 %v13080_v6 }
 0x782   :  { %5873 = vmatpush1.bf16.msra.mxu0 %v13083_v47 }
 0x783   :  { %5996 = vmatpush1.bf16.msra.mxu1 %v13086_v62  ;;  %5874 = vmatprep.subr.bf16.mxu0 %v13089_v4 }
 0x784   :  { %5997 = vmatprep.subr.bf16.mxu1 %v13092_v36 }
 0x786   :  { %5875 = vmatpush1.bf16.msra.mxu0 %v13095_v38 }
 0x787   :  { %5998 = vmatpush1.bf16.msra.mxu1 %v13098_v1  ;;  %5876 = vmatprep.subr.bf16.mxu0 %v13101_v11 }
 0x788   :  { %5999 = vmatprep.subr.bf16.mxu1 %v13104_v23 }
 0x78a   :  { %5877 = vmatpush1.bf16.msra.mxu0 %v13107_v2 }
 0x78b   :  { %6000 = vmatpush1.bf16.msra.mxu1 %v13110_v24  ;;  %5878 = vmatprep.subr.bf16.mxu0 %v13113_v25 }
 0x78c   :  { %6001 = vmatprep.subr.bf16.mxu1 %v13116_v26 }
 0x78e   :  { %5879 = vmatpush1.bf16.msra.mxu0 %v13119_v12 }
 0x78f   :  { %6002 = vmatpush1.bf16.msra.mxu1 %v13122_v27  ;;  %5880 = vmatprep.subr.bf16.mxu0 %v13125_v29 }
 0x790   :  { %6003 = vmatprep.subr.bf16.mxu1 %v13128_v53 }
 0x792   :  { %5881 = vmatpush1.bf16.msra.mxu0 %v13131_v30 }
 0x793   :  { %6004 = vmatpush1.bf16.msra.mxu1 %v13134_v40  ;;  %5882 = vmatprep.subr.bf16.mxu0 %v13137_v41 }
 0x794   :  { %6005 = vmatprep.subr.bf16.mxu1 %v13140_v48 }
 0x796   :  { %5883 = vmatpush1.bf16.msra.mxu0 %v13143_v49 }
 0x797   :  { %6006 = vmatpush1.bf16.msra.mxu1 %v13146_v21  ;;  %5884 = vmatprep.subr.bf16.mxu0 %v13149_v57 }
 0x798   :  { %6007 = vmatprep.subr.bf16.mxu1 %v13152_v22 }
 0x79a   :  { %5885 = vmatpush1.bf16.msra.mxu0 %v13157_v43 }
 0x79b   :  { %6008 = vmatpush1.bf16.msra.mxu1 %v13160_v54  ;;  %5886 = vmatprep.subr.bf16.mxu0 %v13163_v0 }
 0x79c   :  { %6009 = vmatprep.subr.bf16.mxu1 %v13166_v3 }
 0x79e   :  { %5887 = vmatpush1.bf16.msra.mxu0 %v13170_v31 }
 0x79f   :  { %6010 = vmatpush1.bf16.msra.mxu1 %v13173_v35  ;;  %5888 = vmatprep.subr.bf16.mxu0 %v13176_v58 }
 0x7a0   :  { %6011 = vmatprep.subr.bf16.mxu1 %v13179_v59 }
 0x7a2   :  { %5889 = vmatpush1.bf16.msra.mxu0 %v13182_v56 }
 0x7a3   :  { %6012 = vmatpush1.bf16.msra.mxu1 %v13185_v7  ;;  %5899 = vmatprep.subr.bf16.mxu0 %v13188_v46  ;;  %v10193_v46 = vld [vmem:[#allocation11 + $0x430] sm:$0xff]  }
 0x7a4   :  { %6022 = vmatprep.subr.bf16.mxu1 %v13191_v60  ;;  %v10194_v7 = vld [vmem:[#allocation11 + $0x4b0] sm:$0xff]  }
 0x7a5   :  { %5891 = vmatmul.mubr.bf16.vlgmr.msra.gmra.mrb[48].mxu0 %v12963_v16 }
 0x7a6   :  { %6014 = vmatmul.mubr.bf16.vlgmr.msra.gmra.mrb[48].mxu1 %v12963_v16  ;;  %5900 = vmatpush1.bf16.msra.mxu0 %v13198_v17 }
 0x7a7   :  { %5931 = vmatprep.mubr.bf16.mxu0 %v13194_v55  ;;  %6023 = vmatpush1.bf16.msra.mxu1 %v13202_v19  ;;  %v10183_v19 = vld [vmem:[#allocation11 + $0x460] sm:$0xff]  }
 0x7a8   :  { %6054 = vmatprep.mubr.bf16.mxu1 %v13194_v55  ;;  %5901 = vmatprep.subr.bf16.mxu0 %v13206_v33  ;;  %v10181_v33 = vld [vmem:[#allocation11 + $0x418] sm:$0xff]  }
 0x7a9   :  { %6024 = vmatprep.subr.bf16.mxu1 %v13209_v37  ;;  %v10177_v37 = vld [vmem:[#allocation11 + $0x410] sm:$0xff]  }
 0x7aa   :  { %5902 = vmatpush1.bf16.msra.mxu0 %v13212_v15  ;;  %v10176_v15 = vld [vmem:[#allocation11 + $0x4d0] sm:$0xff]  }
 0x7ab   :  { %6025 = vmatpush1.bf16.msra.mxu1 %v13215_v50  ;;  %5903 = vmatprep.subr.bf16.mxu0 %v13218_v20  ;;  %v13362_v20 = vld [vmem:[#allocation9 + $0x5a8] ss:$16 sps:$4 sm:$0xff]  }
 0x7ac   :  { %6026 = vmatprep.subr.bf16.mxu1 %v13221_v18  ;;  %15500 = vst [vmem:[#allocation22_spill] sm:$0xff] %v13362_v20  ;;  %v10172_v50 = vld [vmem:[#allocation11 + $0x4c8] sm:$0xff]  }
 0x7ae   :  { %5904 = vmatpush1.bf16.msra.mxu0 %v13224_v8 }
 0x7af   :  { %6027 = vmatpush1.bf16.msra.mxu1 %v13227_v10  ;;  %5905 = vmatprep.subr.bf16.mxu0 %v13230_v51  ;;  %v13245_v10 = vld [vmem:[#allocation9 + $0x48c] ss:$16 sps:$4 sm:$0xff]   ;;  %v13248_v51 = vld [vmem:[#allocation9 + $0x480] ss:$16 sps:$4 sm:$0xff]  }
 0x7b0   :  { %6028 = vmatprep.subr.bf16.mxu1 %v13233_v52  ;;  %15460 = vst [vmem:[#allocation45_spill] sm:$0xff] %v13245_v10  ;;  %15461 = vst [vmem:[#allocation47_spill] sm:$0xff] %v13248_v51  ;;  %v13251_v52 = vld [vmem:[#allocation9 + $0x488] ss:$16 sps:$4 sm:$0xff]  }
 0x7b1   :  { %15462 = vst [vmem:[#allocation51_spill] sm:$0xff] %v13251_v52 }
 0x7b2   :  { %5906 = vmatpush1.bf16.msra.mxu0 %v13236_v9  ;;  %v13254_v9 = vld [vmem:[#allocation9 + $0x4a4] ss:$16 sps:$4 sm:$0xff]  }
 0x7b3   :  { %6029 = vmatpush1.bf16.msra.mxu1 %v13239_v44  ;;  %5907 = vmatprep.subr.bf16.mxu0 %v13242_v61  ;;  %15463 = vst [vmem:[#allocation52_spill] sm:$0xff] %v13254_v9  ;;  %v13257_v44 = vld [vmem:[#allocation9 + $0x4ac] ss:$16 sps:$4 sm:$0xff]   ;;  %v13260_v61 = vld [vmem:[#allocation9 + $0x4a0] ss:$16 sps:$4 sm:$0xff]  }
 0x7b4   :  { %6030 = vmatprep.subr.bf16.mxu1 %v13245_v10  ;;  %15464 = vst [vmem:[#allocation53_spill] sm:$0xff] %v13257_v44  ;;  %15465 = vst [vmem:[#allocation54_spill] sm:$0xff] %v13260_v61  ;;  %v13263_v10 = vld [vmem:[#allocation9 + $0x4a8] ss:$16 sps:$4 sm:$0xff]  }
 0x7b5   :  { %15466 = vst [vmem:[#allocation55_spill] sm:$0xff] %v13263_v10 }
 0x7b6   :  { %5908 = vmatpush1.bf16.msra.mxu0 %v13248_v51  ;;  %v13266_v51 = vld [vmem:[#allocation9 + $0x4c4] ss:$16 sps:$4 sm:$0xff]  }
 0x7b7   :  { %6031 = vmatpush1.bf16.msra.mxu1 %v13251_v52  ;;  %5909 = vmatprep.subr.bf16.mxu0 %v13254_v9  ;;  %15467 = vst [vmem:[#allocation56_spill] sm:$0xff] %v13266_v51  ;;  %v13269_v52 = vld [vmem:[#allocation9 + $0x4cc] ss:$16 sps:$4 sm:$0xff]   ;;  %v13272_v9 = vld [vmem:[#allocation9 + $0x4c0] ss:$16 sps:$4 sm:$0xff]  }
 0x7b8   :  { %6032 = vmatprep.subr.bf16.mxu1 %v13257_v44  ;;  %15468 = vst [vmem:[#allocation57_spill] sm:$0xff] %v13269_v52  ;;  %15469 = vst [vmem:[#allocation58_spill] sm:$0xff] %v13272_v9  ;;  %v13275_v44 = vld [vmem:[#allocation9 + $0x4c8] ss:$16 sps:$4 sm:$0xff]  }
 0x7b9   :  { %15470 = vst [vmem:[#allocation59_spill] sm:$0xff] %v13275_v44 }
 0x7ba   :  { %5910 = vmatpush1.bf16.msra.mxu0 %v13260_v61  ;;  %v13278_v61 = vld [vmem:[#allocation9 + $0x4e4] ss:$16 sps:$4 sm:$0xff]  }
 0x7bb   :  { %6033 = vmatpush1.bf16.msra.mxu1 %v13263_v10  ;;  %5911 = vmatprep.subr.bf16.mxu0 %v13266_v51  ;;  %15471 = vst [vmem:[#allocation60_spill] sm:$0xff] %v13278_v61  ;;  %v13281_v10 = vld [vmem:[#allocation9 + $0x4ec] ss:$16 sps:$4 sm:$0xff]   ;;  %v13284_v51 = vld [vmem:[#allocation9 + $0x4e0] ss:$16 sps:$4 sm:$0xff]  }
 0x7bc   :  { %6034 = vmatprep.subr.bf16.mxu1 %v13269_v52  ;;  %15472 = vst [vmem:[#allocation61_spill] sm:$0xff] %v13281_v10  ;;  %15473 = vst [vmem:[#allocation62_spill] sm:$0xff] %v13284_v51  ;;  %v13287_v52 = vld [vmem:[#allocation9 + $0x4e8] ss:$16 sps:$4 sm:$0xff]  }
 0x7bd   :  { %15474 = vst [vmem:[#allocation63_spill] sm:$0xff] %v13287_v52 }
 0x7be   :  { %5912 = vmatpush1.bf16.msra.mxu0 %v13272_v9  ;;  %v13290_v9 = vld [vmem:[#allocation9 + $0x504] ss:$16 sps:$4 sm:$0xff]  }
 0x7bf   :  { %6035 = vmatpush1.bf16.msra.mxu1 %v13275_v44  ;;  %5913 = vmatprep.subr.bf16.mxu0 %v13278_v61  ;;  %15475 = vst [vmem:[#allocation64_spill] sm:$0xff] %v13290_v9  ;;  %v13293_v44 = vld [vmem:[#allocation9 + $0x50c] ss:$16 sps:$4 sm:$0xff]   ;;  %v13296_v61 = vld [vmem:[#allocation9 + $0x500] ss:$16 sps:$4 sm:$0xff]  }
 0x7c0   :  { %6036 = vmatprep.subr.bf16.mxu1 %v13281_v10  ;;  %15476 = vst [vmem:[#allocation65_spill] sm:$0xff] %v13293_v44  ;;  %15477 = vst [vmem:[#allocation66_spill] sm:$0xff] %v13296_v61  ;;  %v13299_v10 = vld [vmem:[#allocation9 + $0x508] ss:$16 sps:$4 sm:$0xff]  }
 0x7c1   :  { %15478 = vst [vmem:[#allocation67_spill] sm:$0xff] %v13299_v10 }
 0x7c2   :  { %5914 = vmatpush1.bf16.msra.mxu0 %v13284_v51  ;;  %v13302_v51 = vld [vmem:[#allocation9 + $0x524] ss:$16 sps:$4 sm:$0xff]  }
 0x7c3   :  { %6037 = vmatpush1.bf16.msra.mxu1 %v13287_v52  ;;  %5915 = vmatprep.subr.bf16.mxu0 %v13290_v9  ;;  %15479 = vst [vmem:[#allocation68_spill] sm:$0xff] %v13302_v51  ;;  %v13305_v52 = vld [vmem:[#allocation9 + $0x52c] ss:$16 sps:$4 sm:$0xff]   ;;  %v13308_v9 = vld [vmem:[#allocation9 + $0x520] ss:$16 sps:$4 sm:$0xff]  }
 0x7c4   :  { %6038 = vmatprep.subr.bf16.mxu1 %v13293_v44  ;;  %15480 = vst [vmem:[#allocation69_spill] sm:$0xff] %v13305_v52  ;;  %15481 = vst [vmem:[#allocation70_spill] sm:$0xff] %v13308_v9  ;;  %v13311_v44 = vld [vmem:[#allocation9 + $0x528] ss:$16 sps:$4 sm:$0xff]  }
 0x7c5   :  { %15482 = vst [vmem:[#allocation71_spill] sm:$0xff] %v13311_v44 }
 0x7c6   :  { %5916 = vmatpush1.bf16.msra.mxu0 %v13296_v61  ;;  %v13314_v61 = vld [vmem:[#allocation9 + $0x544] ss:$16 sps:$4 sm:$0xff]  }
 0x7c7   :  { %6039 = vmatpush1.bf16.msra.mxu1 %v13299_v10  ;;  %5917 = vmatprep.subr.bf16.mxu0 %v13302_v51  ;;  %15483 = vst [vmem:[#allocation72_spill] sm:$0xff] %v13314_v61  ;;  %v13317_v10 = vld [vmem:[#allocation9 + $0x54c] ss:$16 sps:$4 sm:$0xff]   ;;  %v13320_v51 = vld [vmem:[#allocation9 + $0x540] ss:$16 sps:$4 sm:$0xff]  }
 0x7c8   :  { %6040 = vmatprep.subr.bf16.mxu1 %v13305_v52  ;;  %15484 = vst [vmem:[#allocation73_spill] sm:$0xff] %v13317_v10  ;;  %15485 = vst [vmem:[#allocation74_spill] sm:$0xff] %v13320_v51  ;;  %v13323_v52 = vld [vmem:[#allocation9 + $0x548] ss:$16 sps:$4 sm:$0xff]  }
 0x7c9   :  { %15486 = vst [vmem:[#allocation75_spill] sm:$0xff] %v13323_v52 }
 0x7ca   :  { %5918 = vmatpush1.bf16.msra.mxu0 %v13308_v9  ;;  %v13326_v9 = vld [vmem:[#allocation9 + $0x564] ss:$16 sps:$4 sm:$0xff]  }
 0x7cb   :  { %6041 = vmatpush1.bf16.msra.mxu1 %v13311_v44  ;;  %5919 = vmatprep.subr.bf16.mxu0 %v13314_v61  ;;  %15487 = vst [vmem:[#allocation77_spill] sm:$0xff] %v13326_v9  ;;  %v13329_v44 = vld [vmem:[#allocation9 + $0x56c] ss:$16 sps:$4 sm:$0xff]   ;;  %v13332_v61 = vld [vmem:[#allocation9 + $0x560] ss:$16 sps:$4 sm:$0xff]  }
 0x7cc   :  { %6042 = vmatprep.subr.bf16.mxu1 %v13317_v10  ;;  %15488 = vst [vmem:[#allocation78_spill] sm:$0xff] %v13329_v44  ;;  %15489 = vst [vmem:[#allocation79_spill] sm:$0xff] %v13332_v61  ;;  %v13335_v10 = vld [vmem:[#allocation9 + $0x568] ss:$16 sps:$4 sm:$0xff]  }
 0x7cd   :  { %15490 = vst [vmem:[#allocation80_spill] sm:$0xff] %v13335_v10 }
 0x7ce   :  { %5920 = vmatpush1.bf16.msra.mxu0 %v13320_v51  ;;  %v13338_v51 = vld [vmem:[#allocation9 + $0x584] ss:$16 sps:$4 sm:$0xff]  }
 0x7cf   :  { %6043 = vmatpush1.bf16.msra.mxu1 %v13323_v52  ;;  %5921 = vmatprep.subr.bf16.mxu0 %v13326_v9  ;;  %15491 = vst [vmem:[#allocation26_spill] sm:$0xff] %v13338_v51  ;;  %v13341_v52 = vld [vmem:[#allocation9 + $0x58c] ss:$16 sps:$4 sm:$0xff]   ;;  %v13344_v9 = vld [vmem:[#allocation9 + $0x580] ss:$16 sps:$4 sm:$0xff]  }
 0x7d0   :  { %6044 = vmatprep.subr.bf16.mxu1 %v13329_v44  ;;  %15492 = vst [vmem:[#allocation81_spill] sm:$0xff] %v13341_v52  ;;  %15493 = vst [vmem:[#allocation82_spill] sm:$0xff] %v13344_v9  ;;  %v15494_v44 = vld [vmem:[#allocation76_spill] sm:$0xff] }
 0x7d1   :  { %v416_v8 = vrot.slane %v12872_v63, %v15494_v44  ;;  %v13365_v63 = vld [vmem:[#allocation9 + $0x5c4] ss:$16 sps:$4 sm:$0xff]   ;;  %v13368_v44 = vld [vmem:[#allocation9 + $0x5cc] ss:$16 sps:$4 sm:$0xff]  }
 0x7d2   :  { %5922 = vmatpush1.bf16.msra.mxu0 %v13332_v61  ;;  %v13349_v61 = vld [vmem:[#allocation9 + $0x588] ss:$16 sps:$4 sm:$0xff]   ;;  %15501 = vst [vmem:[#allocation87_spill] sm:$0xff] %v13365_v63  ;;  %15502 = vst [vmem:[#allocation23_spill] sm:$0xff] %v13368_v44 }
 0x7d3   :  { %6045 = vmatpush1.bf16.msra.mxu1 %v13335_v10  ;;  %5923 = vmatprep.subr.bf16.mxu0 %v13338_v51  ;;  %15495 = vst [vmem:[#allocation83_spill] sm:$0xff] %v13349_v61  ;;  %v13352_v10 = vld [vmem:[#allocation9 + $0x5a4] ss:$16 sps:$4 sm:$0xff]   ;;  %v13355_v51 = vld [vmem:[#allocation9 + $0x5ac] ss:$16 sps:$4 sm:$0xff]  }
 0x7d4   :  { %6046 = vmatprep.subr.bf16.mxu1 %v13341_v52  ;;  %15496 = vst [vmem:[#allocation84_spill] sm:$0xff] %v13352_v10  ;;  %15497 = vst [vmem:[#allocation85_spill] sm:$0xff] %v13355_v51  ;;  %v13358_v52 = vld [vmem:[#allocation9 + $0x5a0] ss:$16 sps:$4 sm:$0xff]  }
 0x7d5   :  { %15498 = vst [vmem:[#allocation86_spill] sm:$0xff] %v13358_v52 }
 0x7d6   :  { %5924 = vmatpush1.bf16.msra.mxu0 %v13344_v9  ;;  %v15499_v9 = vld [vmem:[#allocation48_spill] sm:$0xff] }
 0x7d7   :  { %6047 = vmatpush1.bf16.msra.mxu1 %v13349_v61  ;;  %5925 = vmatprep.subr.bf16.mxu0 %v13352_v10  ;;  %v1980_v18 = vadd.f32 %v15499_v9, %v416_v8  ;;  %v13371_v10 = vld [vmem:[#allocation9 + $0x5c0] ss:$16 sps:$4 sm:$0xff]   ;;  %v13377_v8 = vld [vmem:[#allocation9 + $0x5e4] ss:$16 sps:$4 sm:$0xff]   ;;  %v13388_v61 = vld [vmem:[#allocation9 + $0x5e8] ss:$16 sps:$4 sm:$0xff]  }
 0x7d8   :  { %6048 = vmatprep.subr.bf16.mxu1 %v13355_v51  ;;  %15503 = vst [vmem:[#allocation88_spill] sm:$0xff] %v13371_v10  ;;  %15505 = vst [vmem:[#allocation46_spill] sm:$0xff] %v13377_v8  ;;  %v10167_v9 = vld [vmem:[#allocation11 + $0x440] sm:$0xff]  }
 0x7d9   :  { %v2080_v51 = vmax.f32 %v1980_v18, 0.0  ;;  %15509 = vst [vmem:[#allocation93_spill] sm:$0xff] %v13388_v61 }
 0x7da   :  { %5926 = vmatpush1.bf16.msra.mxu0 %v13358_v52  ;;  %v13374_v52 = vld [vmem:[#allocation9 + $0x5c8] ss:$16 sps:$4 sm:$0xff]  }
 0x7db   :  { %6049 = vmatpush1.bf16.msra.mxu1 %v13362_v20  ;;  %5927 = vmatprep.subr.bf16.mxu0 %v13365_v63  ;;  %15504 = vst [vmem:[#allocation89_spill] sm:$0xff] %v13374_v52  ;;  %v13380_v20 = vld [vmem:[#allocation9 + $0x5ec] ss:$16 sps:$4 sm:$0xff]   ;;  %v10168_v63 = vld [vmem:[#allocation11 + $0x4c0] sm:$0xff]   ;;  %v13386_v18 = vpack.c.bf16 %v2080_v51, %v2080_v51  ;;  %v10175_v51 = vld [vmem:[#allocation11 + $0x450] sm:$0xff]  }
 0x7dc   :  { %6050 = vmatprep.subr.bf16.mxu1 %v13368_v44  ;;  %15506 = vst [vmem:[#allocation90_spill] sm:$0xff] %v13380_v20  ;;  %v13383_v44 = vld [vmem:[#allocation9 + $0x5e0] ss:$16 sps:$4 sm:$0xff]  }
 0x7dd   :  { %15507 = vst [vmem:[#allocation91_spill] sm:$0xff] %v13383_v44  ;;  %15508 = vst [vmem:[#allocation92_spill] sm:$0xff] %v13386_v18 }
 0x7de   :  { %5928 = vmatpush1.bf16.msra.mxu0 %v13371_v10  ;;  %v10169_v10 = vld [vmem:[#allocation11 + $0x400] sm:$0xff]  }
 0x7df   :  { %6051 = vmatpush1.bf16.msra.mxu1 %v13374_v52  ;;  %5929 = vmatprep.subr.bf16.mxu0 %v13377_v8  ;;  %v10170_v52 = vld [vmem:[#allocation11 + $0x480] sm:$0xff]   ;;  %v10171_v8 = vld [vmem:[#allocation11 + $0x448] sm:$0xff]  }
 0x7e0   :  { %6052 = vmatprep.subr.bf16.mxu1 %v13380_v20  ;;  %v10173_v20 = vld [vmem:[#allocation11 + $0x408] sm:$0xff]  }
 0x7e2   :  { %5930 = vmatpush1.bf16.msra.mxu0 %v13383_v44  ;;  %v10174_v44 = vld [vmem:[#allocation11 + $0x488] sm:$0xff]  }
 0x7e3   :  { %6053 = vmatpush1.bf16.msra.mxu1 %v13388_v61  ;;  %9369 = vmatprep.subr.bf16.mxu0 %v10167_v9  ;;  %v10178_v9 = vld [vmem:[#allocation11 + $0x490] sm:$0xff]   ;;  %v10179_v61 = vld [vmem:[#allocation11 + $0x458] sm:$0xff]  }
 0x7e4   :  { %9391 = vmatprep.subr.bf16.mxu1 %v10168_v63  ;;  %v10180_v63 = vld [vmem:[#allocation11 + $0x4d8] sm:$0xff]  }
 0x7e5   :  { %5932 = vmatmul.mubr.bf16.vlgmr.msra.gmra.mrb[48].mxu0 %v13386_v18 }
 0x7e6   :  { %6055 = vmatmul.mubr.bf16.vlgmr.msra.gmra.mrb[48].mxu1 %v13386_v18  ;;  %9370 = vmatpush3.bf16.msra.mxu0 %v10169_v10  ;;  %v10182_v10 = vld [vmem:[#allocation11 + $0x498] sm:$0xff]  }
 0x7e7   :  { %9392 = vmatpush3.bf16.msra.mxu1 %v10170_v52  ;;  %9371 = vmatprep.subr.bf16.mxu0 %v10171_v8  ;;  %v10184_v52 = vld [vmem:[#allocation11 + $0x4e0] sm:$0xff]  }
 0x7e8   :  { %9393 = vmatprep.subr.bf16.mxu1 %v10172_v50  ;;  %v10185_v8 = vld [vmem:[#allocation11 + $0x420] sm:$0xff]  }
 0x7e9   :  { %v10186_v50 = vld [vmem:[#allocation11 + $0x4a0] sm:$0xff]  }
 0x7ea   :  { %9372 = vmatpush3.bf16.msra.mxu0 %v10173_v20  ;;  %v10187_v20 = vld [vmem:[#allocation11 + $0x468] sm:$0xff]  }
 0x7eb   :  { %9394 = vmatpush3.bf16.msra.mxu1 %v10174_v44  ;;  %9373 = vmatprep.subr.bf16.mxu0 %v10175_v51  ;;  %v10188_v44 = vld [vmem:[#allocation11 + $0x4e8] sm:$0xff]  }
 0x7ec   :  { %9395 = vmatprep.subr.bf16.mxu1 %v10176_v15  ;;  %v10189_v51 = vld [vmem:[#allocation11 + $0x428] sm:$0xff]  }
 0x7ee   :  { %9374 = vmatpush3.bf16.msra.mxu0 %v10177_v37  ;;  %v10190_v37 = vld [vmem:[#allocation11 + $0x4a8] sm:$0xff]  }
 0x7ef   :  { %9396 = vmatpush3.bf16.msra.mxu1 %v10178_v9  ;;  %9375 = vmatprep.subr.bf16.mxu0 %v10179_v61 }
 0x7f0   :  { %9397 = vmatprep.subr.bf16.mxu1 %v10180_v63 }
 0x7f2   :  { %9376 = vmatpush3.bf16.msra.mxu0 %v10181_v33 }
 0x7f3   :  { %9398 = vmatpush3.bf16.msra.mxu1 %v10182_v10  ;;  %9377 = vmatprep.subr.bf16.mxu0 %v10183_v19 }
 0x7f4   :  { %9399 = vmatprep.subr.bf16.mxu1 %v10184_v52 }
 0x7f6   :  { %9378 = vmatpush3.bf16.msra.mxu0 %v10185_v8 }
 0x7f7   :  { %9400 = vmatpush3.bf16.msra.mxu1 %v10186_v50  ;;  %9379 = vmatprep.subr.bf16.mxu0 %v10187_v20  ;;  %v10191_v50 = vld [vmem:[#allocation11 + $0x470] sm:$0xff]  }
 0x7f8   :  { %v9341_v15 = vpop.f32.mrb[44].mxu0  ;;  %9401 = vmatprep.subr.bf16.mxu1 %v10188_v44  ;;  %v10192_v20 = vld [vmem:[#allocation11 + $0x4f0] sm:$0xff]   ;;  %v10195_v44 = vld [vmem:[#allocation11 + $0x478] sm:$0xff]  }
 0x7f9   :  { %v9363_v61 = vpop.f32.mrb[44].mxu1  ;;  %v9342_v9 = vpop.f32.mrb[45].mxu0 }
 0x7fa   :  { %v9343_v17 = vadd.f32 %v9342_v9, %v9341_v15  ;;  %v9364_v63 = vpop.f32.mrb[45].mxu1  ;;  %v9344_v18 = vpop.f32.mrb[46].mxu0  ;;  %9380 = vmatpush3.bf16.msra.mxu0 %v10189_v51  ;;  %v10197_v51 = vld [vmem:[#allocation11 + $0x438] sm:$0xff]  }
 0x7fb   :  { %v9365_v33 = vadd.f32 %v9364_v63, %v9363_v61  ;;  %v9366_v10 = vpop.f32.mrb[46].mxu1  ;;  %v9345_v19 = vpop.f32.mrb[47].mxu0  ;;  %9402 = vmatpush3.bf16.msra.mxu1 %v10190_v37  ;;  %9381 = vmatprep.subr.bf16.mxu0 %v10191_v50  ;;  %v10196_v18 = vld [vmem:[#allocation11 + $0x4f8] sm:$0xff]  }
 0x7fc   :  { %v9367_v60 = vpop.f32.mrb[47].mxu1  ;;  %9403 = vmatprep.subr.bf16.mxu1 %v10192_v20  ;;  %v10198_v15 = vld [vmem:[#allocation11 + $0x4b8] sm:$0xff]  }
 0x7fd   :  { %v5787_v52 = vadd.f32 %v9365_v33, %v9343_v17  ;;  %v13396_v60 = vld [vmem:[#allocation9 + $0x4] ss:$16 sps:$4 sm:$0xff]  }
 0x7fe   :  { %9382 = vmatpush3.bf16.msra.mxu0 %v10193_v46 }
 0x7ff   :  { %v13394_v8 = vadd.f32 %v5787_v52, %v12969_v14  ;;  %9404 = vmatpush3.bf16.msra.mxu1 %v10194_v7  ;;  %9383 = vmatprep.subr.bf16.mxu0 %v10195_v44  ;;  %v13399_v14 = vld [vmem:[#allocation9 + $0xc] ss:$16 sps:$4 sm:$0xff]  }
 0x800   :  { %9405 = vmatprep.subr.bf16.mxu1 %v10196_v18  ;;  %15510 = vst [vmem:[#allocation94_spill] sm:$0xff] %v13399_v14 }
 0x802   :  { %9384 = vmatpush3.bf16.msra.mxu0 %v10197_v51 }
 0x803   :  { %9406 = vmatpush3.bf16.msra.mxu1 %v10198_v15  ;;  %6433 = vmatprep.subr.bf16.mxu0 %v13396_v60 }
 0x804   :  { %6556 = vmatprep.subr.bf16.mxu1 %v13399_v14 }
 0x8b8   :  { %v5933_v17 = vpop.f32.mrb[48].mxu0 }
 0x8b9   :  { %v9590_v46 = vadd.f32 %v5933_v17, %v15372_v28  ;;  %v6056_v7 = vpop.f32.mrb[48].mxu1  ;;  %v5935_v37 = vpop.f32.mrb[49].mxu0 }
 0x8ba   :  { %v9592_v61 = vadd.f32 %v6056_v7, %v12127_v39  ;;  %v9591_v9 = vadd.f32 %v5935_v37, %v12118_v32  ;;  %v6058_v63 = vpop.f32.mrb[49].mxu1  ;;  %v5937_v33 = vpop.f32.mrb[50].mxu0  ;;  %v13406_v7 = vld [vmem:[#allocation9] ss:$16 sps:$4 sm:$0xff]   ;;  %v13414_v37 = vld [vmem:[#allocation9 + $0x24] ss:$16 sps:$4 sm:$0xff]  }
 0x8bb   :  { %v6063_v10 = vmax.f32 %v9590_v46, 0.0  ;;  %v9593_v19 = vadd.f32 %v6058_v63, %v12121_v34  ;;  %v6060_v52 = vpop.f32.mrb[50].mxu1  ;;  %v5938_v50 = vpop.f32.mrb[51].mxu0  ;;  %v13409_v46 = vld [vmem:[#allocation9 + $0x8] ss:$16 sps:$4 sm:$0xff]  }
 0x8bc   :  { %v6065_v20 = vmax.f32 %v9592_v61, 0.0  ;;  %v6064_v44 = vmax.f32 %v9591_v9, 0.0  ;;  %v6061_v18 = vpop.f32.mrb[51].mxu1  ;;  %v13417_v61 = vld [vmem:[#allocation9 + $0x2c] ss:$16 sps:$4 sm:$0xff]  }
 0x8bd   :  { %v6066_v51 = vmax.f32 %v9593_v19, 0.0  ;;  %v6132_v14 = vpack.c.bf16 %v6063_v10, %v6063_v10  ;;  %v13426_v9 = vld [vmem:[#allocation9 + $0x44] ss:$16 sps:$4 sm:$0xff]   ;;  %v13432_v63 = vld [vmem:[#allocation9 + $0x40] ss:$16 sps:$4 sm:$0xff]  }
 0x8be   :  { %v6133_v15 = vpack.c.bf16 %v6064_v44, %v6064_v44  ;;  %v6134_v28 = vpack.c.bf16 %v6065_v20, %v6065_v20  ;;  %v13435_v33 = vld [vmem:[#allocation9 + $0x48] ss:$16 sps:$4 sm:$0xff]   ;;  %v13438_v10 = vld [vmem:[#allocation9 + $0x64] ss:$16 sps:$4 sm:$0xff]   ;;  %v13441_v19 = vld [vmem:[#allocation9 + $0x6c] ss:$16 sps:$4 sm:$0xff]  }
 0x8bf   :  { %v6135_v17 = vpack.c.bf16 %v6066_v51, %v6066_v51  ;;  %v13444_v52 = vld [vmem:[#allocation9 + $0x60] ss:$16 sps:$4 sm:$0xff]   ;;  %v13447_v50 = vld [vmem:[#allocation9 + $0x68] ss:$16 sps:$4 sm:$0xff]   ;;  %v13450_v20 = vld [vmem:[#allocation9 + $0x84] ss:$16 sps:$4 sm:$0xff]  }
 0x8c0   :  { %6360 = vmatprep.mubr.bf16.mxu0 %v6133_v15  ;;  %15511 = vst [vmem:[#allocation95_spill] sm:$0xff] %v13450_v20  ;;  %v13453_v44 = vld [vmem:[#allocation9 + $0x8c] ss:$16 sps:$4 sm:$0xff]   ;;  %v13456_v18 = vld [vmem:[#allocation9 + $0x80] ss:$16 sps:$4 sm:$0xff]  }
 0x8c1   :  { %6400 = vmatprep.mubr.bf16.mxu1 %v6135_v17  ;;  %6361 = vmatmul.mubr.bf16.vlgmr.msra.gmra.mrb[52].mxu0 %v6132_v14  ;;  %v13423_v14 = vld [vmem:[#allocation9 + $0x28] ss:$16 sps:$4 sm:$0xff]   ;;  %15512 = vst [vmem:[#allocation96_spill] sm:$0xff] %v13453_v44  ;;  %15513 = vst [vmem:[#allocation97_spill] sm:$0xff] %v13456_v18  ;;  %v13462_v15 = vld [vmem:[#allocation9 + $0xa4] ss:$16 sps:$4 sm:$0xff]  }
 0x8c2   :  { %6401 = vmatmul.mubr.bf16.vlgmr.msra.gmra.mrb[52].mxu1 %v6134_v28  ;;  %6434 = vmatpush1.bf16.msra.mxu0 %v13406_v7  ;;  %v13420_v28 = vld [vmem:[#allocation9 + $0x20] ss:$16 sps:$4 sm:$0xff]   ;;  %v13459_v51 = vld [vmem:[#allocation9 + $0x88] ss:$16 sps:$4 sm:$0xff]   ;;  %15515 = vst [vmem:[#allocation100_spill] sm:$0xff] %v13462_v15 }
 0x8c3   :  { %6557 = vmatpush1.bf16.msra.mxu1 %v13409_v46  ;;  %6465 = vmatprep.mubr.bf16.mxu0 %v12893_v5  ;;  %15514 = vst [vmem:[#allocation99_spill] sm:$0xff] %v13459_v51  ;;  %v13465_v17 = vld [vmem:[#allocation9 + $0xac] ss:$16 sps:$4 sm:$0xff]  }
 0x8c4   :  { %6588 = vmatprep.mubr.bf16.mxu1 %v12893_v5  ;;  %6435 = vmatprep.subr.bf16.mxu0 %v13414_v37  ;;  %v13429_v5 = vld [vmem:[#allocation9 + $0x4c] ss:$16 sps:$4 sm:$0xff]   ;;  %15516 = vst [vmem:[#allocation101_spill] sm:$0xff] %v13465_v17 }
 0x8c5   :  { %6558 = vmatprep.subr.bf16.mxu1 %v13417_v61 }
 0x8c6   :  { %6436 = vmatpush1.bf16.msra.mxu0 %v13420_v28 }
 0x8c7   :  { %6559 = vmatpush1.bf16.msra.mxu1 %v13423_v14  ;;  %6437 = vmatprep.subr.bf16.mxu0 %v13426_v9 }
 0x8c8   :  { %6560 = vmatprep.subr.bf16.mxu1 %v13429_v5 }
 0x8ca   :  { %6438 = vmatpush1.bf16.msra.mxu0 %v13432_v63 }
 0x8cb   :  { %6561 = vmatpush1.bf16.msra.mxu1 %v13435_v33  ;;  %6439 = vmatprep.subr.bf16.mxu0 %v13438_v10 }
 0x8cc   :  { %6562 = vmatprep.subr.bf16.mxu1 %v13441_v19 }
 0x8ce   :  { %6440 = vmatpush1.bf16.msra.mxu0 %v13444_v52 }
 0x8cf   :  { %6563 = vmatpush1.bf16.msra.mxu1 %v13447_v50  ;;  %6441 = vmatprep.subr.bf16.mxu0 %v13450_v20  ;;  %v13468_v20 = vld [vmem:[#allocation9 + $0xa0] ss:$16 sps:$4 sm:$0xff]  }
 0x8d0   :  { %6564 = vmatprep.subr.bf16.mxu1 %v13453_v44  ;;  %15517 = vst [vmem:[#allocation102_spill] sm:$0xff] %v13468_v20  ;;  %v13471_v44 = vld [vmem:[#allocation9 + $0xa8] ss:$16 sps:$4 sm:$0xff]  }
 0x8d1   :  { %15518 = vst [vmem:[#allocation103_spill] sm:$0xff] %v13471_v44 }
 0x8d2   :  { %6442 = vmatpush1.bf16.msra.mxu0 %v13456_v18  ;;  %v13474_v18 = vld [vmem:[#allocation9 + $0xc4] ss:$16 sps:$4 sm:$0xff]  }
 0x8d3   :  { %6565 = vmatpush1.bf16.msra.mxu1 %v13459_v51  ;;  %6443 = vmatprep.subr.bf16.mxu0 %v13462_v15  ;;  %15519 = vst [vmem:[#allocation104_spill] sm:$0xff] %v13474_v18  ;;  %v13477_v51 = vld [vmem:[#allocation9 + $0xcc] ss:$16 sps:$4 sm:$0xff]   ;;  %v13480_v15 = vld [vmem:[#allocation9 + $0xc0] ss:$16 sps:$4 sm:$0xff]  }
 0x8d4   :  { %6566 = vmatprep.subr.bf16.mxu1 %v13465_v17  ;;  %15520 = vst [vmem:[#allocation105_spill] sm:$0xff] %v13477_v51  ;;  %15521 = vst [vmem:[#allocation106_spill] sm:$0xff] %v13480_v15  ;;  %v13483_v17 = vld [vmem:[#allocation9 + $0xc8] ss:$16 sps:$4 sm:$0xff]  }
 0x8d5   :  { %15522 = vst [vmem:[#allocation107_spill] sm:$0xff] %v13483_v17 }
 0x8d6   :  { %6444 = vmatpush1.bf16.msra.mxu0 %v13468_v20  ;;  %v13486_v20 = vld [vmem:[#allocation9 + $0xe4] ss:$16 sps:$4 sm:$0xff]  }
 0x8d7   :  { %6567 = vmatpush1.bf16.msra.mxu1 %v13471_v44  ;;  %6445 = vmatprep.subr.bf16.mxu0 %v13474_v18  ;;  %15523 = vst [vmem:[#allocation108_spill] sm:$0xff] %v13486_v20  ;;  %v13489_v44 = vld [vmem:[#allocation9 + $0xec] ss:$16 sps:$4 sm:$0xff]   ;;  %v13492_v18 = vld [vmem:[#allocation9 + $0xe0] ss:$16 sps:$4 sm:$0xff]  }
 0x8d8   :  { %6568 = vmatprep.subr.bf16.mxu1 %v13477_v51  ;;  %15524 = vst [vmem:[#allocation110_spill] sm:$0xff] %v13489_v44  ;;  %15525 = vst [vmem:[#allocation114_spill] sm:$0xff] %v13492_v18  ;;  %v13495_v51 = vld [vmem:[#allocation9 + $0xe8] ss:$16 sps:$4 sm:$0xff]  }
 0x8d9   :  { %15526 = vst [vmem:[#allocation115_spill] sm:$0xff] %v13495_v51 }
 0x8da   :  { %6446 = vmatpush1.bf16.msra.mxu0 %v13480_v15  ;;  %v13498_v15 = vld [vmem:[#allocation9 + $0x104] ss:$16 sps:$4 sm:$0xff]  }
 0x8db   :  { %6569 = vmatpush1.bf16.msra.mxu1 %v13483_v17  ;;  %6447 = vmatprep.subr.bf16.mxu0 %v13486_v20  ;;  %15527 = vst [vmem:[#allocation116_spill] sm:$0xff] %v13498_v15  ;;  %v13501_v17 = vld [vmem:[#allocation9 + $0x10c] ss:$16 sps:$4 sm:$0xff]   ;;  %v13504_v20 = vld [vmem:[#allocation9 + $0x100] ss:$16 sps:$4 sm:$0xff]  }
 0x8dc   :  { %6570 = vmatprep.subr.bf16.mxu1 %v13489_v44  ;;  %15528 = vst [vmem:[#allocation117_spill] sm:$0xff] %v13501_v17  ;;  %15529 = vst [vmem:[#allocation118_spill] sm:$0xff] %v13504_v20  ;;  %v13507_v44 = vld [vmem:[#allocation9 + $0x108] ss:$16 sps:$4 sm:$0xff]  }
 0x8dd   :  { %15530 = vst [vmem:[#allocation119_spill] sm:$0xff] %v13507_v44 }
 0x8de   :  { %6448 = vmatpush1.bf16.msra.mxu0 %v13492_v18  ;;  %v13510_v18 = vld [vmem:[#allocation9 + $0x124] ss:$16 sps:$4 sm:$0xff]  }
 0x8df   :  { %6571 = vmatpush1.bf16.msra.mxu1 %v13495_v51  ;;  %6449 = vmatprep.subr.bf16.mxu0 %v13498_v15  ;;  %15531 = vst [vmem:[#allocation120_spill] sm:$0xff] %v13510_v18  ;;  %v13513_v51 = vld [vmem:[#allocation9 + $0x12c] ss:$16 sps:$4 sm:$0xff]   ;;  %v13516_v15 = vld [vmem:[#allocation9 + $0x120] ss:$16 sps:$4 sm:$0xff]  }
 0x8e0   :  { %6572 = vmatprep.subr.bf16.mxu1 %v13501_v17  ;;  %15532 = vst [vmem:[#allocation121_spill] sm:$0xff] %v13513_v51  ;;  %15533 = vst [vmem:[#allocation122_spill] sm:$0xff] %v13516_v15  ;;  %v13519_v17 = vld [vmem:[#allocation9 + $0x128] ss:$16 sps:$4 sm:$0xff]  }
 0x8e1   :  { %15534 = vst [vmem:[#allocation123_spill] sm:$0xff] %v13519_v17 }
 0x8e2   :  { %6450 = vmatpush1.bf16.msra.mxu0 %v13504_v20  ;;  %v13522_v20 = vld [vmem:[#allocation9 + $0x144] ss:$16 sps:$4 sm:$0xff]  }
 0x8e3   :  { %6573 = vmatpush1.bf16.msra.mxu1 %v13507_v44  ;;  %6451 = vmatprep.subr.bf16.mxu0 %v13510_v18  ;;  %15535 = vst [vmem:[#allocation124_spill] sm:$0xff] %v13522_v20  ;;  %v13525_v44 = vld [vmem:[#allocation9 + $0x14c] ss:$16 sps:$4 sm:$0xff]   ;;  %v13528_v18 = vld [vmem:[#allocation9 + $0x140] ss:$16 sps:$4 sm:$0xff]  }
 0x8e4   :  { %6574 = vmatprep.subr.bf16.mxu1 %v13513_v51  ;;  %15536 = vst [vmem:[#allocation125_spill] sm:$0xff] %v13525_v44  ;;  %15537 = vst [vmem:[#allocation126_spill] sm:$0xff] %v13528_v18  ;;  %v13531_v51 = vld [vmem:[#allocation9 + $0x148] ss:$16 sps:$4 sm:$0xff]  }
 0x8e5   :  { %15538 = vst [vmem:[#allocation127_spill] sm:$0xff] %v13531_v51 }
 0x8e6   :  { %6452 = vmatpush1.bf16.msra.mxu0 %v13516_v15  ;;  %v13534_v15 = vld [vmem:[#allocation9 + $0x164] ss:$16 sps:$4 sm:$0xff]  }
 0x8e7   :  { %6575 = vmatpush1.bf16.msra.mxu1 %v13519_v17  ;;  %6453 = vmatprep.subr.bf16.mxu0 %v13522_v20  ;;  %15539 = vst [vmem:[#allocation128_spill] sm:$0xff] %v13534_v15  ;;  %v13537_v17 = vld [vmem:[#allocation9 + $0x16c] ss:$16 sps:$4 sm:$0xff]   ;;  %v13540_v20 = vld [vmem:[#allocation9 + $0x160] ss:$16 sps:$4 sm:$0xff]  }
 0x8e8   :  { %6576 = vmatprep.subr.bf16.mxu1 %v13525_v44  ;;  %15540 = vst [vmem:[#allocation129_spill] sm:$0xff] %v13537_v17  ;;  %15541 = vst [vmem:[#allocation130_spill] sm:$0xff] %v13540_v20  ;;  %v13543_v44 = vld [vmem:[#allocation9 + $0x168] ss:$16 sps:$4 sm:$0xff]  }
 0x8e9   :  { %15542 = vst [vmem:[#allocation131_spill] sm:$0xff] %v13543_v44 }
 0x8ea   :  { %6454 = vmatpush1.bf16.msra.mxu0 %v13528_v18  ;;  %v13546_v18 = vld [vmem:[#allocation9 + $0x184] ss:$16 sps:$4 sm:$0xff]  }
 0x8eb   :  { %6577 = vmatpush1.bf16.msra.mxu1 %v13531_v51  ;;  %6455 = vmatprep.subr.bf16.mxu0 %v13534_v15  ;;  %15543 = vst [vmem:[#allocation132_spill] sm:$0xff] %v13546_v18  ;;  %v13549_v51 = vld [vmem:[#allocation9 + $0x18c] ss:$16 sps:$4 sm:$0xff]   ;;  %v13552_v15 = vld [vmem:[#allocation9 + $0x180] ss:$16 sps:$4 sm:$0xff]  }
 0x8ec   :  { %6578 = vmatprep.subr.bf16.mxu1 %v13537_v17  ;;  %15544 = vst [vmem:[#allocation133_spill] sm:$0xff] %v13549_v51  ;;  %15545 = vst [vmem:[#allocation134_spill] sm:$0xff] %v13552_v15  ;;  %v13555_v17 = vld [vmem:[#allocation9 + $0x188] ss:$16 sps:$4 sm:$0xff]  }
 0x8ed   :  { %15546 = vst [vmem:[#allocation135_spill] sm:$0xff] %v13555_v17 }
 0x8ee   :  { %6456 = vmatpush1.bf16.msra.mxu0 %v13540_v20  ;;  %v13558_v20 = vld [vmem:[#allocation9 + $0x1a4] ss:$16 sps:$4 sm:$0xff]  }
 0x8ef   :  { %6579 = vmatpush1.bf16.msra.mxu1 %v13543_v44  ;;  %6457 = vmatprep.subr.bf16.mxu0 %v13546_v18  ;;  %15547 = vst [vmem:[#allocation136_spill] sm:$0xff] %v13558_v20  ;;  %v13561_v44 = vld [vmem:[#allocation9 + $0x1ac] ss:$16 sps:$4 sm:$0xff]   ;;  %v13564_v18 = vld [vmem:[#allocation9 + $0x1a0] ss:$16 sps:$4 sm:$0xff]  }
 0x8f0   :  { %6580 = vmatprep.subr.bf16.mxu1 %v13549_v51  ;;  %15548 = vst [vmem:[#allocation137_spill] sm:$0xff] %v13561_v44  ;;  %15549 = vst [vmem:[#allocation138_spill] sm:$0xff] %v13564_v18  ;;  %v13567_v51 = vld [vmem:[#allocation9 + $0x1a8] ss:$16 sps:$4 sm:$0xff]  }
 0x8f1   :  { %15550 = vst [vmem:[#allocation139_spill] sm:$0xff] %v13567_v51 }
 0x8f2   :  { %6458 = vmatpush1.bf16.msra.mxu0 %v13552_v15  ;;  %v13570_v15 = vld [vmem:[#allocation9 + $0x1c4] ss:$16 sps:$4 sm:$0xff]  }
 0x8f3   :  { %6581 = vmatpush1.bf16.msra.mxu1 %v13555_v17  ;;  %6459 = vmatprep.subr.bf16.mxu0 %v13558_v20  ;;  %15551 = vst [vmem:[#allocation140_spill] sm:$0xff] %v13570_v15  ;;  %v13573_v17 = vld [vmem:[#allocation9 + $0x1cc] ss:$16 sps:$4 sm:$0xff]   ;;  %v13576_v20 = vld [vmem:[#allocation9 + $0x1c0] ss:$16 sps:$4 sm:$0xff]  }
 0x8f4   :  { %6582 = vmatprep.subr.bf16.mxu1 %v13561_v44  ;;  %15552 = vst [vmem:[#allocation141_spill] sm:$0xff] %v13573_v17  ;;  %15553 = vst [vmem:[#allocation142_spill] sm:$0xff] %v13576_v20  ;;  %v13579_v44 = vld [vmem:[#allocation9 + $0x1c8] ss:$16 sps:$4 sm:$0xff]  }
 0x8f5   :  { %15554 = vst [vmem:[#allocation143_spill] sm:$0xff] %v13579_v44 }
 0x8f6   :  { %6460 = vmatpush1.bf16.msra.mxu0 %v13564_v18  ;;  %v13582_v18 = vld [vmem:[#allocation9 + $0x1e4] ss:$16 sps:$4 sm:$0xff]  }
 0x8f7   :  { %6583 = vmatpush1.bf16.msra.mxu1 %v13567_v51  ;;  %6461 = vmatprep.subr.bf16.mxu0 %v13570_v15  ;;  %v13585_v51 = vld [vmem:[#allocation9 + $0x1ec] ss:$16 sps:$4 sm:$0xff]   ;;  %v13588_v15 = vld [vmem:[#allocation9 + $0x1e0] ss:$16 sps:$4 sm:$0xff]  }
 0x8f8   :  { %6584 = vmatprep.subr.bf16.mxu1 %v13573_v17  ;;  %15555 = vst [vmem:[#allocation144_spill] sm:$0xff] %v13585_v51  ;;  %15556 = vst [vmem:[#allocation145_spill] sm:$0xff] %v13588_v15  ;;  %v13591_v17 = vld [vmem:[#allocation9 + $0x1e8] ss:$16 sps:$4 sm:$0xff]  }
 0x8f9   :  { %15557 = vst [vmem:[#allocation146_spill] sm:$0xff] %v13591_v17 }
 0x8fa   :  { %6462 = vmatpush1.bf16.msra.mxu0 %v13576_v20  ;;  %v13594_v20 = vld [vmem:[#allocation9 + $0x204] ss:$16 sps:$4 sm:$0xff]  }
 0x8fb   :  { %6585 = vmatpush1.bf16.msra.mxu1 %v13579_v44  ;;  %6463 = vmatprep.subr.bf16.mxu0 %v13582_v18  ;;  %15558 = vst [vmem:[#allocation147_spill] sm:$0xff] %v13594_v20  ;;  %v13597_v44 = vld [vmem:[#allocation9 + $0x20c] ss:$16 sps:$4 sm:$0xff]  }
 0x8fc   :  { %6586 = vmatprep.subr.bf16.mxu1 %v13585_v51  ;;  %15559 = vst [vmem:[#allocation148_spill] sm:$0xff] %v13597_v44  ;;  %v13602_v51 = vld [vmem:[#allocation9 + $0x200] ss:$16 sps:$4 sm:$0xff]  }
 0x8fd   :  { %15560 = vst [vmem:[#allocation149_spill] sm:$0xff] %v13602_v51 }
 0x8fe   :  { %6464 = vmatpush1.bf16.msra.mxu0 %v13588_v15  ;;  %v13606_v15 = vld [vmem:[#allocation9 + $0x208] ss:$16 sps:$4 sm:$0xff]  }
 0x8ff   :  { %6587 = vmatpush1.bf16.msra.mxu1 %v13591_v17  ;;  %6474 = vmatprep.subr.bf16.mxu0 %v13594_v20  ;;  %15561 = vst [vmem:[#allocation150_spill] sm:$0xff] %v13606_v15  ;;  %v13610_v20 = vld [vmem:[#allocation9 + $0x224] ss:$16 sps:$4 sm:$0xff]  }
 0x900   :  { %6597 = vmatprep.subr.bf16.mxu1 %v13597_v44  ;;  %15562 = vst [vmem:[#allocation151_spill] sm:$0xff] %v13610_v20  ;;  %v13613_v44 = vld [vmem:[#allocation9 + $0x22c] ss:$16 sps:$4 sm:$0xff]   ;;  %v13622_v17 = vld [vmem:[#allocation9 + $0x244] ss:$16 sps:$4 sm:$0xff]  }
 0x901   :  { %6466 = vmatmul.mubr.bf16.vlgmr.msra.gmra.mrb[56].mxu0 %v12963_v16  ;;  %15563 = vst [vmem:[#allocation152_spill] sm:$0xff] %v13613_v44  ;;  %15566 = vst [vmem:[#allocation155_spill] sm:$0xff] %v13622_v17 }
 0x902   :  { %6589 = vmatmul.mubr.bf16.vlgmr.msra.gmra.mrb[56].mxu1 %v12963_v16  ;;  %6475 = vmatpush1.bf16.msra.mxu0 %v13602_v51  ;;  %v13616_v16 = vld [vmem:[#allocation9 + $0x220] ss:$16 sps:$4 sm:$0xff]   ;;  %v13619_v51 = vld [vmem:[#allocation9 + $0x228] ss:$16 sps:$4 sm:$0xff]  }
 0x903   :  { %6506 = vmatprep.mubr.bf16.mxu0 %v13194_v55  ;;  %6598 = vmatpush1.bf16.msra.mxu1 %v13606_v15  ;;  %15564 = vst [vmem:[#allocation153_spill] sm:$0xff] %v13616_v16  ;;  %15565 = vst [vmem:[#allocation154_spill] sm:$0xff] %v13619_v51  ;;  %v13625_v15 = vld [vmem:[#allocation9 + $0x24c] ss:$16 sps:$4 sm:$0xff]  }
 0x904   :  { %6629 = vmatprep.mubr.bf16.mxu1 %v13194_v55  ;;  %6476 = vmatprep.subr.bf16.mxu0 %v13610_v20  ;;  %15567 = vst [vmem:[#allocation156_spill] sm:$0xff] %v13625_v15  ;;  %v13628_v20 = vld [vmem:[#allocation9 + $0x240] ss:$16 sps:$4 sm:$0xff]  }
 0x905   :  { %6599 = vmatprep.subr.bf16.mxu1 %v13613_v44  ;;  %15568 = vst [vmem:[#allocation157_spill] sm:$0xff] %v13628_v20  ;;  %v13631_v44 = vld [vmem:[#allocation9 + $0x248] ss:$16 sps:$4 sm:$0xff]  }
 0x906   :  { %6477 = vmatpush1.bf16.msra.mxu0 %v13616_v16  ;;  %15569 = vst [vmem:[#allocation158_spill] sm:$0xff] %v13631_v44  ;;  %v13634_v16 = vld [vmem:[#allocation9 + $0x264] ss:$16 sps:$4 sm:$0xff]  }
 0x907   :  { %6600 = vmatpush1.bf16.msra.mxu1 %v13619_v51  ;;  %6478 = vmatprep.subr.bf16.mxu0 %v13622_v17  ;;  %15570 = vst [vmem:[#allocation159_spill] sm:$0xff] %v13634_v16  ;;  %v13637_v51 = vld [vmem:[#allocation9 + $0x26c] ss:$16 sps:$4 sm:$0xff]   ;;  %v13640_v17 = vld [vmem:[#allocation9 + $0x260] ss:$16 sps:$4 sm:$0xff]  }
 0x908   :  { %6601 = vmatprep.subr.bf16.mxu1 %v13625_v15  ;;  %15571 = vst [vmem:[#allocation160_spill] sm:$0xff] %v13637_v51  ;;  %15572 = vst [vmem:[#allocation161_spill] sm:$0xff] %v13640_v17  ;;  %v13643_v15 = vld [vmem:[#allocation9 + $0x268] ss:$16 sps:$4 sm:$0xff]  }
 0x909   :  { %15573 = vst [vmem:[#allocation162_spill] sm:$0xff] %v13643_v15 }
 0x90a   :  { %6479 = vmatpush1.bf16.msra.mxu0 %v13628_v20  ;;  %v13646_v20 = vld [vmem:[#allocation9 + $0x284] ss:$16 sps:$4 sm:$0xff]  }
 0x90b   :  { %6602 = vmatpush1.bf16.msra.mxu1 %v13631_v44  ;;  %6480 = vmatprep.subr.bf16.mxu0 %v13634_v16  ;;  %15574 = vst [vmem:[#allocation163_spill] sm:$0xff] %v13646_v20  ;;  %v13649_v44 = vld [vmem:[#allocation9 + $0x28c] ss:$16 sps:$4 sm:$0xff]   ;;  %v13652_v16 = vld [vmem:[#allocation9 + $0x280] ss:$16 sps:$4 sm:$0xff]  }
 0x90c   :  { %6603 = vmatprep.subr.bf16.mxu1 %v13637_v51  ;;  %15575 = vst [vmem:[#allocation164_spill] sm:$0xff] %v13649_v44  ;;  %15576 = vst [vmem:[#allocation165_spill] sm:$0xff] %v13652_v16  ;;  %v13655_v51 = vld [vmem:[#allocation9 + $0x288] ss:$16 sps:$4 sm:$0xff]  }
 0x90d   :  { %15577 = vst [vmem:[#allocation166_spill] sm:$0xff] %v13655_v51 }
 0x90e   :  { %6481 = vmatpush1.bf16.msra.mxu0 %v13640_v17  ;;  %v13658_v17 = vld [vmem:[#allocation9 + $0x2a4] ss:$16 sps:$4 sm:$0xff]  }
 0x90f   :  { %6604 = vmatpush1.bf16.msra.mxu1 %v13643_v15  ;;  %6482 = vmatprep.subr.bf16.mxu0 %v13646_v20  ;;  %v13661_v15 = vld [vmem:[#allocation9 + $0x2ac] ss:$16 sps:$4 sm:$0xff]   ;;  %v13664_v20 = vld [vmem:[#allocation9 + $0x2a0] ss:$16 sps:$4 sm:$0xff]  }
 0x910   :  { %6605 = vmatprep.subr.bf16.mxu1 %v13649_v44  ;;  %v13667_v44 = vld [vmem:[#allocation9 + $0x2a8] ss:$16 sps:$4 sm:$0xff]  }
 0x912   :  { %6483 = vmatpush1.bf16.msra.mxu0 %v13652_v16  ;;  %v13670_v16 = vld [vmem:[#allocation9 + $0x2c4] ss:$16 sps:$4 sm:$0xff]  }
 0x913   :  { %6606 = vmatpush1.bf16.msra.mxu1 %v13655_v51  ;;  %6484 = vmatprep.subr.bf16.mxu0 %v13658_v17  ;;  %v13673_v51 = vld [vmem:[#allocation9 + $0x2cc] ss:$16 sps:$4 sm:$0xff]  }
 0x914   :  { %6607 = vmatprep.subr.bf16.mxu1 %v13661_v15 }
 0x916   :  { %6485 = vmatpush1.bf16.msra.mxu0 %v13664_v20 }
 0x917   :  { %6608 = vmatpush1.bf16.msra.mxu1 %v13667_v44  ;;  %6486 = vmatprep.subr.bf16.mxu0 %v13670_v16 }
 0x918   :  { %6609 = vmatprep.subr.bf16.mxu1 %v13673_v51 }
 0x91a   :  { %6487 = vmatpush1.bf16.msra.mxu0 %v13071_v45  ;;  %v13704_v45 = vld [vmem:[#allocation8 + $0x8] sm:$0xff] }
 0x91b   :  { %6610 = vmatpush1.bf16.msra.mxu1 %v13074_v13  ;;  %6488 = vmatprep.subr.bf16.mxu0 %v13077_v42  ;;  %v15578_v13 = vld [vmem:[#allocation21_spill] sm:$0xff] }
 0x91c   :  { %6611 = vmatprep.subr.bf16.mxu1 %v13080_v6  ;;  %v15579_v42 = vsub.s32 5, %v15578_v13 }
 0x91e   :  { %6489 = vmatpush1.bf16.msra.mxu0 %v13083_v47  ;;  %v428_v6 = vrot.slane %v13704_v45, %v15579_v42  ;;  %v15580_v47 = vld [vmem:[#allocation112_spill] sm:$0xff]  ;;  %v15610_v42 = vld [vmem:[#allocation59_spill] sm:$0xff] }
 0x91f   :  { %6612 = vmatpush1.bf16.msra.mxu1 %v13086_v62  ;;  %6490 = vmatprep.subr.bf16.mxu0 %v13089_v4 }
 0x920   :  { %6613 = vmatprep.subr.bf16.mxu1 %v13092_v36  ;;  %v2023_v62 = vadd.f32 %v15580_v47, %v428_v6  ;;  %v15581_v36 = vld [vmem:[#allocation27_spill] sm:$0xff]  ;;  %v15611_v6 = vld [vmem:[#allocation60_spill] sm:$0xff]  ;;  %v15612_v47 = vld [vmem:[#allocation61_spill] sm:$0xff] }
 0x922   :  { %6491 = vmatpush1.bf16.msra.mxu0 %v13095_v38  ;;  %v2083_v4 = vmax.f32 %v2023_v62, 0.0  ;;  %v15582_v38 = vld [vmem:[#allocation49_spill] sm:$0xff]  ;;  %v15613_v62 = vld [vmem:[#allocation62_spill] sm:$0xff] }
 0x923   :  { %6614 = vmatpush1.bf16.msra.mxu1 %v13098_v1  ;;  %6492 = vmatprep.subr.bf16.mxu0 %v13101_v11  ;;  %v15583_v1 = vld [vmem:[#allocation30_spill] sm:$0xff] }
 0x924   :  { %6615 = vmatprep.subr.bf16.mxu1 %v13104_v23  ;;  %v13722_v11 = vpack.c.bf16 %v2083_v4, %v2083_v4  ;;  %v15584_v23 = vld [vmem:[#allocation92_spill] sm:$0xff]  ;;  %v15614_v4 = vld [vmem:[#allocation63_spill] sm:$0xff] }
 0x926   :  { %6493 = vmatpush1.bf16.msra.mxu0 %v13107_v2  ;;  %v15585_v2 = vld [vmem:[#allocation31_spill] sm:$0xff] }
 0x927   :  { %6616 = vmatpush1.bf16.msra.mxu1 %v13110_v24  ;;  %6494 = vmatprep.subr.bf16.mxu0 %v13113_v25  ;;  %v15586_v24 = vld [vmem:[#allocation32_spill] sm:$0xff]  ;;  %v15587_v25 = vld [vmem:[#allocation33_spill] sm:$0xff] }
 0x928   :  { %6617 = vmatprep.subr.bf16.mxu1 %v13116_v26  ;;  %v15588_v26 = vld [vmem:[#allocation98_spill] sm:$0xff] }
 0x92a   :  { %6495 = vmatpush1.bf16.msra.mxu0 %v13119_v12  ;;  %v15589_v12 = vld [vmem:[#allocation34_spill] sm:$0xff] }
 0x92b   :  { %6618 = vmatpush1.bf16.msra.mxu1 %v13122_v27  ;;  %6496 = vmatprep.subr.bf16.mxu0 %v13125_v29  ;;  %v15590_v27 = vld [vmem:[#allocation35_spill] sm:$0xff]  ;;  %v15591_v29 = vld [vmem:[#allocation36_spill] sm:$0xff] }
 0x92c   :  { %6619 = vmatprep.subr.bf16.mxu1 %v13128_v53  ;;  %v15592_v53 = vld [vmem:[#allocation37_spill] sm:$0xff] }
 0x92e   :  { %6497 = vmatpush1.bf16.msra.mxu0 %v13131_v30  ;;  %v15593_v30 = vld [vmem:[#allocation38_spill] sm:$0xff] }
 0x92f   :  { %6620 = vmatpush1.bf16.msra.mxu1 %v13134_v40  ;;  %6498 = vmatprep.subr.bf16.mxu0 %v13137_v41  ;;  %v15594_v40 = vld [vmem:[#allocation39_spill] sm:$0xff]  ;;  %v15595_v41 = vld [vmem:[#allocation40_spill] sm:$0xff] }
 0x930   :  { %6621 = vmatprep.subr.bf16.mxu1 %v13140_v48  ;;  %v15596_v48 = vld [vmem:[#allocation41_spill] sm:$0xff] }
 0x932   :  { %6499 = vmatpush1.bf16.msra.mxu0 %v13143_v49  ;;  %v15597_v49 = vld [vmem:[#allocation42_spill] sm:$0xff] }
 0x933   :  { %6622 = vmatpush1.bf16.msra.mxu1 %v13146_v21  ;;  %6500 = vmatprep.subr.bf16.mxu0 %v13149_v57  ;;  %v15598_v21 = vld [vmem:[#allocation43_spill] sm:$0xff]  ;;  %v15599_v57 = vld [vmem:[#allocation44_spill] sm:$0xff] }
 0x934   :  { %6623 = vmatprep.subr.bf16.mxu1 %v13152_v22  ;;  %v15600_v22 = vld [vmem:[#allocation45_spill] sm:$0xff] }
 0x936   :  { %6501 = vmatpush1.bf16.msra.mxu0 %v13157_v43  ;;  %v15601_v43 = vld [vmem:[#allocation47_spill] sm:$0xff] }
 0x937   :  { %6624 = vmatpush1.bf16.msra.mxu1 %v13160_v54  ;;  %6502 = vmatprep.subr.bf16.mxu0 %v13163_v0  ;;  %v15602_v54 = vld [vmem:[#allocation51_spill] sm:$0xff]  ;;  %v15603_v0 = vld [vmem:[#allocation52_spill] sm:$0xff] }
 0x938   :  { %6625 = vmatprep.subr.bf16.mxu1 %v13166_v3  ;;  %v15604_v3 = vld [vmem:[#allocation53_spill] sm:$0xff] }
 0x93a   :  { %6503 = vmatpush1.bf16.msra.mxu0 %v13170_v31  ;;  %v15605_v31 = vld [vmem:[#allocation54_spill] sm:$0xff] }
 0x93b   :  { %6626 = vmatpush1.bf16.msra.mxu1 %v13173_v35  ;;  %6504 = vmatprep.subr.bf16.mxu0 %v13176_v58  ;;  %v15606_v35 = vld [vmem:[#allocation55_spill] sm:$0xff]  ;;  %v15607_v58 = vld [vmem:[#allocation56_spill] sm:$0xff] }
 0x93c   :  { %6627 = vmatprep.subr.bf16.mxu1 %v13179_v59  ;;  %v15608_v59 = vld [vmem:[#allocation57_spill] sm:$0xff] }
 0x93e   :  { %6505 = vmatpush1.bf16.msra.mxu0 %v13182_v56  ;;  %v15609_v56 = vld [vmem:[#allocation58_spill] sm:$0xff] }
 0x93f   :  { %6628 = vmatpush1.bf16.msra.mxu1 %v15581_v36  ;;  %6515 = vmatprep.subr.bf16.mxu0 %v15582_v38  ;;  %v15615_v36 = vld [vmem:[#allocation64_spill] sm:$0xff]  ;;  %v15616_v38 = vld [vmem:[#allocation65_spill] sm:$0xff] }
 0x940   :  { %6638 = vmatprep.subr.bf16.mxu1 %v15583_v1  ;;  %v15617_v1 = vld [vmem:[#allocation66_spill] sm:$0xff] }
 0x941   :  { %6507 = vmatmul.mubr.bf16.vlgmr.msra.gmra.mrb[56].mxu0 %v15584_v23 }
 0x942   :  { %6630 = vmatmul.mubr.bf16.vlgmr.msra.gmra.mrb[56].mxu1 %v15584_v23  ;;  %6516 = vmatpush1.bf16.msra.mxu0 %v15585_v2  ;;  %v15618_v2 = vld [vmem:[#allocation67_spill] sm:$0xff] }
 0x943   :  { %6547 = vmatprep.mubr.bf16.mxu0 %v13722_v11  ;;  %6639 = vmatpush1.bf16.msra.mxu1 %v15586_v24  ;;  %v15619_v24 = vld [vmem:[#allocation68_spill] sm:$0xff] }
 0x944   :  { %6670 = vmatprep.mubr.bf16.mxu1 %v13722_v11  ;;  %6517 = vmatprep.subr.bf16.mxu0 %v15587_v25  ;;  %v15620_v25 = vld [vmem:[#allocation69_spill] sm:$0xff] }
 0x945   :  { %6640 = vmatprep.subr.bf16.mxu1 %v15588_v26  ;;  %v15621_v26 = vld [vmem:[#allocation70_spill] sm:$0xff] }
 0x946   :  { %6518 = vmatpush1.bf16.msra.mxu0 %v15589_v12  ;;  %v15622_v12 = vld [vmem:[#allocation71_spill] sm:$0xff] }
 0x947   :  { %6641 = vmatpush1.bf16.msra.mxu1 %v15590_v27  ;;  %6519 = vmatprep.subr.bf16.mxu0 %v15591_v29  ;;  %v15623_v27 = vld [vmem:[#allocation72_spill] sm:$0xff]  ;;  %v15624_v29 = vld [vmem:[#allocation73_spill] sm:$0xff] }
 0x948   :  { %6642 = vmatprep.subr.bf16.mxu1 %v15592_v53  ;;  %v15625_v53 = vld [vmem:[#allocation74_spill] sm:$0xff] }
 0x94a   :  { %6520 = vmatpush1.bf16.msra.mxu0 %v15593_v30  ;;  %v15626_v30 = vld [vmem:[#allocation75_spill] sm:$0xff] }
 0x94b   :  { %6643 = vmatpush1.bf16.msra.mxu1 %v15594_v40  ;;  %6521 = vmatprep.subr.bf16.mxu0 %v15595_v41  ;;  %v15627_v40 = vld [vmem:[#allocation77_spill] sm:$0xff]  ;;  %v15628_v41 = vld [vmem:[#allocation78_spill] sm:$0xff] }
 0x94c   :  { %6644 = vmatprep.subr.bf16.mxu1 %v15596_v48  ;;  %v15629_v48 = vld [vmem:[#allocation79_spill] sm:$0xff] }
 0x94e   :  { %6522 = vmatpush1.bf16.msra.mxu0 %v15597_v49  ;;  %v15630_v49 = vld [vmem:[#allocation80_spill] sm:$0xff] }
 0x94f   :  { %6645 = vmatpush1.bf16.msra.mxu1 %v15598_v21  ;;  %6523 = vmatprep.subr.bf16.mxu0 %v15599_v57  ;;  %v15631_v21 = vld [vmem:[#allocation26_spill] sm:$0xff]  ;;  %v15632_v57 = vld [vmem:[#allocation81_spill] sm:$0xff] }
 0x950   :  { %6646 = vmatprep.subr.bf16.mxu1 %v15600_v22  ;;  %v15633_v22 = vld [vmem:[#allocation82_spill] sm:$0xff] }
 0x952   :  { %6524 = vmatpush1.bf16.msra.mxu0 %v15601_v43  ;;  %v15634_v43 = vsub.s32 4, %v15578_v13 }
 0x953   :  { %6647 = vmatpush1.bf16.msra.mxu1 %v15602_v54  ;;  %6525 = vmatprep.subr.bf16.mxu0 %v15603_v0  ;;  %v15635_v0 = vld [vmem:[#allocation83_spill] sm:$0xff] }
 0x954   :  { %6648 = vmatprep.subr.bf16.mxu1 %v15604_v3  ;;  %v424_v54 = vrot.slane %v13704_v45, %v15634_v43  ;;  %v15636_v3 = vld [vmem:[#allocation84_spill] sm:$0xff]  ;;  %v10213_v43 = vld [vmem:[#allocation11 + $0x518] sm:$0xff]  }
 0x956   :  { %6526 = vmatpush1.bf16.msra.mxu0 %v15605_v31  ;;  %v15637_v31 = vld [vmem:[#allocation85_spill] sm:$0xff] }
 0x957   :  { %6649 = vmatpush1.bf16.msra.mxu1 %v15606_v35  ;;  %6527 = vmatprep.subr.bf16.mxu0 %v15607_v58  ;;  %v15638_v35 = vld [vmem:[#allocation86_spill] sm:$0xff]  ;;  %v15639_v58 = vld [vmem:[#allocation109_spill] sm:$0xff] }
 0x958   :  { %6650 = vmatprep.subr.bf16.mxu1 %v15608_v59  ;;  %v2021_v59 = vadd.f32 %v15639_v58, %v424_v54  ;;  %v10214_v54 = vld [vmem:[#allocation11 + $0x598] sm:$0xff]   ;;  %v10219_v58 = vld [vmem:[#allocation11 + $0x568] sm:$0xff]  }
 0x95a   :  { %6528 = vmatpush1.bf16.msra.mxu0 %v15609_v56  ;;  %v15640_v56 = vld [vmem:[#allocation22_spill] sm:$0xff] }
 0x95b   :  { %6651 = vmatpush1.bf16.msra.mxu1 %v15610_v42  ;;  %6529 = vmatprep.subr.bf16.mxu0 %v15611_v6  ;;  %v15641_v42 = vld [vmem:[#allocation87_spill] sm:$0xff] }
 0x95c   :  { %6652 = vmatprep.subr.bf16.mxu1 %v15612_v47  ;;  %v15642_v6 = vld [vmem:[#allocation23_spill] sm:$0xff]  ;;  %v15643_v47 = vld [vmem:[#allocation88_spill] sm:$0xff] }
 0x95e   :  { %6530 = vmatpush1.bf16.msra.mxu0 %v15613_v62  ;;  %v2082_v62 = vmax.f32 %v2021_v59, 0.0  ;;  %v10220_v59 = vld [vmem:[#allocation11 + $0x5e8] sm:$0xff]  }
 0x95f   :  { %6653 = vmatpush1.bf16.msra.mxu1 %v15614_v4  ;;  %6531 = vmatprep.subr.bf16.mxu0 %v15615_v36  ;;  %v15644_v4 = vld [vmem:[#allocation89_spill] sm:$0xff]  ;;  %v15645_v36 = vld [vmem:[#allocation46_spill] sm:$0xff] }
 0x960   :  { %6654 = vmatprep.subr.bf16.mxu1 %v15616_v38  ;;  %v10199_v38 = vld [vmem:[#allocation11 + $0x540] sm:$0xff]  }
 0x962   :  { %6532 = vmatpush1.bf16.msra.mxu0 %v15617_v1  ;;  %v15646_v1 = vld [vmem:[#allocation90_spill] sm:$0xff] }
 0x963   :  { %6655 = vmatpush1.bf16.msra.mxu1 %v15618_v2  ;;  %6533 = vmatprep.subr.bf16.mxu0 %v15619_v24  ;;  %v10200_v2 = vld [vmem:[#allocation11 + $0x5c0] sm:$0xff]  }
 0x964   :  { %6656 = vmatprep.subr.bf16.mxu1 %v15620_v25  ;;  %v15647_v24 = vld [vmem:[#allocation91_spill] sm:$0xff] }
 0x965   :  { %v10201_v25 = vld [vmem:[#allocation11 + $0x500] sm:$0xff]  }
 0x966   :  { %6534 = vmatpush1.bf16.msra.mxu0 %v15621_v26  ;;  %v13793_v26 = vpack.c.bf16 %v2082_v62, %v2082_v62 }
 0x967   :  { %6657 = vmatpush1.bf16.msra.mxu1 %v15622_v12  ;;  %6535 = vmatprep.subr.bf16.mxu0 %v15623_v27  ;;  %v15648_v12 = vld [vmem:[#allocation93_spill] sm:$0xff]  ;;  %v10202_v27 = vld [vmem:[#allocation11 + $0x580] sm:$0xff]  }
 0x968   :  { %6658 = vmatprep.subr.bf16.mxu1 %v15624_v29  ;;  %v10203_v29 = vld [vmem:[#allocation11 + $0x548] sm:$0xff]  }
 0x96a   :  { %6536 = vmatpush1.bf16.msra.mxu0 %v15625_v53  ;;  %v10204_v53 = vld [vmem:[#allocation11 + $0x5c8] sm:$0xff]  }
 0x96b   :  { %6659 = vmatpush1.bf16.msra.mxu1 %v15626_v30  ;;  %6537 = vmatprep.subr.bf16.mxu0 %v15627_v40  ;;  %v10205_v30 = vld [vmem:[#allocation11 + $0x508] sm:$0xff]  }
 0x96c   :  { %6660 = vmatprep.subr.bf16.mxu1 %v15628_v41  ;;  %v10206_v40 = vld [vmem:[#allocation11 + $0x588] sm:$0xff]   ;;  %v10207_v41 = vld [vmem:[#allocation11 + $0x550] sm:$0xff]  }
 0x96e   :  { %6538 = vmatpush1.bf16.msra.mxu0 %v15629_v48  ;;  %v10208_v48 = vld [vmem:[#allocation11 + $0x5d0] sm:$0xff]  }
 0x96f   :  { %6661 = vmatpush1.bf16.msra.mxu1 %v15630_v49  ;;  %6539 = vmatprep.subr.bf16.mxu0 %v15631_v21  ;;  %v10209_v49 = vld [vmem:[#allocation11 + $0x510] sm:$0xff]  }
 0x970   :  { %6662 = vmatprep.subr.bf16.mxu1 %v15632_v57  ;;  %v10210_v21 = vld [vmem:[#allocation11 + $0x590] sm:$0xff]   ;;  %v10211_v57 = vld [vmem:[#allocation11 + $0x558] sm:$0xff]  }
 0x972   :  { %6540 = vmatpush1.bf16.msra.mxu0 %v15633_v22  ;;  %v10212_v22 = vld [vmem:[#allocation11 + $0x5d8] sm:$0xff]  }
 0x973   :  { %6663 = vmatpush1.bf16.msra.mxu1 %v15635_v0  ;;  %6541 = vmatprep.subr.bf16.mxu0 %v15636_v3  ;;  %v10215_v0 = vld [vmem:[#allocation11 + $0x560] sm:$0xff]  }
 0x974   :  { %6664 = vmatprep.subr.bf16.mxu1 %v15637_v31  ;;  %v10216_v3 = vld [vmem:[#allocation11 + $0x5e0] sm:$0xff]  }
 0x975   :  { %v10217_v31 = vld [vmem:[#allocation11 + $0x520] sm:$0xff]  }
 0x976   :  { %6542 = vmatpush1.bf16.msra.mxu0 %v15638_v35  ;;  %v10218_v35 = vld [vmem:[#allocation11 + $0x5a0] sm:$0xff]  }
 0x977   :  { %6665 = vmatpush1.bf16.msra.mxu1 %v15640_v56  ;;  %6543 = vmatprep.subr.bf16.mxu0 %v15641_v42  ;;  %v10221_v56 = vld [vmem:[#allocation11 + $0x528] sm:$0xff]  }
 0x978   :  { %6666 = vmatprep.subr.bf16.mxu1 %v15642_v6  ;;  %v10222_v42 = vld [vmem:[#allocation11 + $0x5a8] sm:$0xff]  }
 0x97a   :  { %6544 = vmatpush1.bf16.msra.mxu0 %v15643_v47 }
 0x97b   :  { %6667 = vmatpush1.bf16.msra.mxu1 %v15644_v4  ;;  %6545 = vmatprep.subr.bf16.mxu0 %v15645_v36 }
 0x97c   :  { %6668 = vmatprep.subr.bf16.mxu1 %v15646_v1 }
 0x97e   :  { %6546 = vmatpush1.bf16.msra.mxu0 %v15647_v24 }
 0x97f   :  { %6669 = vmatpush1.bf16.msra.mxu1 %v15648_v12  ;;  %9413 = vmatprep.subr.bf16.mxu0 %v10199_v38 }
 0x980   :  { %9435 = vmatprep.subr.bf16.mxu1 %v10200_v2 }
 0x981   :  { %6548 = vmatmul.mubr.bf16.vlgmr.msra.gmra.mrb[56].mxu0 %v13793_v26 }
 0x982   :  { %6671 = vmatmul.mubr.bf16.vlgmr.msra.gmra.mrb[56].mxu1 %v13793_v26  ;;  %9414 = vmatpush3.bf16.msra.mxu0 %v10201_v25 }
 0x983   :  { %9436 = vmatpush3.bf16.msra.mxu1 %v10202_v27  ;;  %9415 = vmatprep.subr.bf16.mxu0 %v10203_v29  ;;  %v10223_v29 = vld [vmem:[#allocation11 + $0x570] sm:$0xff]  }
 0x984   :  { %9437 = vmatprep.subr.bf16.mxu1 %v10204_v53  ;;  %v10224_v53 = vld [vmem:[#allocation11 + $0x5f0] sm:$0xff]  }
 0x986   :  { %9416 = vmatpush3.bf16.msra.mxu0 %v10205_v30  ;;  %v10225_v30 = vld [vmem:[#allocation11 + $0x530] sm:$0xff]  }
 0x987   :  { %9438 = vmatpush3.bf16.msra.mxu1 %v10206_v40  ;;  %9417 = vmatprep.subr.bf16.mxu0 %v10207_v41  ;;  %v10226_v40 = vld [vmem:[#allocation11 + $0x5b0] sm:$0xff]   ;;  %v10227_v41 = vld [vmem:[#allocation11 + $0x578] sm:$0xff]  }
 0x988   :  { %9439 = vmatprep.subr.bf16.mxu1 %v10208_v48  ;;  %v10228_v48 = vld [vmem:[#allocation11 + $0x5f8] sm:$0xff]  }
 0x98a   :  { %9418 = vmatpush3.bf16.msra.mxu0 %v10209_v49  ;;  %v10229_v49 = vld [vmem:[#allocation11 + $0x538] sm:$0xff]  }
 0x98b   :  { %9440 = vmatpush3.bf16.msra.mxu1 %v10210_v21  ;;  %9419 = vmatprep.subr.bf16.mxu0 %v10211_v57  ;;  %v10230_v21 = vld [vmem:[#allocation11 + $0x5b8] sm:$0xff]  }
 0x98c   :  { %9441 = vmatprep.subr.bf16.mxu1 %v10212_v22  ;;  %v15650_v22 = vld [vmem:[#allocation29_spill] sm:$0xff] }
 0x98e   :  { %9420 = vmatpush3.bf16.msra.mxu0 %v10213_v43 }
 0x98f   :  { %9442 = vmatpush3.bf16.msra.mxu1 %v10214_v54  ;;  %9421 = vmatprep.subr.bf16.mxu0 %v10215_v0 }
 0x990   :  { %9443 = vmatprep.subr.bf16.mxu1 %v10216_v3 }
 0x992   :  { %9422 = vmatpush3.bf16.msra.mxu0 %v10217_v31 }
 0x993   :  { %9444 = vmatpush3.bf16.msra.mxu1 %v10218_v35  ;;  %9423 = vmatprep.subr.bf16.mxu0 %v10219_v58 }
 0x994   :  { %v9385_v6 = vpop.f32.mrb[52].mxu0  ;;  %9445 = vmatprep.subr.bf16.mxu1 %v10220_v59 }
 0x995   :  { %v9407_v47 = vpop.f32.mrb[52].mxu1  ;;  %v9386_v62 = vpop.f32.mrb[53].mxu0 }
 0x996   :  { %v9387_v4 = vadd.f32 %v9386_v62, %v9385_v6  ;;  %v9408_v36 = vpop.f32.mrb[53].mxu1  ;;  %v9388_v38 = vpop.f32.mrb[54].mxu0  ;;  %9424 = vmatpush3.bf16.msra.mxu0 %v10221_v56 }
 0x997   :  { %v9409_v1 = vadd.f32 %v9408_v36, %v9407_v47  ;;  %v9410_v2 = vpop.f32.mrb[54].mxu1  ;;  %v9389_v24 = vpop.f32.mrb[55].mxu0  ;;  %9446 = vmatpush3.bf16.msra.mxu1 %v10222_v42  ;;  %9425 = vmatprep.subr.bf16.mxu0 %v10223_v29  ;;  %v15669_v29 = vld [vmem:[#allocation118_spill] sm:$0xff] }
 0x998   :  { %v9411_v25 = vpop.f32.mrb[55].mxu1  ;;  %9447 = vmatprep.subr.bf16.mxu1 %v10224_v53  ;;  %v15666_v24 = vld [vmem:[#allocation115_spill] sm:$0xff] }
 0x999   :  { %v6403_v12 = vadd.f32 %v9409_v1, %v9387_v4  ;;  %v15667_v25 = vld [vmem:[#allocation116_spill] sm:$0xff]  ;;  %v15670_v53 = vld [vmem:[#allocation119_spill] sm:$0xff] }
 0x99a   :  { %9426 = vmatpush3.bf16.msra.mxu0 %v10225_v30  ;;  %v15671_v30 = vld [vmem:[#allocation120_spill] sm:$0xff] }
 0x99b   :  { %v13799_v27 = vadd.f32 %v6403_v12, %v13394_v8  ;;  %9448 = vmatpush3.bf16.msra.mxu1 %v10226_v40  ;;  %9427 = vmatprep.subr.bf16.mxu0 %v10227_v41  ;;  %v15649_v8 = vld [vmem:[#allocation94_spill] sm:$0xff]  ;;  %v15668_v12 = vld [vmem:[#allocation117_spill] sm:$0xff] }
 0x99c   :  { %9449 = vmatprep.subr.bf16.mxu1 %v10228_v48  ;;  %v15672_v40 = vld [vmem:[#allocation121_spill] sm:$0xff]  ;;  %v15673_v41 = vld [vmem:[#allocation122_spill] sm:$0xff]  ;;  %v15674_v48 = vld [vmem:[#allocation123_spill] sm:$0xff] }
 0x99e   :  { %9428 = vmatpush3.bf16.msra.mxu0 %v10229_v49  ;;  %v15675_v49 = vld [vmem:[#allocation124_spill] sm:$0xff] }
 0x99f   :  { %9450 = vmatpush3.bf16.msra.mxu1 %v10230_v21  ;;  %7049 = vmatprep.subr.bf16.mxu0 %v13396_v60  ;;  %v15676_v21 = vld [vmem:[#allocation125_spill] sm:$0xff] }
 0x9a0   :  { %7172 = vmatprep.subr.bf16.mxu1 %v15649_v8  ;;  %v15677_v8 = vld [vmem:[#allocation126_spill] sm:$0xff] }
 0xa54   :  { %v6549_v57 = vpop.f32.mrb[56].mxu0 }
 0xa55   :  { %v9594_v43 = vadd.f32 %v6549_v57, %v15650_v22  ;;  %v6672_v54 = vpop.f32.mrb[56].mxu1  ;;  %v6551_v0 = vpop.f32.mrb[57].mxu0  ;;  %v15678_v57 = vld [vmem:[#allocation127_spill] sm:$0xff] }
 0xa56   :  { %v9596_v3 = vadd.f32 %v6672_v54, %v12127_v39  ;;  %v9595_v31 = vadd.f32 %v6551_v0, %v12118_v32  ;;  %v6674_v35 = vpop.f32.mrb[57].mxu1  ;;  %v6553_v58 = vpop.f32.mrb[58].mxu0  ;;  %v15680_v54 = vld [vmem:[#allocation129_spill] sm:$0xff]  ;;  %v15681_v0 = vld [vmem:[#allocation130_spill] sm:$0xff] }
 0xa57   :  { %v6679_v59 = vmax.f32 %v9594_v43, 0.0  ;;  %v9597_v56 = vadd.f32 %v6674_v35, %v12121_v34  ;;  %v6676_v42 = vpop.f32.mrb[58].mxu1  ;;  %v6554_v6 = vpop.f32.mrb[59].mxu0  ;;  %v15679_v43 = vld [vmem:[#allocation128_spill] sm:$0xff]  ;;  %v15684_v35 = vld [vmem:[#allocation133_spill] sm:$0xff]  ;;  %v15685_v58 = vld [vmem:[#allocation134_spill] sm:$0xff] }
 0xa58   :  { %v6681_v47 = vmax.f32 %v9596_v3, 0.0  ;;  %v6680_v60 = vmax.f32 %v9595_v31, 0.0  ;;  %v6677_v62 = vpop.f32.mrb[59].mxu1  ;;  %v15682_v3 = vld [vmem:[#allocation131_spill] sm:$0xff]  ;;  %v15683_v31 = vld [vmem:[#allocation132_spill] sm:$0xff]  ;;  %v15688_v42 = vld [vmem:[#allocation137_spill] sm:$0xff] }
 0xa59   :  { %v6682_v4 = vmax.f32 %v9597_v56, 0.0  ;;  %v6748_v38 = vpack.c.bf16 %v6679_v59, %v6679_v59  ;;  %v15686_v59 = vld [vmem:[#allocation135_spill] sm:$0xff]  ;;  %v15687_v56 = vld [vmem:[#allocation136_spill] sm:$0xff]  ;;  %v15689_v6 = vld [vmem:[#allocation138_spill] sm:$0xff] }
 0xa5a   :  { %v6749_v36 = vpack.c.bf16 %v6680_v60, %v6680_v60  ;;  %v6750_v2 = vpack.c.bf16 %v6681_v47, %v6681_v47  ;;  %v15690_v47 = vld [vmem:[#allocation139_spill] sm:$0xff]  ;;  %v15691_v60 = vld [vmem:[#allocation140_spill] sm:$0xff]  ;;  %v15692_v62 = vld [vmem:[#allocation141_spill] sm:$0xff] }
 0xa5b   :  { %v6751_v1 = vpack.c.bf16 %v6682_v4, %v6682_v4  ;;  %v15693_v4 = vld [vmem:[#allocation142_spill] sm:$0xff] }
 0xa5c   :  { %6976 = vmatprep.mubr.bf16.mxu0 %v6749_v36  ;;  %v15694_v36 = vld [vmem:[#allocation143_spill] sm:$0xff] }
 0xa5d   :  { %7016 = vmatprep.mubr.bf16.mxu1 %v6751_v1  ;;  %6977 = vmatmul.mubr.bf16.vlgmr.msra.gmra.mrb[60].mxu0 %v6748_v38  ;;  %v15695_v38 = vld [vmem:[#allocation144_spill] sm:$0xff]  ;;  %v15696_v1 = vld [vmem:[#allocation145_spill] sm:$0xff] }
 0xa5e   :  { %7017 = vmatmul.mubr.bf16.vlgmr.msra.gmra.mrb[60].mxu1 %v6750_v2  ;;  %7050 = vmatpush1.bf16.msra.mxu0 %v13406_v7  ;;  %v15652_v7 = vld [vmem:[#allocation96_spill] sm:$0xff]  ;;  %v15697_v2 = vld [vmem:[#allocation146_spill] sm:$0xff] }
 0xa5f   :  { %7173 = vmatpush1.bf16.msra.mxu1 %v13409_v46  ;;  %7081 = vmatprep.mubr.bf16.mxu0 %v13194_v55  ;;  %v15653_v46 = vld [vmem:[#allocation97_spill] sm:$0xff] }
 0xa60   :  { %7204 = vmatprep.mubr.bf16.mxu1 %v13194_v55  ;;  %7051 = vmatprep.subr.bf16.mxu0 %v13414_v37  ;;  %v15651_v55 = vld [vmem:[#allocation95_spill] sm:$0xff] }
 0xa61   :  { %7174 = vmatprep.subr.bf16.mxu1 %v13417_v61  ;;  %v15654_v37 = vld [vmem:[#allocation99_spill] sm:$0xff]  ;;  %v15655_v61 = vld [vmem:[#allocation100_spill] sm:$0xff] }
 0xa62   :  { %7052 = vmatpush1.bf16.msra.mxu0 %v13420_v28  ;;  %v15656_v28 = vld [vmem:[#allocation101_spill] sm:$0xff] }
 0xa63   :  { %7175 = vmatpush1.bf16.msra.mxu1 %v13423_v14  ;;  %7053 = vmatprep.subr.bf16.mxu0 %v13426_v9  ;;  %v15657_v14 = vld [vmem:[#allocation102_spill] sm:$0xff]  ;;  %v15658_v9 = vld [vmem:[#allocation103_spill] sm:$0xff] }
 0xa64   :  { %7176 = vmatprep.subr.bf16.mxu1 %v13429_v5  ;;  %v15659_v5 = vld [vmem:[#allocation104_spill] sm:$0xff] }
 0xa66   :  { %7054 = vmatpush1.bf16.msra.mxu0 %v13432_v63  ;;  %v15660_v63 = vld [vmem:[#allocation105_spill] sm:$0xff] }
 0xa67   :  { %7177 = vmatpush1.bf16.msra.mxu1 %v13435_v33  ;;  %7055 = vmatprep.subr.bf16.mxu0 %v13438_v10  ;;  %v15661_v33 = vld [vmem:[#allocation106_spill] sm:$0xff]  ;;  %v15662_v10 = vld [vmem:[#allocation107_spill] sm:$0xff] }
 0xa68   :  { %7178 = vmatprep.subr.bf16.mxu1 %v13441_v19  ;;  %v15663_v19 = vld [vmem:[#allocation108_spill] sm:$0xff] }
 0xa6a   :  { %7056 = vmatpush1.bf16.msra.mxu0 %v13444_v52  ;;  %v15664_v52 = vld [vmem:[#allocation110_spill] sm:$0xff] }
 0xa6b   :  { %7179 = vmatpush1.bf16.msra.mxu1 %v13447_v50  ;;  %7057 = vmatprep.subr.bf16.mxu0 %v15651_v55  ;;  %v15665_v50 = vld [vmem:[#allocation114_spill] sm:$0xff]  ;;  %v15698_v55 = vld [vmem:[#allocation147_spill] sm:$0xff] }
 0xa6c   :  { %7180 = vmatprep.subr.bf16.mxu1 %v15652_v7  ;;  %v15699_v7 = vld [vmem:[#allocation148_spill] sm:$0xff] }
 0xa6e   :  { %7058 = vmatpush1.bf16.msra.mxu0 %v15653_v46  ;;  %v15700_v46 = vld [vmem:[#allocation149_spill] sm:$0xff] }
 0xa6f   :  { %7181 = vmatpush1.bf16.msra.mxu1 %v15654_v37  ;;  %7059 = vmatprep.subr.bf16.mxu0 %v15655_v61  ;;  %v15701_v37 = vld [vmem:[#allocation150_spill] sm:$0xff]  ;;  %v15703_v61 = vld [vmem:[#allocation152_spill] sm:$0xff] }
 0xa70   :  { %7182 = vmatprep.subr.bf16.mxu1 %v15656_v28  ;;  %v15704_v28 = vld [vmem:[#allocation153_spill] sm:$0xff] }
 0xa72   :  { %7060 = vmatpush1.bf16.msra.mxu0 %v15657_v14  ;;  %v15705_v14 = vld [vmem:[#allocation154_spill] sm:$0xff] }
 0xa73   :  { %7183 = vmatpush1.bf16.msra.mxu1 %v15658_v9  ;;  %7061 = vmatprep.subr.bf16.mxu0 %v15659_v5  ;;  %v15706_v9 = vld [vmem:[#allocation155_spill] sm:$0xff]  ;;  %v15707_v5 = vld [vmem:[#allocation156_spill] sm:$0xff] }
 0xa74   :  { %7184 = vmatprep.subr.bf16.mxu1 %v15660_v63  ;;  %v15709_v63 = vld [vmem:[#allocation158_spill] sm:$0xff] }
 0xa76   :  { %7062 = vmatpush1.bf16.msra.mxu0 %v15661_v33  ;;  %v15710_v33 = vld [vmem:[#allocation159_spill] sm:$0xff] }
 0xa77   :  { %7185 = vmatpush1.bf16.msra.mxu1 %v15662_v10  ;;  %7063 = vmatprep.subr.bf16.mxu0 %v15663_v19  ;;  %v15711_v10 = vld [vmem:[#allocation160_spill] sm:$0xff]  ;;  %v15712_v19 = vld [vmem:[#allocation161_spill] sm:$0xff] }
 0xa78   :  { %7186 = vmatprep.subr.bf16.mxu1 %v15664_v52  ;;  %v15713_v52 = vld [vmem:[#allocation162_spill] sm:$0xff] }
 0xa7a   :  { %7064 = vmatpush1.bf16.msra.mxu0 %v15665_v50  ;;  %v15714_v50 = vld [vmem:[#allocation163_spill] sm:$0xff] }
 0xa7b   :  { %7187 = vmatpush1.bf16.msra.mxu1 %v15666_v24  ;;  %7065 = vmatprep.subr.bf16.mxu0 %v15667_v25  ;;  %v15715_v24 = vld [vmem:[#allocation164_spill] sm:$0xff]  ;;  %v15716_v25 = vld [vmem:[#allocation165_spill] sm:$0xff] }
 0xa7c   :  { %7188 = vmatprep.subr.bf16.mxu1 %v15668_v12  ;;  %v15717_v12 = vld [vmem:[#allocation166_spill] sm:$0xff] }
 0xa7e   :  { %7066 = vmatpush1.bf16.msra.mxu0 %v15669_v29  ;;  %v13901_v29 = vld [vmem:[#allocation9 + $0x2c0] ss:$16 sps:$4 sm:$0xff]  }
 0xa7f   :  { %7189 = vmatpush1.bf16.msra.mxu1 %v15670_v53  ;;  %7067 = vmatprep.subr.bf16.mxu0 %v15671_v30  ;;  %v13904_v53 = vld [vmem:[#allocation9 + $0x2c8] ss:$16 sps:$4 sm:$0xff]   ;;  %v13907_v30 = vld [vmem:[#allocation9 + $0x2e4] ss:$16 sps:$4 sm:$0xff]  }
 0xa80   :  { %7190 = vmatprep.subr.bf16.mxu1 %v15672_v40  ;;  %v13928_v40 = vld [vmem:[#allocation9 + $0x308] ss:$16 sps:$4 sm:$0xff]  }
 0xa82   :  { %7068 = vmatpush1.bf16.msra.mxu0 %v15673_v41  ;;  %v13931_v41 = vld [vmem:[#allocation9 + $0x324] ss:$16 sps:$4 sm:$0xff]  }
 0xa83   :  { %7191 = vmatpush1.bf16.msra.mxu1 %v15674_v48  ;;  %7069 = vmatprep.subr.bf16.mxu0 %v15675_v49  ;;  %v13934_v48 = vld [vmem:[#allocation9 + $0x32c] ss:$16 sps:$4 sm:$0xff]   ;;  %v13937_v49 = vld [vmem:[#allocation9 + $0x320] ss:$16 sps:$4 sm:$0xff]  }
 0xa84   :  { %7192 = vmatprep.subr.bf16.mxu1 %v15676_v21  ;;  %v13940_v21 = vld [vmem:[#allocation9 + $0x328] ss:$16 sps:$4 sm:$0xff]  }
 0xa86   :  { %7070 = vmatpush1.bf16.msra.mxu0 %v15677_v8  ;;  %v13943_v8 = vld [vmem:[#allocation9 + $0x344] ss:$16 sps:$4 sm:$0xff]  }
 0xa87   :  { %7193 = vmatpush1.bf16.msra.mxu1 %v15678_v57  ;;  %7071 = vmatprep.subr.bf16.mxu0 %v15679_v43  ;;  %v13946_v57 = vld [vmem:[#allocation9 + $0x34c] ss:$16 sps:$4 sm:$0xff]   ;;  %v13949_v43 = vld [vmem:[#allocation9 + $0x340] ss:$16 sps:$4 sm:$0xff]  }
 0xa88   :  { %7194 = vmatprep.subr.bf16.mxu1 %v15680_v54  ;;  %v13952_v54 = vld [vmem:[#allocation9 + $0x348] ss:$16 sps:$4 sm:$0xff]  }
 0xa8a   :  { %7072 = vmatpush1.bf16.msra.mxu0 %v15681_v0  ;;  %v13955_v0 = vld [vmem:[#allocation9 + $0x364] ss:$16 sps:$4 sm:$0xff]  }
 0xa8b   :  { %7195 = vmatpush1.bf16.msra.mxu1 %v15682_v3  ;;  %7073 = vmatprep.subr.bf16.mxu0 %v15683_v31  ;;  %v13958_v3 = vld [vmem:[#allocation9 + $0x36c] ss:$16 sps:$4 sm:$0xff]   ;;  %v13961_v31 = vld [vmem:[#allocation9 + $0x360] ss:$16 sps:$4 sm:$0xff]  }
 0xa8c   :  { %7196 = vmatprep.subr.bf16.mxu1 %v15684_v35  ;;  %v13964_v35 = vld [vmem:[#allocation9 + $0x368] ss:$16 sps:$4 sm:$0xff]  }
 0xa8e   :  { %7074 = vmatpush1.bf16.msra.mxu0 %v15685_v58  ;;  %v13967_v58 = vld [vmem:[#allocation9 + $0x384] ss:$16 sps:$4 sm:$0xff]  }
 0xa8f   :  { %7197 = vmatpush1.bf16.msra.mxu1 %v15686_v59  ;;  %7075 = vmatprep.subr.bf16.mxu0 %v15687_v56  ;;  %v13970_v59 = vld [vmem:[#allocation9 + $0x38c] ss:$16 sps:$4 sm:$0xff]   ;;  %v13973_v56 = vld [vmem:[#allocation9 + $0x380] ss:$16 sps:$4 sm:$0xff]  }
 0xa90   :  { %7198 = vmatprep.subr.bf16.mxu1 %v15688_v42  ;;  %v13976_v42 = vld [vmem:[#allocation9 + $0x388] ss:$16 sps:$4 sm:$0xff]  }
 0xa92   :  { %7076 = vmatpush1.bf16.msra.mxu0 %v15689_v6  ;;  %v13979_v6 = vld [vmem:[#allocation9 + $0x3a4] ss:$16 sps:$4 sm:$0xff]  }
 0xa93   :  { %7199 = vmatpush1.bf16.msra.mxu1 %v15690_v47  ;;  %7077 = vmatprep.subr.bf16.mxu0 %v15691_v60  ;;  %v13982_v47 = vld [vmem:[#allocation9 + $0x3ac] ss:$16 sps:$4 sm:$0xff]   ;;  %v15718_v60 = vsub.s32 7, %v15578_v13 }
 0xa94   :  { %7200 = vmatprep.subr.bf16.mxu1 %v15692_v62 }
 0xa95   :  { %v436_v62 = vrot.slane %v13704_v45, %v15718_v60  ;;  %v14058_v60 = vld [vmem:[#allocation9 + $0x448] ss:$16 sps:$4 sm:$0xff]  }
 0xa96   :  { %7078 = vmatpush1.bf16.msra.mxu0 %v15693_v4  ;;  %v13988_v4 = vld [vmem:[#allocation9 + $0x3a0] ss:$16 sps:$4 sm:$0xff]   ;;  %15732 = vst [vmem:[#allocation49_spill] sm:$0xff] %v14058_v60 }
 0xa97   :  { %7201 = vmatpush1.bf16.msra.mxu1 %v15694_v36  ;;  %7079 = vmatprep.subr.bf16.mxu0 %v13582_v18  ;;  %v15702_v18 = vld [vmem:[#allocation151_spill] sm:$0xff]  ;;  %v13991_v36 = vld [vmem:[#allocation9 + $0x3a8] ss:$16 sps:$4 sm:$0xff]  }
 0xa98   :  { %7202 = vmatprep.subr.bf16.mxu1 %v15695_v38  ;;  %v13994_v38 = vld [vmem:[#allocation9 + $0x3c4] ss:$16 sps:$4 sm:$0xff]  }
 0xa9a   :  { %7080 = vmatpush1.bf16.msra.mxu0 %v15696_v1  ;;  %v13997_v1 = vld [vmem:[#allocation9 + $0x3cc] ss:$16 sps:$4 sm:$0xff]  }
 0xa9b   :  { %7203 = vmatpush1.bf16.msra.mxu1 %v15697_v2  ;;  %7090 = vmatprep.subr.bf16.mxu0 %v15698_v55  ;;  %v15719_v2 = vld [vmem:[#allocation113_spill] sm:$0xff] }
 0xa9c   :  { %7213 = vmatprep.subr.bf16.mxu1 %v15699_v7  ;;  %v2064_v55 = vadd.f32 %v15719_v2, %v436_v62  ;;  %v14001_v7 = vld [vmem:[#allocation9 + $0x3c0] ss:$16 sps:$4 sm:$0xff]   ;;  %v14061_v62 = vld [vmem:[#allocation9 + $0x464] ss:$16 sps:$4 sm:$0xff]   ;;  %v14064_v2 = vld [vmem:[#allocation9 + $0x46c] ss:$16 sps:$4 sm:$0xff]  }
 0xa9d   :  { %7082 = vmatmul.mubr.bf16.vlgmr.msra.gmra.mrb[64].mxu0 %v15584_v23  ;;  %15733 = vst [vmem:[#allocation30_spill] sm:$0xff] %v14061_v62  ;;  %15734 = vst [vmem:[#allocation92_spill] sm:$0xff] %v14064_v2 }
 0xa9e   :  { %7205 = vmatmul.mubr.bf16.vlgmr.msra.gmra.mrb[64].mxu1 %v15584_v23  ;;  %7091 = vmatpush1.bf16.msra.mxu0 %v15700_v46  ;;  %v15708_v23 = vld [vmem:[#allocation157_spill] sm:$0xff]  ;;  %v14004_v46 = vld [vmem:[#allocation9 + $0x3c8] ss:$16 sps:$4 sm:$0xff]  }
 0xa9f   :  { %7122 = vmatprep.mubr.bf16.mxu0 %v13722_v11  ;;  %7214 = vmatpush1.bf16.msra.mxu1 %v15701_v37  ;;  %v14007_v37 = vld [vmem:[#allocation9 + $0x3e4] ss:$16 sps:$4 sm:$0xff]  }
 0xaa0   :  { %7245 = vmatprep.mubr.bf16.mxu1 %v13722_v11  ;;  %7092 = vmatprep.subr.bf16.mxu0 %v15702_v18  ;;  %v14010_v18 = vld [vmem:[#allocation9 + $0x3ec] ss:$16 sps:$4 sm:$0xff]  }
 0xaa1   :  { %7215 = vmatprep.subr.bf16.mxu1 %v15703_v61  ;;  %v2085_v61 = vmax.f32 %v2064_v55, 0.0  ;;  %v14067_v55 = vld [vmem:[#allocation9 + $0x460] ss:$16 sps:$4 sm:$0xff]  }
 0xaa2   :  { %7093 = vmatpush1.bf16.msra.mxu0 %v15704_v28  ;;  %v14013_v28 = vld [vmem:[#allocation9 + $0x3e0] ss:$16 sps:$4 sm:$0xff]   ;;  %15735 = vst [vmem:[#allocation31_spill] sm:$0xff] %v14067_v55 }
 0xaa3   :  { %7216 = vmatpush1.bf16.msra.mxu1 %v15705_v14  ;;  %7094 = vmatprep.subr.bf16.mxu0 %v15706_v9  ;;  %v14016_v14 = vld [vmem:[#allocation9 + $0x3e8] ss:$16 sps:$4 sm:$0xff]   ;;  %v14019_v9 = vld [vmem:[#allocation9 + $0x404] ss:$16 sps:$4 sm:$0xff]  }
 0xaa4   :  { %7217 = vmatprep.subr.bf16.mxu1 %v15707_v5  ;;  %15720 = vst [vmem:[#allocation167_spill] sm:$0xff] %v14016_v14  ;;  %15721 = vst [vmem:[#allocation168_spill] sm:$0xff] %v14019_v9  ;;  %v14022_v5 = vld [vmem:[#allocation9 + $0x40c] ss:$16 sps:$4 sm:$0xff]  }
 0xaa5   :  { %15722 = vst [vmem:[#allocation169_spill] sm:$0xff] %v14022_v5 }
 0xaa6   :  { %7095 = vmatpush1.bf16.msra.mxu0 %v15708_v23  ;;  %v14025_v23 = vpack.c.bf16 %v2085_v61, %v2085_v61  ;;  %v14070_v61 = vld [vmem:[#allocation9 + $0x468] ss:$16 sps:$4 sm:$0xff]  }
 0xaa7   :  { %7218 = vmatpush1.bf16.msra.mxu1 %v15709_v63  ;;  %7096 = vmatprep.subr.bf16.mxu0 %v15710_v33  ;;  %v14029_v63 = vld [vmem:[#allocation9 + $0x400] ss:$16 sps:$4 sm:$0xff]   ;;  %v14033_v33 = vld [vmem:[#allocation9 + $0x408] ss:$16 sps:$4 sm:$0xff]   ;;  %15736 = vst [vmem:[#allocation32_spill] sm:$0xff] %v14070_v61 }
 0xaa8   :  { %7219 = vmatprep.subr.bf16.mxu1 %v15711_v10  ;;  %15723 = vst [vmem:[#allocation170_spill] sm:$0xff] %v14029_v63  ;;  %15724 = vst [vmem:[#allocation28_spill] sm:$0xff] %v14033_v33  ;;  %v14037_v10 = vld [vmem:[#allocation9 + $0x424] ss:$16 sps:$4 sm:$0xff]  }
 0xaa9   :  { %15725 = vst [vmem:[#allocation24_spill] sm:$0xff] %v14037_v10 }
 0xaaa   :  { %7097 = vmatpush1.bf16.msra.mxu0 %v15712_v19  ;;  %v14040_v19 = vld [vmem:[#allocation9 + $0x42c] ss:$16 sps:$4 sm:$0xff]  }
 0xaab   :  { %7220 = vmatpush1.bf16.msra.mxu1 %v15713_v52  ;;  %7098 = vmatprep.subr.bf16.mxu0 %v15714_v50  ;;  %15726 = vst [vmem:[#allocation50_spill] sm:$0xff] %v14040_v19  ;;  %v14043_v52 = vld [vmem:[#allocation9 + $0x420] ss:$16 sps:$4 sm:$0xff]   ;;  %v14046_v50 = vld [vmem:[#allocation9 + $0x428] ss:$16 sps:$4 sm:$0xff]  }
 0xaac   :  { %7221 = vmatprep.subr.bf16.mxu1 %v15715_v24  ;;  %15727 = vst [vmem:[#allocation76_spill] sm:$0xff] %v14043_v52  ;;  %15728 = vst [vmem:[#allocation48_spill] sm:$0xff] %v14046_v50  ;;  %v14049_v24 = vld [vmem:[#allocation9 + $0x444] ss:$16 sps:$4 sm:$0xff]  }
 0xaad   :  { %15729 = vst [vmem:[#allocation21_spill] sm:$0xff] %v14049_v24 }
 0xaae   :  { %7099 = vmatpush1.bf16.msra.mxu0 %v15716_v25  ;;  %v14052_v25 = vld [vmem:[#allocation9 + $0x44c] ss:$16 sps:$4 sm:$0xff]  }
 0xaaf   :  { %7222 = vmatpush1.bf16.msra.mxu1 %v15717_v12  ;;  %7100 = vmatprep.subr.bf16.mxu0 %v13658_v17  ;;  %v13922_v17 = vld [vmem:[#allocation9 + $0x30c] ss:$16 sps:$4 sm:$0xff]   ;;  %15730 = vst [vmem:[#allocation112_spill] sm:$0xff] %v14052_v25  ;;  %v14055_v12 = vld [vmem:[#allocation9 + $0x440] ss:$16 sps:$4 sm:$0xff]  }
 0xab0   :  { %7223 = vmatprep.subr.bf16.mxu1 %v13661_v15  ;;  %v13910_v15 = vld [vmem:[#allocation9 + $0x2ec] ss:$16 sps:$4 sm:$0xff]   ;;  %15731 = vst [vmem:[#allocation27_spill] sm:$0xff] %v14055_v12 }
 0xab2   :  { %7101 = vmatpush1.bf16.msra.mxu0 %v13664_v20  ;;  %v13913_v20 = vld [vmem:[#allocation9 + $0x2e0] ss:$16 sps:$4 sm:$0xff]  }
 0xab3   :  { %7224 = vmatpush1.bf16.msra.mxu1 %v13667_v44  ;;  %7102 = vmatprep.subr.bf16.mxu0 %v13670_v16  ;;  %v13916_v44 = vld [vmem:[#allocation9 + $0x2e8] ss:$16 sps:$4 sm:$0xff]   ;;  %v13925_v16 = vld [vmem:[#allocation9 + $0x300] ss:$16 sps:$4 sm:$0xff]  }
 0xab4   :  { %7225 = vmatprep.subr.bf16.mxu1 %v13673_v51  ;;  %v13919_v51 = vld [vmem:[#allocation9 + $0x304] ss:$16 sps:$4 sm:$0xff]  }
 0xab6   :  { %7103 = vmatpush1.bf16.msra.mxu0 %v13901_v29 }
 0xab7   :  { %7226 = vmatpush1.bf16.msra.mxu1 %v13904_v53  ;;  %7104 = vmatprep.subr.bf16.mxu0 %v13907_v30 }
 0xab8   :  { %7227 = vmatprep.subr.bf16.mxu1 %v13910_v15 }
 0xaba   :  { %7105 = vmatpush1.bf16.msra.mxu0 %v13913_v20 }
 0xabb   :  { %7228 = vmatpush1.bf16.msra.mxu1 %v13916_v44  ;;  %7106 = vmatprep.subr.bf16.mxu0 %v13919_v51 }
 0xabc   :  { %7229 = vmatprep.subr.bf16.mxu1 %v13922_v17 }
 0xabe   :  { %7107 = vmatpush1.bf16.msra.mxu0 %v13925_v16 }
 0xabf   :  { %7230 = vmatpush1.bf16.msra.mxu1 %v13928_v40  ;;  %7108 = vmatprep.subr.bf16.mxu0 %v13931_v41 }
 0xac0   :  { %7231 = vmatprep.subr.bf16.mxu1 %v13934_v48 }
 0xac2   :  { %7109 = vmatpush1.bf16.msra.mxu0 %v13937_v49 }
 0xac3   :  { %7232 = vmatpush1.bf16.msra.mxu1 %v13940_v21  ;;  %7110 = vmatprep.subr.bf16.mxu0 %v13943_v8 }
 0xac4   :  { %7233 = vmatprep.subr.bf16.mxu1 %v13946_v57 }
 0xac6   :  { %7111 = vmatpush1.bf16.msra.mxu0 %v13949_v43 }
 0xac7   :  { %7234 = vmatpush1.bf16.msra.mxu1 %v13952_v54  ;;  %7112 = vmatprep.subr.bf16.mxu0 %v13955_v0 }
 0xac8   :  { %7235 = vmatprep.subr.bf16.mxu1 %v13958_v3 }
 0xaca   :  { %7113 = vmatpush1.bf16.msra.mxu0 %v13961_v31 }
 0xacb   :  { %7236 = vmatpush1.bf16.msra.mxu1 %v13964_v35  ;;  %7114 = vmatprep.subr.bf16.mxu0 %v13967_v58 }
 0xacc   :  { %7237 = vmatprep.subr.bf16.mxu1 %v13970_v59 }
 0xace   :  { %7115 = vmatpush1.bf16.msra.mxu0 %v13973_v56 }
 0xacf   :  { %7238 = vmatpush1.bf16.msra.mxu1 %v13976_v42  ;;  %7116 = vmatprep.subr.bf16.mxu0 %v13979_v6 }
 0xad0   :  { %7239 = vmatprep.subr.bf16.mxu1 %v13982_v47 }
 0xad2   :  { %7117 = vmatpush1.bf16.msra.mxu0 %v13988_v4 }
 0xad3   :  { %7240 = vmatpush1.bf16.msra.mxu1 %v13991_v36  ;;  %7118 = vmatprep.subr.bf16.mxu0 %v13994_v38 }
 0xad4   :  { %7241 = vmatprep.subr.bf16.mxu1 %v13997_v1 }
 0xad6   :  { %7119 = vmatpush1.bf16.msra.mxu0 %v14001_v7 }
 0xad7   :  { %7242 = vmatpush1.bf16.msra.mxu1 %v14004_v46  ;;  %7120 = vmatprep.subr.bf16.mxu0 %v14007_v37 }
 0xad8   :  { %7243 = vmatprep.subr.bf16.mxu1 %v14010_v18 }
 0xada   :  { %7121 = vmatpush1.bf16.msra.mxu0 %v14013_v28 }
 0xadb   :  { %7244 = vmatpush1.bf16.msra.mxu1 %v14016_v14  ;;  %7131 = vmatprep.subr.bf16.mxu0 %v14019_v9  ;;  %v10257_v9 = vld [vmem:[#allocation11 + $0x630] sm:$0xff]  }
 0xadc   :  { %7254 = vmatprep.subr.bf16.mxu1 %v14022_v5  ;;  %v10258_v14 = vld [vmem:[#allocation11 + $0x6b0] sm:$0xff]  }
 0xadd   :  { %7123 = vmatmul.mubr.bf16.vlgmr.msra.gmra.mrb[64].mxu0 %v13793_v26 }
 0xade   :  { %7246 = vmatmul.mubr.bf16.vlgmr.msra.gmra.mrb[64].mxu1 %v13793_v26  ;;  %7132 = vmatpush1.bf16.msra.mxu0 %v14029_v63 }
 0xadf   :  { %7163 = vmatprep.mubr.bf16.mxu0 %v14025_v23  ;;  %7255 = vmatpush1.bf16.msra.mxu1 %v14033_v33  ;;  %v10247_v33 = vld [vmem:[#allocation11 + $0x660] sm:$0xff]  }
 0xae0   :  { %7286 = vmatprep.mubr.bf16.mxu1 %v14025_v23  ;;  %7133 = vmatprep.subr.bf16.mxu0 %v14037_v10  ;;  %v10245_v10 = vld [vmem:[#allocation11 + $0x618] sm:$0xff]  }
 0xae1   :  { %7256 = vmatprep.subr.bf16.mxu1 %v14040_v19  ;;  %v10241_v19 = vld [vmem:[#allocation11 + $0x610] sm:$0xff]  }
 0xae2   :  { %7134 = vmatpush1.bf16.msra.mxu0 %v14043_v52  ;;  %v10240_v52 = vld [vmem:[#allocation11 + $0x6d0] sm:$0xff]  }
 0xae3   :  { %7257 = vmatpush1.bf16.msra.mxu1 %v14046_v50  ;;  %7135 = vmatprep.subr.bf16.mxu0 %v14049_v24  ;;  %v14194_v24 = vld [vmem:[#allocation9 + $0x5a8] ss:$16 sps:$4 sm:$0xff]  }
 0xae4   :  { %7258 = vmatprep.subr.bf16.mxu1 %v14052_v25  ;;  %v14181_v25 = vld [vmem:[#allocation9 + $0x588] ss:$16 sps:$4 sm:$0xff]   ;;  %15778 = vst [vmem:[#allocation75_spill] sm:$0xff] %v14194_v24 }
 0xae5   :  { %15773 = vst [vmem:[#allocation71_spill] sm:$0xff] %v14181_v25  ;;  %v10236_v50 = vld [vmem:[#allocation11 + $0x6c8] sm:$0xff]  }
 0xae6   :  { %7136 = vmatpush1.bf16.msra.mxu0 %v14055_v12  ;;  %v14073_v12 = vld [vmem:[#allocation9 + $0x484] ss:$16 sps:$4 sm:$0xff]  }
 0xae7   :  { %7259 = vmatpush1.bf16.msra.mxu1 %v14058_v60  ;;  %7137 = vmatprep.subr.bf16.mxu0 %v14061_v62  ;;  %15737 = vst [vmem:[#allocation33_spill] sm:$0xff] %v14073_v12  ;;  %v14076_v60 = vld [vmem:[#allocation9 + $0x48c] ss:$16 sps:$4 sm:$0xff]   ;;  %v14079_v62 = vld [vmem:[#allocation9 + $0x480] ss:$16 sps:$4 sm:$0xff]  }
 0xae8   :  { %7260 = vmatprep.subr.bf16.mxu1 %v14064_v2  ;;  %15738 = vst [vmem:[#allocation98_spill] sm:$0xff] %v14076_v60  ;;  %15739 = vst [vmem:[#allocation34_spill] sm:$0xff] %v14079_v62  ;;  %v14082_v2 = vld [vmem:[#allocation9 + $0x488] ss:$16 sps:$4 sm:$0xff]  }
 0xae9   :  { %15740 = vst [vmem:[#allocation35_spill] sm:$0xff] %v14082_v2 }
 0xaea   :  { %7138 = vmatpush1.bf16.msra.mxu0 %v14067_v55  ;;  %v14085_v55 = vld [vmem:[#allocation9 + $0x4a4] ss:$16 sps:$4 sm:$0xff]  }
 0xaeb   :  { %7261 = vmatpush1.bf16.msra.mxu1 %v14070_v61  ;;  %7139 = vmatprep.subr.bf16.mxu0 %v14073_v12  ;;  %15741 = vst [vmem:[#allocation36_spill] sm:$0xff] %v14085_v55  ;;  %v14088_v61 = vld [vmem:[#allocation9 + $0x4ac] ss:$16 sps:$4 sm:$0xff]   ;;  %v14091_v12 = vld [vmem:[#allocation9 + $0x4a0] ss:$16 sps:$4 sm:$0xff]  }
 0xaec   :  { %7262 = vmatprep.subr.bf16.mxu1 %v14076_v60  ;;  %15742 = vst [vmem:[#allocation37_spill] sm:$0xff] %v14088_v61  ;;  %15743 = vst [vmem:[#allocation38_spill] sm:$0xff] %v14091_v12  ;;  %v14094_v60 = vld [vmem:[#allocation9 + $0x4a8] ss:$16 sps:$4 sm:$0xff]  }
 0xaed   :  { %15744 = vst [vmem:[#allocation39_spill] sm:$0xff] %v14094_v60 }
 0xaee   :  { %7140 = vmatpush1.bf16.msra.mxu0 %v14079_v62  ;;  %v14097_v62 = vld [vmem:[#allocation9 + $0x4c4] ss:$16 sps:$4 sm:$0xff]  }
 0xaef   :  { %7263 = vmatpush1.bf16.msra.mxu1 %v14082_v2  ;;  %7141 = vmatprep.subr.bf16.mxu0 %v14085_v55  ;;  %15745 = vst [vmem:[#allocation40_spill] sm:$0xff] %v14097_v62  ;;  %v14100_v2 = vld [vmem:[#allocation9 + $0x4cc] ss:$16 sps:$4 sm:$0xff]   ;;  %v14103_v55 = vld [vmem:[#allocation9 + $0x4c0] ss:$16 sps:$4 sm:$0xff]  }
 0xaf0   :  { %7264 = vmatprep.subr.bf16.mxu1 %v14088_v61  ;;  %15746 = vst [vmem:[#allocation41_spill] sm:$0xff] %v14100_v2  ;;  %15747 = vst [vmem:[#allocation42_spill] sm:$0xff] %v14103_v55  ;;  %v14106_v61 = vld [vmem:[#allocation9 + $0x4c8] ss:$16 sps:$4 sm:$0xff]  }
 0xaf1   :  { %15748 = vst [vmem:[#allocation43_spill] sm:$0xff] %v14106_v61 }
 0xaf2   :  { %7142 = vmatpush1.bf16.msra.mxu0 %v14091_v12  ;;  %v14109_v12 = vld [vmem:[#allocation9 + $0x4e4] ss:$16 sps:$4 sm:$0xff]  }
 0xaf3   :  { %7265 = vmatpush1.bf16.msra.mxu1 %v14094_v60  ;;  %7143 = vmatprep.subr.bf16.mxu0 %v14097_v62  ;;  %15749 = vst [vmem:[#allocation44_spill] sm:$0xff] %v14109_v12  ;;  %v14112_v60 = vld [vmem:[#allocation9 + $0x4ec] ss:$16 sps:$4 sm:$0xff]   ;;  %v14115_v62 = vld [vmem:[#allocation9 + $0x4e0] ss:$16 sps:$4 sm:$0xff]  }
 0xaf4   :  { %7266 = vmatprep.subr.bf16.mxu1 %v14100_v2  ;;  %15750 = vst [vmem:[#allocation45_spill] sm:$0xff] %v14112_v60  ;;  %15751 = vst [vmem:[#allocation47_spill] sm:$0xff] %v14115_v62  ;;  %v14118_v2 = vld [vmem:[#allocation9 + $0x4e8] ss:$16 sps:$4 sm:$0xff]  }
 0xaf5   :  { %15752 = vst [vmem:[#allocation51_spill] sm:$0xff] %v14118_v2 }
 0xaf6   :  { %7144 = vmatpush1.bf16.msra.mxu0 %v14103_v55  ;;  %v14121_v55 = vld [vmem:[#allocation9 + $0x504] ss:$16 sps:$4 sm:$0xff]  }
 0xaf7   :  { %7267 = vmatpush1.bf16.msra.mxu1 %v14106_v61  ;;  %7145 = vmatprep.subr.bf16.mxu0 %v14109_v12  ;;  %15753 = vst [vmem:[#allocation52_spill] sm:$0xff] %v14121_v55  ;;  %v14124_v61 = vld [vmem:[#allocation9 + $0x50c] ss:$16 sps:$4 sm:$0xff]   ;;  %v14127_v12 = vld [vmem:[#allocation9 + $0x500] ss:$16 sps:$4 sm:$0xff]  }
 0xaf8   :  { %7268 = vmatprep.subr.bf16.mxu1 %v14112_v60  ;;  %15754 = vst [vmem:[#allocation53_spill] sm:$0xff] %v14124_v61  ;;  %15755 = vst [vmem:[#allocation54_spill] sm:$0xff] %v14127_v12  ;;  %v14130_v60 = vld [vmem:[#allocation9 + $0x508] ss:$16 sps:$4 sm:$0xff]  }
 0xaf9   :  { %15756 = vst [vmem:[#allocation55_spill] sm:$0xff] %v14130_v60 }
 0xafa   :  { %7146 = vmatpush1.bf16.msra.mxu0 %v14115_v62  ;;  %v14133_v62 = vld [vmem:[#allocation9 + $0x524] ss:$16 sps:$4 sm:$0xff]  }
 0xafb   :  { %7269 = vmatpush1.bf16.msra.mxu1 %v14118_v2  ;;  %7147 = vmatprep.subr.bf16.mxu0 %v14121_v55  ;;  %15757 = vst [vmem:[#allocation56_spill] sm:$0xff] %v14133_v62  ;;  %v14136_v2 = vld [vmem:[#allocation9 + $0x52c] ss:$16 sps:$4 sm:$0xff]   ;;  %v14139_v55 = vld [vmem:[#allocation9 + $0x520] ss:$16 sps:$4 sm:$0xff]  }
 0xafc   :  { %7270 = vmatprep.subr.bf16.mxu1 %v14124_v61  ;;  %15758 = vst [vmem:[#allocation57_spill] sm:$0xff] %v14136_v2  ;;  %15759 = vst [vmem:[#allocation58_spill] sm:$0xff] %v14139_v55  ;;  %v14142_v61 = vld [vmem:[#allocation9 + $0x528] ss:$16 sps:$4 sm:$0xff]  }
 0xafd   :  { %15760 = vst [vmem:[#allocation59_spill] sm:$0xff] %v14142_v61 }
 0xafe   :  { %7148 = vmatpush1.bf16.msra.mxu0 %v14127_v12  ;;  %v14145_v12 = vld [vmem:[#allocation9 + $0x544] ss:$16 sps:$4 sm:$0xff]  }
 0xaff   :  { %7271 = vmatpush1.bf16.msra.mxu1 %v14130_v60  ;;  %7149 = vmatprep.subr.bf16.mxu0 %v14133_v62  ;;  %15761 = vst [vmem:[#allocation60_spill] sm:$0xff] %v14145_v12  ;;  %v14148_v60 = vld [vmem:[#allocation9 + $0x54c] ss:$16 sps:$4 sm:$0xff]   ;;  %v14151_v62 = vld [vmem:[#allocation9 + $0x540] ss:$16 sps:$4 sm:$0xff]  }
 0xb00   :  { %7272 = vmatprep.subr.bf16.mxu1 %v14136_v2  ;;  %15762 = vst [vmem:[#allocation61_spill] sm:$0xff] %v14148_v60  ;;  %15763 = vst [vmem:[#allocation62_spill] sm:$0xff] %v14151_v62  ;;  %v14154_v2 = vld [vmem:[#allocation9 + $0x548] ss:$16 sps:$4 sm:$0xff]  }
 0xb01   :  { %15764 = vst [vmem:[#allocation63_spill] sm:$0xff] %v14154_v2 }
 0xb02   :  { %7150 = vmatpush1.bf16.msra.mxu0 %v14139_v55  ;;  %v14157_v55 = vld [vmem:[#allocation9 + $0x564] ss:$16 sps:$4 sm:$0xff]  }
 0xb03   :  { %7273 = vmatpush1.bf16.msra.mxu1 %v14142_v61  ;;  %7151 = vmatprep.subr.bf16.mxu0 %v14145_v12  ;;  %15765 = vst [vmem:[#allocation64_spill] sm:$0xff] %v14157_v55  ;;  %v14160_v61 = vld [vmem:[#allocation9 + $0x56c] ss:$16 sps:$4 sm:$0xff]   ;;  %v14163_v12 = vld [vmem:[#allocation9 + $0x560] ss:$16 sps:$4 sm:$0xff]  }
 0xb04   :  { %7274 = vmatprep.subr.bf16.mxu1 %v14148_v60  ;;  %15766 = vst [vmem:[#allocation65_spill] sm:$0xff] %v14160_v61  ;;  %15767 = vst [vmem:[#allocation66_spill] sm:$0xff] %v14163_v12  ;;  %v14166_v60 = vld [vmem:[#allocation9 + $0x568] ss:$16 sps:$4 sm:$0xff]  }
 0xb05   :  { %15768 = vst [vmem:[#allocation67_spill] sm:$0xff] %v14166_v60 }
 0xb06   :  { %7152 = vmatpush1.bf16.msra.mxu0 %v14151_v62  ;;  %v14169_v62 = vld [vmem:[#allocation9 + $0x584] ss:$16 sps:$4 sm:$0xff]  }
 0xb07   :  { %7275 = vmatpush1.bf16.msra.mxu1 %v14154_v2  ;;  %7153 = vmatprep.subr.bf16.mxu0 %v14157_v55  ;;  %15769 = vst [vmem:[#allocation68_spill] sm:$0xff] %v14169_v62  ;;  %v14172_v2 = vld [vmem:[#allocation9 + $0x58c] ss:$16 sps:$4 sm:$0xff]   ;;  %v14175_v55 = vld [vmem:[#allocation9 + $0x580] ss:$16 sps:$4 sm:$0xff]  }
 0xb08   :  { %7276 = vmatprep.subr.bf16.mxu1 %v14160_v61  ;;  %15770 = vst [vmem:[#allocation69_spill] sm:$0xff] %v14172_v2  ;;  %15771 = vst [vmem:[#allocation70_spill] sm:$0xff] %v14175_v55  ;;  %v15772_v61 = vsub.s32 6, %v15578_v13 }
 0xb0a   :  { %7154 = vmatpush1.bf16.msra.mxu0 %v14163_v12  ;;  %v432_v12 = vrot.slane %v13704_v45, %v15772_v61  ;;  %v14197_v45 = vld [vmem:[#allocation9 + $0x5c4] ss:$16 sps:$4 sm:$0xff]   ;;  %v14200_v61 = vld [vmem:[#allocation9 + $0x5cc] ss:$16 sps:$4 sm:$0xff]  }
 0xb0b   :  { %7277 = vmatpush1.bf16.msra.mxu1 %v14166_v60  ;;  %7155 = vmatprep.subr.bf16.mxu0 %v14169_v62  ;;  %v14184_v60 = vld [vmem:[#allocation9 + $0x5a4] ss:$16 sps:$4 sm:$0xff]   ;;  %v14187_v62 = vld [vmem:[#allocation9 + $0x5ac] ss:$16 sps:$4 sm:$0xff]   ;;  %15779 = vst [vmem:[#allocation77_spill] sm:$0xff] %v14197_v45  ;;  %15780 = vst [vmem:[#allocation78_spill] sm:$0xff] %v14200_v61 }
 0xb0c   :  { %7278 = vmatprep.subr.bf16.mxu1 %v14172_v2  ;;  %15774 = vst [vmem:[#allocation72_spill] sm:$0xff] %v14184_v60  ;;  %15775 = vst [vmem:[#allocation73_spill] sm:$0xff] %v14187_v62  ;;  %v14190_v2 = vld [vmem:[#allocation9 + $0x5a0] ss:$16 sps:$4 sm:$0xff]  }
 0xb0d   :  { %15776 = vst [vmem:[#allocation74_spill] sm:$0xff] %v14190_v2 }
 0xb0e   :  { %7156 = vmatpush1.bf16.msra.mxu0 %v14175_v55  ;;  %v15777_v55 = vld [vmem:[#allocation111_spill] sm:$0xff] }
 0xb0f   :  { %7279 = vmatpush1.bf16.msra.mxu1 %v14181_v25  ;;  %7157 = vmatprep.subr.bf16.mxu0 %v14184_v60  ;;  %v2062_v13 = vadd.f32 %v15777_v55, %v432_v12  ;;  %v14203_v60 = vld [vmem:[#allocation9 + $0x5c0] ss:$16 sps:$4 sm:$0xff]   ;;  %v14209_v12 = vld [vmem:[#allocation9 + $0x5e4] ss:$16 sps:$4 sm:$0xff]   ;;  %v14220_v25 = vld [vmem:[#allocation9 + $0x5e8] ss:$16 sps:$4 sm:$0xff]  }
 0xb10   :  { %7280 = vmatprep.subr.bf16.mxu1 %v14187_v62  ;;  %15781 = vst [vmem:[#allocation79_spill] sm:$0xff] %v14203_v60  ;;  %15783 = vst [vmem:[#allocation26_spill] sm:$0xff] %v14209_v12  ;;  %v10231_v55 = vld [vmem:[#allocation11 + $0x640] sm:$0xff]  }
 0xb11   :  { %v2084_v62 = vmax.f32 %v2062_v13, 0.0  ;;  %15787 = vst [vmem:[#allocation84_spill] sm:$0xff] %v14220_v25 }
 0xb12   :  { %7158 = vmatpush1.bf16.msra.mxu0 %v14190_v2  ;;  %v14206_v2 = vld [vmem:[#allocation9 + $0x5c8] ss:$16 sps:$4 sm:$0xff]  }
 0xb13   :  { %7281 = vmatpush1.bf16.msra.mxu1 %v14194_v24  ;;  %7159 = vmatprep.subr.bf16.mxu0 %v14197_v45  ;;  %15782 = vst [vmem:[#allocation80_spill] sm:$0xff] %v14206_v2  ;;  %v14212_v24 = vld [vmem:[#allocation9 + $0x5ec] ss:$16 sps:$4 sm:$0xff]   ;;  %v10232_v45 = vld [vmem:[#allocation11 + $0x6c0] sm:$0xff]   ;;  %v14218_v13 = vpack.c.bf16 %v2084_v62, %v2084_v62  ;;  %v10239_v62 = vld [vmem:[#allocation11 + $0x650] sm:$0xff]  }
 0xb14   :  { %7282 = vmatprep.subr.bf16.mxu1 %v14200_v61  ;;  %15784 = vst [vmem:[#allocation81_spill] sm:$0xff] %v14212_v24  ;;  %v14215_v61 = vld [vmem:[#allocation9 + $0x5e0] ss:$16 sps:$4 sm:$0xff]  }
 0xb15   :  { %15785 = vst [vmem:[#allocation82_spill] sm:$0xff] %v14215_v61  ;;  %15786 = vst [vmem:[#allocation83_spill] sm:$0xff] %v14218_v13 }
 0xb16   :  { %7160 = vmatpush1.bf16.msra.mxu0 %v14203_v60  ;;  %v10233_v60 = vld [vmem:[#allocation11 + $0x600] sm:$0xff]  }
 0xb17   :  { %7283 = vmatpush1.bf16.msra.mxu1 %v14206_v2  ;;  %7161 = vmatprep.subr.bf16.mxu0 %v14209_v12  ;;  %v10234_v2 = vld [vmem:[#allocation11 + $0x680] sm:$0xff]   ;;  %v10235_v12 = vld [vmem:[#allocation11 + $0x648] sm:$0xff]  }
 0xb18   :  { %7284 = vmatprep.subr.bf16.mxu1 %v14212_v24  ;;  %v10237_v24 = vld [vmem:[#allocation11 + $0x608] sm:$0xff]  }
 0xb1a   :  { %7162 = vmatpush1.bf16.msra.mxu0 %v14215_v61  ;;  %v10238_v61 = vld [vmem:[#allocation11 + $0x688] sm:$0xff]  }
 0xb1b   :  { %7285 = vmatpush1.bf16.msra.mxu1 %v14220_v25  ;;  %9457 = vmatprep.subr.bf16.mxu0 %v10231_v55  ;;  %v10242_v55 = vld [vmem:[#allocation11 + $0x690] sm:$0xff]   ;;  %v10243_v25 = vld [vmem:[#allocation11 + $0x658] sm:$0xff]  }
 0xb1c   :  { %9479 = vmatprep.subr.bf16.mxu1 %v10232_v45  ;;  %v10244_v45 = vld [vmem:[#allocation11 + $0x6d8] sm:$0xff]  }
 0xb1d   :  { %7164 = vmatmul.mubr.bf16.vlgmr.msra.gmra.mrb[64].mxu0 %v14218_v13 }
 0xb1e   :  { %7287 = vmatmul.mubr.bf16.vlgmr.msra.gmra.mrb[64].mxu1 %v14218_v13  ;;  %9458 = vmatpush3.bf16.msra.mxu0 %v10233_v60  ;;  %v10246_v60 = vld [vmem:[#allocation11 + $0x698] sm:$0xff]  }
 0xb1f   :  { %9480 = vmatpush3.bf16.msra.mxu1 %v10234_v2  ;;  %9459 = vmatprep.subr.bf16.mxu0 %v10235_v12  ;;  %v10248_v2 = vld [vmem:[#allocation11 + $0x6e0] sm:$0xff]  }
 0xb20   :  { %9481 = vmatprep.subr.bf16.mxu1 %v10236_v50  ;;  %v10249_v12 = vld [vmem:[#allocation11 + $0x620] sm:$0xff]  }
 0xb21   :  { %v10250_v50 = vld [vmem:[#allocation11 + $0x6a0] sm:$0xff]  }
 0xb22   :  { %9460 = vmatpush3.bf16.msra.mxu0 %v10237_v24  ;;  %v10251_v24 = vld [vmem:[#allocation11 + $0x668] sm:$0xff]  }
 0xb23   :  { %9482 = vmatpush3.bf16.msra.mxu1 %v10238_v61  ;;  %9461 = vmatprep.subr.bf16.mxu0 %v10239_v62  ;;  %v10252_v61 = vld [vmem:[#allocation11 + $0x6e8] sm:$0xff]  }
 0xb24   :  { %9483 = vmatprep.subr.bf16.mxu1 %v10240_v52  ;;  %v10253_v62 = vld [vmem:[#allocation11 + $0x628] sm:$0xff]  }
 0xb26   :  { %9462 = vmatpush3.bf16.msra.mxu0 %v10241_v19  ;;  %v10254_v19 = vld [vmem:[#allocation11 + $0x6a8] sm:$0xff]  }
 0xb27   :  { %9484 = vmatpush3.bf16.msra.mxu1 %v10242_v55  ;;  %9463 = vmatprep.subr.bf16.mxu0 %v10243_v25 }
 0xb28   :  { %9485 = vmatprep.subr.bf16.mxu1 %v10244_v45 }
 0xb2a   :  { %9464 = vmatpush3.bf16.msra.mxu0 %v10245_v10 }
 0xb2b   :  { %9486 = vmatpush3.bf16.msra.mxu1 %v10246_v60  ;;  %9465 = vmatprep.subr.bf16.mxu0 %v10247_v33 }
 0xb2c   :  { %9487 = vmatprep.subr.bf16.mxu1 %v10248_v2 }
 0xb2e   :  { %9466 = vmatpush3.bf16.msra.mxu0 %v10249_v12 }
 0xb2f   :  { %9488 = vmatpush3.bf16.msra.mxu1 %v10250_v50  ;;  %9467 = vmatprep.subr.bf16.mxu0 %v10251_v24  ;;  %v10255_v50 = vld [vmem:[#allocation11 + $0x670] sm:$0xff]  }
 0xb30   :  { %v9429_v52 = vpop.f32.mrb[60].mxu0  ;;  %9489 = vmatprep.subr.bf16.mxu1 %v10252_v61  ;;  %v10256_v24 = vld [vmem:[#allocation11 + $0x6f0] sm:$0xff]   ;;  %v10259_v61 = vld [vmem:[#allocation11 + $0x678] sm:$0xff]  }
 0xb31   :  { %v9451_v25 = vpop.f32.mrb[60].mxu1  ;;  %v9430_v55 = vpop.f32.mrb[61].mxu0 }
 0xb32   :  { %v9431_v63 = vadd.f32 %v9430_v55, %v9429_v52  ;;  %v9452_v45 = vpop.f32.mrb[61].mxu1  ;;  %v9432_v13 = vpop.f32.mrb[62].mxu0  ;;  %9468 = vmatpush3.bf16.msra.mxu0 %v10253_v62  ;;  %v10261_v62 = vld [vmem:[#allocation11 + $0x638] sm:$0xff]  }
 0xb33   :  { %v9453_v10 = vadd.f32 %v9452_v45, %v9451_v25  ;;  %v9454_v60 = vpop.f32.mrb[62].mxu1  ;;  %v9433_v33 = vpop.f32.mrb[63].mxu0  ;;  %9490 = vmatpush3.bf16.msra.mxu1 %v10254_v19  ;;  %9469 = vmatprep.subr.bf16.mxu0 %v10255_v50  ;;  %v10260_v13 = vld [vmem:[#allocation11 + $0x6f8] sm:$0xff]  }
 0xb34   :  { %v9455_v5 = vpop.f32.mrb[63].mxu1  ;;  %9491 = vmatprep.subr.bf16.mxu1 %v10256_v24  ;;  %v10262_v52 = vld [vmem:[#allocation11 + $0x6b8] sm:$0xff]  }
 0xb35   :  { %v7019_v2 = vadd.f32 %v9453_v10, %v9431_v63  ;;  %v10882_v5 = vld [vmem:[#allocation9 + $0x4] ss:$16 sps:$4 sm:$0xff]  }
 0xb36   :  { %9470 = vmatpush3.bf16.msra.mxu0 %v10257_v9 }
 0xb37   :  { %v14226_v12 = vadd.f32 %v7019_v2, %v13799_v27  ;;  %9492 = vmatpush3.bf16.msra.mxu1 %v10258_v14  ;;  %9471 = vmatprep.subr.bf16.mxu0 %v10259_v61  ;;  %v10883_v27 = vld [vmem:[#allocation9 + $0xc] ss:$16 sps:$4 sm:$0xff]  }
 0xb38   :  { %9493 = vmatprep.subr.bf16.mxu1 %v10260_v13 }
 0xb3a   :  { %9472 = vmatpush3.bf16.msra.mxu0 %v10261_v62 }
 0xb3b   :  { %9494 = vmatpush3.bf16.msra.mxu1 %v10262_v52  ;;  %7665 = vmatprep.subr.bf16.mxu0 %v10882_v5 }
 0xb3c   :  { %7788 = vmatprep.subr.bf16.mxu1 %v10883_v27 }
 0xbf0   :  { %v7165_v63 = vpop.f32.mrb[64].mxu0 }
 0xbf1   :  { %v9598_v19 = vadd.f32 %v7165_v63, %v15650_v22  ;;  %v7288_v25 = vpop.f32.mrb[64].mxu1  ;;  %v7167_v55 = vpop.f32.mrb[65].mxu0 }
 0xbf2   :  { %v9600_v9 = vadd.f32 %v7288_v25, %v12127_v39  ;;  %v9599_v14 = vadd.f32 %v7167_v55, %v12118_v32  ;;  %v7290_v45 = vpop.f32.mrb[65].mxu1  ;;  %v7169_v10 = vpop.f32.mrb[66].mxu0  ;;  %v10884_v25 = vld [vmem:[#allocation9] ss:$16 sps:$4 sm:$0xff]   ;;  %v10885_v55 = vld [vmem:[#allocation9 + $0x8] ss:$16 sps:$4 sm:$0xff]  }
 0xbf3   :  { %v7295_v60 = vmax.f32 %v9598_v19, 0.0  ;;  %v9601_v33 = vadd.f32 %v7290_v45, %v12121_v34  ;;  %v7292_v2 = vpop.f32.mrb[66].mxu1  ;;  %v7170_v50 = vpop.f32.mrb[67].mxu0  ;;  %v10886_v19 = vld [vmem:[#allocation9 + $0x24] ss:$16 sps:$4 sm:$0xff]  }
 0xbf4   :  { %v7297_v24 = vmax.f32 %v9600_v9, 0.0  ;;  %v7296_v61 = vmax.f32 %v9599_v14, 0.0  ;;  %v7293_v13 = vpop.f32.mrb[67].mxu1  ;;  %v10887_v9 = vld [vmem:[#allocation9 + $0x2c] ss:$16 sps:$4 sm:$0xff]  }
 0xbf5   :  { %v7298_v62 = vmax.f32 %v9601_v33, 0.0  ;;  %v7364_v5 = vpack.c.bf16 %v7295_v60, %v7295_v60  ;;  %v10888_v14 = vld [vmem:[#allocation9 + $0x20] ss:$16 sps:$4 sm:$0xff]   ;;  %v10889_v45 = vld [vmem:[#allocation9 + $0x28] ss:$16 sps:$4 sm:$0xff]  }
 0xbf6   :  { %v7365_v52 = vpack.c.bf16 %v7296_v61, %v7296_v61  ;;  %v7366_v63 = vpack.c.bf16 %v7297_v24, %v7297_v24  ;;  %v10890_v10 = vld [vmem:[#allocation9 + $0x44] ss:$16 sps:$4 sm:$0xff]   ;;  %v10891_v60 = vld [vmem:[#allocation9 + $0x4c] ss:$16 sps:$4 sm:$0xff]   ;;  %v10892_v33 = vld [vmem:[#allocation9 + $0x40] ss:$16 sps:$4 sm:$0xff]  }
 0xbf7   :  { %v7367_v27 = vpack.c.bf16 %v7298_v62, %v7298_v62  ;;  %v10893_v2 = vld [vmem:[#allocation9 + $0x48] ss:$16 sps:$4 sm:$0xff]   ;;  %v10894_v50 = vld [vmem:[#allocation9 + $0x64] ss:$16 sps:$4 sm:$0xff]   ;;  %v10895_v24 = vld [vmem:[#allocation9 + $0x6c] ss:$16 sps:$4 sm:$0xff]  }
 0xbf8   :  { %7592 = vmatprep.mubr.bf16.mxu0 %v7365_v52  ;;  %v10897_v61 = vld [vmem:[#allocation9 + $0x68] ss:$16 sps:$4 sm:$0xff]   ;;  %v10898_v13 = vld [vmem:[#allocation9 + $0x84] ss:$16 sps:$4 sm:$0xff]   ;;  %v10899_v62 = vld [vmem:[#allocation9 + $0x8c] ss:$16 sps:$4 sm:$0xff]  }
 0xbf9   :  { %7632 = vmatprep.mubr.bf16.mxu1 %v7367_v27  ;;  %7593 = vmatmul.mubr.bf16.vlgmr.msra.gmra.mrb[68].mxu0 %v7364_v5  ;;  %v10900_v52 = vld [vmem:[#allocation9 + $0x80] ss:$16 sps:$4 sm:$0xff]   ;;  %v10901_v5 = vld [vmem:[#allocation9 + $0x88] ss:$16 sps:$4 sm:$0xff]   ;;  %v10902_v27 = vld [vmem:[#allocation9 + $0xa4] ss:$16 sps:$4 sm:$0xff]  }
 0xbfa   :  { %7633 = vmatmul.mubr.bf16.vlgmr.msra.gmra.mrb[68].mxu1 %v7366_v63  ;;  %7666 = vmatpush1.bf16.msra.mxu0 %v10884_v25  ;;  %v10903_v63 = vld [vmem:[#allocation9 + $0xac] ss:$16 sps:$4 sm:$0xff]   ;;  %v10904_v25 = vld [vmem:[#allocation9 + $0xa0] ss:$16 sps:$4 sm:$0xff]  }
 0xbfb   :  { %7789 = vmatpush1.bf16.msra.mxu1 %v10885_v55  ;;  %7697 = vmatprep.mubr.bf16.mxu0 %v13722_v11  ;;  %v10905_v55 = vld [vmem:[#allocation9 + $0xa8] ss:$16 sps:$4 sm:$0xff]  }
 0xbfc   :  { %7820 = vmatprep.mubr.bf16.mxu1 %v13722_v11  ;;  %7667 = vmatprep.subr.bf16.mxu0 %v10886_v19  ;;  %v10896_v11 = vld [vmem:[#allocation9 + $0x60] ss:$16 sps:$4 sm:$0xff]   ;;  %v10906_v19 = vld [vmem:[#allocation9 + $0xc4] ss:$16 sps:$4 sm:$0xff]  }
 0xbfd   :  { %7790 = vmatprep.subr.bf16.mxu1 %v10887_v9  ;;  %v10907_v9 = vld [vmem:[#allocation9 + $0xcc] ss:$16 sps:$4 sm:$0xff]  }
 0xbfe   :  { %7668 = vmatpush1.bf16.msra.mxu0 %v10888_v14  ;;  %v10908_v14 = vld [vmem:[#allocation9 + $0xc0] ss:$16 sps:$4 sm:$0xff]  }
 0xbff   :  { %7791 = vmatpush1.bf16.msra.mxu1 %v10889_v45  ;;  %7669 = vmatprep.subr.bf16.mxu0 %v10890_v10  ;;  %v10909_v45 = vld [vmem:[#allocation9 + $0xc8] ss:$16 sps:$4 sm:$0xff]   ;;  %v10910_v10 = vld [vmem:[#allocation9 + $0xe4] ss:$16 sps:$4 sm:$0xff]  }
 0xc00   :  { %7792 = vmatprep.subr.bf16.mxu1 %v10891_v60  ;;  %v10911_v60 = vld [vmem:[#allocation9 + $0xec] ss:$16 sps:$4 sm:$0xff]  }
 0xc02   :  { %7670 = vmatpush1.bf16.msra.mxu0 %v10892_v33  ;;  %v10912_v33 = vld [vmem:[#allocation9 + $0xe0] ss:$16 sps:$4 sm:$0xff]  }
 0xc03   :  { %7793 = vmatpush1.bf16.msra.mxu1 %v10893_v2  ;;  %7671 = vmatprep.subr.bf16.mxu0 %v10894_v50  ;;  %v10913_v2 = vld [vmem:[#allocation9 + $0xe8] ss:$16 sps:$4 sm:$0xff]   ;;  %v10914_v50 = vld [vmem:[#allocation9 + $0x104] ss:$16 sps:$4 sm:$0xff]  }
 0xc04   :  { %7794 = vmatprep.subr.bf16.mxu1 %v10895_v24  ;;  %v10915_v24 = vld [vmem:[#allocation9 + $0x10c] ss:$16 sps:$4 sm:$0xff]  }
 0xc06   :  { %7672 = vmatpush1.bf16.msra.mxu0 %v10896_v11  ;;  %v10916_v11 = vld [vmem:[#allocation9 + $0x100] ss:$16 sps:$4 sm:$0xff]  }
 0xc07   :  { %7795 = vmatpush1.bf16.msra.mxu1 %v10897_v61  ;;  %7673 = vmatprep.subr.bf16.mxu0 %v10898_v13  ;;  %v10917_v61 = vld [vmem:[#allocation9 + $0x108] ss:$16 sps:$4 sm:$0xff]   ;;  %v10918_v13 = vld [vmem:[#allocation9 + $0x124] ss:$16 sps:$4 sm:$0xff]  }
 0xc08   :  { %7796 = vmatprep.subr.bf16.mxu1 %v10899_v62  ;;  %v10919_v62 = vld [vmem:[#allocation9 + $0x12c] ss:$16 sps:$4 sm:$0xff]  }
 0xc0a   :  { %7674 = vmatpush1.bf16.msra.mxu0 %v10900_v52  ;;  %v10920_v52 = vld [vmem:[#allocation9 + $0x120] ss:$16 sps:$4 sm:$0xff]  }
 0xc0b   :  { %7797 = vmatpush1.bf16.msra.mxu1 %v10901_v5  ;;  %7675 = vmatprep.subr.bf16.mxu0 %v10902_v27  ;;  %v10921_v5 = vld [vmem:[#allocation9 + $0x128] ss:$16 sps:$4 sm:$0xff]   ;;  %v10922_v27 = vld [vmem:[#allocation9 + $0x144] ss:$16 sps:$4 sm:$0xff]  }
 0xc0c   :  { %7798 = vmatprep.subr.bf16.mxu1 %v10903_v63  ;;  %v10923_v63 = vld [vmem:[#allocation9 + $0x14c] ss:$16 sps:$4 sm:$0xff]  }
 0xc0e   :  { %7676 = vmatpush1.bf16.msra.mxu0 %v10904_v25  ;;  %v10924_v25 = vld [vmem:[#allocation9 + $0x140] ss:$16 sps:$4 sm:$0xff]  }
 0xc0f   :  { %7799 = vmatpush1.bf16.msra.mxu1 %v10905_v55  ;;  %7677 = vmatprep.subr.bf16.mxu0 %v10906_v19  ;;  %v10925_v55 = vld [vmem:[#allocation9 + $0x148] ss:$16 sps:$4 sm:$0xff]   ;;  %v10926_v19 = vld [vmem:[#allocation9 + $0x164] ss:$16 sps:$4 sm:$0xff]  }
 0xc10   :  { %7800 = vmatprep.subr.bf16.mxu1 %v10907_v9  ;;  %v10927_v9 = vld [vmem:[#allocation9 + $0x16c] ss:$16 sps:$4 sm:$0xff]  }
 0xc12   :  { %7678 = vmatpush1.bf16.msra.mxu0 %v10908_v14  ;;  %v10928_v14 = vld [vmem:[#allocation9 + $0x160] ss:$16 sps:$4 sm:$0xff]  }
 0xc13   :  { %7801 = vmatpush1.bf16.msra.mxu1 %v10909_v45  ;;  %7679 = vmatprep.subr.bf16.mxu0 %v10910_v10  ;;  %v10929_v45 = vld [vmem:[#allocation9 + $0x168] ss:$16 sps:$4 sm:$0xff]   ;;  %v10930_v10 = vld [vmem:[#allocation9 + $0x184] ss:$16 sps:$4 sm:$0xff]  }
 0xc14   :  { %7802 = vmatprep.subr.bf16.mxu1 %v10911_v60  ;;  %v10931_v60 = vld [vmem:[#allocation9 + $0x18c] ss:$16 sps:$4 sm:$0xff]  }
 0xc16   :  { %7680 = vmatpush1.bf16.msra.mxu0 %v10912_v33  ;;  %v10932_v33 = vld [vmem:[#allocation9 + $0x180] ss:$16 sps:$4 sm:$0xff]  }
 0xc17   :  { %7803 = vmatpush1.bf16.msra.mxu1 %v10913_v2  ;;  %7681 = vmatprep.subr.bf16.mxu0 %v10914_v50  ;;  %v10933_v2 = vld [vmem:[#allocation9 + $0x188] ss:$16 sps:$4 sm:$0xff]   ;;  %v10934_v50 = vld [vmem:[#allocation9 + $0x1a4] ss:$16 sps:$4 sm:$0xff]  }
 0xc18   :  { %7804 = vmatprep.subr.bf16.mxu1 %v10915_v24  ;;  %v10935_v24 = vld [vmem:[#allocation9 + $0x1ac] ss:$16 sps:$4 sm:$0xff]  }
 0xc1a   :  { %7682 = vmatpush1.bf16.msra.mxu0 %v10916_v11  ;;  %v10936_v11 = vld [vmem:[#allocation9 + $0x1a0] ss:$16 sps:$4 sm:$0xff]  }
 0xc1b   :  { %7805 = vmatpush1.bf16.msra.mxu1 %v10917_v61  ;;  %7683 = vmatprep.subr.bf16.mxu0 %v10918_v13  ;;  %v10937_v61 = vld [vmem:[#allocation9 + $0x1a8] ss:$16 sps:$4 sm:$0xff]   ;;  %v10938_v13 = vld [vmem:[#allocation9 + $0x1c4] ss:$16 sps:$4 sm:$0xff]  }
 0xc1c   :  { %7806 = vmatprep.subr.bf16.mxu1 %v10919_v62  ;;  %v10939_v62 = vld [vmem:[#allocation9 + $0x1cc] ss:$16 sps:$4 sm:$0xff]  }
 0xc1e   :  { %7684 = vmatpush1.bf16.msra.mxu0 %v10920_v52  ;;  %v10940_v52 = vld [vmem:[#allocation9 + $0x1c0] ss:$16 sps:$4 sm:$0xff]  }
 0xc1f   :  { %7807 = vmatpush1.bf16.msra.mxu1 %v10921_v5  ;;  %7685 = vmatprep.subr.bf16.mxu0 %v10922_v27  ;;  %v10941_v5 = vld [vmem:[#allocation9 + $0x1c8] ss:$16 sps:$4 sm:$0xff]   ;;  %v10942_v27 = vld [vmem:[#allocation9 + $0x1e4] ss:$16 sps:$4 sm:$0xff]  }
 0xc20   :  { %7808 = vmatprep.subr.bf16.mxu1 %v10923_v63  ;;  %v10943_v63 = vld [vmem:[#allocation9 + $0x1ec] ss:$16 sps:$4 sm:$0xff]  }
 0xc22   :  { %7686 = vmatpush1.bf16.msra.mxu0 %v10924_v25  ;;  %v10944_v25 = vld [vmem:[#allocation9 + $0x1e0] ss:$16 sps:$4 sm:$0xff]  }
 0xc23   :  { %7809 = vmatpush1.bf16.msra.mxu1 %v10925_v55  ;;  %7687 = vmatprep.subr.bf16.mxu0 %v10926_v19  ;;  %v10945_v55 = vld [vmem:[#allocation9 + $0x1e8] ss:$16 sps:$4 sm:$0xff]   ;;  %v10946_v19 = vld [vmem:[#allocation9 + $0x204] ss:$16 sps:$4 sm:$0xff]  }
 0xc24   :  { %7810 = vmatprep.subr.bf16.mxu1 %v10927_v9  ;;  %v10947_v9 = vld [vmem:[#allocation9 + $0x20c] ss:$16 sps:$4 sm:$0xff]  }
 0xc26   :  { %7688 = vmatpush1.bf16.msra.mxu0 %v10928_v14  ;;  %v10948_v14 = vld [vmem:[#allocation9 + $0x200] ss:$16 sps:$4 sm:$0xff]  }
 0xc27   :  { %7811 = vmatpush1.bf16.msra.mxu1 %v10929_v45  ;;  %7689 = vmatprep.subr.bf16.mxu0 %v10930_v10  ;;  %v10949_v45 = vld [vmem:[#allocation9 + $0x208] ss:$16 sps:$4 sm:$0xff]   ;;  %v10950_v10 = vld [vmem:[#allocation9 + $0x224] ss:$16 sps:$4 sm:$0xff]  }
 0xc28   :  { %7812 = vmatprep.subr.bf16.mxu1 %v10931_v60  ;;  %v10951_v60 = vld [vmem:[#allocation9 + $0x22c] ss:$16 sps:$4 sm:$0xff]  }
 0xc2a   :  { %7690 = vmatpush1.bf16.msra.mxu0 %v10932_v33  ;;  %v10952_v33 = vld [vmem:[#allocation9 + $0x220] ss:$16 sps:$4 sm:$0xff]  }
 0xc2b   :  { %7813 = vmatpush1.bf16.msra.mxu1 %v10933_v2  ;;  %7691 = vmatprep.subr.bf16.mxu0 %v10934_v50  ;;  %v10953_v2 = vld [vmem:[#allocation9 + $0x228] ss:$16 sps:$4 sm:$0xff]   ;;  %v10954_v50 = vld [vmem:[#allocation9 + $0x244] ss:$16 sps:$4 sm:$0xff]  }
 0xc2c   :  { %7814 = vmatprep.subr.bf16.mxu1 %v10935_v24  ;;  %v10955_v24 = vld [vmem:[#allocation9 + $0x24c] ss:$16 sps:$4 sm:$0xff]  }
 0xc2e   :  { %7692 = vmatpush1.bf16.msra.mxu0 %v10936_v11  ;;  %v10957_v11 = vld [vmem:[#allocation9 + $0x248] ss:$16 sps:$4 sm:$0xff]  }
 0xc2f   :  { %7815 = vmatpush1.bf16.msra.mxu1 %v10937_v61  ;;  %7693 = vmatprep.subr.bf16.mxu0 %v10938_v13  ;;  %v10958_v61 = vld [vmem:[#allocation9 + $0x264] ss:$16 sps:$4 sm:$0xff]   ;;  %v10959_v13 = vld [vmem:[#allocation9 + $0x26c] ss:$16 sps:$4 sm:$0xff]  }
 0xc30   :  { %7816 = vmatprep.subr.bf16.mxu1 %v10939_v62  ;;  %v10961_v62 = vld [vmem:[#allocation9 + $0x268] ss:$16 sps:$4 sm:$0xff]  }
 0xc32   :  { %7694 = vmatpush1.bf16.msra.mxu0 %v10940_v52  ;;  %v10962_v52 = vld [vmem:[#allocation9 + $0x284] ss:$16 sps:$4 sm:$0xff]  }
 0xc33   :  { %7817 = vmatpush1.bf16.msra.mxu1 %v10941_v5  ;;  %7695 = vmatprep.subr.bf16.mxu0 %v10942_v27  ;;  %v10963_v5 = vld [vmem:[#allocation9 + $0x28c] ss:$16 sps:$4 sm:$0xff]   ;;  %v10964_v27 = vld [vmem:[#allocation9 + $0x280] ss:$16 sps:$4 sm:$0xff]  }
 0xc34   :  { %7818 = vmatprep.subr.bf16.mxu1 %v10943_v63  ;;  %v10965_v63 = vld [vmem:[#allocation9 + $0x288] ss:$16 sps:$4 sm:$0xff]  }
 0xc36   :  { %7696 = vmatpush1.bf16.msra.mxu0 %v10944_v25  ;;  %v10966_v25 = vld [vmem:[#allocation9 + $0x2a4] ss:$16 sps:$4 sm:$0xff]  }
 0xc37   :  { %7819 = vmatpush1.bf16.msra.mxu1 %v10945_v55  ;;  %7706 = vmatprep.subr.bf16.mxu0 %v10946_v19  ;;  %v10967_v55 = vld [vmem:[#allocation9 + $0x2ac] ss:$16 sps:$4 sm:$0xff]   ;;  %v10968_v19 = vld [vmem:[#allocation9 + $0x2a0] ss:$16 sps:$4 sm:$0xff]  }
 0xc38   :  { %7829 = vmatprep.subr.bf16.mxu1 %v10947_v9  ;;  %v10969_v9 = vld [vmem:[#allocation9 + $0x2a8] ss:$16 sps:$4 sm:$0xff]  }
 0xc39   :  { %7698 = vmatmul.mubr.bf16.vlgmr.msra.gmra.mrb[72].mxu0 %v13793_v26 }
 0xc3a   :  { %7821 = vmatmul.mubr.bf16.vlgmr.msra.gmra.mrb[72].mxu1 %v13793_v26  ;;  %7707 = vmatpush1.bf16.msra.mxu0 %v10948_v14  ;;  %v10956_v26 = vld [vmem:[#allocation9 + $0x240] ss:$16 sps:$4 sm:$0xff]   ;;  %v10970_v14 = vld [vmem:[#allocation9 + $0x2c4] ss:$16 sps:$4 sm:$0xff]  }
 0xc3b   :  { %7738 = vmatprep.mubr.bf16.mxu0 %v14025_v23  ;;  %7830 = vmatpush1.bf16.msra.mxu1 %v10949_v45  ;;  %v10971_v45 = vld [vmem:[#allocation9 + $0x2cc] ss:$16 sps:$4 sm:$0xff]  }
 0xc3c   :  { %7861 = vmatprep.mubr.bf16.mxu1 %v14025_v23  ;;  %7708 = vmatprep.subr.bf16.mxu0 %v10950_v10  ;;  %v10960_v23 = vld [vmem:[#allocation9 + $0x260] ss:$16 sps:$4 sm:$0xff]   ;;  %v15825_v10 = vld [vmem:[#allocation54_spill] sm:$0xff] }
 0xc3d   :  { %7831 = vmatprep.subr.bf16.mxu1 %v10951_v60  ;;  %v15826_v60 = vld [vmem:[#allocation55_spill] sm:$0xff] }
 0xc3e   :  { %7709 = vmatpush1.bf16.msra.mxu0 %v10952_v33  ;;  %v15827_v33 = vld [vmem:[#allocation56_spill] sm:$0xff] }
 0xc3f   :  { %7832 = vmatpush1.bf16.msra.mxu1 %v10953_v2  ;;  %7710 = vmatprep.subr.bf16.mxu0 %v10954_v50  ;;  %v15828_v2 = vld [vmem:[#allocation57_spill] sm:$0xff]  ;;  %v15829_v50 = vld [vmem:[#allocation58_spill] sm:$0xff] }
 0xc40   :  { %7833 = vmatprep.subr.bf16.mxu1 %v10955_v24  ;;  %v15830_v24 = vld [vmem:[#allocation59_spill] sm:$0xff] }
 0xc42   :  { %7711 = vmatpush1.bf16.msra.mxu0 %v10956_v26  ;;  %v15831_v26 = vld [vmem:[#allocation60_spill] sm:$0xff] }
 0xc43   :  { %7834 = vmatpush1.bf16.msra.mxu1 %v10957_v11  ;;  %7712 = vmatprep.subr.bf16.mxu0 %v10958_v61  ;;  %v15832_v11 = vld [vmem:[#allocation61_spill] sm:$0xff]  ;;  %v15833_v61 = vld [vmem:[#allocation62_spill] sm:$0xff] }
 0xc44   :  { %7835 = vmatprep.subr.bf16.mxu1 %v10959_v13  ;;  %v15834_v13 = vld [vmem:[#allocation63_spill] sm:$0xff] }
 0xc46   :  { %7713 = vmatpush1.bf16.msra.mxu0 %v10960_v23  ;;  %v15835_v23 = vld [vmem:[#allocation64_spill] sm:$0xff] }
 0xc47   :  { %7836 = vmatpush1.bf16.msra.mxu1 %v10961_v62  ;;  %7714 = vmatprep.subr.bf16.mxu0 %v10962_v52  ;;  %v15836_v62 = vld [vmem:[#allocation65_spill] sm:$0xff]  ;;  %v15837_v52 = vld [vmem:[#allocation66_spill] sm:$0xff] }
 0xc48   :  { %7837 = vmatprep.subr.bf16.mxu1 %v10963_v5  ;;  %v15838_v5 = vld [vmem:[#allocation67_spill] sm:$0xff] }
 0xc4a   :  { %7715 = vmatpush1.bf16.msra.mxu0 %v10964_v27  ;;  %v15839_v27 = vld [vmem:[#allocation68_spill] sm:$0xff] }
 0xc4b   :  { %7838 = vmatpush1.bf16.msra.mxu1 %v10965_v63  ;;  %7716 = vmatprep.subr.bf16.mxu0 %v10966_v25  ;;  %v15840_v63 = vld [vmem:[#allocation69_spill] sm:$0xff]  ;;  %v15841_v25 = vld [vmem:[#allocation70_spill] sm:$0xff] }
 0xc4c   :  { %7839 = vmatprep.subr.bf16.mxu1 %v10967_v55  ;;  %v15842_v55 = vld [vmem:[#allocation71_spill] sm:$0xff] }
 0xc4e   :  { %7717 = vmatpush1.bf16.msra.mxu0 %v10968_v19  ;;  %v15843_v19 = vld [vmem:[#allocation72_spill] sm:$0xff] }
 0xc4f   :  { %7840 = vmatpush1.bf16.msra.mxu1 %v10969_v9  ;;  %7718 = vmatprep.subr.bf16.mxu0 %v10970_v14  ;;  %v15844_v9 = vld [vmem:[#allocation73_spill] sm:$0xff]  ;;  %v15845_v14 = vld [vmem:[#allocation74_spill] sm:$0xff] }
 0xc50   :  { %7841 = vmatprep.subr.bf16.mxu1 %v10971_v45  ;;  %v15846_v45 = vld [vmem:[#allocation75_spill] sm:$0xff] }
 0xc52   :  { %7719 = vmatpush1.bf16.msra.mxu0 %v13901_v29  ;;  %v15788_v29 = vld [vmem:[#allocation167_spill] sm:$0xff] }
 0xc53   :  { %7842 = vmatpush1.bf16.msra.mxu1 %v13904_v53  ;;  %7720 = vmatprep.subr.bf16.mxu0 %v13907_v30  ;;  %v15789_v53 = vld [vmem:[#allocation168_spill] sm:$0xff]  ;;  %v15790_v30 = vld [vmem:[#allocation169_spill] sm:$0xff] }
 0xc54   :  { %7843 = vmatprep.subr.bf16.mxu1 %v13910_v15  ;;  %v15791_v15 = vld [vmem:[#allocation83_spill] sm:$0xff] }
 0xc56   :  { %7721 = vmatpush1.bf16.msra.mxu0 %v13913_v20  ;;  %v15792_v20 = vld [vmem:[#allocation170_spill] sm:$0xff] }
 0xc57   :  { %7844 = vmatpush1.bf16.msra.mxu1 %v13916_v44  ;;  %7722 = vmatprep.subr.bf16.mxu0 %v13919_v51  ;;  %v15793_v44 = vld [vmem:[#allocation28_spill] sm:$0xff] }
 0xc58   :  { %7845 = vmatprep.subr.bf16.mxu1 %v13922_v17  ;;  %v15794_v51 = vld [vmem:[#allocation24_spill] sm:$0xff]  ;;  %v15795_v17 = vld [vmem:[#allocation50_spill] sm:$0xff] }
 0xc5a   :  { %7723 = vmatpush1.bf16.msra.mxu0 %v13925_v16  ;;  %v15796_v16 = vld [vmem:[#allocation20_spill] sm:$0xff] }
 0xc5b   :  { %7846 = vmatpush1.bf16.msra.mxu1 %v13928_v40  ;;  %7724 = vmatprep.subr.bf16.mxu0 %v13931_v41  ;;  %v15797_v40 = vld [vmem:[#allocation76_spill] sm:$0xff] }
 0xc5c   :  { %7847 = vmatprep.subr.bf16.mxu1 %v13934_v48  ;;  %v15798_v41 = vld [vmem:[#allocation48_spill] sm:$0xff]  ;;  %v15799_v48 = vld [vmem:[#allocation21_spill] sm:$0xff] }
 0xc5e   :  { %7725 = vmatpush1.bf16.msra.mxu0 %v13937_v49  ;;  %v15800_v49 = vld [vmem:[#allocation112_spill] sm:$0xff] }
 0xc5f   :  { %7848 = vmatpush1.bf16.msra.mxu1 %v13940_v21  ;;  %7726 = vmatprep.subr.bf16.mxu0 %v13943_v8  ;;  %v15801_v21 = vld [vmem:[#allocation27_spill] sm:$0xff]  ;;  %v15802_v8 = vld [vmem:[#allocation49_spill] sm:$0xff] }
 0xc60   :  { %7849 = vmatprep.subr.bf16.mxu1 %v13946_v57  ;;  %v15803_v57 = vld [vmem:[#allocation30_spill] sm:$0xff] }
 0xc62   :  { %7727 = vmatpush1.bf16.msra.mxu0 %v13949_v43  ;;  %v15804_v43 = vld [vmem:[#allocation92_spill] sm:$0xff] }
 0xc63   :  { %7850 = vmatpush1.bf16.msra.mxu1 %v13952_v54  ;;  %7728 = vmatprep.subr.bf16.mxu0 %v13955_v0  ;;  %v15805_v54 = vld [vmem:[#allocation31_spill] sm:$0xff]  ;;  %v15806_v0 = vld [vmem:[#allocation32_spill] sm:$0xff] }
 0xc64   :  { %7851 = vmatprep.subr.bf16.mxu1 %v13958_v3  ;;  %v15807_v3 = vld [vmem:[#allocation33_spill] sm:$0xff] }
 0xc66   :  { %7729 = vmatpush1.bf16.msra.mxu0 %v13961_v31  ;;  %v15808_v31 = vld [vmem:[#allocation98_spill] sm:$0xff] }
 0xc67   :  { %7852 = vmatpush1.bf16.msra.mxu1 %v13964_v35  ;;  %7730 = vmatprep.subr.bf16.mxu0 %v13967_v58  ;;  %v15809_v35 = vld [vmem:[#allocation34_spill] sm:$0xff]  ;;  %v15810_v58 = vld [vmem:[#allocation35_spill] sm:$0xff] }
 0xc68   :  { %7853 = vmatprep.subr.bf16.mxu1 %v13970_v59  ;;  %v15811_v59 = vld [vmem:[#allocation36_spill] sm:$0xff] }
 0xc6a   :  { %7731 = vmatpush1.bf16.msra.mxu0 %v13973_v56  ;;  %v15812_v56 = vld [vmem:[#allocation37_spill] sm:$0xff] }
 0xc6b   :  { %7854 = vmatpush1.bf16.msra.mxu1 %v13976_v42  ;;  %7732 = vmatprep.subr.bf16.mxu0 %v13979_v6  ;;  %v15813_v42 = vld [vmem:[#allocation38_spill] sm:$0xff]  ;;  %v15814_v6 = vld [vmem:[#allocation39_spill] sm:$0xff] }
 0xc6c   :  { %7855 = vmatprep.subr.bf16.mxu1 %v13982_v47  ;;  %v15815_v47 = vld [vmem:[#allocation40_spill] sm:$0xff] }
 0xc6e   :  { %7733 = vmatpush1.bf16.msra.mxu0 %v13988_v4  ;;  %v15816_v4 = vld [vmem:[#allocation41_spill] sm:$0xff] }
 0xc6f   :  { %7856 = vmatpush1.bf16.msra.mxu1 %v13991_v36  ;;  %7734 = vmatprep.subr.bf16.mxu0 %v13994_v38  ;;  %v15817_v36 = vld [vmem:[#allocation42_spill] sm:$0xff]  ;;  %v15818_v38 = vld [vmem:[#allocation43_spill] sm:$0xff] }
 0xc70   :  { %7857 = vmatprep.subr.bf16.mxu1 %v13997_v1  ;;  %v15819_v1 = vld [vmem:[#allocation44_spill] sm:$0xff] }
 0xc72   :  { %7735 = vmatpush1.bf16.msra.mxu0 %v14001_v7  ;;  %v15820_v7 = vld [vmem:[#allocation45_spill] sm:$0xff] }
 0xc73   :  { %7858 = vmatpush1.bf16.msra.mxu1 %v14004_v46  ;;  %7736 = vmatprep.subr.bf16.mxu0 %v14007_v37  ;;  %v15821_v46 = vld [vmem:[#allocation47_spill] sm:$0xff] }
 0xc74   :  { %7859 = vmatprep.subr.bf16.mxu1 %v14010_v18  ;;  %v15822_v37 = vld [vmem:[#allocation51_spill] sm:$0xff]  ;;  %v15823_v18 = vld [vmem:[#allocation52_spill] sm:$0xff] }
 0xc76   :  { %7737 = vmatpush1.bf16.msra.mxu0 %v14013_v28  ;;  %v15824_v28 = vld [vmem:[#allocation53_spill] sm:$0xff] }
 0xc77   :  { %7860 = vmatpush1.bf16.msra.mxu1 %v15788_v29  ;;  %7747 = vmatprep.subr.bf16.mxu0 %v15789_v53  ;;  %v15847_v29 = vld [vmem:[#allocation77_spill] sm:$0xff]  ;;  %v15848_v53 = vld [vmem:[#allocation78_spill] sm:$0xff] }
 0xc78   :  { %7870 = vmatprep.subr.bf16.mxu1 %v15790_v30  ;;  %v15849_v30 = vld [vmem:[#allocation79_spill] sm:$0xff] }
 0xc79   :  { %7739 = vmatmul.mubr.bf16.vlgmr.msra.gmra.mrb[72].mxu0 %v15791_v15 }
 0xc7a   :  { %7862 = vmatmul.mubr.bf16.vlgmr.msra.gmra.mrb[72].mxu1 %v15791_v15  ;;  %7748 = vmatpush1.bf16.msra.mxu0 %v15792_v20  ;;  %v15850_v15 = vld [vmem:[#allocation80_spill] sm:$0xff]  ;;  %v15851_v20 = vld [vmem:[#allocation26_spill] sm:$0xff] }
 0xc7b   :  { %7871 = vmatpush1.bf16.msra.mxu1 %v15793_v44  ;;  %7749 = vmatprep.subr.bf16.mxu0 %v15794_v51  ;;  %v10263_v44 = vld [vmem:[#allocation11 + $0x740] sm:$0xff]   ;;  %v15852_v51 = vld [vmem:[#allocation81_spill] sm:$0xff] }
 0xc7c   :  { %7872 = vmatprep.subr.bf16.mxu1 %v15795_v17  ;;  %7779 = vmatprep.mubr.bf16.mxu0 %v15796_v16  ;;  %v10264_v17 = vld [vmem:[#allocation11 + $0x7c0] sm:$0xff]  }
 0xc7d   :  { %7902 = vmatprep.mubr.bf16.mxu1 %v15796_v16  ;;  %v15853_v16 = vld [vmem:[#allocation82_spill] sm:$0xff] }
 0xc7e   :  { %7750 = vmatpush1.bf16.msra.mxu0 %v15797_v40  ;;  %v10265_v40 = vld [vmem:[#allocation11 + $0x700] sm:$0xff]  }
 0xc7f   :  { %7873 = vmatpush1.bf16.msra.mxu1 %v15798_v41  ;;  %7751 = vmatprep.subr.bf16.mxu0 %v15799_v48  ;;  %v15854_v41 = vld [vmem:[#allocation84_spill] sm:$0xff]  ;;  %v10266_v48 = vld [vmem:[#allocation11 + $0x780] sm:$0xff]  }
 0xc80   :  { %7874 = vmatprep.subr.bf16.mxu1 %v15800_v49  ;;  %v10267_v49 = vld [vmem:[#allocation11 + $0x748] sm:$0xff]  }
 0xc82   :  { %7752 = vmatpush1.bf16.msra.mxu0 %v15801_v21  ;;  %v10268_v21 = vld [vmem:[#allocation11 + $0x7c8] sm:$0xff]  }
 0xc83   :  { %7875 = vmatpush1.bf16.msra.mxu1 %v15802_v8  ;;  %7753 = vmatprep.subr.bf16.mxu0 %v15803_v57  ;;  %v15855_v8 = vld [vmem:[#allocation25_spill] sm:$0xff]  ;;  %v10269_v57 = vld [vmem:[#allocation11 + $0x708] sm:$0xff]  }
 0xc84   :  { %7876 = vmatprep.subr.bf16.mxu1 %v15804_v43  ;;  %v10270_v43 = vld [vmem:[#allocation11 + $0x788] sm:$0xff]  }
 0xc86   :  { %7754 = vmatpush1.bf16.msra.mxu0 %v15805_v54  ;;  %v10271_v54 = vld [vmem:[#allocation11 + $0x750] sm:$0xff]  }
 0xc87   :  { %7877 = vmatpush1.bf16.msra.mxu1 %v15806_v0  ;;  %7755 = vmatprep.subr.bf16.mxu0 %v15807_v3  ;;  %v10272_v0 = vld [vmem:[#allocation11 + $0x7d0] sm:$0xff]  }
 0xc88   :  { %7878 = vmatprep.subr.bf16.mxu1 %v15808_v31  ;;  %v10273_v3 = vld [vmem:[#allocation11 + $0x710] sm:$0xff]  }
 0xc89   :  { %v10274_v31 = vld [vmem:[#allocation11 + $0x790] sm:$0xff]  }
 0xc8a   :  { %7756 = vmatpush1.bf16.msra.mxu0 %v15809_v35  ;;  %v10275_v35 = vld [vmem:[#allocation11 + $0x758] sm:$0xff]  }
 0xc8b   :  { %7879 = vmatpush1.bf16.msra.mxu1 %v15810_v58  ;;  %7757 = vmatprep.subr.bf16.mxu0 %v15811_v59  ;;  %v10276_v58 = vld [vmem:[#allocation11 + $0x7d8] sm:$0xff]  }
 0xc8c   :  { %7880 = vmatprep.subr.bf16.mxu1 %v15812_v56  ;;  %v10277_v59 = vld [vmem:[#allocation11 + $0x718] sm:$0xff]  }
 0xc8d   :  { %v10278_v56 = vld [vmem:[#allocation11 + $0x798] sm:$0xff]  }
 0xc8e   :  { %7758 = vmatpush1.bf16.msra.mxu0 %v15813_v42  ;;  %v10279_v42 = vld [vmem:[#allocation11 + $0x760] sm:$0xff]  }
 0xc8f   :  { %7881 = vmatpush1.bf16.msra.mxu1 %v15814_v6  ;;  %7759 = vmatprep.subr.bf16.mxu0 %v15815_v47  ;;  %v10280_v6 = vld [vmem:[#allocation11 + $0x7e0] sm:$0xff]  }
 0xc90   :  { %7882 = vmatprep.subr.bf16.mxu1 %v15816_v4  ;;  %v10281_v47 = vld [vmem:[#allocation11 + $0x720] sm:$0xff]  }
 0xc91   :  { %v10282_v4 = vld [vmem:[#allocation11 + $0x7a0] sm:$0xff]  }
 0xc92   :  { %7760 = vmatpush1.bf16.msra.mxu0 %v15817_v36  ;;  %v10283_v36 = vld [vmem:[#allocation11 + $0x768] sm:$0xff]  }
 0xc93   :  { %7883 = vmatpush1.bf16.msra.mxu1 %v15818_v38  ;;  %7761 = vmatprep.subr.bf16.mxu0 %v15819_v1  ;;  %v10284_v38 = vld [vmem:[#allocation11 + $0x7e8] sm:$0xff]  }
 0xc94   :  { %7884 = vmatprep.subr.bf16.mxu1 %v15820_v7  ;;  %v10285_v1 = vld [vmem:[#allocation11 + $0x728] sm:$0xff]  }
 0xc95   :  { %v10286_v7 = vld [vmem:[#allocation11 + $0x7a8] sm:$0xff]  }
 0xc96   :  { %7762 = vmatpush1.bf16.msra.mxu0 %v15821_v46 }
 0xc97   :  { %7885 = vmatpush1.bf16.msra.mxu1 %v15822_v37  ;;  %7763 = vmatprep.subr.bf16.mxu0 %v15823_v18 }
 0xc98   :  { %7886 = vmatprep.subr.bf16.mxu1 %v15824_v28 }
 0xc9a   :  { %7764 = vmatpush1.bf16.msra.mxu0 %v15825_v10 }
 0xc9b   :  { %7887 = vmatpush1.bf16.msra.mxu1 %v15826_v60  ;;  %7765 = vmatprep.subr.bf16.mxu0 %v15827_v33 }
 0xc9c   :  { %7888 = vmatprep.subr.bf16.mxu1 %v15828_v2 }
 0xc9e   :  { %7766 = vmatpush1.bf16.msra.mxu0 %v15829_v50 }
 0xc9f   :  { %7889 = vmatpush1.bf16.msra.mxu1 %v15830_v24  ;;  %7767 = vmatprep.subr.bf16.mxu0 %v15831_v26 }
 0xca0   :  { %7890 = vmatprep.subr.bf16.mxu1 %v15832_v11 }
 0xca2   :  { %7768 = vmatpush1.bf16.msra.mxu0 %v15833_v61  ;;  %v10287_v61 = vld [vmem:[#allocation11 + $0x770] sm:$0xff]  }
 0xca3   :  { %7891 = vmatpush1.bf16.msra.mxu1 %v15834_v13  ;;  %7769 = vmatprep.subr.bf16.mxu0 %v15835_v23  ;;  %v10288_v13 = vld [vmem:[#allocation11 + $0x7f0] sm:$0xff]  }
 0xca4   :  { %7892 = vmatprep.subr.bf16.mxu1 %v15836_v62  ;;  %v10289_v23 = vld [vmem:[#allocation11 + $0x730] sm:$0xff]  }
 0xca5   :  { %v10290_v62 = vld [vmem:[#allocation11 + $0x7b0] sm:$0xff]  }
 0xca6   :  { %7770 = vmatpush1.bf16.msra.mxu0 %v15837_v52  ;;  %v10291_v52 = vld [vmem:[#allocation11 + $0x778] sm:$0xff]  }
 0xca7   :  { %7893 = vmatpush1.bf16.msra.mxu1 %v15838_v5  ;;  %7771 = vmatprep.subr.bf16.mxu0 %v15839_v27  ;;  %v10292_v5 = vld [vmem:[#allocation11 + $0x7f8] sm:$0xff]  }
 0xca8   :  { %7894 = vmatprep.subr.bf16.mxu1 %v15840_v63  ;;  %v10293_v27 = vld [vmem:[#allocation11 + $0x738] sm:$0xff]  }
 0xca9   :  { %v10294_v63 = vld [vmem:[#allocation11 + $0x7b8] sm:$0xff]  }
 0xcaa   :  { %7772 = vmatpush1.bf16.msra.mxu0 %v15841_v25  ;;  %v11148_v25 = vmov 0.0  }
 0xcab   :  { %7895 = vmatpush1.bf16.msra.mxu1 %v15842_v55  ;;  %7773 = vmatprep.subr.bf16.mxu0 %v15843_v19 }
 0xcac   :  { %7896 = vmatprep.subr.bf16.mxu1 %v15844_v9 }
 0xcae   :  { %7774 = vmatpush1.bf16.msra.mxu0 %v15845_v14 }
 0xcaf   :  { %7897 = vmatpush1.bf16.msra.mxu1 %v15846_v45  ;;  %7775 = vmatprep.subr.bf16.mxu0 %v15847_v29 }
 0xcb0   :  { %7898 = vmatprep.subr.bf16.mxu1 %v15848_v53 }
 0xcb2   :  { %7776 = vmatpush1.bf16.msra.mxu0 %v15849_v30 }
 0xcb3   :  { %7899 = vmatpush1.bf16.msra.mxu1 %v15850_v15  ;;  %7777 = vmatprep.subr.bf16.mxu0 %v15851_v20 }
 0xcb4   :  { %7900 = vmatprep.subr.bf16.mxu1 %v15852_v51 }
 0xcb6   :  { %7778 = vmatpush1.bf16.msra.mxu0 %v15853_v16 }
 0xcb7   :  { %7901 = vmatpush1.bf16.msra.mxu1 %v15854_v41  ;;  %9501 = vmatprep.subr.bf16.mxu0 %v10263_v44 }
 0xcb8   :  { %9523 = vmatprep.subr.bf16.mxu1 %v10264_v17 }
 0xcb9   :  { %7780 = vmatmul.mubr.bf16.vlgmr.msra.gmra.mrb[72].mxu0 %v15855_v8 }
 0xcba   :  { %7903 = vmatmul.mubr.bf16.vlgmr.msra.gmra.mrb[72].mxu1 %v15855_v8  ;;  %9502 = vmatpush3.bf16.msra.mxu0 %v10265_v40  ;;  %v10299_v8 = vld [vmem:[#allocation12 + $0x20] sm:$0xff]  }
 0xcbb   :  { %9524 = vmatpush3.bf16.msra.mxu1 %v10266_v48  ;;  %9503 = vmatprep.subr.bf16.mxu0 %v10267_v49  ;;  %v10295_v48 = vld [vmem:[#allocation12] sm:$0xff]  }
 0xcbc   :  { %9525 = vmatprep.subr.bf16.mxu1 %v10268_v21 }
 0xcbe   :  { %9504 = vmatpush3.bf16.msra.mxu0 %v10269_v57  ;;  %v10300_v57 = vld [vmem:[#allocation12 + $0x28] sm:$0xff]  }
 0xcbf   :  { %9526 = vmatpush3.bf16.msra.mxu1 %v10270_v43  ;;  %9505 = vmatprep.subr.bf16.mxu0 %v10271_v54  ;;  %v10301_v43 = vld [vmem:[#allocation12 + $0x30] sm:$0xff]   ;;  %v10302_v54 = vld [vmem:[#allocation12 + $0x38] sm:$0xff]  }
 0xcc0   :  { %9527 = vmatprep.subr.bf16.mxu1 %v10272_v0 }
 0xcc2   :  { %9506 = vmatpush3.bf16.msra.mxu0 %v10273_v3 }
 0xcc3   :  { %9528 = vmatpush3.bf16.msra.mxu1 %v10274_v31  ;;  %9507 = vmatprep.subr.bf16.mxu0 %v10275_v35 }
 0xcc4   :  { %9529 = vmatprep.subr.bf16.mxu1 %v10276_v58 }
 0xcc6   :  { %9508 = vmatpush3.bf16.msra.mxu0 %v10277_v59 }
 0xcc7   :  { %9530 = vmatpush3.bf16.msra.mxu1 %v10278_v56  ;;  %9509 = vmatprep.subr.bf16.mxu0 %v10279_v42 }
 0xcc8   :  { %9531 = vmatprep.subr.bf16.mxu1 %v10280_v6 }
 0xcca   :  { %9510 = vmatpush3.bf16.msra.mxu0 %v10281_v47 }
 0xccb   :  { %9532 = vmatpush3.bf16.msra.mxu1 %v10282_v4  ;;  %9511 = vmatprep.subr.bf16.mxu0 %v10283_v36  ;;  %v9159_v36 = vld [vmem:[%s14378_s6] ss:$0 sm:$0xff]  ;;  %s11104_s6 = scalar_lea.vmem %s8386_s22, 128 }
 0xccc   :  { %v9473_v46 = vpop.f32.mrb[68].mxu0  ;;  %9533 = vmatprep.subr.bf16.mxu1 %v10284_v38  ;;  %p11105_p6 = scmp.ne.s32.totalorder %s8386_s22, %s11104_s6  ;;  %p11110_p8 = scmp.lt.s32.totalorder %s11104_s6, %s11104_s6 }
 0xccd   :  { %v9495_v37 = vpop.f32.mrb[68].mxu1  ;;  %v9474_v18 = vpop.f32.mrb[69].mxu0 }
 0xcce   :  { %v9475_v28 = vadd.f32 %v9474_v18, %v9473_v46  ;;  %v9496_v10 = vpop.f32.mrb[69].mxu1  ;;  %v9476_v60 = vpop.f32.mrb[70].mxu0  ;;  %9512 = vmatpush3.bf16.msra.mxu0 %v10285_v1  ;;  %p11111_p9 = por %p11110_p8, %p11109_p7 }
 0xccf   :  { %v9497_v33 = vadd.f32 %v9496_v10, %v9495_v37  ;;  %v9498_v2 = vpop.f32.mrb[70].mxu1  ;;  %v9477_v50 = vpop.f32.mrb[71].mxu0  ;;  %9534 = vmatpush3.bf16.msra.mxu1 %v10286_v7  ;;  %9513 = vmatprep.subr.bf16.mxu0 %v10287_v61  ;;  %v9160_v37 = vld [vmem:[%s14380_s8] ss:$0 sm:$0xff] }
 0xcd0   :  { %v9499_v24 = vpop.f32.mrb[71].mxu1  ;;  %9535 = vmatprep.subr.bf16.mxu1 %v10288_v13  ;;  %p11112_p10 = pnand %p11111_p9, %p11105_p6 }
 0xcd1   :  { %v7635_v26 = vadd.f32 %v9497_v33, %v9475_v28 }
 0xcd2   :  { %9514 = vmatpush3.bf16.msra.mxu0 %v10289_v23 }
 0xcd3   :  { %v14347_v11 = vadd.f32 %v7635_v26, %v14226_v12  ;;  %9536 = vmatpush3.bf16.msra.mxu1 %v10290_v62  ;;  %9515 = vmatprep.subr.bf16.mxu0 %v10291_v52 }
 0xcd4   :  { %9537 = vmatprep.subr.bf16.mxu1 %v10292_v5 }
 0xcd6   :  { %9516 = vmatpush3.bf16.msra.mxu0 %v10293_v27 }
 0xcd7   :  { %9538 = vmatpush3.bf16.msra.mxu1 %v10294_v63  ;;  %9554 = vmatprep.subr.bf16.mxu0 %v11148_v25 }
 0xd8c   :  { %v7781_v12 = vpop.f32.mrb[72].mxu0 }
 0xd8d   :  { %v9602_v55 = vadd.f32 %v7781_v12, %v15650_v22  ;;  %v7904_v19 = vpop.f32.mrb[72].mxu1  ;;  %v7783_v9 = vpop.f32.mrb[73].mxu0 }
 0xd8e   :  { %v9604_v14 = vadd.f32 %v7904_v19, %v12127_v39  ;;  %v9603_v45 = vadd.f32 %v7783_v9, %v12118_v32  ;;  %v7906_v29 = vpop.f32.mrb[73].mxu1  ;;  %v7785_v53 = vpop.f32.mrb[74].mxu0  ;;  %v10296_v32 = vld [vmem:[#allocation12 + $0x8] sm:$0xff]   ;;  %v10298_v39 = vld [vmem:[#allocation12 + $0x18] sm:$0xff]  }
 0xd8f   :  { %v7911_v30 = vmax.f32 %v9602_v55, 0.0  ;;  %v9605_v15 = vadd.f32 %v7906_v29, %v12121_v34  ;;  %v7908_v20 = vpop.f32.mrb[74].mxu1  ;;  %v7786_v44 = vpop.f32.mrb[75].mxu0  ;;  %v10297_v34 = vld [vmem:[#allocation12 + $0x10] sm:$0xff]  }
 0xd90   :  { %v7913_v51 = vmax.f32 %v9604_v14, 0.0  ;;  %v7912_v17 = vmax.f32 %v9603_v45, 0.0  ;;  %v7909_v16 = vpop.f32.mrb[75].mxu1 }
 0xd91   :  { %v7914_v40 = vmax.f32 %v9605_v15, 0.0  ;;  %v7980_v22 = vpack.c.bf16 %v7911_v30, %v7911_v30 }
 0xd92   :  { %v7981_v41 = vpack.c.bf16 %v7912_v17, %v7912_v17  ;;  %v7982_v21 = vpack.c.bf16 %v7913_v51, %v7913_v51 }
 0xd93   :  { %v7983_v49 = vpack.c.bf16 %v7914_v40, %v7914_v40 }
 0xd94   :  { %8208 = vmatprep.mubr.bf16.mxu0 %v7981_v41 }
 0xd95   :  { %8248 = vmatprep.mubr.bf16.mxu1 %v7983_v49  ;;  %8209 = vmatmul.mubr.bf16.vlgmr.msra.gmra.mrb[76].mxu0 %v7980_v22 }
 0xd96   :  { %8249 = vmatmul.mubr.bf16.vlgmr.msra.gmra.mrb[76].mxu1 %v7982_v21  ;;  %9555 = vmatpush3.bf16.msra.mxu0 %v10295_v48 }
 0xd97   :  { %9556 = vmatprep.subr.bf16.mxu0 %v11148_v25  ;;  %9570 = vmatprep.mubr.msk.bf16.mxu0 %vm11149_vm0, %v11148_v25 }
 0xd9a   :  { %9557 = vmatpush3.bf16.msra.mxu0 %v10296_v32 }
 0xd9b   :  { %9558 = vmatprep.subr.bf16.mxu0 %v11148_v25 }
 0xd9e   :  { %9559 = vmatpush3.bf16.msra.mxu0 %v10297_v34 }
 0xd9f   :  { %9560 = vmatprep.subr.bf16.mxu0 %v11148_v25 }
 0xda2   :  { %9561 = vmatpush3.bf16.msra.mxu0 %v10298_v39 }
 0xda3   :  { %9562 = vmatprep.subr.bf16.mxu0 %v11148_v25 }
 0xda6   :  { %9563 = vmatpush3.bf16.msra.mxu0 %v10299_v8 }
 0xda7   :  { %9564 = vmatprep.subr.bf16.mxu0 %v11148_v25 }
 0xdaa   :  { %9565 = vmatpush3.bf16.msra.mxu0 %v10300_v57 }
 0xdab   :  { %9566 = vmatprep.subr.bf16.mxu0 %v11148_v25 }
 0xdae   :  { %9567 = vmatpush3.bf16.msra.mxu0 %v10301_v43 }
 0xdaf   :  { %9568 = vmatprep.subr.bf16.mxu0 %v11148_v25 }
 0xdb2   :  { %9569 = vmatpush3.bf16.msra.mxu0 %v10302_v54 }
 0xe68   :  { %v9517_v0 = vpop.f32.mrb[76].mxu0 }
 0xe69   :  { %v9539_v3 = vpop.f32.mrb[76].mxu1  ;;  %v9518_v31 = vpop.f32.mrb[77].mxu0 }
 0xe6a   :  { %v9519_v35 = vadd.f32 %v9518_v31, %v9517_v0  ;;  %v9540_v58 = vpop.f32.mrb[77].mxu1  ;;  %v9520_v59 = vpop.f32.mrb[78].mxu0 }
 0xe6b   :  { %v9541_v56 = vadd.f32 %v9540_v58, %v9539_v3  ;;  %v9542_v42 = vpop.f32.mrb[78].mxu1  ;;  %v9521_v6 = vpop.f32.mrb[79].mxu0 }
 0xe6c   :  { %v9543_v47 = vpop.f32.mrb[79].mxu1 }
 0xe6d   :  { %v8251_v4 = vadd.f32 %v9541_v56, %v9519_v35 }
 0xe6f   :  { %v8256_v38 = vadd.f32 %v8251_v4, %v14347_v11 }
 0xe71   :  { %v8264_v1 = vadd.f32 %v9159_v36, %v8256_v38 }
 0xe73   :  { %v8265_v7 = vmax.f32 %v8264_v1, 0.0 }
 0xe75   :  { %v8282_v46 = vpack.c.bf16 %v8265_v7, %v8265_v7 }
 0xe77   :  { %9571 = vmatmul.mubr.bf16.vlgmr.msra.gmra.mrb[80].mxu0 %v8282_v46 }
 0xf4a   :  { %v8372_v18 = vpop.f32.mrb[80].mxu0 }
 0xf4b   :  { %v8373_v28 = vadd.f32 %v9160_v37, %v8372_v18  ;;  %v9572_v10 = vpop.f32.mrb[81].mxu0 }
 0xf4c   :  { %v8375_v60 = vpop.f32.mrb[82].mxu0 }
 0xf4d   :  { %8378 = vst [vmem:[#allocation14] sm:$0xff] %v8373_v28  ;;  %v9573_v33 = vpop.f32.mrb[83].mxu0 }
 0xf4e   :  { %11115 = shalt.err (!%p11112_p10)
}
 0xf4f   :  { %s11116_s8 = scalar_lea.hbm %s14381_s9, 128 }
 0xf50   :  { %p11117_p11 = scmp.ne.s32.totalorder %s14381_s9, %s11116_s8  ;;  %p11120_p12 = scmp.lt.u32.totalorder %s11116_s8, %s14381_s9 }
 0xf52   :  { %p11122_p13 = pnand %p11120_p12, %p11117_p11 }
 0xf54   :  { %11125 = shalt.err (!%p11122_p13)
}
 0xf55   :  { %8388 = dma.vmem_to_hbm [thread:$0]  %s8386_s22, 128, %s14381_s9, [#allocation5]  }
 0xf56   :  { %11134 = dma.done.wait [#allocation5], 128  }
 0xf57   :  { %11135 = vsyncadd [#allocation5], 4294967168 }
 0xf58   :  { %8392 = vsyncpa [#allocation4], 1 }
 0xf59   :  { %8393 = vsyncpa [#allocation7], 1 }
 0xf5a   :  { %8394 = vsyncpa [#allocation10], 1 }
 0xf5b   :  { %8395 = vsyncpa [#allocation13], 1 }
 0xf5c   :  { %8396 = vsyncpa [#allocation5], 1 }

</bundles_post_ra>
